<compile_context>
chip_gen: v6e
topology: v6e:2x2x1
jax: 0.10.0
libtpu: 0.0.40
codegen_flags: <defaults>
</compile_context>

<pallas_src>
import jax
import jax.numpy as jnp
from jax.experimental import pallas as pl
from jax.experimental.pallas import tpu as pltpu

# ----------------------------------------------------------------------------
# Scaled-down wav2vec2-base config (same topology, smaller widths/depth).
# ----------------------------------------------------------------------------
CONV_DIM     = (32, 32, 32, 32, 32, 32, 32)       # base: (512,)*7
CONV_KERNEL  = (10, 3, 3, 3, 3, 2, 2)             # same as base
CONV_STRIDE  = (5, 2, 2, 2, 2, 2, 2)              # same as base (x320 downsample)
HIDDEN       = 64                                 # base: 768
NUM_HEADS    = 4                                  # base: 12
HEAD_DIM     = HIDDEN // NUM_HEADS
NUM_LAYERS   = 2                                  # base: 12
INTERMEDIATE = 128                                # base: 3072
POS_KERNEL   = 3                                  # base: 128 (+ SamePadLayer)
POS_GROUPS   = 4                                  # base: 16
PROJ_SIZE    = 256                                # classifier_proj_size (exact)
NUM_LABELS   = 8                                  # BaseModel: nn.Linear(256, 8)
LN_EPS       = 1e-5

_SQRT1_2 = 0.7071067811865476


def _pad8(n):
    return ((n + 7) // 8) * 8


def _gelu(v):
    """Exact (erf) GELU, matching torch.nn.functional.gelu."""
    return 0.5 * v * (1.0 + jax.lax.erf(v * _SQRT1_2))


def _dot(a, b):
    """MXU matmul with f32 accumulation."""
    return jnp.dot(a, b, preferred_element_type=jnp.float32)


def _layernorm(x, g, b, eps=LN_EPS):
    mu = jnp.mean(x, axis=-1, keepdims=True)
    var = jnp.mean((x - mu) ** 2, axis=-1, keepdims=True)
    return (x - mu) * jax.lax.rsqrt(var + eps) * g + b


def _const_spec(arr):
    """Full-array block whose block index never changes across the grid."""
    zeros = (0,) * arr.ndim
    return pl.BlockSpec(arr.shape, lambda i, _z=zeros: _z)


# ----------------------------------------------------------------------------
# Parameters (weights pre-cast to bf16, biases / norm params kept f32)
# ----------------------------------------------------------------------------
def _linear_init(key, fan_in, fan_out, scale=0.02):
    kw, _ = jax.random.split(key)
    w = (scale * jax.random.normal(kw, (fan_out, fan_in), jnp.float32)).T  # (in, out)
    b = jnp.zeros((fan_out,), jnp.float32)
    return w, b


def init_params(key):
    p = {}
    keys = jax.random.split(key, 64)
    ki = iter(keys)

    # conv feature encoder (torch layout (Cout, Cin, k), bias=False)
    conv_ws = []
    cin = 1
    for cout, k in zip(CONV_DIM, CONV_KERNEL):
        w = 0.02 * jax.random.normal(next(ki), (cout, cin, k), jnp.float32)
        conv_ws.append(w.transpose(2, 1, 0).reshape(k * cin, cout))   # (k*Cin, Cout)
        cin = cout
    C0 = CONV_DIM[0]
    p['conv0_w'] = conv_ws[0].astype(jnp.bfloat16)                    # (10, 32)
    p['conv14_w'] = jnp.stack(conv_ws[1:5]).astype(jnp.bfloat16)      # (4, 96, 32)
    p['conv56_w'] = jnp.stack(conv_ws[5:7]).astype(jnp.bfloat16)      # (2, 64, 32)
    p['gn_g'] = jnp.ones((1, C0), jnp.float32)
    p['gn_b'] = jnp.zeros((1, C0), jnp.float32)

    # feature projection
    p['fp_ln_g'] = jnp.ones((1, CONV_DIM[-1]), jnp.float32)
    p['fp_ln_b'] = jnp.zeros((1, CONV_DIM[-1]), jnp.float32)
    fw, fb = _linear_init(next(ki), CONV_DIM[-1], HIDDEN)
    p['fp_w'] = fw.astype(jnp.bfloat16)
    p['fp_b'] = fb.reshape(1, HIDDEN)

    # positional grouped conv folded into one block-diagonal dense weight.
    # TODO(synk): weight_norm is folded into the raw weight; base config's even
    # kernel (128) + SamePadLayer is approximated by k=3 symmetric 'same' pad.
    cg = HIDDEN // POS_GROUPS
    wp = 0.02 * jax.random.normal(next(ki), (HIDDEN, cg, POS_KERNEL), jnp.float32)
    wpos = jnp.zeros((POS_KERNEL * HIDDEN, HIDDEN), jnp.float32)
    for g in range(POS_GROUPS):
        for j in range(POS_KERNEL):
            blk = wp[g * cg:(g + 1) * cg, :, j]                       # (cout, cin)
            wpos = wpos.at[j * HIDDEN + g * cg:j * HIDDEN + (g + 1) * cg,
                           g * cg:(g + 1) * cg].set(blk.T)            # (cin, cout)
    p['pos_w'] = wpos.astype(jnp.bfloat16)                            # (3H, H)
    p['pos_b'] = jnp.zeros((1, HIDDEN), jnp.float32)
    p['enc_ln_g'] = jnp.ones((1, HIDDEN), jnp.float32)
    p['enc_ln_b'] = jnp.zeros((1, HIDDEN), jnp.float32)

    # transformer layers: weights stacked along a leading layer axis
    st = {n: [] for n in ('wqkv', 'bqkv', 'wo', 'bo', 'ln1_g', 'ln1_b',
                          'w1', 'b1', 'w2', 'b2', 'ln2_g', 'ln2_b')}
    for _ in range(NUM_LAYERS):
        wq, bq = _linear_init(next(ki), HIDDEN, HIDDEN)
        wk, bk = _linear_init(next(ki), HIDDEN, HIDDEN)
        wv, bv = _linear_init(next(ki), HIDDEN, HIDDEN)
        st['wqkv'].append(jnp.concatenate([wq, wk, wv], axis=1))      # (H, 3H)
        st['bqkv'].append(jnp.concatenate([bq, bk, bv], axis=0))      # (3H,)
        wo, bo = _linear_init(next(ki), HIDDEN, HIDDEN)
        st['wo'].append(wo); st['bo'].append(bo)
        st['ln1_g'].append(jnp.ones((HIDDEN,), jnp.float32))
        st['ln1_b'].append(jnp.zeros((HIDDEN,), jnp.float32))
        w1, b1 = _linear_init(next(ki), HIDDEN, INTERMEDIATE)
        w2, b2 = _linear_init(next(ki), INTERMEDIATE, HIDDEN)
        st['w1'].append(w1); st['b1'].append(b1)
        st['w2'].append(w2); st['b2'].append(b2)
        st['ln2_g'].append(jnp.ones((HIDDEN,), jnp.float32))
        st['ln2_b'].append(jnp.zeros((HIDDEN,), jnp.float32))
    for n in ('wqkv', 'wo', 'w1', 'w2'):
        p[n] = jnp.stack(st[n]).astype(jnp.bfloat16)                  # (L, K, N) bf16
    for n in ('bqkv', 'bo', 'ln1_g', 'ln1_b', 'b1', 'b2', 'ln2_g', 'ln2_b'):
        p[n] = jnp.stack(st[n])[:, None, :]                           # (L, 1, N) f32

    # projector (hidden -> 256) and BaseModel.classifier (256 -> 8),
    # folded exactly in f32 (mean-pool commutes with the affine projector).
    pw, pb = _linear_init(next(ki), HIDDEN, PROJ_SIZE)
    cw, cb = _linear_init(next(ki), PROJ_SIZE, NUM_LABELS)
    p['head_w'] = pw @ cw                                             # (H, 8)  f32
    p['head_b'] = (pb @ cw + cb).reshape(1, NUM_LABELS)               # (1, 8)  f32
    return p


# ----------------------------------------------------------------------------
# Fully fused forward: one pallas_call, grid=(B,)
# ----------------------------------------------------------------------------
def base_model_forward(params, x):
    """BaseModel.forward: x (B, T) raw audio -> (B, 8) logits."""
    B, T = x.shape
    C = CONV_DIM[0]

    # static conv output lengths
    lens = []
    L = T
    for k, s in zip(CONV_KERNEL, CONV_STRIDE):
        L = (L - k) // s + 1
        lens.append(L)
    L0, S = lens[0], lens[-1]

    # Reshape raw audio to (B, L0+1, stride0) so conv-0's stride-5 taps become
    # two contiguous sublane slices inside the kernel (no HBM im2col).
    s0 = CONV_STRIDE[0]
    n_rows = L0 + 1
    need = n_rows * s0
    if T < need:
        x = jnp.pad(x, ((0, 0), (0, need - T)))
    xr = x[:, :need].astype(jnp.float32).reshape(B, n_rows, s0)

    scale = HEAD_DIM ** -0.5

    def kernel(x_ref, c0w_ref, c14w_ref, c56w_ref, gng_ref, gnb_ref,
               fplg_ref, fplb_ref, fpw_ref, fpb_ref,
               posw_ref, posb_ref, elg_ref, elb_ref,
               wqkv_ref, bqkv_ref, wo_ref, bo_ref, l1g_ref, l1b_ref,
               w1_ref, b1_ref, w2_ref, b2_ref, l2g_ref, l2b_ref,
               hw_ref, hb_ref,
               out_ref,
               buf_a, buf_b, pos_buf):
        # -------- conv layer 0 (k=10, s=5, cin=1) + GroupNorm + GELU --------
        x0 = x_ref[0, 0:L0, :].astype(jnp.bfloat16)          # taps 0..4
        x1 = x_ref[0, 1:L0 + 1, :].astype(jnp.bfloat16)      # taps 5..9
        w0 = c0w_ref[...]
        h = _dot(x0, w0[0:s0, :]) + _dot(x1, w0[s0:2 * s0, :])       # (L0, C) f32
        # GroupNorm(num_groups == channels): per-channel stats over time
        mu = jnp.mean(h, axis=0, keepdims=True)
        var = jnp.mean((h - mu) ** 2, axis=0, keepdims=True)
        h = (h - mu) * jax.lax.rsqrt(var + LN_EPS) * gng_ref[...] + gnb_ref[...]
        buf_a[0:L0, :] = _gelu(h)

        # -------- conv layers 1..6 (stride 2, bias-free) + GELU --------
        # in-kernel im2col: taps are strided reads from VMEM ping-pong scratch.
        bufs = (buf_a, buf_b)
        cur = 0
        for li in range(1, 7):
            k = CONV_KERNEL[li]
            Lo = lens[li]
            src, dst = bufs[cur], bufs[1 - cur]
            w_l = c14w_ref[li - 1] if li <= 4 else c56w_ref[li - 5]   # (k*C, C)
            acc = None
            for j in range(k):
                tap = src[pl.ds(j, Lo, stride=2), :].astype(jnp.bfloat16)
                part = _dot(tap, w_l[j * C:(j + 1) * C, :])
                acc = part if acc is None else acc + part
            dst[0:Lo, :] = _gelu(acc)
            cur = 1 - cur

        hc = bufs[cur][0:S, :]                                        # (S, C) f32

        # -------- feature projection: LayerNorm + Linear --------
        hn = _layernorm(hc, fplg_ref[...], fplb_ref[...])
        hp = _dot(hn.astype(jnp.bfloat16), fpw_ref[...]) + fpb_ref[...]   # (S, H)

        # -------- positional conv (grouped conv == block-diag matmul)
        #          + GELU + residual + encoder LayerNorm --------
        pos_buf[...] = jnp.zeros_like(pos_buf)
        pos_buf[1:S + 1, :] = hp
        wp = posw_ref[...]
        pos = _dot(pos_buf[0:S, :].astype(jnp.bfloat16), wp[0:HIDDEN, :])
        pos = pos + _dot(pos_buf[1:S + 1, :].astype(jnp.bfloat16),
                         wp[HIDDEN:2 * HIDDEN, :])
        pos = pos + _dot(pos_buf[2:S + 2, :].astype(jnp.bfloat16),
                         wp[2 * HIDDEN:, :])
        h = _layernorm(hp + _gelu(pos + posb_ref[...]), elg_ref[...], elb_ref[...])

        # -------- transformer encoder layers (post-norm) --------
        for l in range(NUM_LAYERS):
            h_bf = h.astype(jnp.bfloat16)
            qkv = _dot(h_bf, wqkv_ref[l]) + bqkv_ref[l]               # (S, 3H) f32
            q = qkv[:, 0:HIDDEN]
            k_t = qkv[:, HIDDEN:2 * HIDDEN].T.astype(jnp.bfloat16)    # (H, S)
            v_bf = qkv[:, 2 * HIDDEN:].astype(jnp.bfloat16)           # (S, H)
            wo_l = wo_ref[l]                                          # (H, H) bf16
            attn = None
            for hh in range(NUM_HEADS):
                lo, hi = hh * HEAD_DIM, (hh + 1) * HEAD_DIM
                sc = _dot(q[:, lo:hi].astype(jnp.bfloat16), k_t[lo:hi, :]) * scale
                sc = sc - jnp.max(sc, axis=-1, keepdims=True)
                pr = jnp.exp(sc)
                pr = pr * pl.reciprocal(jnp.sum(pr, axis=-1, keepdims=True),
                                        approx=True)
                o_h = _dot(pr.astype(jnp.bfloat16), v_bf[:, lo:hi])   # (S, Dh)
                # fold the head output straight into the output projection
                # (keeps everything lane-dense; no concat / head transposes)
                ctr = _dot(o_h.astype(jnp.bfloat16), wo_l[lo:hi, :])  # (S, H)
                attn = ctr if attn is None else attn + ctr
            h = _layernorm(h + attn + bo_ref[l], l1g_ref[l], l1b_ref[l])

            ff = _gelu(_dot(h.astype(jnp.bfloat16), w1_ref[l]) + b1_ref[l])
            ff = _dot(ff.astype(jnp.bfloat16), w2_ref[l]) + b2_ref[l]
            h = _layernorm(h + ff, l2g_ref[l], l2b_ref[l])

        # -------- tail: mean pool + folded projector∘classifier (f32) --------
        # TODO(synk): no attention-mask handling; mean-pools over all S frames
        # (matches HF behaviour for equal-length, unpadded clips).
        pooled = jnp.mean(h, axis=0, keepdims=True)                   # (1, H)
        out_ref[0] = _dot(pooled, hw_ref[...]) + hb_ref[...]          # (1, 8)

    weight_args = [
        params['conv0_w'], params['conv14_w'], params['conv56_w'],
        params['gn_g'], params['gn_b'],
        params['fp_ln_g'], params['fp_ln_b'], params['fp_w'], params['fp_b'],
        params['pos_w'], params['pos_b'], params['enc_ln_g'], params['enc_ln_b'],
        params['wqkv'], params['bqkv'], params['wo'], params['bo'],
        params['ln1_g'], params['ln1_b'], params['w1'], params['b1'],
        params['w2'], params['b2'], params['ln2_g'], params['ln2_b'],
        params['head_w'], params['head_b'],
    ]
    in_specs = [pl.BlockSpec((1, n_rows, s0), lambda i: (i, 0, 0))]
    in_specs += [_const_spec(w) for w in weight_args]

    out = pl.pallas_call(
        kernel,
        out_shape=jax.ShapeDtypeStruct((B, 1, NUM_LABELS), jnp.float32),
        grid=(B,),
        in_specs=in_specs,
        out_specs=pl.BlockSpec((1, 1, NUM_LABELS), lambda i: (i, 0, 0)),
        scratch_shapes=[
            pltpu.VMEM((_pad8(lens[0]), C), jnp.float32),    # conv ping buffer
            pltpu.VMEM((_pad8(lens[1]), C), jnp.float32),    # conv pong buffer
            pltpu.VMEM((_pad8(S + 2), HIDDEN), jnp.float32), # padded pos-conv seq
        ],
        compiler_params=pltpu.CompilerParams(
            dimension_semantics=("parallel",)),
    )(xr, *weight_args)
    return out.reshape(B, NUM_LABELS)


if __name__ == "__main__":
    key = jax.random.PRNGKey(0)
    k_params, k_x = jax.random.split(key)

    params = init_params(k_params)

    # small deterministic "raw audio" batch: 2 clips of 3200 samples
    # (downsampled by the conv stack to a sequence of length 9)
    x = jax.random.normal(k_x, (2, 3200), jnp.float32)

    logits = jax.jit(base_model_forward)(params, x)
    logits = jax.block_until_ready(logits)

    assert logits.shape == (2, NUM_LABELS)
    assert logits.dtype == jnp.float32
    assert bool(jnp.all(jnp.isfinite(logits)))
    print("KERNEL_OK")
</pallas_src>

<mosaic_0001>
module attributes {stable_mosaic.version = 11 : i64} {
  func.func @kernel(%arg0: i32, %arg1: memref<1x640x5xf32, #tpu.memory_space<vmem>>, %arg2: memref<10x32xbf16, #tpu.memory_space<vmem>>, %arg3: memref<4x96x32xbf16, #tpu.memory_space<vmem>>, %arg4: memref<2x64x32xbf16, #tpu.memory_space<vmem>>, %arg5: memref<1x32xf32, #tpu.memory_space<vmem>>, %arg6: memref<1x32xf32, #tpu.memory_space<vmem>>, %arg7: memref<1x32xf32, #tpu.memory_space<vmem>>, %arg8: memref<1x32xf32, #tpu.memory_space<vmem>>, %arg9: memref<32x64xbf16, #tpu.memory_space<vmem>>, %arg10: memref<1x64xf32, #tpu.memory_space<vmem>>, %arg11: memref<192x64xbf16, #tpu.memory_space<vmem>>, %arg12: memref<1x64xf32, #tpu.memory_space<vmem>>, %arg13: memref<1x64xf32, #tpu.memory_space<vmem>>, %arg14: memref<1x64xf32, #tpu.memory_space<vmem>>, %arg15: memref<2x64x192xbf16, #tpu.memory_space<vmem>>, %arg16: memref<2x1x192xf32, #tpu.memory_space<vmem>>, %arg17: memref<2x64x64xbf16, #tpu.memory_space<vmem>>, %arg18: memref<2x1x64xf32, #tpu.memory_space<vmem>>, %arg19: memref<2x1x64xf32, #tpu.memory_space<vmem>>, %arg20: memref<2x1x64xf32, #tpu.memory_space<vmem>>, %arg21: memref<2x64x128xbf16, #tpu.memory_space<vmem>>, %arg22: memref<2x1x128xf32, #tpu.memory_space<vmem>>, %arg23: memref<2x128x64xbf16, #tpu.memory_space<vmem>>, %arg24: memref<2x1x64xf32, #tpu.memory_space<vmem>>, %arg25: memref<2x1x64xf32, #tpu.memory_space<vmem>>, %arg26: memref<2x1x64xf32, #tpu.memory_space<vmem>>, %arg27: memref<64x8xf32, #tpu.memory_space<vmem>>, %arg28: memref<1x8xf32, #tpu.memory_space<vmem>>, %arg29: memref<1x1x8xf32, #tpu.memory_space<vmem>>, %arg30: memref<640x32xf32, #tpu.memory_space<vmem>>, %arg31: memref<320x32xf32, #tpu.memory_space<vmem>>, %arg32: memref<16x64xf32, #tpu.memory_space<vmem>>) attributes {dimension_semantics = [#tpu.dimension_semantics<parallel>], iteration_bounds = array<i64: 2>, scalar_prefetch = 0 : i64, scratch_operands = 3 : i64, tpu.core_type = #tpu.core_type<tc>, window_params = [{transform_indices = @transform_0, window_bounds = array<i64: 1, 640, 5>}, {pipeline_mode = #tpu.pipeline_mode<synchronous>, transform_indices = @transform_1, window_bounds = array<i64: 10, 32>}, {pipeline_mode = #tpu.pipeline_mode<synchronous>, transform_indices = @transform_2, window_bounds = array<i64: 4, 96, 32>}, {pipeline_mode = #tpu.pipeline_mode<synchronous>, transform_indices = @transform_3, window_bounds = array<i64: 2, 64, 32>}, {pipeline_mode = #tpu.pipeline_mode<synchronous>, transform_indices = @transform_4, window_bounds = array<i64: 1, 32>}, {pipeline_mode = #tpu.pipeline_mode<synchronous>, transform_indices = @transform_5, window_bounds = array<i64: 1, 32>}, {pipeline_mode = #tpu.pipeline_mode<synchronous>, transform_indices = @transform_6, window_bounds = array<i64: 1, 32>}, {pipeline_mode = #tpu.pipeline_mode<synchronous>, transform_indices = @transform_7, window_bounds = array<i64: 1, 32>}, {pipeline_mode = #tpu.pipeline_mode<synchronous>, transform_indices = @transform_8, window_bounds = array<i64: 32, 64>}, {pipeline_mode = #tpu.pipeline_mode<synchronous>, transform_indices = @transform_9, window_bounds = array<i64: 1, 64>}, {pipeline_mode = #tpu.pipeline_mode<synchronous>, transform_indices = @transform_10, window_bounds = array<i64: 192, 64>}, {pipeline_mode = #tpu.pipeline_mode<synchronous>, transform_indices = @transform_11, window_bounds = array<i64: 1, 64>}, {pipeline_mode = #tpu.pipeline_mode<synchronous>, transform_indices = @transform_12, window_bounds = array<i64: 1, 64>}, {pipeline_mode = #tpu.pipeline_mode<synchronous>, transform_indices = @transform_13, window_bounds = array<i64: 1, 64>}, {pipeline_mode = #tpu.pipeline_mode<synchronous>, transform_indices = @transform_14, window_bounds = array<i64: 2, 64, 192>}, {pipeline_mode = #tpu.pipeline_mode<synchronous>, transform_indices = @transform_15, window_bounds = array<i64: 2, 1, 192>}, {pipeline_mode = #tpu.pipeline_mode<synchronous>, transform_indices = @transform_16, window_bounds = array<i64: 2, 64, 64>}, {pipeline_mode = #tpu.pipeline_mode<synchronous>, transform_indices = @transform_17, window_bounds = array<i64: 2, 1, 64>}, {pipeline_mode = #tpu.pipeline_mode<synchronous>, transform_indices = @transform_18, window_bounds = array<i64: 2, 1, 64>}, {pipeline_mode = #tpu.pipeline_mode<synchronous>, transform_indices = @transform_19, window_bounds = array<i64: 2, 1, 64>}, {pipeline_mode = #tpu.pipeline_mode<synchronous>, transform_indices = @transform_20, window_bounds = array<i64: 2, 64, 128>}, {pipeline_mode = #tpu.pipeline_mode<synchronous>, transform_indices = @transform_21, window_bounds = array<i64: 2, 1, 128>}, {pipeline_mode = #tpu.pipeline_mode<synchronous>, transform_indices = @transform_22, window_bounds = array<i64: 2, 128, 64>}, {pipeline_mode = #tpu.pipeline_mode<synchronous>, transform_indices = @transform_23, window_bounds = array<i64: 2, 1, 64>}, {pipeline_mode = #tpu.pipeline_mode<synchronous>, transform_indices = @transform_24, window_bounds = array<i64: 2, 1, 64>}, {pipeline_mode = #tpu.pipeline_mode<synchronous>, transform_indices = @transform_25, window_bounds = array<i64: 2, 1, 64>}, {pipeline_mode = #tpu.pipeline_mode<synchronous>, transform_indices = @transform_26, window_bounds = array<i64: 64, 8>}, {pipeline_mode = #tpu.pipeline_mode<synchronous>, transform_indices = @transform_27, window_bounds = array<i64: 1, 8>}, {transform_indices = @transform_28, window_bounds = array<i64: 1, 1, 8>}]} {
    %c0 = arith.constant 0 : index
    %c0_0 = arith.constant 0 : index
    %c0_1 = arith.constant 0 : index
    %0 = vector.load %arg1[%c0, %c0_0, %c0_1] : memref<1x640x5xf32, #tpu.memory_space<vmem>>, vector<1x639x5xf32>
    %1 = vector.shape_cast %0 : vector<1x639x5xf32> to vector<639x5xf32>
    %2 = arith.truncf %1 : vector<639x5xf32> to vector<639x5xbf16>
    %c0_2 = arith.constant 0 : index
    %c1 = arith.constant 1 : index
    %c0_3 = arith.constant 0 : index
    %3 = vector.load %arg1[%c0_2, %c1, %c0_3] : memref<1x640x5xf32, #tpu.memory_space<vmem>>, vector<1x639x5xf32>
    %4 = vector.shape_cast %3 : vector<1x639x5xf32> to vector<639x5xf32>
    %5 = arith.truncf %4 : vector<639x5xf32> to vector<639x5xbf16>
    %c0_4 = arith.constant 0 : index
    %c0_5 = arith.constant 0 : index
    %6 = vector.load %arg2[%c0_4, %c0_5] : memref<10x32xbf16, #tpu.memory_space<vmem>>, vector<10x32xbf16>
    %7 = vector.extract_strided_slice %6 {offsets = [0, 0], sizes = [5, 32], strides = [1, 1]} : vector<10x32xbf16> to vector<5x32xbf16>
    %cst = arith.constant dense<0.000000e+00> : vector<639x32xf32>
    %8 = tpu.matmul %2, %7, %cst {dimension_numbers = #tpu.dot_dimension_numbers<[1], [0], [0], [1], [0, 0, 1, 1], [], []>} : vector<639x5xbf16>, vector<5x32xbf16>, vector<639x32xf32> -> vector<639x32xf32>
    %9 = vector.extract_strided_slice %6 {offsets = [5, 0], sizes = [5, 32], strides = [1, 1]} : vector<10x32xbf16> to vector<5x32xbf16>
    %cst_6 = arith.constant dense<0.000000e+00> : vector<639x32xf32>
    %10 = tpu.matmul %5, %9, %cst_6 {dimension_numbers = #tpu.dot_dimension_numbers<[1], [0], [0], [1], [0, 0, 1, 1], [], []>} : vector<639x5xbf16>, vector<5x32xbf16>, vector<639x32xf32> -> vector<639x32xf32>
    %11 = arith.addf %8, %10 : vector<639x32xf32>
    %cst_7 = arith.constant dense<0.000000e+00> : vector<32xf32>
    %12 = vector.multi_reduction <add>, %11, %cst_7 [0] : vector<639x32xf32> to vector<32xf32>
    %13 = vector.shape_cast %12 : vector<32xf32> to vector<1x32xf32>
    %cst_8 = arith.constant 6.390000e+02 : f32
    %14 = vector.broadcast %cst_8 : f32 to vector<1x32xf32>
    %15 = arith.divf %13, %14 : vector<1x32xf32>
    %16 = vector.broadcast %15 : vector<1x32xf32> to vector<639x32xf32>
    %17 = arith.subf %11, %16 : vector<639x32xf32>
    %18 = arith.mulf %17, %17 : vector<639x32xf32>
    %cst_9 = arith.constant dense<0.000000e+00> : vector<32xf32>
    %19 = vector.multi_reduction <add>, %18, %cst_9 [0] : vector<639x32xf32> to vector<32xf32>
    %20 = vector.shape_cast %19 : vector<32xf32> to vector<1x32xf32>
    %cst_10 = arith.constant 6.390000e+02 : f32
    %21 = vector.broadcast %cst_10 : f32 to vector<1x32xf32>
    %22 = arith.divf %20, %21 : vector<1x32xf32>
    %23 = vector.broadcast %15 : vector<1x32xf32> to vector<639x32xf32>
    %24 = arith.subf %11, %23 : vector<639x32xf32>
    %cst_11 = arith.constant 9.99999974E-6 : f32
    %25 = vector.broadcast %cst_11 : f32 to vector<1x32xf32>
    %26 = arith.addf %22, %25 : vector<1x32xf32>
    %27 = math.rsqrt %26 : vector<1x32xf32>
    %28 = vector.broadcast %27 : vector<1x32xf32> to vector<639x32xf32>
    %29 = arith.mulf %24, %28 : vector<639x32xf32>
    %c0_12 = arith.constant 0 : index
    %c0_13 = arith.constant 0 : index
    %30 = vector.load %arg5[%c0_12, %c0_13] : memref<1x32xf32, #tpu.memory_space<vmem>>, vector<1x32xf32>
    %31 = vector.broadcast %30 : vector<1x32xf32> to vector<639x32xf32>
    %32 = arith.mulf %29, %31 : vector<639x32xf32>
    %c0_14 = arith.constant 0 : index
    %c0_15 = arith.constant 0 : index
    %33 = vector.load %arg6[%c0_14, %c0_15] : memref<1x32xf32, #tpu.memory_space<vmem>>, vector<1x32xf32>
    %34 = vector.broadcast %33 : vector<1x32xf32> to vector<639x32xf32>
    %35 = arith.addf %32, %34 : vector<639x32xf32>
    %cst_16 = arith.constant 5.000000e-01 : f32
    %36 = vector.broadcast %cst_16 : f32 to vector<639x32xf32>
    %37 = arith.mulf %36, %35 : vector<639x32xf32>
    %cst_17 = arith.constant 0.707106769 : f32
    %38 = vector.broadcast %cst_17 : f32 to vector<639x32xf32>
    %39 = arith.mulf %35, %38 : vector<639x32xf32>
    %40 = math.erf %39 : vector<639x32xf32>
    %cst_18 = arith.constant 1.000000e+00 : f32
    %41 = vector.broadcast %cst_18 : f32 to vector<639x32xf32>
    %42 = arith.addf %41, %40 : vector<639x32xf32>
    %43 = arith.mulf %37, %42 : vector<639x32xf32>
    %c0_19 = arith.constant 0 : index
    %c0_20 = arith.constant 0 : index
    %44 = vector.load %arg30[%c0_19, %c0_20] : memref<640x32xf32, #tpu.memory_space<vmem>>, vector<639x32xf32>
    tpu.vector_store %arg30[%c0_19, %c0_20], %43 {strides = array<i32>} : memref<640x32xf32, #tpu.memory_space<vmem>>, vector<639x32xf32>,
    %c0_21 = arith.constant 0 : index
    %c0_22 = arith.constant 0 : index
    %c0_23 = arith.constant 0 : index
    %45 = vector.load %arg3[%c0_21, %c0_22, %c0_23] : memref<4x96x32xbf16, #tpu.memory_space<vmem>>, vector<1x96x32xbf16>
    %46 = vector.shape_cast %45 : vector<1x96x32xbf16> to vector<96x32xbf16>
    %c0_24 = arith.constant 0 : index
    %c0_25 = arith.constant 0 : index
    %47 = tpu.strided_load %arg30[%c0_24, %c0_25] {strides = array<i32: 2, 1>} : memref<640x32xf32, #tpu.memory_space<vmem>>, vector<319x32xf32>
    %48 = arith.truncf %47 : vector<319x32xf32> to vector<319x32xbf16>
    %49 = vector.extract_strided_slice %46 {offsets = [0, 0], sizes = [32, 32], strides = [1, 1]} : vector<96x32xbf16> to vector<32x32xbf16>
    %cst_26 = arith.constant dense<0.000000e+00> : vector<319x32xf32>
    %50 = tpu.matmul %48, %49, %cst_26 {dimension_numbers = #tpu.dot_dimension_numbers<[1], [0], [0], [1], [0, 0, 1, 1], [], []>} : vector<319x32xbf16>, vector<32x32xbf16>, vector<319x32xf32> -> vector<319x32xf32>
    %c1_27 = arith.constant 1 : index
    %c0_28 = arith.constant 0 : index
    %51 = tpu.strided_load %arg30[%c1_27, %c0_28] {strides = array<i32: 2, 1>} : memref<640x32xf32, #tpu.memory_space<vmem>>, vector<319x32xf32>
    %52 = arith.truncf %51 : vector<319x32xf32> to vector<319x32xbf16>
    %53 = vector.extract_strided_slice %46 {offsets = [32, 0], sizes = [32, 32], strides = [1, 1]} : vector<96x32xbf16> to vector<32x32xbf16>
    %cst_29 = arith.constant dense<0.000000e+00> : vector<319x32xf32>
    %54 = tpu.matmul %52, %53, %cst_29 {dimension_numbers = #tpu.dot_dimension_numbers<[1], [0], [0], [1], [0, 0, 1, 1], [], []>} : vector<319x32xbf16>, vector<32x32xbf16>, vector<319x32xf32> -> vector<319x32xf32>
    %55 = arith.addf %50, %54 : vector<319x32xf32>
    %c2 = arith.constant 2 : index
    %c0_30 = arith.constant 0 : index
    %56 = tpu.strided_load %arg30[%c2, %c0_30] {strides = array<i32: 2, 1>} : memref<640x32xf32, #tpu.memory_space<vmem>>, vector<319x32xf32>
    %57 = arith.truncf %56 : vector<319x32xf32> to vector<319x32xbf16>
    %58 = vector.extract_strided_slice %46 {offsets = [64, 0], sizes = [32, 32], strides = [1, 1]} : vector<96x32xbf16> to vector<32x32xbf16>
    %cst_31 = arith.constant dense<0.000000e+00> : vector<319x32xf32>
    %59 = tpu.matmul %57, %58, %cst_31 {dimension_numbers = #tpu.dot_dimension_numbers<[1], [0], [0], [1], [0, 0, 1, 1], [], []>} : vector<319x32xbf16>, vector<32x32xbf16>, vector<319x32xf32> -> vector<319x32xf32>
    %60 = arith.addf %55, %59 : vector<319x32xf32>
    %cst_32 = arith.constant 5.000000e-01 : f32
    %61 = vector.broadcast %cst_32 : f32 to vector<319x32xf32>
    %62 = arith.mulf %61, %60 : vector<319x32xf32>
    %cst_33 = arith.constant 0.707106769 : f32
    %63 = vector.broadcast %cst_33 : f32 to vector<319x32xf32>
    %64 = arith.mulf %60, %63 : vector<319x32xf32>
    %65 = math.erf %64 : vector<319x32xf32>
    %cst_34 = arith.constant 1.000000e+00 : f32
    %66 = vector.broadcast %cst_34 : f32 to vector<319x32xf32>
    %67 = arith.addf %66, %65 : vector<319x32xf32>
    %68 = arith.mulf %62, %67 : vector<319x32xf32>
    %c0_35 = arith.constant 0 : index
    %c0_36 = arith.constant 0 : index
    %69 = vector.load %arg31[%c0_35, %c0_36] : memref<320x32xf32, #tpu.memory_space<vmem>>, vector<319x32xf32>
    tpu.vector_store %arg31[%c0_35, %c0_36], %68 {strides = array<i32>} : memref<320x32xf32, #tpu.memory_space<vmem>>, vector<319x32xf32>,
    %c1_37 = arith.constant 1 : index
    %c0_38 = arith.constant 0 : index
    %c0_39 = arith.constant 0 : index
    %70 = vector.load %arg3[%c1_37, %c0_38, %c0_39] : memref<4x96x32xbf16, #tpu.memory_space<vmem>>, vector<1x96x32xbf16>
    %71 = vector.shape_cast %70 : vector<1x96x32xbf16> to vector<96x32xbf16>
    %c0_40 = arith.constant 0 : index
    %c0_41 = arith.constant 0 : index
    %72 = tpu.strided_load %arg31[%c0_40, %c0_41] {strides = array<i32: 2, 1>} : memref<320x32xf32, #tpu.memory_space<vmem>>, vector<159x32xf32>
    %73 = arith.truncf %72 : vector<159x32xf32> to vector<159x32xbf16>
    %74 = vector.extract_strided_slice %71 {offsets = [0, 0], sizes = [32, 32], strides = [1, 1]} : vector<96x32xbf16> to vector<32x32xbf16>
    %cst_42 = arith.constant dense<0.000000e+00> : vector<159x32xf32>
    %75 = tpu.matmul %73, %74, %cst_42 {dimension_numbers = #tpu.dot_dimension_numbers<[1], [0], [0], [1], [0, 0, 1, 1], [], []>} : vector<159x32xbf16>, vector<32x32xbf16>, vector<159x32xf32> -> vector<159x32xf32>
    %c1_43 = arith.constant 1 : index
    %c0_44 = arith.constant 0 : index
    %76 = tpu.strided_load %arg31[%c1_43, %c0_44] {strides = array<i32: 2, 1>} : memref<320x32xf32, #tpu.memory_space<vmem>>, vector<159x32xf32>
    %77 = arith.truncf %76 : vector<159x32xf32> to vector<159x32xbf16>
    %78 = vector.extract_strided_slice %71 {offsets = [32, 0], sizes = [32, 32], strides = [1, 1]} : vector<96x32xbf16> to vector<32x32xbf16>
    %cst_45 = arith.constant dense<0.000000e+00> : vector<159x32xf32>
    %79 = tpu.matmul %77, %78, %cst_45 {dimension_numbers = #tpu.dot_dimension_numbers<[1], [0], [0], [1], [0, 0, 1, 1], [], []>} : vector<159x32xbf16>, vector<32x32xbf16>, vector<159x32xf32> -> vector<159x32xf32>
    %80 = arith.addf %75, %79 : vector<159x32xf32>
    %c2_46 = arith.constant 2 : index
    %c0_47 = arith.constant 0 : index
    %81 = tpu.strided_load %arg31[%c2_46, %c0_47] {strides = array<i32: 2, 1>} : memref<320x32xf32, #tpu.memory_space<vmem>>, vector<159x32xf32>
    %82 = arith.truncf %81 : vector<159x32xf32> to vector<159x32xbf16>
    %83 = vector.extract_strided_slice %71 {offsets = [64, 0], sizes = [32, 32], strides = [1, 1]} : vector<96x32xbf16> to vector<32x32xbf16>
    %cst_48 = arith.constant dense<0.000000e+00> : vector<159x32xf32>
    %84 = tpu.matmul %82, %83, %cst_48 {dimension_numbers = #tpu.dot_dimension_numbers<[1], [0], [0], [1], [0, 0, 1, 1], [], []>} : vector<159x32xbf16>, vector<32x32xbf16>, vector<159x32xf32> -> vector<159x32xf32>
    %85 = arith.addf %80, %84 : vector<159x32xf32>
    %cst_49 = arith.constant 5.000000e-01 : f32
    %86 = vector.broadcast %cst_49 : f32 to vector<159x32xf32>
    %87 = arith.mulf %86, %85 : vector<159x32xf32>
    %cst_50 = arith.constant 0.707106769 : f32
    %88 = vector.broadcast %cst_50 : f32 to vector<159x32xf32>
    %89 = arith.mulf %85, %88 : vector<159x32xf32>
    %90 = math.erf %89 : vector<159x32xf32>
    %cst_51 = arith.constant 1.000000e+00 : f32
    %91 = vector.broadcast %cst_51 : f32 to vector<159x32xf32>
    %92 = arith.addf %91, %90 : vector<159x32xf32>
    %93 = arith.mulf %87, %92 : vector<159x32xf32>
    %c0_52 = arith.constant 0 : index
    %c0_53 = arith.constant 0 : index
    %94 = vector.load %arg30[%c0_52, %c0_53] : memref<640x32xf32, #tpu.memory_space<vmem>>, vector<159x32xf32>
    tpu.vector_store %arg30[%c0_52, %c0_53], %93 {strides = array<i32>} : memref<640x32xf32, #tpu.memory_space<vmem>>, vector<159x32xf32>,
    %c2_54 = arith.constant 2 : index
    %c0_55 = arith.constant 0 : index
    %c0_56 = arith.constant 0 : index
    %95 = vector.load %arg3[%c2_54, %c0_55, %c0_56] : memref<4x96x32xbf16, #tpu.memory_space<vmem>>, vector<1x96x32xbf16>
    %96 = vector.shape_cast %95 : vector<1x96x32xbf16> to vector<96x32xbf16>
    %c0_57 = arith.constant 0 : index
    %c0_58 = arith.constant 0 : index
    %97 = tpu.strided_load %arg30[%c0_57, %c0_58] {strides = array<i32: 2, 1>} : memref<640x32xf32, #tpu.memory_space<vmem>>, vector<79x32xf32>
    %98 = arith.truncf %97 : vector<79x32xf32> to vector<79x32xbf16>
    %99 = vector.extract_strided_slice %96 {offsets = [0, 0], sizes = [32, 32], strides = [1, 1]} : vector<96x32xbf16> to vector<32x32xbf16>
    %cst_59 = arith.constant dense<0.000000e+00> : vector<79x32xf32>
    %100 = tpu.matmul %98, %99, %cst_59 {dimension_numbers = #tpu.dot_dimension_numbers<[1], [0], [0], [1], [0, 0, 1, 1], [], []>} : vector<79x32xbf16>, vector<32x32xbf16>, vector<79x32xf32> -> vector<79x32xf32>
    %c1_60 = arith.constant 1 : index
    %c0_61 = arith.constant 0 : index
    %101 = tpu.strided_load %arg30[%c1_60, %c0_61] {strides = array<i32: 2, 1>} : memref<640x32xf32, #tpu.memory_space<vmem>>, vector<79x32xf32>
    %102 = arith.truncf %101 : vector<79x32xf32> to vector<79x32xbf16>
    %103 = vector.extract_strided_slice %96 {offsets = [32, 0], sizes = [32, 32], strides = [1, 1]} : vector<96x32xbf16> to vector<32x32xbf16>
    %cst_62 = arith.constant dense<0.000000e+00> : vector<79x32xf32>
    %104 = tpu.matmul %102, %103, %cst_62 {dimension_numbers = #tpu.dot_dimension_numbers<[1], [0], [0], [1], [0, 0, 1, 1], [], []>} : vector<79x32xbf16>, vector<32x32xbf16>, vector<79x32xf32> -> vector<79x32xf32>
    %105 = arith.addf %100, %104 : vector<79x32xf32>
    %c2_63 = arith.constant 2 : index
    %c0_64 = arith.constant 0 : index
    %106 = tpu.strided_load %arg30[%c2_63, %c0_64] {strides = array<i32: 2, 1>} : memref<640x32xf32, #tpu.memory_space<vmem>>, vector<79x32xf32>
    %107 = arith.truncf %106 : vector<79x32xf32> to vector<79x32xbf16>
    %108 = vector.extract_strided_slice %96 {offsets = [64, 0], sizes = [32, 32], strides = [1, 1]} : vector<96x32xbf16> to vector<32x32xbf16>
    %cst_65 = arith.constant dense<0.000000e+00> : vector<79x32xf32>
    %109 = tpu.matmul %107, %108, %cst_65 {dimension_numbers = #tpu.dot_dimension_numbers<[1], [0], [0], [1], [0, 0, 1, 1], [], []>} : vector<79x32xbf16>, vector<32x32xbf16>, vector<79x32xf32> -> vector<79x32xf32>
    %110 = arith.addf %105, %109 : vector<79x32xf32>
    %cst_66 = arith.constant 5.000000e-01 : f32
    %111 = vector.broadcast %cst_66 : f32 to vector<79x32xf32>
    %112 = arith.mulf %111, %110 : vector<79x32xf32>
    %cst_67 = arith.constant 0.707106769 : f32
    %113 = vector.broadcast %cst_67 : f32 to vector<79x32xf32>
    %114 = arith.mulf %110, %113 : vector<79x32xf32>
    %115 = math.erf %114 : vector<79x32xf32>
    %cst_68 = arith.constant 1.000000e+00 : f32
    %116 = vector.broadcast %cst_68 : f32 to vector<79x32xf32>
    %117 = arith.addf %116, %115 : vector<79x32xf32>
    %118 = arith.mulf %112, %117 : vector<79x32xf32>
    %c0_69 = arith.constant 0 : index
    %c0_70 = arith.constant 0 : index
    %119 = vector.load %arg31[%c0_69, %c0_70] : memref<320x32xf32, #tpu.memory_space<vmem>>, vector<79x32xf32>
    tpu.vector_store %arg31[%c0_69, %c0_70], %118 {strides = array<i32>} : memref<320x32xf32, #tpu.memory_space<vmem>>, vector<79x32xf32>,
    %c3 = arith.constant 3 : index
    %c0_71 = arith.constant 0 : index
    %c0_72 = arith.constant 0 : index
    %120 = vector.load %arg3[%c3, %c0_71, %c0_72] : memref<4x96x32xbf16, #tpu.memory_space<vmem>>, vector<1x96x32xbf16>
    %121 = vector.shape_cast %120 : vector<1x96x32xbf16> to vector<96x32xbf16>
    %c0_73 = arith.constant 0 : index
    %c0_74 = arith.constant 0 : index
    %122 = tpu.strided_load %arg31[%c0_73, %c0_74] {strides = array<i32: 2, 1>} : memref<320x32xf32, #tpu.memory_space<vmem>>, vector<39x32xf32>
    %123 = arith.truncf %122 : vector<39x32xf32> to vector<39x32xbf16>
    %124 = vector.extract_strided_slice %121 {offsets = [0, 0], sizes = [32, 32], strides = [1, 1]} : vector<96x32xbf16> to vector<32x32xbf16>
    %cst_75 = arith.constant dense<0.000000e+00> : vector<39x32xf32>
    %125 = tpu.matmul %123, %124, %cst_75 {dimension_numbers = #tpu.dot_dimension_numbers<[1], [0], [0], [1], [0, 0, 1, 1], [], []>} : vector<39x32xbf16>, vector<32x32xbf16>, vector<39x32xf32> -> vector<39x32xf32>
    %c1_76 = arith.constant 1 : index
    %c0_77 = arith.constant 0 : index
    %126 = tpu.strided_load %arg31[%c1_76, %c0_77] {strides = array<i32: 2, 1>} : memref<320x32xf32, #tpu.memory_space<vmem>>, vector<39x32xf32>
    %127 = arith.truncf %126 : vector<39x32xf32> to vector<39x32xbf16>
    %128 = vector.extract_strided_slice %121 {offsets = [32, 0], sizes = [32, 32], strides = [1, 1]} : vector<96x32xbf16> to vector<32x32xbf16>
    %cst_78 = arith.constant dense<0.000000e+00> : vector<39x32xf32>
    %129 = tpu.matmul %127, %128, %cst_78 {dimension_numbers = #tpu.dot_dimension_numbers<[1], [0], [0], [1], [0, 0, 1, 1], [], []>} : vector<39x32xbf16>, vector<32x32xbf16>, vector<39x32xf32> -> vector<39x32xf32>
    %130 = arith.addf %125, %129 : vector<39x32xf32>
    %c2_79 = arith.constant 2 : index
    %c0_80 = arith.constant 0 : index
    %131 = tpu.strided_load %arg31[%c2_79, %c0_80] {strides = array<i32: 2, 1>} : memref<320x32xf32, #tpu.memory_space<vmem>>, vector<39x32xf32>
    %132 = arith.truncf %131 : vector<39x32xf32> to vector<39x32xbf16>
    %133 = vector.extract_strided_slice %121 {offsets = [64, 0], sizes = [32, 32], strides = [1, 1]} : vector<96x32xbf16> to vector<32x32xbf16>
    %cst_81 = arith.constant dense<0.000000e+00> : vector<39x32xf32>
    %134 = tpu.matmul %132, %133, %cst_81 {dimension_numbers = #tpu.dot_dimension_numbers<[1], [0], [0], [1], [0, 0, 1, 1], [], []>} : vector<39x32xbf16>, vector<32x32xbf16>, vector<39x32xf32> -> vector<39x32xf32>
    %135 = arith.addf %130, %134 : vector<39x32xf32>
    %cst_82 = arith.constant 5.000000e-01 : f32
    %136 = vector.broadcast %cst_82 : f32 to vector<39x32xf32>
    %137 = arith.mulf %136, %135 : vector<39x32xf32>
    %cst_83 = arith.constant 0.707106769 : f32
    %138 = vector.broadcast %cst_83 : f32 to vector<39x32xf32>
    %139 = arith.mulf %135, %138 : vector<39x32xf32>
    %140 = math.erf %139 : vector<39x32xf32>
    %cst_84 = arith.constant 1.000000e+00 : f32
    %141 = vector.broadcast %cst_84 : f32 to vector<39x32xf32>
    %142 = arith.addf %141, %140 : vector<39x32xf32>
    %143 = arith.mulf %137, %142 : vector<39x32xf32>
    %c0_85 = arith.constant 0 : index
    %c0_86 = arith.constant 0 : index
    %144 = vector.load %arg30[%c0_85, %c0_86] : memref<640x32xf32, #tpu.memory_space<vmem>>, vector<39x32xf32>
    tpu.vector_store %arg30[%c0_85, %c0_86], %143 {strides = array<i32>} : memref<640x32xf32, #tpu.memory_space<vmem>>, vector<39x32xf32>,
    %c0_87 = arith.constant 0 : index
    %c0_88 = arith.constant 0 : index
    %c0_89 = arith.constant 0 : index
    %145 = vector.load %arg4[%c0_87, %c0_88, %c0_89] : memref<2x64x32xbf16, #tpu.memory_space<vmem>>, vector<1x64x32xbf16>
    %146 = vector.shape_cast %145 : vector<1x64x32xbf16> to vector<64x32xbf16>
    %c0_90 = arith.constant 0 : index
    %c0_91 = arith.constant 0 : index
    %147 = tpu.strided_load %arg30[%c0_90, %c0_91] {strides = array<i32: 2, 1>} : memref<640x32xf32, #tpu.memory_space<vmem>>, vector<19x32xf32>
    %148 = arith.truncf %147 : vector<19x32xf32> to vector<19x32xbf16>
    %149 = vector.extract_strided_slice %146 {offsets = [0, 0], sizes = [32, 32], strides = [1, 1]} : vector<64x32xbf16> to vector<32x32xbf16>
    %cst_92 = arith.constant dense<0.000000e+00> : vector<19x32xf32>
    %150 = tpu.matmul %148, %149, %cst_92 {dimension_numbers = #tpu.dot_dimension_numbers<[1], [0], [0], [1], [0, 0, 1, 1], [], []>} : vector<19x32xbf16>, vector<32x32xbf16>, vector<19x32xf32> -> vector<19x32xf32>
    %c1_93 = arith.constant 1 : index
    %c0_94 = arith.constant 0 : index
    %151 = tpu.strided_load %arg30[%c1_93, %c0_94] {strides = array<i32: 2, 1>} : memref<640x32xf32, #tpu.memory_space<vmem>>, vector<19x32xf32>
    %152 = arith.truncf %151 : vector<19x32xf32> to vector<19x32xbf16>
    %153 = vector.extract_strided_slice %146 {offsets = [32, 0], sizes = [32, 32], strides = [1, 1]} : vector<64x32xbf16> to vector<32x32xbf16>
    %cst_95 = arith.constant dense<0.000000e+00> : vector<19x32xf32>
    %154 = tpu.matmul %152, %153, %cst_95 {dimension_numbers = #tpu.dot_dimension_numbers<[1], [0], [0], [1], [0, 0, 1, 1], [], []>} : vector<19x32xbf16>, vector<32x32xbf16>, vector<19x32xf32> -> vector<19x32xf32>
    %155 = arith.addf %150, %154 : vector<19x32xf32>
    %cst_96 = arith.constant 5.000000e-01 : f32
    %156 = vector.broadcast %cst_96 : f32 to vector<19x32xf32>
    %157 = arith.mulf %156, %155 : vector<19x32xf32>
    %cst_97 = arith.constant 0.707106769 : f32
    %158 = vector.broadcast %cst_97 : f32 to vector<19x32xf32>
    %159 = arith.mulf %155, %158 : vector<19x32xf32>
    %160 = math.erf %159 : vector<19x32xf32>
    %cst_98 = arith.constant 1.000000e+00 : f32
    %161 = vector.broadcast %cst_98 : f32 to vector<19x32xf32>
    %162 = arith.addf %161, %160 : vector<19x32xf32>
    %163 = arith.mulf %157, %162 : vector<19x32xf32>
    %c0_99 = arith.constant 0 : index
    %c0_100 = arith.constant 0 : index
    %164 = vector.load %arg31[%c0_99, %c0_100] : memref<320x32xf32, #tpu.memory_space<vmem>>, vector<19x32xf32>
    tpu.vector_store %arg31[%c0_99, %c0_100], %163 {strides = array<i32>} : memref<320x32xf32, #tpu.memory_space<vmem>>, vector<19x32xf32>,
    %c1_101 = arith.constant 1 : index
    %c0_102 = arith.constant 0 : index
    %c0_103 = arith.constant 0 : index
    %165 = vector.load %arg4[%c1_101, %c0_102, %c0_103] : memref<2x64x32xbf16, #tpu.memory_space<vmem>>, vector<1x64x32xbf16>
    %166 = vector.shape_cast %165 : vector<1x64x32xbf16> to vector<64x32xbf16>
    %c0_104 = arith.constant 0 : index
    %c0_105 = arith.constant 0 : index
    %167 = tpu.strided_load %arg31[%c0_104, %c0_105] {strides = array<i32: 2, 1>} : memref<320x32xf32, #tpu.memory_space<vmem>>, vector<9x32xf32>
    %168 = arith.truncf %167 : vector<9x32xf32> to vector<9x32xbf16>
    %169 = vector.extract_strided_slice %166 {offsets = [0, 0], sizes = [32, 32], strides = [1, 1]} : vector<64x32xbf16> to vector<32x32xbf16>
    %cst_106 = arith.constant dense<0.000000e+00> : vector<9x32xf32>
    %170 = tpu.matmul %168, %169, %cst_106 {dimension_numbers = #tpu.dot_dimension_numbers<[1], [0], [0], [1], [0, 0, 1, 1], [], []>} : vector<9x32xbf16>, vector<32x32xbf16>, vector<9x32xf32> -> vector<9x32xf32>
    %c1_107 = arith.constant 1 : index
    %c0_108 = arith.constant 0 : index
    %171 = tpu.strided_load %arg31[%c1_107, %c0_108] {strides = array<i32: 2, 1>} : memref<320x32xf32, #tpu.memory_space<vmem>>, vector<9x32xf32>
    %172 = arith.truncf %171 : vector<9x32xf32> to vector<9x32xbf16>
    %173 = vector.extract_strided_slice %166 {offsets = [32, 0], sizes = [32, 32], strides = [1, 1]} : vector<64x32xbf16> to vector<32x32xbf16>
    %cst_109 = arith.constant dense<0.000000e+00> : vector<9x32xf32>
    %174 = tpu.matmul %172, %173, %cst_109 {dimension_numbers = #tpu.dot_dimension_numbers<[1], [0], [0], [1], [0, 0, 1, 1], [], []>} : vector<9x32xbf16>, vector<32x32xbf16>, vector<9x32xf32> -> vector<9x32xf32>
    %175 = arith.addf %170, %174 : vector<9x32xf32>
    %cst_110 = arith.constant 5.000000e-01 : f32
    %176 = vector.broadcast %cst_110 : f32 to vector<9x32xf32>
    %177 = arith.mulf %176, %175 : vector<9x32xf32>
    %cst_111 = arith.constant 0.707106769 : f32
    %178 = vector.broadcast %cst_111 : f32 to vector<9x32xf32>
    %179 = arith.mulf %175, %178 : vector<9x32xf32>
    %180 = math.erf %179 : vector<9x32xf32>
    %cst_112 = arith.constant 1.000000e+00 : f32
    %181 = vector.broadcast %cst_112 : f32 to vector<9x32xf32>
    %182 = arith.addf %181, %180 : vector<9x32xf32>
    %183 = arith.mulf %177, %182 : vector<9x32xf32>
    %c0_113 = arith.constant 0 : index
    %c0_114 = arith.constant 0 : index
    %184 = vector.load %arg30[%c0_113, %c0_114] : memref<640x32xf32, #tpu.memory_space<vmem>>, vector<9x32xf32>
    tpu.vector_store %arg30[%c0_113, %c0_114], %183 {strides = array<i32>} : memref<640x32xf32, #tpu.memory_space<vmem>>, vector<9x32xf32>,
    %c0_115 = arith.constant 0 : index
    %c0_116 = arith.constant 0 : index
    %185 = vector.load %arg30[%c0_115, %c0_116] : memref<640x32xf32, #tpu.memory_space<vmem>>, vector<9x32xf32>
    %c0_117 = arith.constant 0 : index
    %c0_118 = arith.constant 0 : index
    %186 = vector.load %arg7[%c0_117, %c0_118] : memref<1x32xf32, #tpu.memory_space<vmem>>, vector<1x32xf32>
    %c0_119 = arith.constant 0 : index
    %c0_120 = arith.constant 0 : index
    %187 = vector.load %arg8[%c0_119, %c0_120] : memref<1x32xf32, #tpu.memory_space<vmem>>, vector<1x32xf32>
    %cst_121 = arith.constant dense<0.000000e+00> : vector<9xf32>
    %188 = vector.multi_reduction <add>, %185, %cst_121 [1] : vector<9x32xf32> to vector<9xf32>
    %189 = vector.shape_cast %188 : vector<9xf32> to vector<9x1xf32>
    %cst_122 = arith.constant 3.200000e+01 : f32
    %190 = vector.broadcast %cst_122 : f32 to vector<9x1xf32>
    %191 = arith.divf %189, %190 : vector<9x1xf32>
    %192 = vector.broadcast %191 : vector<9x1xf32> to vector<9x32xf32>
    %193 = arith.subf %185, %192 : vector<9x32xf32>
    %194 = arith.mulf %193, %193 : vector<9x32xf32>
    %cst_123 = arith.constant dense<0.000000e+00> : vector<9xf32>
    %195 = vector.multi_reduction <add>, %194, %cst_123 [1] : vector<9x32xf32> to vector<9xf32>
    %196 = vector.shape_cast %195 : vector<9xf32> to vector<9x1xf32>
    %cst_124 = arith.constant 3.200000e+01 : f32
    %197 = vector.broadcast %cst_124 : f32 to vector<9x1xf32>
    %198 = arith.divf %196, %197 : vector<9x1xf32>
    %199 = vector.broadcast %191 : vector<9x1xf32> to vector<9x32xf32>
    %200 = arith.subf %185, %199 : vector<9x32xf32>
    %cst_125 = arith.constant 9.99999974E-6 : f32
    %201 = vector.broadcast %cst_125 : f32 to vector<9x1xf32>
    %202 = arith.addf %198, %201 : vector<9x1xf32>
    %203 = math.rsqrt %202 : vector<9x1xf32>
    %204 = vector.broadcast %203 : vector<9x1xf32> to vector<9x32xf32>
    %205 = arith.mulf %200, %204 : vector<9x32xf32>
    %206 = vector.broadcast %186 : vector<1x32xf32> to vector<9x32xf32>
    %207 = arith.mulf %205, %206 : vector<9x32xf32>
    %208 = vector.broadcast %187 : vector<1x32xf32> to vector<9x32xf32>
    %209 = arith.addf %207, %208 : vector<9x32xf32>
    %210 = arith.truncf %209 : vector<9x32xf32> to vector<9x32xbf16>
    %c0_126 = arith.constant 0 : index
    %c0_127 = arith.constant 0 : index
    %211 = vector.load %arg9[%c0_126, %c0_127] : memref<32x64xbf16, #tpu.memory_space<vmem>>, vector<32x64xbf16>
    %cst_128 = arith.constant dense<0.000000e+00> : vector<9x64xf32>
    %212 = tpu.matmul %210, %211, %cst_128 {dimension_numbers = #tpu.dot_dimension_numbers<[1], [0], [0], [1], [0, 0, 1, 1], [], []>} : vector<9x32xbf16>, vector<32x64xbf16>, vector<9x64xf32> -> vector<9x64xf32>
    %c0_129 = arith.constant 0 : index
    %c0_130 = arith.constant 0 : index
    %213 = vector.load %arg10[%c0_129, %c0_130] : memref<1x64xf32, #tpu.memory_space<vmem>>, vector<1x64xf32>
    %214 = vector.broadcast %213 : vector<1x64xf32> to vector<9x64xf32>
    %215 = arith.addf %212, %214 : vector<9x64xf32>
    %cst_131 = arith.constant 0.000000e+00 : f32
    %216 = vector.broadcast %cst_131 : f32 to vector<16x64xf32>
    %c0_132 = arith.constant 0 : index
    %c0_133 = arith.constant 0 : index
    %217 = vector.load %arg32[%c0_132, %c0_133] : memref<16x64xf32, #tpu.memory_space<vmem>>, vector<16x64xf32>
    tpu.vector_store %arg32[%c0_132, %c0_133], %216 {strides = array<i32>} : memref<16x64xf32, #tpu.memory_space<vmem>>, vector<16x64xf32>,
    %c1_134 = arith.constant 1 : index
    %c0_135 = arith.constant 0 : index
    %218 = vector.load %arg32[%c1_134, %c0_135] : memref<16x64xf32, #tpu.memory_space<vmem>>, vector<9x64xf32>
    tpu.vector_store %arg32[%c1_134, %c0_135], %215 {strides = array<i32>} : memref<16x64xf32, #tpu.memory_space<vmem>>, vector<9x64xf32>,
    %c0_136 = arith.constant 0 : index
    %c0_137 = arith.constant 0 : index
    %219 = vector.load %arg11[%c0_136, %c0_137] : memref<192x64xbf16, #tpu.memory_space<vmem>>, vector<192x64xbf16>
    %c0_138 = arith.constant 0 : index
    %c0_139 = arith.constant 0 : index
    %220 = vector.load %arg32[%c0_138, %c0_139] : memref<16x64xf32, #tpu.memory_space<vmem>>, vector<9x64xf32>
    %221 = arith.truncf %220 : vector<9x64xf32> to vector<9x64xbf16>
    %222 = vector.extract_strided_slice %219 {offsets = [0, 0], sizes = [64, 64], strides = [1, 1]} : vector<192x64xbf16> to vector<64x64xbf16>
    %cst_140 = arith.constant dense<0.000000e+00> : vector<9x64xf32>
    %223 = tpu.matmul %221, %222, %cst_140 {dimension_numbers = #tpu.dot_dimension_numbers<[1], [0], [0], [1], [0, 0, 1, 1], [], []>} : vector<9x64xbf16>, vector<64x64xbf16>, vector<9x64xf32> -> vector<9x64xf32>
    %c1_141 = arith.constant 1 : index
    %c0_142 = arith.constant 0 : index
    %224 = vector.load %arg32[%c1_141, %c0_142] : memref<16x64xf32, #tpu.memory_space<vmem>>, vector<9x64xf32>
    %225 = arith.truncf %224 : vector<9x64xf32> to vector<9x64xbf16>
    %226 = vector.extract_strided_slice %219 {offsets = [64, 0], sizes = [64, 64], strides = [1, 1]} : vector<192x64xbf16> to vector<64x64xbf16>
    %cst_143 = arith.constant dense<0.000000e+00> : vector<9x64xf32>
    %227 = tpu.matmul %225, %226, %cst_143 {dimension_numbers = #tpu.dot_dimension_numbers<[1], [0], [0], [1], [0, 0, 1, 1], [], []>} : vector<9x64xbf16>, vector<64x64xbf16>, vector<9x64xf32> -> vector<9x64xf32>
    %228 = arith.addf %223, %227 : vector<9x64xf32>
    %c2_144 = arith.constant 2 : index
    %c0_145 = arith.constant 0 : index
    %229 = vector.load %arg32[%c2_144, %c0_145] : memref<16x64xf32, #tpu.memory_space<vmem>>, vector<9x64xf32>
    %230 = arith.truncf %229 : vector<9x64xf32> to vector<9x64xbf16>
    %231 = vector.extract_strided_slice %219 {offsets = [128, 0], sizes = [64, 64], strides = [1, 1]} : vector<192x64xbf16> to vector<64x64xbf16>
    %cst_146 = arith.constant dense<0.000000e+00> : vector<9x64xf32>
    %232 = tpu.matmul %230, %231, %cst_146 {dimension_numbers = #tpu.dot_dimension_numbers<[1], [0], [0], [1], [0, 0, 1, 1], [], []>} : vector<9x64xbf16>, vector<64x64xbf16>, vector<9x64xf32> -> vector<9x64xf32>
    %233 = arith.addf %228, %232 : vector<9x64xf32>
    %c0_147 = arith.constant 0 : index
    %c0_148 = arith.constant 0 : index
    %234 = vector.load %arg12[%c0_147, %c0_148] : memref<1x64xf32, #tpu.memory_space<vmem>>, vector<1x64xf32>
    %235 = vector.broadcast %234 : vector<1x64xf32> to vector<9x64xf32>
    %236 = arith.addf %233, %235 : vector<9x64xf32>
    %cst_149 = arith.constant 5.000000e-01 : f32
    %237 = vector.broadcast %cst_149 : f32 to vector<9x64xf32>
    %238 = arith.mulf %237, %236 : vector<9x64xf32>
    %cst_150 = arith.constant 0.707106769 : f32
    %239 = vector.broadcast %cst_150 : f32 to vector<9x64xf32>
    %240 = arith.mulf %236, %239 : vector<9x64xf32>
    %241 = math.erf %240 : vector<9x64xf32>
    %cst_151 = arith.constant 1.000000e+00 : f32
    %242 = vector.broadcast %cst_151 : f32 to vector<9x64xf32>
    %243 = arith.addf %242, %241 : vector<9x64xf32>
    %244 = arith.mulf %238, %243 : vector<9x64xf32>
    %245 = arith.addf %215, %244 : vector<9x64xf32>
    %c0_152 = arith.constant 0 : index
    %c0_153 = arith.constant 0 : index
    %246 = vector.load %arg13[%c0_152, %c0_153] : memref<1x64xf32, #tpu.memory_space<vmem>>, vector<1x64xf32>
    %c0_154 = arith.constant 0 : index
    %c0_155 = arith.constant 0 : index
    %247 = vector.load %arg14[%c0_154, %c0_155] : memref<1x64xf32, #tpu.memory_space<vmem>>, vector<1x64xf32>
    %cst_156 = arith.constant dense<0.000000e+00> : vector<9xf32>
    %248 = vector.multi_reduction <add>, %245, %cst_156 [1] : vector<9x64xf32> to vector<9xf32>
    %249 = vector.shape_cast %248 : vector<9xf32> to vector<9x1xf32>
    %cst_157 = arith.constant 6.400000e+01 : f32
    %250 = vector.broadcast %cst_157 : f32 to vector<9x1xf32>
    %251 = arith.divf %249, %250 : vector<9x1xf32>
    %252 = vector.broadcast %251 : vector<9x1xf32> to vector<9x64xf32>
    %253 = arith.subf %245, %252 : vector<9x64xf32>
    %254 = arith.mulf %253, %253 : vector<9x64xf32>
    %cst_158 = arith.constant dense<0.000000e+00> : vector<9xf32>
    %255 = vector.multi_reduction <add>, %254, %cst_158 [1] : vector<9x64xf32> to vector<9xf32>
    %256 = vector.shape_cast %255 : vector<9xf32> to vector<9x1xf32>
    %cst_159 = arith.constant 6.400000e+01 : f32
    %257 = vector.broadcast %cst_159 : f32 to vector<9x1xf32>
    %258 = arith.divf %256, %257 : vector<9x1xf32>
    %259 = vector.broadcast %251 : vector<9x1xf32> to vector<9x64xf32>
    %260 = arith.subf %245, %259 : vector<9x64xf32>
    %cst_160 = arith.constant 9.99999974E-6 : f32
    %261 = vector.broadcast %cst_160 : f32 to vector<9x1xf32>
    %262 = arith.addf %258, %261 : vector<9x1xf32>
    %263 = math.rsqrt %262 : vector<9x1xf32>
    %264 = vector.broadcast %263 : vector<9x1xf32> to vector<9x64xf32>
    %265 = arith.mulf %260, %264 : vector<9x64xf32>
    %266 = vector.broadcast %246 : vector<1x64xf32> to vector<9x64xf32>
    %267 = arith.mulf %265, %266 : vector<9x64xf32>
    %268 = vector.broadcast %247 : vector<1x64xf32> to vector<9x64xf32>
    %269 = arith.addf %267, %268 : vector<9x64xf32>
    %270 = arith.truncf %269 : vector<9x64xf32> to vector<9x64xbf16>
    %c0_161 = arith.constant 0 : index
    %c0_162 = arith.constant 0 : index
    %c0_163 = arith.constant 0 : index
    %271 = vector.load %arg15[%c0_161, %c0_162, %c0_163] : memref<2x64x192xbf16, #tpu.memory_space<vmem>>, vector<1x64x192xbf16>
    %272 = vector.shape_cast %271 : vector<1x64x192xbf16> to vector<64x192xbf16>
    %cst_164 = arith.constant dense<0.000000e+00> : vector<9x192xf32>
    %273 = tpu.matmul %270, %272, %cst_164 {dimension_numbers = #tpu.dot_dimension_numbers<[1], [0], [0], [1], [0, 0, 1, 1], [], []>} : vector<9x64xbf16>, vector<64x192xbf16>, vector<9x192xf32> -> vector<9x192xf32>
    %c0_165 = arith.constant 0 : index
    %c0_166 = arith.constant 0 : index
    %c0_167 = arith.constant 0 : index
    %274 = vector.load %arg16[%c0_165, %c0_166, %c0_167] : memref<2x1x192xf32, #tpu.memory_space<vmem>>, vector<1x1x192xf32>
    %275 = vector.shape_cast %274 : vector<1x1x192xf32> to vector<1x192xf32>
    %276 = vector.broadcast %275 : vector<1x192xf32> to vector<9x192xf32>
    %277 = arith.addf %273, %276 : vector<9x192xf32>
    %278 = vector.extract_strided_slice %277 {offsets = [0, 0], sizes = [9, 64], strides = [1, 1]} : vector<9x192xf32> to vector<9x64xf32>
    %279 = vector.extract_strided_slice %277 {offsets = [0, 64], sizes = [9, 64], strides = [1, 1]} : vector<9x192xf32> to vector<9x64xf32>
    %280 = tpu.transpose %279, [1, 0] : vector<9x64xf32> -> vector<64x9xf32>
    %281 = arith.truncf %280 : vector<64x9xf32> to vector<64x9xbf16>
    %282 = vector.extract_strided_slice %277 {offsets = [0, 128], sizes = [9, 64], strides = [1, 1]} : vector<9x192xf32> to vector<9x64xf32>
    %283 = arith.truncf %282 : vector<9x64xf32> to vector<9x64xbf16>
    %c0_168 = arith.constant 0 : index
    %c0_169 = arith.constant 0 : index
    %c0_170 = arith.constant 0 : index
    %284 = vector.load %arg17[%c0_168, %c0_169, %c0_170] : memref<2x64x64xbf16, #tpu.memory_space<vmem>>, vector<1x64x64xbf16>
    %285 = vector.shape_cast %284 : vector<1x64x64xbf16> to vector<64x64xbf16>
    %286 = vector.extract_strided_slice %278 {offsets = [0, 0], sizes = [9, 16], strides = [1, 1]} : vector<9x64xf32> to vector<9x16xf32>
    %287 = arith.truncf %286 : vector<9x16xf32> to vector<9x16xbf16>
    %288 = vector.extract_strided_slice %281 {offsets = [0, 0], sizes = [16, 9], strides = [1, 1]} : vector<64x9xbf16> to vector<16x9xbf16>
    %cst_171 = arith.constant dense<0.000000e+00> : vector<9x9xf32>
    %289 = tpu.matmul %287, %288, %cst_171 {dimension_numbers = #tpu.dot_dimension_numbers<[1], [0], [0], [1], [0, 0, 1, 1], [], []>} : vector<9x16xbf16>, vector<16x9xbf16>, vector<9x9xf32> -> vector<9x9xf32>
    %cst_172 = arith.constant 2.500000e-01 : f32
    %290 = vector.broadcast %cst_172 : f32 to vector<9x9xf32>
    %291 = arith.mulf %289, %290 : vector<9x9xf32>
    %cst_173 = arith.constant dense<0xFF800000> : vector<9xf32>
    %292 = vector.multi_reduction <maximumf>, %291, %cst_173 [1] : vector<9x9xf32> to vector<9xf32>
    %293 = vector.shape_cast %292 : vector<9xf32> to vector<9x1xf32>
    %294 = vector.broadcast %293 : vector<9x1xf32> to vector<9x9xf32>
    %295 = arith.subf %291, %294 : vector<9x9xf32>
    %296 = math.exp %295 : vector<9x9xf32>
    %cst_174 = arith.constant dense<0.000000e+00> : vector<9xf32>
    %297 = vector.multi_reduction <add>, %296, %cst_174 [1] : vector<9x9xf32> to vector<9xf32>
    %298 = vector.shape_cast %297 : vector<9xf32> to vector<9x1xf32>
    %299 = tpu.reciprocal %298 {approx = true} : vector<9x1xf32> -> vector<9x1xf32>
    %300 = vector.broadcast %299 : vector<9x1xf32> to vector<9x9xf32>
    %301 = arith.mulf %296, %300 : vector<9x9xf32>
    %302 = arith.truncf %301 : vector<9x9xf32> to vector<9x9xbf16>
    %303 = vector.extract_strided_slice %283 {offsets = [0, 0], sizes = [9, 16], strides = [1, 1]} : vector<9x64xbf16> to vector<9x16xbf16>
    %cst_175 = arith.constant dense<0.000000e+00> : vector<9x16xf32>
    %304 = tpu.matmul %302, %303, %cst_175 {dimension_numbers = #tpu.dot_dimension_numbers<[1], [0], [0], [1], [0, 0, 1, 1], [], []>} : vector<9x9xbf16>, vector<9x16xbf16>, vector<9x16xf32> -> vector<9x16xf32>
    %305 = arith.truncf %304 : vector<9x16xf32> to vector<9x16xbf16>
    %306 = vector.extract_strided_slice %285 {offsets = [0, 0], sizes = [16, 64], strides = [1, 1]} : vector<64x64xbf16> to vector<16x64xbf16>
    %cst_176 = arith.constant dense<0.000000e+00> : vector<9x64xf32>
    %307 = tpu.matmul %305, %306, %cst_176 {dimension_numbers = #tpu.dot_dimension_numbers<[1], [0], [0], [1], [0, 0, 1, 1], [], []>} : vector<9x16xbf16>, vector<16x64xbf16>, vector<9x64xf32> -> vector<9x64xf32>
    %308 = vector.extract_strided_slice %278 {offsets = [0, 16], sizes = [9, 16], strides = [1, 1]} : vector<9x64xf32> to vector<9x16xf32>
    %309 = arith.truncf %308 : vector<9x16xf32> to vector<9x16xbf16>
    %310 = vector.extract_strided_slice %281 {offsets = [16, 0], sizes = [16, 9], strides = [1, 1]} : vector<64x9xbf16> to vector<16x9xbf16>
    %cst_177 = arith.constant dense<0.000000e+00> : vector<9x9xf32>
    %311 = tpu.matmul %309, %310, %cst_177 {dimension_numbers = #tpu.dot_dimension_numbers<[1], [0], [0], [1], [0, 0, 1, 1], [], []>} : vector<9x16xbf16>, vector<16x9xbf16>, vector<9x9xf32> -> vector<9x9xf32>
    %cst_178 = arith.constant 2.500000e-01 : f32
    %312 = vector.broadcast %cst_178 : f32 to vector<9x9xf32>
    %313 = arith.mulf %311, %312 : vector<9x9xf32>
    %cst_179 = arith.constant dense<0xFF800000> : vector<9xf32>
    %314 = vector.multi_reduction <maximumf>, %313, %cst_179 [1] : vector<9x9xf32> to vector<9xf32>
    %315 = vector.shape_cast %314 : vector<9xf32> to vector<9x1xf32>
    %316 = vector.broadcast %315 : vector<9x1xf32> to vector<9x9xf32>
    %317 = arith.subf %313, %316 : vector<9x9xf32>
    %318 = math.exp %317 : vector<9x9xf32>
    %cst_180 = arith.constant dense<0.000000e+00> : vector<9xf32>
    %319 = vector.multi_reduction <add>, %318, %cst_180 [1] : vector<9x9xf32> to vector<9xf32>
    %320 = vector.shape_cast %319 : vector<9xf32> to vector<9x1xf32>
    %321 = tpu.reciprocal %320 {approx = true} : vector<9x1xf32> -> vector<9x1xf32>
    %322 = vector.broadcast %321 : vector<9x1xf32> to vector<9x9xf32>
    %323 = arith.mulf %318, %322 : vector<9x9xf32>
    %324 = arith.truncf %323 : vector<9x9xf32> to vector<9x9xbf16>
    %325 = vector.extract_strided_slice %283 {offsets = [0, 16], sizes = [9, 16], strides = [1, 1]} : vector<9x64xbf16> to vector<9x16xbf16>
    %cst_181 = arith.constant dense<0.000000e+00> : vector<9x16xf32>
    %326 = tpu.matmul %324, %325, %cst_181 {dimension_numbers = #tpu.dot_dimension_numbers<[1], [0], [0], [1], [0, 0, 1, 1], [], []>} : vector<9x9xbf16>, vector<9x16xbf16>, vector<9x16xf32> -> vector<9x16xf32>
    %327 = arith.truncf %326 : vector<9x16xf32> to vector<9x16xbf16>
    %328 = vector.extract_strided_slice %285 {offsets = [16, 0], sizes = [16, 64], strides = [1, 1]} : vector<64x64xbf16> to vector<16x64xbf16>
    %cst_182 = arith.constant dense<0.000000e+00> : vector<9x64xf32>
    %329 = tpu.matmul %327, %328, %cst_182 {dimension_numbers = #tpu.dot_dimension_numbers<[1], [0], [0], [1], [0, 0, 1, 1], [], []>} : vector<9x16xbf16>, vector<16x64xbf16>, vector<9x64xf32> -> vector<9x64xf32>
    %330 = arith.addf %307, %329 : vector<9x64xf32>
    %331 = vector.extract_strided_slice %278 {offsets = [0, 32], sizes = [9, 16], strides = [1, 1]} : vector<9x64xf32> to vector<9x16xf32>
    %332 = arith.truncf %331 : vector<9x16xf32> to vector<9x16xbf16>
    %333 = vector.extract_strided_slice %281 {offsets = [32, 0], sizes = [16, 9], strides = [1, 1]} : vector<64x9xbf16> to vector<16x9xbf16>
    %cst_183 = arith.constant dense<0.000000e+00> : vector<9x9xf32>
    %334 = tpu.matmul %332, %333, %cst_183 {dimension_numbers = #tpu.dot_dimension_numbers<[1], [0], [0], [1], [0, 0, 1, 1], [], []>} : vector<9x16xbf16>, vector<16x9xbf16>, vector<9x9xf32> -> vector<9x9xf32>
    %cst_184 = arith.constant 2.500000e-01 : f32
    %335 = vector.broadcast %cst_184 : f32 to vector<9x9xf32>
    %336 = arith.mulf %334, %335 : vector<9x9xf32>
    %cst_185 = arith.constant dense<0xFF800000> : vector<9xf32>
    %337 = vector.multi_reduction <maximumf>, %336, %cst_185 [1] : vector<9x9xf32> to vector<9xf32>
    %338 = vector.shape_cast %337 : vector<9xf32> to vector<9x1xf32>
    %339 = vector.broadcast %338 : vector<9x1xf32> to vector<9x9xf32>
    %340 = arith.subf %336, %339 : vector<9x9xf32>
    %341 = math.exp %340 : vector<9x9xf32>
    %cst_186 = arith.constant dense<0.000000e+00> : vector<9xf32>
    %342 = vector.multi_reduction <add>, %341, %cst_186 [1] : vector<9x9xf32> to vector<9xf32>
    %343 = vector.shape_cast %342 : vector<9xf32> to vector<9x1xf32>
    %344 = tpu.reciprocal %343 {approx = true} : vector<9x1xf32> -> vector<9x1xf32>
    %345 = vector.broadcast %344 : vector<9x1xf32> to vector<9x9xf32>
    %346 = arith.mulf %341, %345 : vector<9x9xf32>
    %347 = arith.truncf %346 : vector<9x9xf32> to vector<9x9xbf16>
    %348 = vector.extract_strided_slice %283 {offsets = [0, 32], sizes = [9, 16], strides = [1, 1]} : vector<9x64xbf16> to vector<9x16xbf16>
    %cst_187 = arith.constant dense<0.000000e+00> : vector<9x16xf32>
    %349 = tpu.matmul %347, %348, %cst_187 {dimension_numbers = #tpu.dot_dimension_numbers<[1], [0], [0], [1], [0, 0, 1, 1], [], []>} : vector<9x9xbf16>, vector<9x16xbf16>, vector<9x16xf32> -> vector<9x16xf32>
    %350 = arith.truncf %349 : vector<9x16xf32> to vector<9x16xbf16>
    %351 = vector.extract_strided_slice %285 {offsets = [32, 0], sizes = [16, 64], strides = [1, 1]} : vector<64x64xbf16> to vector<16x64xbf16>
    %cst_188 = arith.constant dense<0.000000e+00> : vector<9x64xf32>
    %352 = tpu.matmul %350, %351, %cst_188 {dimension_numbers = #tpu.dot_dimension_numbers<[1], [0], [0], [1], [0, 0, 1, 1], [], []>} : vector<9x16xbf16>, vector<16x64xbf16>, vector<9x64xf32> -> vector<9x64xf32>
    %353 = arith.addf %330, %352 : vector<9x64xf32>
    %354 = vector.extract_strided_slice %278 {offsets = [0, 48], sizes = [9, 16], strides = [1, 1]} : vector<9x64xf32> to vector<9x16xf32>
    %355 = arith.truncf %354 : vector<9x16xf32> to vector<9x16xbf16>
    %356 = vector.extract_strided_slice %281 {offsets = [48, 0], sizes = [16, 9], strides = [1, 1]} : vector<64x9xbf16> to vector<16x9xbf16>
    %cst_189 = arith.constant dense<0.000000e+00> : vector<9x9xf32>
    %357 = tpu.matmul %355, %356, %cst_189 {dimension_numbers = #tpu.dot_dimension_numbers<[1], [0], [0], [1], [0, 0, 1, 1], [], []>} : vector<9x16xbf16>, vector<16x9xbf16>, vector<9x9xf32> -> vector<9x9xf32>
    %cst_190 = arith.constant 2.500000e-01 : f32
    %358 = vector.broadcast %cst_190 : f32 to vector<9x9xf32>
    %359 = arith.mulf %357, %358 : vector<9x9xf32>
    %cst_191 = arith.constant dense<0xFF800000> : vector<9xf32>
    %360 = vector.multi_reduction <maximumf>, %359, %cst_191 [1] : vector<9x9xf32> to vector<9xf32>
    %361 = vector.shape_cast %360 : vector<9xf32> to vector<9x1xf32>
    %362 = vector.broadcast %361 : vector<9x1xf32> to vector<9x9xf32>
    %363 = arith.subf %359, %362 : vector<9x9xf32>
    %364 = math.exp %363 : vector<9x9xf32>
    %cst_192 = arith.constant dense<0.000000e+00> : vector<9xf32>
    %365 = vector.multi_reduction <add>, %364, %cst_192 [1] : vector<9x9xf32> to vector<9xf32>
    %366 = vector.shape_cast %365 : vector<9xf32> to vector<9x1xf32>
    %367 = tpu.reciprocal %366 {approx = true} : vector<9x1xf32> -> vector<9x1xf32>
    %368 = vector.broadcast %367 : vector<9x1xf32> to vector<9x9xf32>
    %369 = arith.mulf %364, %368 : vector<9x9xf32>
    %370 = arith.truncf %369 : vector<9x9xf32> to vector<9x9xbf16>
    %371 = vector.extract_strided_slice %283 {offsets = [0, 48], sizes = [9, 16], strides = [1, 1]} : vector<9x64xbf16> to vector<9x16xbf16>
    %cst_193 = arith.constant dense<0.000000e+00> : vector<9x16xf32>
    %372 = tpu.matmul %370, %371, %cst_193 {dimension_numbers = #tpu.dot_dimension_numbers<[1], [0], [0], [1], [0, 0, 1, 1], [], []>} : vector<9x9xbf16>, vector<9x16xbf16>, vector<9x16xf32> -> vector<9x16xf32>
    %373 = arith.truncf %372 : vector<9x16xf32> to vector<9x16xbf16>
    %374 = vector.extract_strided_slice %285 {offsets = [48, 0], sizes = [16, 64], strides = [1, 1]} : vector<64x64xbf16> to vector<16x64xbf16>
    %cst_194 = arith.constant dense<0.000000e+00> : vector<9x64xf32>
    %375 = tpu.matmul %373, %374, %cst_194 {dimension_numbers = #tpu.dot_dimension_numbers<[1], [0], [0], [1], [0, 0, 1, 1], [], []>} : vector<9x16xbf16>, vector<16x64xbf16>, vector<9x64xf32> -> vector<9x64xf32>
    %376 = arith.addf %353, %375 : vector<9x64xf32>
    %377 = arith.addf %269, %376 : vector<9x64xf32>
    %c0_195 = arith.constant 0 : index
    %c0_196 = arith.constant 0 : index
    %c0_197 = arith.constant 0 : index
    %378 = vector.load %arg18[%c0_195, %c0_196, %c0_197] : memref<2x1x64xf32, #tpu.memory_space<vmem>>, vector<1x1x64xf32>
    %379 = vector.shape_cast %378 : vector<1x1x64xf32> to vector<1x64xf32>
    %380 = vector.broadcast %379 : vector<1x64xf32> to vector<9x64xf32>
    %381 = arith.addf %377, %380 : vector<9x64xf32>
    %c0_198 = arith.constant 0 : index
    %c0_199 = arith.constant 0 : index
    %c0_200 = arith.constant 0 : index
    %382 = vector.load %arg19[%c0_198, %c0_199, %c0_200] : memref<2x1x64xf32, #tpu.memory_space<vmem>>, vector<1x1x64xf32>
    %383 = vector.shape_cast %382 : vector<1x1x64xf32> to vector<1x64xf32>
    %c0_201 = arith.constant 0 : index
    %c0_202 = arith.constant 0 : index
    %c0_203 = arith.constant 0 : index
    %384 = vector.load %arg20[%c0_201, %c0_202, %c0_203] : memref<2x1x64xf32, #tpu.memory_space<vmem>>, vector<1x1x64xf32>
    %385 = vector.shape_cast %384 : vector<1x1x64xf32> to vector<1x64xf32>
    %cst_204 = arith.constant dense<0.000000e+00> : vector<9xf32>
    %386 = vector.multi_reduction <add>, %381, %cst_204 [1] : vector<9x64xf32> to vector<9xf32>
    %387 = vector.shape_cast %386 : vector<9xf32> to vector<9x1xf32>
    %cst_205 = arith.constant 6.400000e+01 : f32
    %388 = vector.broadcast %cst_205 : f32 to vector<9x1xf32>
    %389 = arith.divf %387, %388 : vector<9x1xf32>
    %390 = vector.broadcast %389 : vector<9x1xf32> to vector<9x64xf32>
    %391 = arith.subf %381, %390 : vector<9x64xf32>
    %392 = arith.mulf %391, %391 : vector<9x64xf32>
    %cst_206 = arith.constant dense<0.000000e+00> : vector<9xf32>
    %393 = vector.multi_reduction <add>, %392, %cst_206 [1] : vector<9x64xf32> to vector<9xf32>
    %394 = vector.shape_cast %393 : vector<9xf32> to vector<9x1xf32>
    %cst_207 = arith.constant 6.400000e+01 : f32
    %395 = vector.broadcast %cst_207 : f32 to vector<9x1xf32>
    %396 = arith.divf %394, %395 : vector<9x1xf32>
    %397 = vector.broadcast %389 : vector<9x1xf32> to vector<9x64xf32>
    %398 = arith.subf %381, %397 : vector<9x64xf32>
    %cst_208 = arith.constant 9.99999974E-6 : f32
    %399 = vector.broadcast %cst_208 : f32 to vector<9x1xf32>
    %400 = arith.addf %396, %399 : vector<9x1xf32>
    %401 = math.rsqrt %400 : vector<9x1xf32>
    %402 = vector.broadcast %401 : vector<9x1xf32> to vector<9x64xf32>
    %403 = arith.mulf %398, %402 : vector<9x64xf32>
    %404 = vector.broadcast %383 : vector<1x64xf32> to vector<9x64xf32>
    %405 = arith.mulf %403, %404 : vector<9x64xf32>
    %406 = vector.broadcast %385 : vector<1x64xf32> to vector<9x64xf32>
    %407 = arith.addf %405, %406 : vector<9x64xf32>
    %408 = arith.truncf %407 : vector<9x64xf32> to vector<9x64xbf16>
    %c0_209 = arith.constant 0 : index
    %c0_210 = arith.constant 0 : index
    %c0_211 = arith.constant 0 : index
    %409 = vector.load %arg21[%c0_209, %c0_210, %c0_211] : memref<2x64x128xbf16, #tpu.memory_space<vmem>>, vector<1x64x128xbf16>
    %410 = vector.shape_cast %409 : vector<1x64x128xbf16> to vector<64x128xbf16>
    %cst_212 = arith.constant dense<0.000000e+00> : vector<9x128xf32>
    %411 = tpu.matmul %408, %410, %cst_212 {dimension_numbers = #tpu.dot_dimension_numbers<[1], [0], [0], [1], [0, 0, 1, 1], [], []>} : vector<9x64xbf16>, vector<64x128xbf16>, vector<9x128xf32> -> vector<9x128xf32>
    %c0_213 = arith.constant 0 : index
    %c0_214 = arith.constant 0 : index
    %c0_215 = arith.constant 0 : index
    %412 = vector.load %arg22[%c0_213, %c0_214, %c0_215] : memref<2x1x128xf32, #tpu.memory_space<vmem>>, vector<1x1x128xf32>
    %413 = vector.shape_cast %412 : vector<1x1x128xf32> to vector<1x128xf32>
    %414 = vector.broadcast %413 : vector<1x128xf32> to vector<9x128xf32>
    %415 = arith.addf %411, %414 : vector<9x128xf32>
    %cst_216 = arith.constant 5.000000e-01 : f32
    %416 = vector.broadcast %cst_216 : f32 to vector<9x128xf32>
    %417 = arith.mulf %416, %415 : vector<9x128xf32>
    %cst_217 = arith.constant 0.707106769 : f32
    %418 = vector.broadcast %cst_217 : f32 to vector<9x128xf32>
    %419 = arith.mulf %415, %418 : vector<9x128xf32>
    %420 = math.erf %419 : vector<9x128xf32>
    %cst_218 = arith.constant 1.000000e+00 : f32
    %421 = vector.broadcast %cst_218 : f32 to vector<9x128xf32>
    %422 = arith.addf %421, %420 : vector<9x128xf32>
    %423 = arith.mulf %417, %422 : vector<9x128xf32>
    %424 = arith.truncf %423 : vector<9x128xf32> to vector<9x128xbf16>
    %c0_219 = arith.constant 0 : index
    %c0_220 = arith.constant 0 : index
    %c0_221 = arith.constant 0 : index
    %425 = vector.load %arg23[%c0_219, %c0_220, %c0_221] : memref<2x128x64xbf16, #tpu.memory_space<vmem>>, vector<1x128x64xbf16>
    %426 = vector.shape_cast %425 : vector<1x128x64xbf16> to vector<128x64xbf16>
    %cst_222 = arith.constant dense<0.000000e+00> : vector<9x64xf32>
    %427 = tpu.matmul %424, %426, %cst_222 {dimension_numbers = #tpu.dot_dimension_numbers<[1], [0], [0], [1], [0, 0, 1, 1], [], []>} : vector<9x128xbf16>, vector<128x64xbf16>, vector<9x64xf32> -> vector<9x64xf32>
    %c0_223 = arith.constant 0 : index
    %c0_224 = arith.constant 0 : index
    %c0_225 = arith.constant 0 : index
    %428 = vector.load %arg24[%c0_223, %c0_224, %c0_225] : memref<2x1x64xf32, #tpu.memory_space<vmem>>, vector<1x1x64xf32>
    %429 = vector.shape_cast %428 : vector<1x1x64xf32> to vector<1x64xf32>
    %430 = vector.broadcast %429 : vector<1x64xf32> to vector<9x64xf32>
    %431 = arith.addf %427, %430 : vector<9x64xf32>
    %432 = arith.addf %407, %431 : vector<9x64xf32>
    %c0_226 = arith.constant 0 : index
    %c0_227 = arith.constant 0 : index
    %c0_228 = arith.constant 0 : index
    %433 = vector.load %arg25[%c0_226, %c0_227, %c0_228] : memref<2x1x64xf32, #tpu.memory_space<vmem>>, vector<1x1x64xf32>
    %434 = vector.shape_cast %433 : vector<1x1x64xf32> to vector<1x64xf32>
    %c0_229 = arith.constant 0 : index
    %c0_230 = arith.constant 0 : index
    %c0_231 = arith.constant 0 : index
    %435 = vector.load %arg26[%c0_229, %c0_230, %c0_231] : memref<2x1x64xf32, #tpu.memory_space<vmem>>, vector<1x1x64xf32>
    %436 = vector.shape_cast %435 : vector<1x1x64xf32> to vector<1x64xf32>
    %cst_232 = arith.constant dense<0.000000e+00> : vector<9xf32>
    %437 = vector.multi_reduction <add>, %432, %cst_232 [1] : vector<9x64xf32> to vector<9xf32>
    %438 = vector.shape_cast %437 : vector<9xf32> to vector<9x1xf32>
    %cst_233 = arith.constant 6.400000e+01 : f32
    %439 = vector.broadcast %cst_233 : f32 to vector<9x1xf32>
    %440 = arith.divf %438, %439 : vector<9x1xf32>
    %441 = vector.broadcast %440 : vector<9x1xf32> to vector<9x64xf32>
    %442 = arith.subf %432, %441 : vector<9x64xf32>
    %443 = arith.mulf %442, %442 : vector<9x64xf32>
    %cst_234 = arith.constant dense<0.000000e+00> : vector<9xf32>
    %444 = vector.multi_reduction <add>, %443, %cst_234 [1] : vector<9x64xf32> to vector<9xf32>
    %445 = vector.shape_cast %444 : vector<9xf32> to vector<9x1xf32>
    %cst_235 = arith.constant 6.400000e+01 : f32
    %446 = vector.broadcast %cst_235 : f32 to vector<9x1xf32>
    %447 = arith.divf %445, %446 : vector<9x1xf32>
    %448 = vector.broadcast %440 : vector<9x1xf32> to vector<9x64xf32>
    %449 = arith.subf %432, %448 : vector<9x64xf32>
    %cst_236 = arith.constant 9.99999974E-6 : f32
    %450 = vector.broadcast %cst_236 : f32 to vector<9x1xf32>
    %451 = arith.addf %447, %450 : vector<9x1xf32>
    %452 = math.rsqrt %451 : vector<9x1xf32>
    %453 = vector.broadcast %452 : vector<9x1xf32> to vector<9x64xf32>
    %454 = arith.mulf %449, %453 : vector<9x64xf32>
    %455 = vector.broadcast %434 : vector<1x64xf32> to vector<9x64xf32>
    %456 = arith.mulf %454, %455 : vector<9x64xf32>
    %457 = vector.broadcast %436 : vector<1x64xf32> to vector<9x64xf32>
    %458 = arith.addf %456, %457 : vector<9x64xf32>
    %459 = arith.truncf %458 : vector<9x64xf32> to vector<9x64xbf16>
    %c1_237 = arith.constant 1 : index
    %c0_238 = arith.constant 0 : index
    %c0_239 = arith.constant 0 : index
    %460 = vector.load %arg15[%c1_237, %c0_238, %c0_239] : memref<2x64x192xbf16, #tpu.memory_space<vmem>>, vector<1x64x192xbf16>
    %461 = vector.shape_cast %460 : vector<1x64x192xbf16> to vector<64x192xbf16>
    %cst_240 = arith.constant dense<0.000000e+00> : vector<9x192xf32>
    %462 = tpu.matmul %459, %461, %cst_240 {dimension_numbers = #tpu.dot_dimension_numbers<[1], [0], [0], [1], [0, 0, 1, 1], [], []>} : vector<9x64xbf16>, vector<64x192xbf16>, vector<9x192xf32> -> vector<9x192xf32>
    %c1_241 = arith.constant 1 : index
    %c0_242 = arith.constant 0 : index
    %c0_243 = arith.constant 0 : index
    %463 = vector.load %arg16[%c1_241, %c0_242, %c0_243] : memref<2x1x192xf32, #tpu.memory_space<vmem>>, vector<1x1x192xf32>
    %464 = vector.shape_cast %463 : vector<1x1x192xf32> to vector<1x192xf32>
    %465 = vector.broadcast %464 : vector<1x192xf32> to vector<9x192xf32>
    %466 = arith.addf %462, %465 : vector<9x192xf32>
    %467 = vector.extract_strided_slice %466 {offsets = [0, 0], sizes = [9, 64], strides = [1, 1]} : vector<9x192xf32> to vector<9x64xf32>
    %468 = vector.extract_strided_slice %466 {offsets = [0, 64], sizes = [9, 64], strides = [1, 1]} : vector<9x192xf32> to vector<9x64xf32>
    %469 = tpu.transpose %468, [1, 0] : vector<9x64xf32> -> vector<64x9xf32>
    %470 = arith.truncf %469 : vector<64x9xf32> to vector<64x9xbf16>
    %471 = vector.extract_strided_slice %466 {offsets = [0, 128], sizes = [9, 64], strides = [1, 1]} : vector<9x192xf32> to vector<9x64xf32>
    %472 = arith.truncf %471 : vector<9x64xf32> to vector<9x64xbf16>
    %c1_244 = arith.constant 1 : index
    %c0_245 = arith.constant 0 : index
    %c0_246 = arith.constant 0 : index
    %473 = vector.load %arg17[%c1_244, %c0_245, %c0_246] : memref<2x64x64xbf16, #tpu.memory_space<vmem>>, vector<1x64x64xbf16>
    %474 = vector.shape_cast %473 : vector<1x64x64xbf16> to vector<64x64xbf16>
    %475 = vector.extract_strided_slice %467 {offsets = [0, 0], sizes = [9, 16], strides = [1, 1]} : vector<9x64xf32> to vector<9x16xf32>
    %476 = arith.truncf %475 : vector<9x16xf32> to vector<9x16xbf16>
    %477 = vector.extract_strided_slice %470 {offsets = [0, 0], sizes = [16, 9], strides = [1, 1]} : vector<64x9xbf16> to vector<16x9xbf16>
    %cst_247 = arith.constant dense<0.000000e+00> : vector<9x9xf32>
    %478 = tpu.matmul %476, %477, %cst_247 {dimension_numbers = #tpu.dot_dimension_numbers<[1], [0], [0], [1], [0, 0, 1, 1], [], []>} : vector<9x16xbf16>, vector<16x9xbf16>, vector<9x9xf32> -> vector<9x9xf32>
    %cst_248 = arith.constant 2.500000e-01 : f32
    %479 = vector.broadcast %cst_248 : f32 to vector<9x9xf32>
    %480 = arith.mulf %478, %479 : vector<9x9xf32>
    %cst_249 = arith.constant dense<0xFF800000> : vector<9xf32>
    %481 = vector.multi_reduction <maximumf>, %480, %cst_249 [1] : vector<9x9xf32> to vector<9xf32>
    %482 = vector.shape_cast %481 : vector<9xf32> to vector<9x1xf32>
    %483 = vector.broadcast %482 : vector<9x1xf32> to vector<9x9xf32>
    %484 = arith.subf %480, %483 : vector<9x9xf32>
    %485 = math.exp %484 : vector<9x9xf32>
    %cst_250 = arith.constant dense<0.000000e+00> : vector<9xf32>
    %486 = vector.multi_reduction <add>, %485, %cst_250 [1] : vector<9x9xf32> to vector<9xf32>
    %487 = vector.shape_cast %486 : vector<9xf32> to vector<9x1xf32>
    %488 = tpu.reciprocal %487 {approx = true} : vector<9x1xf32> -> vector<9x1xf32>
    %489 = vector.broadcast %488 : vector<9x1xf32> to vector<9x9xf32>
    %490 = arith.mulf %485, %489 : vector<9x9xf32>
    %491 = arith.truncf %490 : vector<9x9xf32> to vector<9x9xbf16>
    %492 = vector.extract_strided_slice %472 {offsets = [0, 0], sizes = [9, 16], strides = [1, 1]} : vector<9x64xbf16> to vector<9x16xbf16>
    %cst_251 = arith.constant dense<0.000000e+00> : vector<9x16xf32>
    %493 = tpu.matmul %491, %492, %cst_251 {dimension_numbers = #tpu.dot_dimension_numbers<[1], [0], [0], [1], [0, 0, 1, 1], [], []>} : vector<9x9xbf16>, vector<9x16xbf16>, vector<9x16xf32> -> vector<9x16xf32>
    %494 = arith.truncf %493 : vector<9x16xf32> to vector<9x16xbf16>
    %495 = vector.extract_strided_slice %474 {offsets = [0, 0], sizes = [16, 64], strides = [1, 1]} : vector<64x64xbf16> to vector<16x64xbf16>
    %cst_252 = arith.constant dense<0.000000e+00> : vector<9x64xf32>
    %496 = tpu.matmul %494, %495, %cst_252 {dimension_numbers = #tpu.dot_dimension_numbers<[1], [0], [0], [1], [0, 0, 1, 1], [], []>} : vector<9x16xbf16>, vector<16x64xbf16>, vector<9x64xf32> -> vector<9x64xf32>
    %497 = vector.extract_strided_slice %467 {offsets = [0, 16], sizes = [9, 16], strides = [1, 1]} : vector<9x64xf32> to vector<9x16xf32>
    %498 = arith.truncf %497 : vector<9x16xf32> to vector<9x16xbf16>
    %499 = vector.extract_strided_slice %470 {offsets = [16, 0], sizes = [16, 9], strides = [1, 1]} : vector<64x9xbf16> to vector<16x9xbf16>
    %cst_253 = arith.constant dense<0.000000e+00> : vector<9x9xf32>
    %500 = tpu.matmul %498, %499, %cst_253 {dimension_numbers = #tpu.dot_dimension_numbers<[1], [0], [0], [1], [0, 0, 1, 1], [], []>} : vector<9x16xbf16>, vector<16x9xbf16>, vector<9x9xf32> -> vector<9x9xf32>
    %cst_254 = arith.constant 2.500000e-01 : f32
    %501 = vector.broadcast %cst_254 : f32 to vector<9x9xf32>
    %502 = arith.mulf %500, %501 : vector<9x9xf32>
    %cst_255 = arith.constant dense<0xFF800000> : vector<9xf32>
    %503 = vector.multi_reduction <maximumf>, %502, %cst_255 [1] : vector<9x9xf32> to vector<9xf32>
    %504 = vector.shape_cast %503 : vector<9xf32> to vector<9x1xf32>
    %505 = vector.broadcast %504 : vector<9x1xf32> to vector<9x9xf32>
    %506 = arith.subf %502, %505 : vector<9x9xf32>
    %507 = math.exp %506 : vector<9x9xf32>
    %cst_256 = arith.constant dense<0.000000e+00> : vector<9xf32>
    %508 = vector.multi_reduction <add>, %507, %cst_256 [1] : vector<9x9xf32> to vector<9xf32>
    %509 = vector.shape_cast %508 : vector<9xf32> to vector<9x1xf32>
    %510 = tpu.reciprocal %509 {approx = true} : vector<9x1xf32> -> vector<9x1xf32>
    %511 = vector.broadcast %510 : vector<9x1xf32> to vector<9x9xf32>
    %512 = arith.mulf %507, %511 : vector<9x9xf32>
    %513 = arith.truncf %512 : vector<9x9xf32> to vector<9x9xbf16>
    %514 = vector.extract_strided_slice %472 {offsets = [0, 16], sizes = [9, 16], strides = [1, 1]} : vector<9x64xbf16> to vector<9x16xbf16>
    %cst_257 = arith.constant dense<0.000000e+00> : vector<9x16xf32>
    %515 = tpu.matmul %513, %514, %cst_257 {dimension_numbers = #tpu.dot_dimension_numbers<[1], [0], [0], [1], [0, 0, 1, 1], [], []>} : vector<9x9xbf16>, vector<9x16xbf16>, vector<9x16xf32> -> vector<9x16xf32>
    %516 = arith.truncf %515 : vector<9x16xf32> to vector<9x16xbf16>
    %517 = vector.extract_strided_slice %474 {offsets = [16, 0], sizes = [16, 64], strides = [1, 1]} : vector<64x64xbf16> to vector<16x64xbf16>
    %cst_258 = arith.constant dense<0.000000e+00> : vector<9x64xf32>
    %518 = tpu.matmul %516, %517, %cst_258 {dimension_numbers = #tpu.dot_dimension_numbers<[1], [0], [0], [1], [0, 0, 1, 1], [], []>} : vector<9x16xbf16>, vector<16x64xbf16>, vector<9x64xf32> -> vector<9x64xf32>
    %519 = arith.addf %496, %518 : vector<9x64xf32>
    %520 = vector.extract_strided_slice %467 {offsets = [0, 32], sizes = [9, 16], strides = [1, 1]} : vector<9x64xf32> to vector<9x16xf32>
    %521 = arith.truncf %520 : vector<9x16xf32> to vector<9x16xbf16>
    %522 = vector.extract_strided_slice %470 {offsets = [32, 0], sizes = [16, 9], strides = [1, 1]} : vector<64x9xbf16> to vector<16x9xbf16>
    %cst_259 = arith.constant dense<0.000000e+00> : vector<9x9xf32>
    %523 = tpu.matmul %521, %522, %cst_259 {dimension_numbers = #tpu.dot_dimension_numbers<[1], [0], [0], [1], [0, 0, 1, 1], [], []>} : vector<9x16xbf16>, vector<16x9xbf16>, vector<9x9xf32> -> vector<9x9xf32>
    %cst_260 = arith.constant 2.500000e-01 : f32
    %524 = vector.broadcast %cst_260 : f32 to vector<9x9xf32>
    %525 = arith.mulf %523, %524 : vector<9x9xf32>
    %cst_261 = arith.constant dense<0xFF800000> : vector<9xf32>
    %526 = vector.multi_reduction <maximumf>, %525, %cst_261 [1] : vector<9x9xf32> to vector<9xf32>
    %527 = vector.shape_cast %526 : vector<9xf32> to vector<9x1xf32>
    %528 = vector.broadcast %527 : vector<9x1xf32> to vector<9x9xf32>
    %529 = arith.subf %525, %528 : vector<9x9xf32>
    %530 = math.exp %529 : vector<9x9xf32>
    %cst_262 = arith.constant dense<0.000000e+00> : vector<9xf32>
    %531 = vector.multi_reduction <add>, %530, %cst_262 [1] : vector<9x9xf32> to vector<9xf32>
    %532 = vector.shape_cast %531 : vector<9xf32> to vector<9x1xf32>
    %533 = tpu.reciprocal %532 {approx = true} : vector<9x1xf32> -> vector<9x1xf32>
    %534 = vector.broadcast %533 : vector<9x1xf32> to vector<9x9xf32>
    %535 = arith.mulf %530, %534 : vector<9x9xf32>
    %536 = arith.truncf %535 : vector<9x9xf32> to vector<9x9xbf16>
    %537 = vector.extract_strided_slice %472 {offsets = [0, 32], sizes = [9, 16], strides = [1, 1]} : vector<9x64xbf16> to vector<9x16xbf16>
    %cst_263 = arith.constant dense<0.000000e+00> : vector<9x16xf32>
    %538 = tpu.matmul %536, %537, %cst_263 {dimension_numbers = #tpu.dot_dimension_numbers<[1], [0], [0], [1], [0, 0, 1, 1], [], []>} : vector<9x9xbf16>, vector<9x16xbf16>, vector<9x16xf32> -> vector<9x16xf32>
    %539 = arith.truncf %538 : vector<9x16xf32> to vector<9x16xbf16>
    %540 = vector.extract_strided_slice %474 {offsets = [32, 0], sizes = [16, 64], strides = [1, 1]} : vector<64x64xbf16> to vector<16x64xbf16>
    %cst_264 = arith.constant dense<0.000000e+00> : vector<9x64xf32>
    %541 = tpu.matmul %539, %540, %cst_264 {dimension_numbers = #tpu.dot_dimension_numbers<[1], [0], [0], [1], [0, 0, 1, 1], [], []>} : vector<9x16xbf16>, vector<16x64xbf16>, vector<9x64xf32> -> vector<9x64xf32>
    %542 = arith.addf %519, %541 : vector<9x64xf32>
    %543 = vector.extract_strided_slice %467 {offsets = [0, 48], sizes = [9, 16], strides = [1, 1]} : vector<9x64xf32> to vector<9x16xf32>
    %544 = arith.truncf %543 : vector<9x16xf32> to vector<9x16xbf16>
    %545 = vector.extract_strided_slice %470 {offsets = [48, 0], sizes = [16, 9], strides = [1, 1]} : vector<64x9xbf16> to vector<16x9xbf16>
    %cst_265 = arith.constant dense<0.000000e+00> : vector<9x9xf32>
    %546 = tpu.matmul %544, %545, %cst_265 {dimension_numbers = #tpu.dot_dimension_numbers<[1], [0], [0], [1], [0, 0, 1, 1], [], []>} : vector<9x16xbf16>, vector<16x9xbf16>, vector<9x9xf32> -> vector<9x9xf32>
    %cst_266 = arith.constant 2.500000e-01 : f32
    %547 = vector.broadcast %cst_266 : f32 to vector<9x9xf32>
    %548 = arith.mulf %546, %547 : vector<9x9xf32>
    %cst_267 = arith.constant dense<0xFF800000> : vector<9xf32>
    %549 = vector.multi_reduction <maximumf>, %548, %cst_267 [1] : vector<9x9xf32> to vector<9xf32>
    %550 = vector.shape_cast %549 : vector<9xf32> to vector<9x1xf32>
    %551 = vector.broadcast %550 : vector<9x1xf32> to vector<9x9xf32>
    %552 = arith.subf %548, %551 : vector<9x9xf32>
    %553 = math.exp %552 : vector<9x9xf32>
    %cst_268 = arith.constant dense<0.000000e+00> : vector<9xf32>
    %554 = vector.multi_reduction <add>, %553, %cst_268 [1] : vector<9x9xf32> to vector<9xf32>
    %555 = vector.shape_cast %554 : vector<9xf32> to vector<9x1xf32>
    %556 = tpu.reciprocal %555 {approx = true} : vector<9x1xf32> -> vector<9x1xf32>
    %557 = vector.broadcast %556 : vector<9x1xf32> to vector<9x9xf32>
    %558 = arith.mulf %553, %557 : vector<9x9xf32>
    %559 = arith.truncf %558 : vector<9x9xf32> to vector<9x9xbf16>
    %560 = vector.extract_strided_slice %472 {offsets = [0, 48], sizes = [9, 16], strides = [1, 1]} : vector<9x64xbf16> to vector<9x16xbf16>
    %cst_269 = arith.constant dense<0.000000e+00> : vector<9x16xf32>
    %561 = tpu.matmul %559, %560, %cst_269 {dimension_numbers = #tpu.dot_dimension_numbers<[1], [0], [0], [1], [0, 0, 1, 1], [], []>} : vector<9x9xbf16>, vector<9x16xbf16>, vector<9x16xf32> -> vector<9x16xf32>
    %562 = arith.truncf %561 : vector<9x16xf32> to vector<9x16xbf16>
    %563 = vector.extract_strided_slice %474 {offsets = [48, 0], sizes = [16, 64], strides = [1, 1]} : vector<64x64xbf16> to vector<16x64xbf16>
    %cst_270 = arith.constant dense<0.000000e+00> : vector<9x64xf32>
    %564 = tpu.matmul %562, %563, %cst_270 {dimension_numbers = #tpu.dot_dimension_numbers<[1], [0], [0], [1], [0, 0, 1, 1], [], []>} : vector<9x16xbf16>, vector<16x64xbf16>, vector<9x64xf32> -> vector<9x64xf32>
    %565 = arith.addf %542, %564 : vector<9x64xf32>
    %566 = arith.addf %458, %565 : vector<9x64xf32>
    %c1_271 = arith.constant 1 : index
    %c0_272 = arith.constant 0 : index
    %c0_273 = arith.constant 0 : index
    %567 = vector.load %arg18[%c1_271, %c0_272, %c0_273] : memref<2x1x64xf32, #tpu.memory_space<vmem>>, vector<1x1x64xf32>
    %568 = vector.shape_cast %567 : vector<1x1x64xf32> to vector<1x64xf32>
    %569 = vector.broadcast %568 : vector<1x64xf32> to vector<9x64xf32>
    %570 = arith.addf %566, %569 : vector<9x64xf32>
    %c1_274 = arith.constant 1 : index
    %c0_275 = arith.constant 0 : index
    %c0_276 = arith.constant 0 : index
    %571 = vector.load %arg19[%c1_274, %c0_275, %c0_276] : memref<2x1x64xf32, #tpu.memory_space<vmem>>, vector<1x1x64xf32>
    %572 = vector.shape_cast %571 : vector<1x1x64xf32> to vector<1x64xf32>
    %c1_277 = arith.constant 1 : index
    %c0_278 = arith.constant 0 : index
    %c0_279 = arith.constant 0 : index
    %573 = vector.load %arg20[%c1_277, %c0_278, %c0_279] : memref<2x1x64xf32, #tpu.memory_space<vmem>>, vector<1x1x64xf32>
    %574 = vector.shape_cast %573 : vector<1x1x64xf32> to vector<1x64xf32>
    %cst_280 = arith.constant dense<0.000000e+00> : vector<9xf32>
    %575 = vector.multi_reduction <add>, %570, %cst_280 [1] : vector<9x64xf32> to vector<9xf32>
    %576 = vector.shape_cast %575 : vector<9xf32> to vector<9x1xf32>
    %cst_281 = arith.constant 6.400000e+01 : f32
    %577 = vector.broadcast %cst_281 : f32 to vector<9x1xf32>
    %578 = arith.divf %576, %577 : vector<9x1xf32>
    %579 = vector.broadcast %578 : vector<9x1xf32> to vector<9x64xf32>
    %580 = arith.subf %570, %579 : vector<9x64xf32>
    %581 = arith.mulf %580, %580 : vector<9x64xf32>
    %cst_282 = arith.constant dense<0.000000e+00> : vector<9xf32>
    %582 = vector.multi_reduction <add>, %581, %cst_282 [1] : vector<9x64xf32> to vector<9xf32>
    %583 = vector.shape_cast %582 : vector<9xf32> to vector<9x1xf32>
    %cst_283 = arith.constant 6.400000e+01 : f32
    %584 = vector.broadcast %cst_283 : f32 to vector<9x1xf32>
    %585 = arith.divf %583, %584 : vector<9x1xf32>
    %586 = vector.broadcast %578 : vector<9x1xf32> to vector<9x64xf32>
    %587 = arith.subf %570, %586 : vector<9x64xf32>
    %cst_284 = arith.constant 9.99999974E-6 : f32
    %588 = vector.broadcast %cst_284 : f32 to vector<9x1xf32>
    %589 = arith.addf %585, %588 : vector<9x1xf32>
    %590 = math.rsqrt %589 : vector<9x1xf32>
    %591 = vector.broadcast %590 : vector<9x1xf32> to vector<9x64xf32>
    %592 = arith.mulf %587, %591 : vector<9x64xf32>
    %593 = vector.broadcast %572 : vector<1x64xf32> to vector<9x64xf32>
    %594 = arith.mulf %592, %593 : vector<9x64xf32>
    %595 = vector.broadcast %574 : vector<1x64xf32> to vector<9x64xf32>
    %596 = arith.addf %594, %595 : vector<9x64xf32>
    %597 = arith.truncf %596 : vector<9x64xf32> to vector<9x64xbf16>
    %c1_285 = arith.constant 1 : index
    %c0_286 = arith.constant 0 : index
    %c0_287 = arith.constant 0 : index
    %598 = vector.load %arg21[%c1_285, %c0_286, %c0_287] : memref<2x64x128xbf16, #tpu.memory_space<vmem>>, vector<1x64x128xbf16>
    %599 = vector.shape_cast %598 : vector<1x64x128xbf16> to vector<64x128xbf16>
    %cst_288 = arith.constant dense<0.000000e+00> : vector<9x128xf32>
    %600 = tpu.matmul %597, %599, %cst_288 {dimension_numbers = #tpu.dot_dimension_numbers<[1], [0], [0], [1], [0, 0, 1, 1], [], []>} : vector<9x64xbf16>, vector<64x128xbf16>, vector<9x128xf32> -> vector<9x128xf32>
    %c1_289 = arith.constant 1 : index
    %c0_290 = arith.constant 0 : index
    %c0_291 = arith.constant 0 : index
    %601 = vector.load %arg22[%c1_289, %c0_290, %c0_291] : memref<2x1x128xf32, #tpu.memory_space<vmem>>, vector<1x1x128xf32>
    %602 = vector.shape_cast %601 : vector<1x1x128xf32> to vector<1x128xf32>
    %603 = vector.broadcast %602 : vector<1x128xf32> to vector<9x128xf32>
    %604 = arith.addf %600, %603 : vector<9x128xf32>
    %cst_292 = arith.constant 5.000000e-01 : f32
    %605 = vector.broadcast %cst_292 : f32 to vector<9x128xf32>
    %606 = arith.mulf %605, %604 : vector<9x128xf32>
    %cst_293 = arith.constant 0.707106769 : f32
    %607 = vector.broadcast %cst_293 : f32 to vector<9x128xf32>
    %608 = arith.mulf %604, %607 : vector<9x128xf32>
    %609 = math.erf %608 : vector<9x128xf32>
    %cst_294 = arith.constant 1.000000e+00 : f32
    %610 = vector.broadcast %cst_294 : f32 to vector<9x128xf32>
    %611 = arith.addf %610, %609 : vector<9x128xf32>
    %612 = arith.mulf %606, %611 : vector<9x128xf32>
    %613 = arith.truncf %612 : vector<9x128xf32> to vector<9x128xbf16>
    %c1_295 = arith.constant 1 : index
    %c0_296 = arith.constant 0 : index
    %c0_297 = arith.constant 0 : index
    %614 = vector.load %arg23[%c1_295, %c0_296, %c0_297] : memref<2x128x64xbf16, #tpu.memory_space<vmem>>, vector<1x128x64xbf16>
    %615 = vector.shape_cast %614 : vector<1x128x64xbf16> to vector<128x64xbf16>
    %cst_298 = arith.constant dense<0.000000e+00> : vector<9x64xf32>
    %616 = tpu.matmul %613, %615, %cst_298 {dimension_numbers = #tpu.dot_dimension_numbers<[1], [0], [0], [1], [0, 0, 1, 1], [], []>} : vector<9x128xbf16>, vector<128x64xbf16>, vector<9x64xf32> -> vector<9x64xf32>
    %c1_299 = arith.constant 1 : index
    %c0_300 = arith.constant 0 : index
    %c0_301 = arith.constant 0 : index
    %617 = vector.load %arg24[%c1_299, %c0_300, %c0_301] : memref<2x1x64xf32, #tpu.memory_space<vmem>>, vector<1x1x64xf32>
    %618 = vector.shape_cast %617 : vector<1x1x64xf32> to vector<1x64xf32>
    %619 = vector.broadcast %618 : vector<1x64xf32> to vector<9x64xf32>
    %620 = arith.addf %616, %619 : vector<9x64xf32>
    %621 = arith.addf %596, %620 : vector<9x64xf32>
    %c1_302 = arith.constant 1 : index
    %c0_303 = arith.constant 0 : index
    %c0_304 = arith.constant 0 : index
    %622 = vector.load %arg25[%c1_302, %c0_303, %c0_304] : memref<2x1x64xf32, #tpu.memory_space<vmem>>, vector<1x1x64xf32>
    %623 = vector.shape_cast %622 : vector<1x1x64xf32> to vector<1x64xf32>
    %c1_305 = arith.constant 1 : index
    %c0_306 = arith.constant 0 : index
    %c0_307 = arith.constant 0 : index
    %624 = vector.load %arg26[%c1_305, %c0_306, %c0_307] : memref<2x1x64xf32, #tpu.memory_space<vmem>>, vector<1x1x64xf32>
    %625 = vector.shape_cast %624 : vector<1x1x64xf32> to vector<1x64xf32>
    %cst_308 = arith.constant dense<0.000000e+00> : vector<9xf32>
    %626 = vector.multi_reduction <add>, %621, %cst_308 [1] : vector<9x64xf32> to vector<9xf32>
    %627 = vector.shape_cast %626 : vector<9xf32> to vector<9x1xf32>
    %cst_309 = arith.constant 6.400000e+01 : f32
    %628 = vector.broadcast %cst_309 : f32 to vector<9x1xf32>
    %629 = arith.divf %627, %628 : vector<9x1xf32>
    %630 = vector.broadcast %629 : vector<9x1xf32> to vector<9x64xf32>
    %631 = arith.subf %621, %630 : vector<9x64xf32>
    %632 = arith.mulf %631, %631 : vector<9x64xf32>
    %cst_310 = arith.constant dense<0.000000e+00> : vector<9xf32>
    %633 = vector.multi_reduction <add>, %632, %cst_310 [1] : vector<9x64xf32> to vector<9xf32>
    %634 = vector.shape_cast %633 : vector<9xf32> to vector<9x1xf32>
    %cst_311 = arith.constant 6.400000e+01 : f32
    %635 = vector.broadcast %cst_311 : f32 to vector<9x1xf32>
    %636 = arith.divf %634, %635 : vector<9x1xf32>
    %637 = vector.broadcast %629 : vector<9x1xf32> to vector<9x64xf32>
    %638 = arith.subf %621, %637 : vector<9x64xf32>
    %cst_312 = arith.constant 9.99999974E-6 : f32
    %639 = vector.broadcast %cst_312 : f32 to vector<9x1xf32>
    %640 = arith.addf %636, %639 : vector<9x1xf32>
    %641 = math.rsqrt %640 : vector<9x1xf32>
    %642 = vector.broadcast %641 : vector<9x1xf32> to vector<9x64xf32>
    %643 = arith.mulf %638, %642 : vector<9x64xf32>
    %644 = vector.broadcast %623 : vector<1x64xf32> to vector<9x64xf32>
    %645 = arith.mulf %643, %644 : vector<9x64xf32>
    %646 = vector.broadcast %625 : vector<1x64xf32> to vector<9x64xf32>
    %647 = arith.addf %645, %646 : vector<9x64xf32>
    %cst_313 = arith.constant dense<0.000000e+00> : vector<64xf32>
    %648 = vector.multi_reduction <add>, %647, %cst_313 [0] : vector<9x64xf32> to vector<64xf32>
    %649 = vector.shape_cast %648 : vector<64xf32> to vector<1x64xf32>
    %cst_314 = arith.constant 9.000000e+00 : f32
    %650 = vector.broadcast %cst_314 : f32 to vector<1x64xf32>
    %651 = arith.divf %649, %650 : vector<1x64xf32>
    %c0_315 = arith.constant 0 : index
    %c0_316 = arith.constant 0 : index
    %652 = vector.load %arg27[%c0_315, %c0_316] : memref<64x8xf32, #tpu.memory_space<vmem>>, vector<64x8xf32>
    %cst_317 = arith.constant dense<0.000000e+00> : vector<1x8xf32>
    %653 = tpu.matmul %651, %652, %cst_317 {dimension_numbers = #tpu.dot_dimension_numbers<[1], [0], [0], [1], [0, 0, 1, 1], [], []>} : vector<1x64xf32>, vector<64x8xf32>, vector<1x8xf32> -> vector<1x8xf32>
    %c0_318 = arith.constant 0 : index
    %c0_319 = arith.constant 0 : index
    %654 = vector.load %arg28[%c0_318, %c0_319] : memref<1x8xf32, #tpu.memory_space<vmem>>, vector<1x8xf32>
    %655 = arith.addf %653, %654 : vector<1x8xf32>
    %c0_320 = arith.constant 0 : index
    %c0_321 = arith.constant 0 : index
    %c0_322 = arith.constant 0 : index
    %656 = vector.load %arg29[%c0_320, %c0_321, %c0_322] : memref<1x1x8xf32, #tpu.memory_space<vmem>>, vector<1x1x8xf32>
    %657 = vector.shape_cast %656 : vector<1x1x8xf32> to vector<1x8xf32>
    %658 = vector.shape_cast %655 : vector<1x8xf32> to vector<1x1x8xf32>
    tpu.vector_store %arg29[%c0_320, %c0_321, %c0_322], %658 {strides = array<i32>} : memref<1x1x8xf32, #tpu.memory_space<vmem>>, vector<1x1x8xf32>,
    return
  }
  func.func @transform_0(%arg0: i32) -> (i32, i32, i32) {
    %c0_i32 = arith.constant 0 : i32
    %c0_i32_0 = arith.constant 0 : i32
    %c0_i32_1 = arith.constant 0 : i32
    return %arg0, %c0_i32, %c0_i32_0 : i32, i32, i32
  }
  func.func @transform_1(%arg0: i32) -> (i32, i32) {
    %c0_i32 = arith.constant 0 : i32
    %c0_i32_0 = arith.constant 0 : i32
    %c0_i32_1 = arith.constant 0 : i32
    return %c0_i32, %c0_i32_0 : i32, i32
  }
  func.func @transform_2(%arg0: i32) -> (i32, i32, i32) {
    %c0_i32 = arith.constant 0 : i32
    %c0_i32_0 = arith.constant 0 : i32
    %c0_i32_1 = arith.constant 0 : i32
    %c0_i32_2 = arith.constant 0 : i32
    return %c0_i32, %c0_i32_0, %c0_i32_1 : i32, i32, i32
  }
  func.func @transform_3(%arg0: i32) -> (i32, i32, i32) {
    %c0_i32 = arith.constant 0 : i32
    %c0_i32_0 = arith.constant 0 : i32
    %c0_i32_1 = arith.constant 0 : i32
    %c0_i32_2 = arith.constant 0 : i32
    return %c0_i32, %c0_i32_0, %c0_i32_1 : i32, i32, i32
  }
  func.func @transform_4(%arg0: i32) -> (i32, i32) {
    %c0_i32 = arith.constant 0 : i32
    %c0_i32_0 = arith.constant 0 : i32
    %c0_i32_1 = arith.constant 0 : i32
    return %c0_i32, %c0_i32_0 : i32, i32
  }
  func.func @transform_5(%arg0: i32) -> (i32, i32) {
    %c0_i32 = arith.constant 0 : i32
    %c0_i32_0 = arith.constant 0 : i32
    %c0_i32_1 = arith.constant 0 : i32
    return %c0_i32, %c0_i32_0 : i32, i32
  }
  func.func @transform_6(%arg0: i32) -> (i32, i32) {
    %c0_i32 = arith.constant 0 : i32
    %c0_i32_0 = arith.constant 0 : i32
    %c0_i32_1 = arith.constant 0 : i32
    return %c0_i32, %c0_i32_0 : i32, i32
  }
  func.func @transform_7(%arg0: i32) -> (i32, i32) {
    %c0_i32 = arith.constant 0 : i32
    %c0_i32_0 = arith.constant 0 : i32
    %c0_i32_1 = arith.constant 0 : i32
    return %c0_i32, %c0_i32_0 : i32, i32
  }
  func.func @transform_8(%arg0: i32) -> (i32, i32) {
    %c0_i32 = arith.constant 0 : i32
    %c0_i32_0 = arith.constant 0 : i32
    %c0_i32_1 = arith.constant 0 : i32
    return %c0_i32, %c0_i32_0 : i32, i32
  }
  func.func @transform_9(%arg0: i32) -> (i32, i32) {
    %c0_i32 = arith.constant 0 : i32
    %c0_i32_0 = arith.constant 0 : i32
    %c0_i32_1 = arith.constant 0 : i32
    return %c0_i32, %c0_i32_0 : i32, i32
  }
  func.func @transform_10(%arg0: i32) -> (i32, i32) {
    %c0_i32 = arith.constant 0 : i32
    %c0_i32_0 = arith.constant 0 : i32
    %c0_i32_1 = arith.constant 0 : i32
    return %c0_i32, %c0_i32_0 : i32, i32
  }
  func.func @transform_11(%arg0: i32) -> (i32, i32) {
    %c0_i32 = arith.constant 0 : i32
    %c0_i32_0 = arith.constant 0 : i32
    %c0_i32_1 = arith.constant 0 : i32
    return %c0_i32, %c0_i32_0 : i32, i32
  }
  func.func @transform_12(%arg0: i32) -> (i32, i32) {
    %c0_i32 = arith.constant 0 : i32
    %c0_i32_0 = arith.constant 0 : i32
    %c0_i32_1 = arith.constant 0 : i32
    return %c0_i32, %c0_i32_0 : i32, i32
  }
  func.func @transform_13(%arg0: i32) -> (i32, i32) {
    %c0_i32 = arith.constant 0 : i32
    %c0_i32_0 = arith.constant 0 : i32
    %c0_i32_1 = arith.constant 0 : i32
    return %c0_i32, %c0_i32_0 : i32, i32
  }
  func.func @transform_14(%arg0: i32) -> (i32, i32, i32) {
    %c0_i32 = arith.constant 0 : i32
    %c0_i32_0 = arith.constant 0 : i32
    %c0_i32_1 = arith.constant 0 : i32
    %c0_i32_2 = arith.constant 0 : i32
    return %c0_i32, %c0_i32_0, %c0_i32_1 : i32, i32, i32
  }
  func.func @transform_15(%arg0: i32) -> (i32, i32, i32) {
    %c0_i32 = arith.constant 0 : i32
    %c0_i32_0 = arith.constant 0 : i32
    %c0_i32_1 = arith.constant 0 : i32
    %c0_i32_2 = arith.constant 0 : i32
    return %c0_i32, %c0_i32_0, %c0_i32_1 : i32, i32, i32
  }
  func.func @transform_16(%arg0: i32) -> (i32, i32, i32) {
    %c0_i32 = arith.constant 0 : i32
    %c0_i32_0 = arith.constant 0 : i32
    %c0_i32_1 = arith.constant 0 : i32
    %c0_i32_2 = arith.constant 0 : i32
    return %c0_i32, %c0_i32_0, %c0_i32_1 : i32, i32, i32
  }
  func.func @transform_17(%arg0: i32) -> (i32, i32, i32) {
    %c0_i32 = arith.constant 0 : i32
    %c0_i32_0 = arith.constant 0 : i32
    %c0_i32_1 = arith.constant 0 : i32
    %c0_i32_2 = arith.constant 0 : i32
    return %c0_i32, %c0_i32_0, %c0_i32_1 : i32, i32, i32
  }
  func.func @transform_18(%arg0: i32) -> (i32, i32, i32) {
    %c0_i32 = arith.constant 0 : i32
    %c0_i32_0 = arith.constant 0 : i32
    %c0_i32_1 = arith.constant 0 : i32
    %c0_i32_2 = arith.constant 0 : i32
    return %c0_i32, %c0_i32_0, %c0_i32_1 : i32, i32, i32
  }
  func.func @transform_19(%arg0: i32) -> (i32, i32, i32) {
    %c0_i32 = arith.constant 0 : i32
    %c0_i32_0 = arith.constant 0 : i32
    %c0_i32_1 = arith.constant 0 : i32
    %c0_i32_2 = arith.constant 0 : i32
    return %c0_i32, %c0_i32_0, %c0_i32_1 : i32, i32, i32
  }
  func.func @transform_20(%arg0: i32) -> (i32, i32, i32) {
    %c0_i32 = arith.constant 0 : i32
    %c0_i32_0 = arith.constant 0 : i32
    %c0_i32_1 = arith.constant 0 : i32
    %c0_i32_2 = arith.constant 0 : i32
    return %c0_i32, %c0_i32_0, %c0_i32_1 : i32, i32, i32
  }
  func.func @transform_21(%arg0: i32) -> (i32, i32, i32) {
    %c0_i32 = arith.constant 0 : i32
    %c0_i32_0 = arith.constant 0 : i32
    %c0_i32_1 = arith.constant 0 : i32
    %c0_i32_2 = arith.constant 0 : i32
    return %c0_i32, %c0_i32_0, %c0_i32_1 : i32, i32, i32
  }
  func.func @transform_22(%arg0: i32) -> (i32, i32, i32) {
    %c0_i32 = arith.constant 0 : i32
    %c0_i32_0 = arith.constant 0 : i32
    %c0_i32_1 = arith.constant 0 : i32
    %c0_i32_2 = arith.constant 0 : i32
    return %c0_i32, %c0_i32_0, %c0_i32_1 : i32, i32, i32
  }
  func.func @transform_23(%arg0: i32) -> (i32, i32, i32) {
    %c0_i32 = arith.constant 0 : i32
    %c0_i32_0 = arith.constant 0 : i32
    %c0_i32_1 = arith.constant 0 : i32
    %c0_i32_2 = arith.constant 0 : i32
    return %c0_i32, %c0_i32_0, %c0_i32_1 : i32, i32, i32
  }
  func.func @transform_24(%arg0: i32) -> (i32, i32, i32) {
    %c0_i32 = arith.constant 0 : i32
    %c0_i32_0 = arith.constant 0 : i32
    %c0_i32_1 = arith.constant 0 : i32
    %c0_i32_2 = arith.constant 0 : i32
    return %c0_i32, %c0_i32_0, %c0_i32_1 : i32, i32, i32
  }
  func.func @transform_25(%arg0: i32) -> (i32, i32, i32) {
    %c0_i32 = arith.constant 0 : i32
    %c0_i32_0 = arith.constant 0 : i32
    %c0_i32_1 = arith.constant 0 : i32
    %c0_i32_2 = arith.constant 0 : i32
    return %c0_i32, %c0_i32_0, %c0_i32_1 : i32, i32, i32
  }
  func.func @transform_26(%arg0: i32) -> (i32, i32) {
    %c0_i32 = arith.constant 0 : i32
    %c0_i32_0 = arith.constant 0 : i32
    %c0_i32_1 = arith.constant 0 : i32
    return %c0_i32, %c0_i32_0 : i32, i32
  }
  func.func @transform_27(%arg0: i32) -> (i32, i32) {
    %c0_i32 = arith.constant 0 : i32
    %c0_i32_0 = arith.constant 0 : i32
    %c0_i32_1 = arith.constant 0 : i32
    return %c0_i32, %c0_i32_0 : i32, i32
  }
  func.func @transform_28(%arg0: i32) -> (i32, i32, i32) {
    %c0_i32 = arith.constant 0 : i32
    %c0_i32_0 = arith.constant 0 : i32
    %c0_i32_1 = arith.constant 0 : i32
    return %arg0, %c0_i32, %c0_i32_0 : i32, i32, i32
  }
}

</mosaic_0001>

<bundles_post_ra>
// kernel: base_model_forward.1
= control target key start
LH: loop header
LB: loop body
LE: loop exit
PB: predicated region body
PF: predicated region fallthrough
CT: control target
= control target key end

     0   :  { %s16016_s0 = inlined_call_operand.vmem [shape: f32[2,640,5], index: 0, kind: input, shape index: {}]   ;;  %s16017_s1 = inlined_call_operand.vmem [shape: bf16[10,32], index: 1, kind: input, shape index: {}]   ;;  %s16018_s2 = inlined_call_operand.vmem [shape: bf16[4,96,32], index: 2, kind: input, shape index: {}]   ;;  %s16019_s3 = inlined_call_operand.vmem [shape: bf16[2,64,32], index: 3, kind: input, shape index: {}]   ;;  %s16020_s4 = inlined_call_operand.vmem [shape: f32[1,32], index: 4, kind: input, shape index: {}]   ;;  %s16021_s5 = inlined_call_operand.vmem [shape: f32[1,32], index: 5, kind: input, shape index: {}]   ;;  %s16022_s6 = inlined_call_operand.vmem [shape: f32[1,32], index: 6, kind: input, shape index: {}]   ;;  %s16023_s7 = inlined_call_operand.vmem [shape: f32[1,32], index: 7, kind: input, shape index: {}]   ;;  %s16024_s8 = inlined_call_operand.vmem [shape: bf16[32,64], index: 8, kind: input, shape index: {}]   ;;  %s16025_s9 = inlined_call_operand.vmem [shape: f32[1,64], index: 9, kind: input, shape index: {}]   ;;  %s16026_s10 = inlined_call_operand.vmem [shape: bf16[192,64], index: 10, kind: input, shape index: {}]   ;;  %s16027_s11 = inlined_call_operand.vmem [shape: f32[1,64], index: 11, kind: input, shape index: {}]   ;;  %s16028_s12 = inlined_call_operand.vmem [shape: f32[1,64], index: 12, kind: input, shape index: {}]   ;;  %s16029_s13 = inlined_call_operand.vmem [shape: f32[1,64], index: 13, kind: input, shape index: {}]   ;;  %s16030_s14 = inlined_call_operand.vmem [shape: bf16[2,64,192], index: 14, kind: input, shape index: {}]   ;;  %s16031_s15 = inlined_call_operand.vmem [shape: f32[2,1,192], index: 15, kind: input, shape index: {}]   ;;  %s16032_s16 = inlined_call_operand.vmem [shape: bf16[2,64,64], index: 16, kind: input, shape index: {}]   ;;  %s16033_s17 = inlined_call_operand.vmem [shape: f32[2,1,64], index: 17, kind: input, shape index: {}]   ;;  %s16034_s18 = inlined_call_operand.vmem [shape: f32[2,1,64], index: 18, kind: input, shape index: {}]   ;;  %s16035_s19 = inlined_call_operand.vmem [shape: f32[2,1,64], index: 19, kind: input, shape index: {}]   ;;  %s16036_s20 = inlined_call_operand.vmem [shape: bf16[2,64,128], index: 20, kind: input, shape index: {}]   ;;  %s16037_s21 = inlined_call_operand.vmem [shape: f32[2,1,128], index: 21, kind: input, shape index: {}]   ;;  %s16038_s22 = inlined_call_operand.vmem [shape: bf16[2,128,64], index: 22, kind: input, shape index: {}]   ;;  %s16039_s23 = inlined_call_operand.vmem [shape: f32[2,1,64], index: 23, kind: input, shape index: {}]   ;;  %s16040_s24 = inlined_call_operand.vmem [shape: f32[2,1,64], index: 24, kind: input, shape index: {}]   ;;  %s16041_s25 = inlined_call_operand.vmem [shape: f32[2,1,64], index: 25, kind: input, shape index: {}]   ;;  %s16042_s26 = inlined_call_operand.vmem [shape: f32[64,8], index: 26, kind: input, shape index: {}]   ;;  %s16043_s27 = inlined_call_operand.vmem [shape: f32[1,8], index: 27, kind: input, shape index: {}]   ;;  %s16044_s28 = inlined_call_operand.hbm [shape: f32[2,1,8], index: 28, kind: output, shape index: {}]  }
   0x1   :  { %16182 = sst [smem:[#allocation106_spill]] %s16016_s0 }
   0x2   :  { %16183 = sst [smem:[#allocation107_spill]] %s16017_s1 }
   0x3   :  { %16184 = sst [smem:[#allocation108_spill]] %s16018_s2 }
   0x4   :  { %16185 = sst [smem:[#allocation109_spill]] %s16019_s3 }
   0x5   :  { %16186 = sst [smem:[#allocation110_spill]] %s16020_s4 }
   0x6   :  { %16187 = sst [smem:[#allocation111_spill]] %s16021_s5 }
   0x7   :  { %16188 = sst [smem:[#allocation112_spill]] %s16022_s6 }
   0x8   :  { %16189 = sst [smem:[#allocation113_spill]] %s16023_s7 }
   0x9   :  { %16190 = sst [smem:[#allocation114_spill]] %s16024_s8 }
   0xa   :  { %16191 = sst [smem:[#allocation115_spill]] %s16025_s9 }
   0xb   :  { %16192 = sst [smem:[#allocation116_spill]] %s16026_s10 }
   0xc   :  { %16193 = sst [smem:[#allocation117_spill]] %s16027_s11 }
   0xd   :  { %16194 = sst [smem:[#allocation118_spill]] %s16028_s12 }
   0xe   :  { %16195 = sst [smem:[#allocation119_spill]] %s16029_s13 }
   0xf   :  { %16196 = sst [smem:[#allocation120_spill]] %s16030_s14 }
  0x10   :  { %33 = vsyncpa [#allocation6], 0 }
  0x11   :  { %35 = vsyncpa [#allocation6 + $0x1], 0  ;;  %s11765_s8 = smov 0   ;;  %s11767_s5 = smov 0  }
  0x12   :  { %s11769_s9 = smov 0   ;;  %s11771_s30 = smov 0  }
  0x13 LB: > { %16197 = sst [smem:[#allocation8_spill]] %s11605_s9  ;;  %s11786_s3 = sadd.s32 4294967295, %s11609_s30   ;;  %s11609_s30 = sphi %s11771_s30, %s16729_s30   ;;  %s11605_s9 = sphi %s11769_s9, %s16731_s9   ;;  %s11601_s5 = sphi %s11767_s5, %s16733_s5   ;;  %s11597_s8 = sphi %s11765_s8, %s16732_s8  }
  0x14   : > { %s9398_s6 = sadd.s32 4294967294, %s11609_s30   ;;  %s11790_s10 = sadd.s32 1, %s11609_s30  }
  0x15   : > { %16198 = sst [smem:[#allocation9_spill]] %s11790_s10  ;;  %s641_s0 = sadd.s32 1, %s11605_s9 }
  0x16   : > { %s638_s11 = ssub.s32 %s11609_s30, %s11790_s10  ;;  %p651_p0 = scmp.ne.s32.totalorder %s11605_s9, %s11601_s5 }
  0x17   : > { %p639_p1 = scmp.eq.s32.totalorder %s638_s11, 0  ;;  %p652_p2 = scmp.eq.s32.totalorder %s11786_s3, 1 }
  0x18   : > { %p657_p3 = scmp.ne.s32.totalorder %s11601_s5, %s11597_s8  ;;  %p658_p4 = scmp.eq.s32.totalorder %s9398_s6, 1 }
  0x19   : > { %s11801_s29 = scalar_select %p639_p1, %s11605_s9, %s641_s0  }
  0x1a   : > { %p11803_p5 = por %p652_p2, %p651_p0  ;;  %p11807_p6 = por %p658_p4, %p657_p3 }
  0x1b   : > { %16199 = sst [smem:[#allocation10_spill]] %s11801_s29  ;;  %p9401_p7 = scmp.ge.s32.totalorder %s11609_s30, 1 }
  0x1c   : > { %p765_p8 = scmp.lt.s32.totalorder %s11609_s30, 3 }
  0x1e   : > { %p766_p9 = pnand %p9401_p7, %p765_p8 }
  0x20   : > { %769 = sbr.rel (%p766_p9) target bundleno = 11023 (0x2b0f), region = 132 }
  0x25   : > { %s16202_s4 = sld [smem:[#allocation107_spill]]  ;;  %vm1220_vm0 = vcmask 1041408   ;;  %vm1221_vm1 = vcmask 1042432   ;;  %p838_p10 = scmp.lt.s32.totalorder %s11786_s3, 1  ;;  %v16051_v3 = vmov 65535   ;;  %vm1099_vm2 = vcmask 39936  }
  0x26   : > { %v1222_v4 = vsel %vm1220_vm0, 4294967295, %v16051_v3  ;;  %s16203_s0 = sld [smem:[#allocation106_spill]]  ;;  %vm2056_vm3 = vcmask 261120   ;;  %vm2214_vm4 = vcmask 260096   ;;  %vm11613_vm5 = vmmov 0   ;;  %s16728_s10 = smov 80  }
  0x27   : > { %v1223_v7 = vsel %vm1221_vm1, %v1222_v4, 0  ;;  %s839_s11 = scalar_select %p838_p10, %s11786_s3, 1  ;;  %vm6338_vm6 = vcmask 256000   ;;  %vm6478_vm7 = vcmask 253952   ;;  %vm6595_vm8 = vcmask 523264  }
  0x28   : > { %s16716_s29 = sld [smem:[#allocation112_spill]]  ;;  %vm6599_vm9 = vcmask 516096   ;;  %vm7142_vm10 = vcmask 1043456   ;;  %vm7143_vm11 = vcmask 1044480   ;;  %vm7067_vm12 = vcmask 130048   ;;  %s9845_s6 = sshll.u32 %s11786_s3, 4 }
  0x29   : > { %s10976_s12 = smul.u32 640, %s839_s11  ;;  %s16715_s11 = sld [smem:[#allocation114_spill]]  ;;  %vm7114_vm13 = vcmask 72704   ;;  %vm7118_vm14 = vcmask 65536   ;;  %vm9328_vm15 = vcmask 57344  }
  0x2a   : > { %s16717_s9 = sld [smem:[#allocation113_spill]]  ;;  %s11619_s3 = smov [#allocation5]  }
  0x2b   : > { %v1084_v0 = vld [vmem:[%s16202_s4] sm:$0xf]  ;;  %v1085_v1 = vld [vmem:[%s16202_s4 + $0x4] sm:$0x1]  ;;  %s16719_s1 = sld [smem:[#allocation115_spill]] }
  0x2c   : > { %v9403_v2 = vcombine.low %v1084_v0, %v1085_v1  ;;  %v1701_v8 = vand.u32 %v1223_v7, %v1084_v0  ;;  %s11825_s4 = scalar_lea.vmem %s16203_s0, %s10976_s12  ;;  %s16311_s12 = sld [smem:[#allocation110_spill]] }
  0x2d   : > { %v844_v12 = vld [vmem:[%s11825_s4] sm:$0xff]  ;;  %v845_v13 = vld [vmem:[%s11825_s4 + $0x8] sm:$0xff]  ;;  %v846_v14 = vld [vmem:[%s11825_s4 + $0x10] sm:$0xff]  ;;  %s16312_s0 = sld [smem:[#allocation111_spill]] }
  0x2e   : > { %v1092_v5 = vshrl.u32 %v9403_v2, 16  ;;  %v1095_v6 = vshll.u32 %v9403_v2, 16  ;;  %10267 = vmatprep.subr.bf16.mxu1 %v1701_v8  ;;  %v924_v15 = vpack.c.bf16 %v845_v13, %v844_v12  ;;  %v847_v17 = vld [vmem:[%s11825_s4 + $0x18] sm:$0xff]  ;;  %v964_v18 = vld [vmem:[%s11825_s4 + $0x1] sm:$0xff]  ;;  %v965_v19 = vld [vmem:[%s11825_s4 + $0x9] sm:$0xff]  ;;  %s16721_s14 = sld [smem:[#allocation120_spill]] }
  0x2f   : > { %10268 = vmatpush3.bf16.msra.mxu1 %v1701_v8  ;;  %v925_v20 = vpack.c.bf16 %v847_v17, %v846_v14  ;;  %v1044_v21 = vpack.c.bf16 %v965_v19, %v964_v18  ;;  %v966_v22 = vld [vmem:[%s11825_s4 + $0x11] sm:$0xff]  ;;  %v967_v23 = vld [vmem:[%s11825_s4 + $0x19] sm:$0xff]  ;;  %v849_v26 = vld [vmem:[%s11825_s4 + $0x28] sm:$0xff]  ;;  %s16723_s13 = sld [smem:[#allocation119_spill]] }
  0x30   : > { %v1094_v9 = vrot.slane %v1092_v5, 2  ;;  %v1097_v10 = vrot.slane %v1095_v6, 3  ;;  %v848_v24 = vld [vmem:[%s11825_s4 + $0x20] sm:$0xff]  ;;  %10269 = vmatprep.mubr.msk.bf16.mxu1 %vm1099_vm2, %v924_v15  ;;  %v1045_v25 = vpack.c.bf16 %v967_v23, %v966_v22  ;;  %v969_v29 = vld [vmem:[%s11825_s4 + $0x29] sm:$0xff]  ;;  %v851_v31 = vld [vmem:[%s11825_s4 + $0x38] sm:$0xff] }
  0x31   : > { %v926_v27 = vpack.c.bf16 %v849_v26, %v848_v24  ;;  %v968_v28 = vld [vmem:[%s11825_s4 + $0x21] sm:$0xff]  ;;  %10187 = vmatprep.mubr.msk.bf16.mxu0 %vm1099_vm2, %v1044_v21  ;;  %v850_v30 = vld [vmem:[%s11825_s4 + $0x30] sm:$0xff]  ;;  %v971_v37 = vld [vmem:[%s11825_s4 + $0x39] sm:$0xff] }
  0x32   : > { %v1098_v11 = vor.u32 %v1097_v10, %v1094_v9  ;;  %10270 = vmatmul.mubr.msk.bf16.vlgmr.msra.gmra.mxu1 %vm1099_vm2, %v925_v20  ;;  %v1046_v32 = vpack.c.bf16 %v969_v29, %v968_v28  ;;  %v852_v33 = vld [vmem:[%s11825_s4 + $0x40] sm:$0xff]  ;;  %v853_v34 = vld [vmem:[%s11825_s4 + $0x48] sm:$0xff]  ;;  %v927_v35 = vpack.c.bf16 %v851_v31, %v850_v30  ;;  %v970_v36 = vld [vmem:[%s11825_s4 + $0x31] sm:$0xff] }
  0x33   : > { %10273 = vmatprep.mubr.msk.bf16.mxu1 %vm1099_vm2, %v926_v27  ;;  %v928_v38 = vpack.c.bf16 %v853_v34, %v852_v33  ;;  %v972_v39 = vld [vmem:[%s11825_s4 + $0x41] sm:$0xff]  ;;  %v973_v40 = vld [vmem:[%s11825_s4 + $0x49] sm:$0xff]  ;;  %v1047_v41 = vpack.c.bf16 %v971_v37, %v970_v36  ;;  %v855_v44 = vld [vmem:[%s11825_s4 + $0x58] sm:$0xff] }
  0x34   : > { %v1225_v16 = vand.u32 %v1223_v7, %v1098_v11  ;;  %v1048_v42 = vpack.c.bf16 %v973_v40, %v972_v39  ;;  %v854_v43 = vld [vmem:[%s11825_s4 + $0x50] sm:$0xff]  ;;  %v856_v45 = vld [vmem:[%s11825_s4 + $0x60] sm:$0xff]  ;;  %v857_v46 = vld [vmem:[%s11825_s4 + $0x68] sm:$0xff] }
  0x35   : > { %v929_v47 = vpack.c.bf16 %v855_v44, %v854_v43  ;;  %v974_v48 = vld [vmem:[%s11825_s4 + $0x51] sm:$0xff]  ;;  %v975_v49 = vld [vmem:[%s11825_s4 + $0x59] sm:$0xff]  ;;  %v930_v50 = vpack.c.bf16 %v857_v46, %v856_v45  ;;  %v976_v51 = vld [vmem:[%s11825_s4 + $0x61] sm:$0xff] }
  0x36   : > { %10185 = vmatprep.subr.bf16.mxu0 %v1225_v16  ;;  %v977_v52 = vld [vmem:[%s11825_s4 + $0x69] sm:$0xff]  ;;  %v1049_v53 = vpack.c.bf16 %v975_v49, %v974_v48  ;;  %v859_v56 = vld [vmem:[%s11825_s4 + $0x78] sm:$0xff]  ;;  %v860_v57 = vld [vmem:[%s11825_s4 + $0x80] sm:$0xff] }
  0x37   : > { %10186 = vmatpush3.bf16.msra.mxu0 %v1225_v16  ;;  %v1050_v54 = vpack.c.bf16 %v977_v52, %v976_v51  ;;  %v858_v55 = vld [vmem:[%s11825_s4 + $0x70] sm:$0xff]  ;;  %v861_v58 = vld [vmem:[%s11825_s4 + $0x88] sm:$0xff]  ;;  %v979_v61 = vld [vmem:[%s11825_s4 + $0x79] sm:$0xff] }
  0x38   : > { %v931_v59 = vpack.c.bf16 %v859_v56, %v858_v55  ;;  %v978_v60 = vld [vmem:[%s11825_s4 + $0x71] sm:$0xff]  ;;  %v932_v62 = vpack.c.bf16 %v861_v58, %v860_v57  ;;  %v980_v63 = vld [vmem:[%s11825_s4 + $0x81] sm:$0xff]  ;;  %v981_v0 = vld [vmem:[%s11825_s4 + $0x89] sm:$0xff] }
  0x39   : > { %v1051_v1 = vpack.c.bf16 %v979_v61, %v978_v60  ;;  %v1052_v2 = vpack.c.bf16 %v981_v0, %v980_v63  ;;  %v862_v4 = vld [vmem:[%s11825_s4 + $0x90] sm:$0xff]  ;;  %v863_v5 = vld [vmem:[%s11825_s4 + $0x98] sm:$0xff]  ;;  %v864_v6 = vld [vmem:[%s11825_s4 + $0xa0] sm:$0xff] }
  0x3a   : > { %10188 = vmatmul.mubr.msk.bf16.vlgmr.msra.gmra.mxu0 %vm1099_vm2, %v1045_v25  ;;  %10274 = vmatmul.mubr.msk.bf16.gmra.mxu1 %vm1099_vm2, %v927_v35  ;;  %v865_v7 = vld [vmem:[%s11825_s4 + $0xa8] sm:$0xff]  ;;  %v933_v8 = vpack.c.bf16 %v863_v5, %v862_v4  ;;  %v982_v9 = vld [vmem:[%s11825_s4 + $0x91] sm:$0xff]  ;;  %v983_v10 = vld [vmem:[%s11825_s4 + $0x99] sm:$0xff] }
  0x3b   : > { %10191 = vmatprep.mubr.msk.bf16.mxu0 %vm1099_vm2, %v1046_v32  ;;  %10277 = vmatprep.mubr.msk.bf16.mxu1 %vm1099_vm2, %v928_v38  ;;  %v934_v11 = vpack.c.bf16 %v865_v7, %v864_v6  ;;  %v984_v12 = vld [vmem:[%s11825_s4 + $0xa1] sm:$0xff]  ;;  %v985_v13 = vld [vmem:[%s11825_s4 + $0xa9] sm:$0xff]  ;;  %v1053_v14 = vpack.c.bf16 %v983_v10, %v982_v9  ;;  %v867_v17 = vld [vmem:[%s11825_s4 + $0xb8] sm:$0xff] }
  0x3c   : > { %v1054_v15 = vpack.c.bf16 %v985_v13, %v984_v12  ;;  %v866_v16 = vld [vmem:[%s11825_s4 + $0xb0] sm:$0xff]  ;;  %v868_v18 = vld [vmem:[%s11825_s4 + $0xc0] sm:$0xff]  ;;  %v869_v19 = vld [vmem:[%s11825_s4 + $0xc8] sm:$0xff] }
  0x3d   : > { %v935_v20 = vpack.c.bf16 %v867_v17, %v866_v16  ;;  %v986_v21 = vld [vmem:[%s11825_s4 + $0xb1] sm:$0xff]  ;;  %v987_v22 = vld [vmem:[%s11825_s4 + $0xb9] sm:$0xff]  ;;  %v936_v23 = vpack.c.bf16 %v869_v19, %v868_v18  ;;  %v988_v24 = vld [vmem:[%s11825_s4 + $0xc1] sm:$0xff] }
  0x3e   : > { %v989_v25 = vld [vmem:[%s11825_s4 + $0xc9] sm:$0xff]  ;;  %v1055_v26 = vpack.c.bf16 %v987_v22, %v986_v21  ;;  %v871_v29 = vld [vmem:[%s11825_s4 + $0xd8] sm:$0xff]  ;;  %v872_v30 = vld [vmem:[%s11825_s4 + $0xe0] sm:$0xff] }
  0x3f   : > { %v1056_v27 = vpack.c.bf16 %v989_v25, %v988_v24  ;;  %v870_v28 = vld [vmem:[%s11825_s4 + $0xd0] sm:$0xff]  ;;  %v873_v31 = vld [vmem:[%s11825_s4 + $0xe8] sm:$0xff]  ;;  %v991_v34 = vld [vmem:[%s11825_s4 + $0xd9] sm:$0xff] }
  0x40   : > { %v937_v32 = vpack.c.bf16 %v871_v29, %v870_v28  ;;  %v990_v33 = vld [vmem:[%s11825_s4 + $0xd1] sm:$0xff]  ;;  %v938_v35 = vpack.c.bf16 %v873_v31, %v872_v30  ;;  %v992_v36 = vld [vmem:[%s11825_s4 + $0xe1] sm:$0xff]  ;;  %v993_v37 = vld [vmem:[%s11825_s4 + $0xe9] sm:$0xff] }
  0x41   : > { %v1057_v38 = vpack.c.bf16 %v991_v34, %v990_v33  ;;  %v874_v39 = vld [vmem:[%s11825_s4 + $0xf0] sm:$0xff]  ;;  %v875_v40 = vld [vmem:[%s11825_s4 + $0xf8] sm:$0xff]  ;;  %v877_v43 = vld [vmem:[%s11825_s4 + $0x108] sm:$0xff] }
  0x42   : > { %10192 = vmatmul.mubr.msk.bf16.gmra.mxu0 %vm1099_vm2, %v1047_v41  ;;  %10278 = vmatmul.mubr.msk.bf16.gmra.mxu1 %vm1099_vm2, %v929_v47  ;;  %v1058_v41 = vpack.c.bf16 %v993_v37, %v992_v36  ;;  %v994_v44 = vld [vmem:[%s11825_s4 + $0xf1] sm:$0xff]  ;;  %v995_v45 = vld [vmem:[%s11825_s4 + $0xf9] sm:$0xff]  ;;  %v996_v46 = vld [vmem:[%s11825_s4 + $0x101] sm:$0xff]  ;;  %v939_v48 = vpack.c.bf16 %v875_v40, %v874_v39 }
  0x43   : > { %10195 = vmatprep.mubr.msk.bf16.mxu0 %vm1099_vm2, %v1048_v42  ;;  %10281 = vmatprep.mubr.msk.bf16.mxu1 %vm1099_vm2, %v930_v50  ;;  %v876_v42 = vld [vmem:[%s11825_s4 + $0x100] sm:$0xff]  ;;  %v997_v47 = vld [vmem:[%s11825_s4 + $0x109] sm:$0xff]  ;;  %v1059_v50 = vpack.c.bf16 %v995_v45, %v994_v44  ;;  %v879_v52 = vld [vmem:[%s11825_s4 + $0x118] sm:$0xff] }
  0x44   : > { %v940_v49 = vpack.c.bf16 %v877_v43, %v876_v42  ;;  %v878_v51 = vld [vmem:[%s11825_s4 + $0x110] sm:$0xff]  ;;  %v881_v55 = vld [vmem:[%s11825_s4 + $0x128] sm:$0xff]  ;;  %v999_v57 = vld [vmem:[%s11825_s4 + $0x119] sm:$0xff] }
  0x45   : > { %v998_v56 = vld [vmem:[%s11825_s4 + $0x111] sm:$0xff]  ;;  %v1000_v58 = vld [vmem:[%s11825_s4 + $0x121] sm:$0xff]  ;;  %v941_v60 = vpack.c.bf16 %v879_v52, %v878_v51  ;;  %v1003_v6 = vld [vmem:[%s11825_s4 + $0x139] sm:$0xff] }
  0x46   : > { %v882_v63 = vld [vmem:[%s11825_s4 + $0x130] sm:$0xff]  ;;  %v883_v0 = vld [vmem:[%s11825_s4 + $0x138] sm:$0xff]  ;;  %v885_v4 = vld [vmem:[%s11825_s4 + $0x148] sm:$0xff] }
  0x47   : > { %v1002_v5 = vld [vmem:[%s11825_s4 + $0x131] sm:$0xff]  ;;  %v1004_v7 = vld [vmem:[%s11825_s4 + $0x141] sm:$0xff]  ;;  %v943_v9 = vpack.c.bf16 %v883_v0, %v882_v63  ;;  %v1007_v18 = vld [vmem:[%s11825_s4 + $0x159] sm:$0xff] }
  0x48   : > { %v886_v12 = vld [vmem:[%s11825_s4 + $0x150] sm:$0xff]  ;;  %v887_v13 = vld [vmem:[%s11825_s4 + $0x158] sm:$0xff]  ;;  %v889_v16 = vld [vmem:[%s11825_s4 + $0x168] sm:$0xff] }
  0x49   : > { %v1006_v17 = vld [vmem:[%s11825_s4 + $0x151] sm:$0xff]  ;;  %v1008_v19 = vld [vmem:[%s11825_s4 + $0x161] sm:$0xff]  ;;  %v945_v21 = vpack.c.bf16 %v887_v13, %v886_v12  ;;  %v1011_v30 = vld [vmem:[%s11825_s4 + $0x179] sm:$0xff] }
  0x4a   : > { %10196 = vmatmul.mubr.msk.bf16.gmra.mxu0 %vm1099_vm2, %v1049_v53  ;;  %10282 = vmatmul.mubr.msk.bf16.gmra.mxu1 %vm1099_vm2, %v931_v59  ;;  %v1060_v53 = vpack.c.bf16 %v997_v47, %v996_v46  ;;  %v1001_v59 = vld [vmem:[%s11825_s4 + $0x129] sm:$0xff]  ;;  %v891_v25 = vld [vmem:[%s11825_s4 + $0x178] sm:$0xff]  ;;  %v1012_v31 = vld [vmem:[%s11825_s4 + $0x181] sm:$0xff] }
  0x4b   : > { %10199 = vmatprep.mubr.msk.bf16.mxu0 %vm1099_vm2, %v1050_v54  ;;  %10285 = vmatprep.mubr.msk.bf16.mxu1 %vm1099_vm2, %v932_v62  ;;  %v880_v54 = vld [vmem:[%s11825_s4 + $0x120] sm:$0xff]  ;;  %v1061_v62 = vpack.c.bf16 %v999_v57, %v998_v56  ;;  %v890_v24 = vld [vmem:[%s11825_s4 + $0x170] sm:$0xff]  ;;  %v893_v28 = vld [vmem:[%s11825_s4 + $0x188] sm:$0xff] }
  0x4c   : > { %v942_v61 = vpack.c.bf16 %v881_v55, %v880_v54  ;;  %v1010_v29 = vld [vmem:[%s11825_s4 + $0x171] sm:$0xff]  ;;  %v947_v33 = vpack.c.bf16 %v891_v25, %v890_v24  ;;  %v896_v39 = vld [vmem:[%s11825_s4 + $0x1a0] sm:$0xff]  ;;  %v897_v40 = vld [vmem:[%s11825_s4 + $0x1a8] sm:$0xff] }
  0x4d   : > { %v894_v36 = vld [vmem:[%s11825_s4 + $0x190] sm:$0xff]  ;;  %v895_v37 = vld [vmem:[%s11825_s4 + $0x198] sm:$0xff]  ;;  %v1016_v43 = vld [vmem:[%s11825_s4 + $0x1a1] sm:$0xff]  ;;  %v950_v46 = vpack.c.bf16 %v897_v40, %v896_v39 }
  0x4e   : > { %v1015_v42 = vld [vmem:[%s11825_s4 + $0x199] sm:$0xff]  ;;  %v1017_v44 = vld [vmem:[%s11825_s4 + $0x1a9] sm:$0xff]  ;;  %v949_v45 = vpack.c.bf16 %v895_v37, %v894_v36  ;;  %v1020_v55 = vld [vmem:[%s11825_s4 + $0x1c1] sm:$0xff] }
  0x4f   : > { %v900_v51 = vld [vmem:[%s11825_s4 + $0x1c0] sm:$0xff]  ;;  %v901_v52 = vld [vmem:[%s11825_s4 + $0x1c8] sm:$0xff]  ;;  %v1034_v39 = vld [vmem:[%s11825_s4 + $0x231] sm:$0xff] }
  0x50   : > { %v1019_v54 = vld [vmem:[%s11825_s4 + $0x1b9] sm:$0xff]  ;;  %v1021_v56 = vld [vmem:[%s11825_s4 + $0x1c9] sm:$0xff] }
  0x51   : > { %v904_v63 = vld [vmem:[%s11825_s4 + $0x1e0] sm:$0xff]  ;;  %v905_v0 = vld [vmem:[%s11825_s4 + $0x1e8] sm:$0xff] }
  0x52   : > { %10200 = vmatmul.mubr.msk.bf16.gmra.mxu0 %vm1099_vm2, %v1051_v1  ;;  %10286 = vmatmul.mubr.msk.bf16.gmra.mxu1 %vm1099_vm2, %v933_v8  ;;  %v1062_v1 = vpack.c.bf16 %v1001_v59, %v1000_v58  ;;  %v1005_v8 = vld [vmem:[%s11825_s4 + $0x149] sm:$0xff]  ;;  %v952_v58 = vpack.c.bf16 %v901_v52, %v900_v51  ;;  %v908_v12 = vld [vmem:[%s11825_s4 + $0x200] sm:$0xff]  ;;  %v1038_v51 = vld [vmem:[%s11825_s4 + $0x251] sm:$0xff] }
  0x53   : > { %10203 = vmatprep.mubr.msk.bf16.mxu0 %vm1099_vm2, %v1052_v2  ;;  %10289 = vmatprep.mubr.msk.bf16.mxu1 %vm1099_vm2, %v934_v11  ;;  %v884_v2 = vld [vmem:[%s11825_s4 + $0x140] sm:$0xff]  ;;  %v1063_v11 = vpack.c.bf16 %v1003_v6, %v1002_v5  ;;  %v954_v5 = vpack.c.bf16 %v905_v0, %v904_v63  ;;  %v909_v13 = vld [vmem:[%s11825_s4 + $0x208] sm:$0xff] }
  0x54   : > { %v944_v10 = vpack.c.bf16 %v885_v4, %v884_v2  ;;  %v1022_v2 = vld [vmem:[%s11825_s4 + $0x1d1] sm:$0xff]  ;;  %v1023_v4 = vld [vmem:[%s11825_s4 + $0x1d9] sm:$0xff]  ;;  %v1024_v6 = vld [vmem:[%s11825_s4 + $0x1e1] sm:$0xff] }
  0x55   : > { %v912_v24 = vld [vmem:[%s11825_s4 + $0x220] sm:$0xff]  ;;  %v913_v25 = vld [vmem:[%s11825_s4 + $0x228] sm:$0xff] }
  0x56   : > { %v916_v36 = vld [vmem:[%s11825_s4 + $0x240] sm:$0xff]  ;;  %v917_v37 = vld [vmem:[%s11825_s4 + $0x248] sm:$0xff] }
  0x57   : > { %v1035_v40 = vld [vmem:[%s11825_s4 + $0x239] sm:$0xff] }
  0x58   : > { %v1039_v52 = vld [vmem:[%s11825_s4 + $0x259] sm:$0xff] }
  0x5a   : > { %10204 = vmatmul.mubr.msk.bf16.gmra.mxu0 %vm1099_vm2, %v1053_v14  ;;  %10290 = vmatmul.mubr.msk.bf16.gmra.mxu1 %vm1099_vm2, %v935_v20  ;;  %v1064_v14 = vpack.c.bf16 %v1005_v8, %v1004_v7  ;;  %v1009_v20 = vld [vmem:[%s11825_s4 + $0x169] sm:$0xff]  ;;  %v1073_v8 = vpack.c.bf16 %v1023_v4, %v1022_v2 }
  0x5b   : > { %10207 = vmatprep.mubr.msk.bf16.mxu0 %vm1099_vm2, %v1054_v15  ;;  %10293 = vmatprep.mubr.msk.bf16.mxu1 %vm1099_vm2, %v936_v23  ;;  %v888_v15 = vld [vmem:[%s11825_s4 + $0x160] sm:$0xff]  ;;  %v1065_v23 = vpack.c.bf16 %v1007_v18, %v1006_v17  ;;  %v1025_v7 = vld [vmem:[%s11825_s4 + $0x1e9] sm:$0xff]  ;;  %v956_v17 = vpack.c.bf16 %v909_v13, %v908_v12 }
  0x5c   : > { %v946_v22 = vpack.c.bf16 %v889_v16, %v888_v15  ;;  %v1026_v15 = vld [vmem:[%s11825_s4 + $0x1f1] sm:$0xff]  ;;  %v1027_v16 = vld [vmem:[%s11825_s4 + $0x1f9] sm:$0xff]  ;;  %v1028_v18 = vld [vmem:[%s11825_s4 + $0x201] sm:$0xff] }
  0x62   : > { %10208 = vmatmul.mubr.msk.bf16.gmra.mxu0 %vm1099_vm2, %v1055_v26  ;;  %10294 = vmatmul.mubr.msk.bf16.gmra.mxu1 %vm1099_vm2, %v937_v32  ;;  %v1066_v26 = vpack.c.bf16 %v1009_v20, %v1008_v19  ;;  %v1013_v32 = vld [vmem:[%s11825_s4 + $0x189] sm:$0xff]  ;;  %v1075_v20 = vpack.c.bf16 %v1027_v16, %v1026_v15 }
  0x63   : > { %10211 = vmatprep.mubr.msk.bf16.mxu0 %vm1099_vm2, %v1056_v27  ;;  %10297 = vmatprep.mubr.msk.bf16.mxu1 %vm1099_vm2, %v938_v35  ;;  %v892_v27 = vld [vmem:[%s11825_s4 + $0x180] sm:$0xff]  ;;  %v1067_v35 = vpack.c.bf16 %v1011_v30, %v1010_v29  ;;  %v1029_v19 = vld [vmem:[%s11825_s4 + $0x209] sm:$0xff]  ;;  %v958_v29 = vpack.c.bf16 %v913_v25, %v912_v24 }
  0x64   : > { %v948_v34 = vpack.c.bf16 %v893_v28, %v892_v27  ;;  %v1030_v27 = vld [vmem:[%s11825_s4 + $0x211] sm:$0xff]  ;;  %v1031_v28 = vld [vmem:[%s11825_s4 + $0x219] sm:$0xff]  ;;  %v1032_v30 = vld [vmem:[%s11825_s4 + $0x221] sm:$0xff] }
  0x6a   : > { %10212 = vmatmul.mubr.msk.bf16.gmra.mxu0 %vm1099_vm2, %v1057_v38  ;;  %10298 = vmatmul.mubr.msk.bf16.gmra.mxu1 %vm1099_vm2, %v939_v48  ;;  %v1068_v38 = vpack.c.bf16 %v1013_v32, %v1012_v31  ;;  %v898_v48 = vld [vmem:[%s11825_s4 + $0x1b0] sm:$0xff]  ;;  %v1077_v32 = vpack.c.bf16 %v1031_v28, %v1030_v27 }
  0x6b   : > { %10215 = vmatprep.mubr.msk.bf16.mxu0 %vm1099_vm2, %v1058_v41  ;;  %10301 = vmatprep.mubr.msk.bf16.mxu1 %vm1099_vm2, %v940_v49  ;;  %v1014_v41 = vld [vmem:[%s11825_s4 + $0x191] sm:$0xff]  ;;  %v1033_v31 = vld [vmem:[%s11825_s4 + $0x229] sm:$0xff] }
  0x6c   : > { %v1069_v47 = vpack.c.bf16 %v1015_v42, %v1014_v41  ;;  %v899_v49 = vld [vmem:[%s11825_s4 + $0x1b8] sm:$0xff]  ;;  %v960_v41 = vpack.c.bf16 %v917_v37, %v916_v36  ;;  %v1036_v42 = vld [vmem:[%s11825_s4 + $0x241] sm:$0xff] }
  0x6d   : > { %v951_v57 = vpack.c.bf16 %v899_v49, %v898_v48  ;;  %v920_v48 = vld [vmem:[%s11825_s4 + $0x260] sm:$0xff]  ;;  %v921_v49 = vld [vmem:[%s11825_s4 + $0x268] sm:$0xff] }
  0x72   : > { %10216 = vmatmul.mubr.msk.bf16.gmra.mxu0 %vm1099_vm2, %v1059_v50  ;;  %10302 = vmatmul.mubr.msk.bf16.gmra.mxu1 %vm1099_vm2, %v941_v60  ;;  %v1070_v50 = vpack.c.bf16 %v1017_v44, %v1016_v43  ;;  %v1072_v60 = vpack.c.bf16 %v1021_v56, %v1020_v55  ;;  %v1037_v43 = vld [vmem:[%s11825_s4 + $0x249] sm:$0xff]  ;;  %v1079_v44 = vpack.c.bf16 %v1035_v40, %v1034_v39 }
  0x73   : > { %10219 = vmatprep.mubr.msk.bf16.mxu0 %vm1099_vm2, %v1060_v53  ;;  %10305 = vmatprep.mubr.msk.bf16.mxu1 %vm1099_vm2, %v942_v61  ;;  %v1018_v53 = vld [vmem:[%s11825_s4 + $0x1b1] sm:$0xff]  ;;  %v1041_v55 = vld [vmem:[%s11825_s4 + $0x269] sm:$0xff]  ;;  %v1081_v56 = vpack.c.bf16 %v1039_v52, %v1038_v51 }
  0x74   : > { %v1071_v59 = vpack.c.bf16 %v1019_v54, %v1018_v53  ;;  %v902_v61 = vld [vmem:[%s11825_s4 + $0x1d0] sm:$0xff]  ;;  %v962_v53 = vpack.c.bf16 %v921_v49, %v920_v48  ;;  %v1040_v54 = vld [vmem:[%s11825_s4 + $0x261] sm:$0xff] }
  0x7a   : > { %10220 = vmatmul.mubr.msk.bf16.gmra.mxu0 %vm1099_vm2, %v1061_v62  ;;  %10306 = vmatmul.mubr.msk.bf16.gmra.mxu1 %vm1099_vm2, %v943_v9  ;;  %v903_v62 = vld [vmem:[%s11825_s4 + $0x1d8] sm:$0xff]  ;;  %v1074_v9 = vpack.c.bf16 %v1025_v7, %v1024_v6 }
  0x7b   : > { %10223 = vmatprep.mubr.msk.bf16.mxu0 %vm1099_vm2, %v1062_v1  ;;  %10309 = vmatprep.mubr.msk.bf16.mxu1 %vm1099_vm2, %v944_v10  ;;  %v953_v1 = vpack.c.bf16 %v903_v62, %v902_v61  ;;  %v906_v10 = vld [vmem:[%s11825_s4 + $0x1f0] sm:$0xff]  ;;  %v1043_v62 = vld [vmem:[%s11825_s4 + $0x279] sm:$0x7f] }
  0x7c   : > { %v1042_v61 = vld [vmem:[%s11825_s4 + $0x271] sm:$0xff] }
  0x7d   : > { %v1083_v63 = vpack.c.bf16 %v1043_v62, %v1042_v61 }
  0x82   : > { %10224 = vmatmul.mubr.msk.bf16.gmra.mxu0 %vm1099_vm2, %v1063_v11  ;;  %10310 = vmatmul.mubr.msk.bf16.gmra.mxu1 %vm1099_vm2, %v945_v21  ;;  %v907_v11 = vld [vmem:[%s11825_s4 + $0x1f8] sm:$0xff]  ;;  %v1076_v21 = vpack.c.bf16 %v1029_v19, %v1028_v18 }
  0x83   : > { %10227 = vmatprep.mubr.msk.bf16.mxu0 %vm1099_vm2, %v1064_v14  ;;  %10313 = vmatprep.mubr.msk.bf16.mxu1 %vm1099_vm2, %v946_v22  ;;  %v955_v14 = vpack.c.bf16 %v907_v11, %v906_v10  ;;  %v910_v22 = vld [vmem:[%s11825_s4 + $0x210] sm:$0xff] }
  0x8a   : > { %10228 = vmatmul.mubr.msk.bf16.gmra.mxu0 %vm1099_vm2, %v1065_v23  ;;  %10314 = vmatmul.mubr.msk.bf16.gmra.mxu1 %vm1099_vm2, %v947_v33  ;;  %v911_v23 = vld [vmem:[%s11825_s4 + $0x218] sm:$0xff]  ;;  %v1078_v33 = vpack.c.bf16 %v1033_v31, %v1032_v30 }
  0x8b   : > { %10231 = vmatprep.mubr.msk.bf16.mxu0 %vm1099_vm2, %v1066_v26  ;;  %10317 = vmatprep.mubr.msk.bf16.mxu1 %vm1099_vm2, %v948_v34  ;;  %v957_v26 = vpack.c.bf16 %v911_v23, %v910_v22  ;;  %v914_v34 = vld [vmem:[%s11825_s4 + $0x230] sm:$0xff] }
  0x92   : > { %10232 = vmatmul.mubr.msk.bf16.gmra.mxu0 %vm1099_vm2, %v1067_v35  ;;  %10318 = vmatmul.mubr.msk.bf16.gmra.mxu1 %vm1099_vm2, %v949_v45  ;;  %v915_v35 = vld [vmem:[%s11825_s4 + $0x238] sm:$0xff]  ;;  %v1080_v45 = vpack.c.bf16 %v1037_v43, %v1036_v42 }
  0x93   : > { %10235 = vmatprep.mubr.msk.bf16.mxu0 %vm1099_vm2, %v1068_v38  ;;  %10321 = vmatprep.mubr.msk.bf16.mxu1 %vm1099_vm2, %v950_v46  ;;  %v959_v38 = vpack.c.bf16 %v915_v35, %v914_v34  ;;  %v918_v46 = vld [vmem:[%s11825_s4 + $0x250] sm:$0xff] }
  0x9a   : > { %10236 = vmatmul.mubr.msk.bf16.gmra.mxu0 %vm1099_vm2, %v1069_v47  ;;  %10322 = vmatmul.mubr.msk.bf16.gmra.mxu1 %vm1099_vm2, %v951_v57  ;;  %v919_v47 = vld [vmem:[%s11825_s4 + $0x258] sm:$0xff]  ;;  %v1082_v57 = vpack.c.bf16 %v1041_v55, %v1040_v54 }
  0x9b   : > { %10239 = vmatprep.mubr.msk.bf16.mxu0 %vm1099_vm2, %v1070_v50  ;;  %10325 = vmatprep.mubr.msk.bf16.mxu1 %vm1099_vm2, %v952_v58  ;;  %v961_v50 = vpack.c.bf16 %v919_v47, %v918_v46  ;;  %v922_v58 = vld [vmem:[%s11825_s4 + $0x270] sm:$0xff] }
  0xa2   : > { %10240 = vmatmul.mubr.msk.bf16.gmra.mxu0 %vm1099_vm2, %v1071_v59  ;;  %10326 = vmatmul.mubr.msk.bf16.gmra.mxu1 %vm1099_vm2, %v953_v1  ;;  %v923_v59 = vld [vmem:[%s11825_s4 + $0x278] sm:$0x7f]  ;;  %s16714_s4 = sld [smem:[#allocation109_spill]] }
  0xa3   : > { %10243 = vmatprep.mubr.msk.bf16.mxu0 %vm1099_vm2, %v1072_v60  ;;  %10329 = vmatprep.mubr.msk.bf16.mxu1 %vm1099_vm2, %v954_v5  ;;  %v963_v60 = vpack.c.bf16 %v923_v59, %v922_v58 }
  0xaa   : > { %10244 = vmatmul.mubr.msk.bf16.gmra.mxu0 %vm1099_vm2, %v1073_v8  ;;  %10330 = vmatmul.mubr.msk.bf16.gmra.mxu1 %vm1099_vm2, %v955_v14 }
  0xab   : > { %10247 = vmatprep.mubr.msk.bf16.mxu0 %vm1099_vm2, %v1074_v9  ;;  %10333 = vmatprep.mubr.msk.bf16.mxu1 %vm1099_vm2, %v956_v17 }
  0xb2   : > { %10248 = vmatmul.mubr.msk.bf16.gmra.mxu0 %vm1099_vm2, %v1075_v20  ;;  %10334 = vmatmul.mubr.msk.bf16.gmra.mxu1 %vm1099_vm2, %v957_v26 }
  0xb3   : > { %10251 = vmatprep.mubr.msk.bf16.mxu0 %vm1099_vm2, %v1076_v21  ;;  %10337 = vmatprep.mubr.msk.bf16.mxu1 %vm1099_vm2, %v958_v29 }
  0xba   : > { %10252 = vmatmul.mubr.msk.bf16.gmra.mxu0 %vm1099_vm2, %v1077_v32  ;;  %10338 = vmatmul.mubr.msk.bf16.gmra.mxu1 %vm1099_vm2, %v959_v38 }
  0xbb   : > { %10255 = vmatprep.mubr.msk.bf16.mxu0 %vm1099_vm2, %v1078_v33  ;;  %10341 = vmatprep.mubr.msk.bf16.mxu1 %vm1099_vm2, %v960_v41 }
  0xc2   : > { %10256 = vmatmul.mubr.msk.bf16.gmra.mxu0 %vm1099_vm2, %v1079_v44  ;;  %10342 = vmatmul.mubr.msk.bf16.gmra.mxu1 %vm1099_vm2, %v961_v50 }
  0xc3   : > { %10259 = vmatprep.mubr.msk.bf16.mxu0 %vm1099_vm2, %v1080_v45  ;;  %10345 = vmatprep.mubr.msk.bf16.mxu1 %vm1099_vm2, %v962_v53 }
  0xca   : > { %10260 = vmatmul.mubr.msk.bf16.gmra.mxu0 %vm1099_vm2, %v1081_v56  ;;  %10346 = vmatmul.mubr.msk.bf16.gmra.mxu1 %vm1099_vm2, %v963_v60 }
  0xcb   : > { %10263 = vmatprep.mubr.msk.bf16.mxu0 %vm1099_vm2, %v1082_v57 }
  0xd2   : > { %10264 = vmatmul.mubr.msk.bf16.gmra.mxu0 %vm1099_vm2, %v1083_v63 }
  0xf2   : > { %v10271_v0 = vpop.f32.mrf.mxu1 }
  0xf4   : > { %v1737_v1 = vpop.f32.mrf.mxu1 }
  0xf6   : > { %v10272_v4 = vpop.f32.mrf.mxu1 }
  0xf8   : > { %v1740_v6 = vpop.f32.mrf.mxu1 }
  0xfa   : > { %v10189_v2 = vpop.f32.mrf.mxu0  ;;  %v10275_v9 = vpop.f32.mrf.mxu1 }
  0xfb   : > { %v12069_v11 = vadd.f32 %v10271_v0, %v10189_v2 }
  0xfc   : > { %v1261_v5 = vpop.f32.mrf.mxu0  ;;  %v1753_v13 = vpop.f32.mrf.mxu1 }
  0xfd   : > { %v12067_v8 = vadd.f32 %v1737_v1, %v1261_v5  ;;  %v2060_v21 = vsel %vm2056_vm3, %v12069_v11, 0.0 }
  0xfe   : > { %v10190_v7 = vpop.f32.mrf.mxu0  ;;  %v10276_v18 = vpop.f32.mrf.mxu1 }
  0xff   : > { %v2057_v15 = vsel %vm2056_vm3, %v12067_v8, 0.0  ;;  %v12075_v16 = vadd.f32 %v10272_v4, %v10190_v7 }
 0x100   : > { %v1264_v10 = vpop.f32.mrf.mxu0  ;;  %v1756_v23 = vpop.f32.mrf.mxu1 }
 0x101   : > { %v12071_v12 = vadd.f32 %v1740_v6, %v1264_v10  ;;  %v2062_v26 = vsel %vm2056_vm3, %v12075_v16, 0.0 }
 0x102   : > { %v10193_v14 = vpop.f32.mrf.mxu0  ;;  %v10279_v27 = vpop.f32.mrf.mxu1 }
 0x103   : > { %v2058_v17 = vsel %vm2056_vm3, %v12071_v12, 0.0  ;;  %v12085_v30 = vadd.f32 %v10275_v9, %v10193_v14 }
 0x104   : > { %v2059_v19 = vadd.f32 %v2058_v17, %v2057_v15  ;;  %v1277_v20 = vpop.f32.mrf.mxu0  ;;  %v1769_v33 = vpop.f32.mrf.mxu1 }
 0x105   : > { %v12081_v22 = vadd.f32 %v1753_v13, %v1277_v20  ;;  %v2068_v41 = vsel %vm2056_vm3, %v12085_v30, 0.0 }
 0x106   : > { %v2061_v24 = vadd.f32 %v2060_v21, %v2059_v19  ;;  %v10194_v25 = vpop.f32.mrf.mxu0  ;;  %v10280_v38 = vpop.f32.mrf.mxu1 }
 0x107   : > { %v2064_v31 = vsel %vm2056_vm3, %v12081_v22, 0.0  ;;  %v12091_v36 = vadd.f32 %v10276_v18, %v10194_v25 }
 0x108   : > { %v2063_v28 = vadd.f32 %v2062_v26, %v2061_v24  ;;  %v1280_v29 = vpop.f32.mrf.mxu0  ;;  %v1772_v43 = vpop.f32.mrf.mxu1 }
 0x109   : > { %v12089_v32 = vadd.f32 %v1756_v23, %v1280_v29  ;;  %v2070_v46 = vsel %vm2056_vm3, %v12091_v36, 0.0 }
 0x10a   : > { %v2065_v34 = vadd.f32 %v2064_v31, %v2063_v28  ;;  %v10197_v35 = vpop.f32.mrf.mxu0  ;;  %v10283_v47 = vpop.f32.mrf.mxu1 }
 0x10b   : > { %v2066_v37 = vsel %vm2056_vm3, %v12089_v32, 0.0  ;;  %v12101_v50 = vadd.f32 %v10279_v27, %v10197_v35 }
 0x10c   : > { %v2067_v39 = vadd.f32 %v2066_v37, %v2065_v34  ;;  %v1293_v40 = vpop.f32.mrf.mxu0  ;;  %v1785_v53 = vpop.f32.mrf.mxu1 }
 0x10d   : > { %v12097_v42 = vadd.f32 %v1769_v33, %v1293_v40  ;;  %v2076_v61 = vsel %vm2056_vm3, %v12101_v50, 0.0 }
 0x10e   : > { %v2069_v44 = vadd.f32 %v2068_v41, %v2067_v39  ;;  %v10198_v45 = vpop.f32.mrf.mxu0  ;;  %v10284_v58 = vpop.f32.mrf.mxu1 }
 0x10f   : > { %v2072_v51 = vsel %vm2056_vm3, %v12097_v42, 0.0  ;;  %v12107_v56 = vadd.f32 %v10280_v38, %v10198_v45 }
 0x110   : > { %v2071_v48 = vadd.f32 %v2070_v46, %v2069_v44  ;;  %v1296_v49 = vpop.f32.mrf.mxu0  ;;  %v1788_v63 = vpop.f32.mrf.mxu1 }
 0x111   : > { %v12105_v52 = vadd.f32 %v1772_v43, %v1296_v49  ;;  %v2078_v2 = vsel %vm2056_vm3, %v12107_v56, 0.0 }
 0x112   : > { %v2073_v54 = vadd.f32 %v2072_v51, %v2071_v48  ;;  %v10201_v55 = vpop.f32.mrf.mxu0  ;;  %v10287_v4 = vpop.f32.mrf.mxu1 }
 0x113   : > { %v2074_v57 = vsel %vm2056_vm3, %v12105_v52, 0.0  ;;  %v12117_v7 = vadd.f32 %v10283_v47, %v10201_v55 }
 0x114   : > { %v2075_v59 = vadd.f32 %v2074_v57, %v2073_v54  ;;  %v1309_v60 = vpop.f32.mrf.mxu0  ;;  %v1801_v13 = vpop.f32.mrf.mxu1 }
 0x115   : > { %v12113_v62 = vadd.f32 %v1785_v53, %v1309_v60  ;;  %v2084_v23 = vsel %vm2056_vm3, %v12117_v7, 0.0 }
 0x116   : > { %v2077_v0 = vadd.f32 %v2076_v61, %v2075_v59  ;;  %v10202_v1 = vpop.f32.mrf.mxu0  ;;  %v10288_v19 = vpop.f32.mrf.mxu1 }
 0x117   : > { %v2080_v9 = vsel %vm2056_vm3, %v12113_v62, 0.0  ;;  %v12123_v17 = vadd.f32 %v10284_v58, %v10202_v1 }
 0x118   : > { %v2079_v5 = vadd.f32 %v2078_v2, %v2077_v0  ;;  %v1312_v6 = vpop.f32.mrf.mxu0  ;;  %v1804_v25 = vpop.f32.mrf.mxu1 }
 0x119   : > { %v12121_v10 = vadd.f32 %v1788_v63, %v1312_v6  ;;  %v2086_v28 = vsel %vm2056_vm3, %v12123_v17, 0.0 }
 0x11a   : > { %v2081_v14 = vadd.f32 %v2080_v9, %v2079_v5  ;;  %v10205_v15 = vpop.f32.mrf.mxu0  ;;  %v10291_v29 = vpop.f32.mrf.mxu1 }
 0x11b   : > { %v2082_v18 = vsel %vm2056_vm3, %v12121_v10, 0.0  ;;  %v12133_v34 = vadd.f32 %v10287_v4, %v10205_v15 }
 0x11c   : > { %v2083_v20 = vadd.f32 %v2082_v18, %v2081_v14  ;;  %v1325_v21 = vpop.f32.mrf.mxu0  ;;  %v1817_v38 = vpop.f32.mrf.mxu1 }
 0x11d   : > { %v12129_v24 = vadd.f32 %v1801_v13, %v1325_v21  ;;  %v2092_v47 = vsel %vm2056_vm3, %v12133_v34, 0.0 }
 0x11e   : > { %v2085_v26 = vadd.f32 %v2084_v23, %v2083_v20  ;;  %v10206_v27 = vpop.f32.mrf.mxu0  ;;  %v10292_v44 = vpop.f32.mrf.mxu1 }
 0x11f   : > { %v2088_v35 = vsel %vm2056_vm3, %v12129_v24, 0.0  ;;  %v12139_v41 = vadd.f32 %v10288_v19, %v10206_v27 }
 0x120   : > { %v2087_v31 = vadd.f32 %v2086_v28, %v2085_v26  ;;  %v1328_v33 = vpop.f32.mrf.mxu0  ;;  %v1820_v49 = vpop.f32.mrf.mxu1 }
 0x121   : > { %v12137_v37 = vadd.f32 %v1804_v25, %v1328_v33  ;;  %v2094_v54 = vsel %vm2056_vm3, %v12139_v41, 0.0 }
 0x122   : > { %v2089_v39 = vadd.f32 %v2088_v35, %v2087_v31  ;;  %v10209_v40 = vpop.f32.mrf.mxu0  ;;  %v10295_v55 = vpop.f32.mrf.mxu1 }
 0x123   : > { %v2090_v43 = vsel %vm2056_vm3, %v12137_v37, 0.0  ;;  %v12149_v59 = vadd.f32 %v10291_v29, %v10209_v40 }
 0x124   : > { %v2091_v45 = vadd.f32 %v2090_v43, %v2089_v39  ;;  %v1341_v46 = vpop.f32.mrf.mxu0  ;;  %v1833_v63 = vpop.f32.mrf.mxu1 }
 0x125   : > { %v12145_v48 = vadd.f32 %v1817_v38, %v1341_v46  ;;  %v2100_v13 = vsel %vm2056_vm3, %v12149_v59, 0.0 }
 0x126   : > { %v2093_v51 = vadd.f32 %v2092_v47, %v2091_v45  ;;  %v10210_v53 = vpop.f32.mrf.mxu0  ;;  %v10296_v5 = vpop.f32.mrf.mxu1 }
 0x127   : > { %v2096_v60 = vsel %vm2056_vm3, %v12145_v48, 0.0  ;;  %v12155_v2 = vadd.f32 %v10292_v44, %v10210_v53 }
 0x128   : > { %v2095_v57 = vadd.f32 %v2094_v54, %v2093_v51  ;;  %v1344_v58 = vpop.f32.mrf.mxu0  ;;  %v1836_v15 = vpop.f32.mrf.mxu1 }
 0x129   : > { %v12153_v61 = vadd.f32 %v1820_v49, %v1344_v58  ;;  %v2102_v20 = vsel %vm2056_vm3, %v12155_v2, 0.0 }
 0x12a   : > { %v2097_v0 = vadd.f32 %v2096_v60, %v2095_v57  ;;  %v10213_v1 = vpop.f32.mrf.mxu0  ;;  %v10299_v21 = vpop.f32.mrf.mxu1 }
 0x12b   : > { %v2098_v4 = vsel %vm2056_vm3, %v12153_v61, 0.0  ;;  %v12165_v26 = vadd.f32 %v10295_v55, %v10213_v1 }
 0x12c   : > { %v2099_v6 = vadd.f32 %v2098_v4, %v2097_v0  ;;  %v1357_v9 = vpop.f32.mrf.mxu0  ;;  %v1849_v29 = vpop.f32.mrf.mxu1 }
 0x12d   : > { %v12161_v14 = vadd.f32 %v1833_v63, %v1357_v9  ;;  %v2108_v44 = vsel %vm2056_vm3, %v12165_v26, 0.0 }
 0x12e   : > { %v2101_v18 = vadd.f32 %v2100_v13, %v2099_v6  ;;  %v10214_v19 = vpop.f32.mrf.mxu0  ;;  %v10300_v39 = vpop.f32.mrf.mxu1 }
 0x12f   : > { %v2104_v27 = vsel %vm2056_vm3, %v12161_v14, 0.0  ;;  %v12171_v35 = vadd.f32 %v10296_v5, %v10214_v19 }
 0x130   : > { %v2103_v23 = vadd.f32 %v2102_v20, %v2101_v18  ;;  %v1360_v25 = vpop.f32.mrf.mxu0  ;;  %v1852_v46 = vpop.f32.mrf.mxu1 }
 0x131   : > { %v12169_v28 = vadd.f32 %v1836_v15, %v1360_v25  ;;  %v2110_v51 = vsel %vm2056_vm3, %v12171_v35, 0.0 }
 0x132   : > { %v2105_v31 = vadd.f32 %v2104_v27, %v2103_v23  ;;  %v10217_v33 = vpop.f32.mrf.mxu0  ;;  %v10303_v53 = vpop.f32.mrf.mxu1 }
 0x133   : > { %v2106_v38 = vsel %vm2056_vm3, %v12169_v28, 0.0  ;;  %v12181_v57 = vadd.f32 %v10299_v21, %v10217_v33 }
 0x134   : > { %v2107_v40 = vadd.f32 %v2106_v38, %v2105_v31  ;;  %v1373_v43 = vpop.f32.mrf.mxu0  ;;  %v1865_v63 = vpop.f32.mrf.mxu1 }
 0x135   : > { %v12177_v45 = vadd.f32 %v1849_v29, %v1373_v43  ;;  %16204 = vst [vmem:[#allocation11_spill] sm:$0xff] %v12181_v57  ;;  %v2116_v15 = vsel %vm2056_vm3, %v12181_v57, 0.0 }
 0x136   : > { %v2109_v47 = vadd.f32 %v2108_v44, %v2107_v40  ;;  %v10218_v49 = vpop.f32.mrf.mxu0  ;;  %v10304_v6 = vpop.f32.mrf.mxu1 }
 0x137   : > { %v2112_v58 = vsel %vm2056_vm3, %v12177_v45, 0.0  ;;  %v12187_v4 = vadd.f32 %v10300_v39, %v10218_v49 }
 0x138   : > { %v2111_v54 = vadd.f32 %v2110_v51, %v2109_v47  ;;  %v1376_v55 = vpop.f32.mrf.mxu0  ;;  %v1868_v19 = vpop.f32.mrf.mxu1 }
 0x139   : > { %v12185_v60 = vadd.f32 %v1852_v46, %v1376_v55  ;;  %16205 = vst [vmem:[#allocation12_spill] sm:$0xff] %v12187_v4  ;;  %v2118_v23 = vsel %vm2056_vm3, %v12187_v4, 0.0 }
 0x13a   : > { %v2113_v0 = vadd.f32 %v2112_v58, %v2111_v54  ;;  %v10221_v1 = vpop.f32.mrf.mxu0  ;;  %v10307_v25 = vpop.f32.mrf.mxu1 }
 0x13b   : > { %v2114_v5 = vsel %vm2056_vm3, %v12185_v60, 0.0  ;;  %v12197_v31 = vadd.f32 %v10303_v53, %v10221_v1 }
 0x13c   : > { %v2115_v9 = vadd.f32 %v2114_v5, %v2113_v0  ;;  %v1389_v13 = vpop.f32.mrf.mxu0  ;;  %v1881_v39 = vpop.f32.mrf.mxu1 }
 0x13d   : > { %v12193_v18 = vadd.f32 %v1865_v63, %v1389_v13  ;;  %16207 = vst [vmem:[#allocation14_spill] sm:$0xff] %v12197_v31  ;;  %v2124_v53 = vsel %vm2056_vm3, %v12197_v31, 0.0 }
 0x13e   : > { %v2117_v20 = vadd.f32 %v2116_v15, %v2115_v9  ;;  %v10222_v21 = vpop.f32.mrf.mxu0  ;;  %v10308_v47 = vpop.f32.mrf.mxu1 }
 0x13f   : > { %16206 = vst [vmem:[#allocation13_spill] sm:$0xff] %v12193_v18  ;;  %v2120_v33 = vsel %vm2056_vm3, %v12193_v18, 0.0  ;;  %v12203_v44 = vadd.f32 %v10304_v6, %v10222_v21 }
 0x140   : > { %v2119_v27 = vadd.f32 %v2118_v23, %v2117_v20  ;;  %v1392_v29 = vpop.f32.mrf.mxu0  ;;  %v1884_v55 = vpop.f32.mrf.mxu1 }
 0x141   : > { %v12201_v38 = vadd.f32 %v1868_v19, %v1392_v29  ;;  %16209 = vst [vmem:[#allocation16_spill] sm:$0xff] %v12203_v44  ;;  %v2126_v0 = vsel %vm2056_vm3, %v12203_v44, 0.0 }
 0x142   : > { %v2121_v40 = vadd.f32 %v2120_v33, %v2119_v27  ;;  %v10225_v43 = vpop.f32.mrf.mxu0  ;;  %v10311_v1 = vpop.f32.mrf.mxu1 }
 0x143   : > { %16208 = vst [vmem:[#allocation15_spill] sm:$0xff] %v12201_v38  ;;  %v2122_v46 = vsel %vm2056_vm3, %v12201_v38, 0.0  ;;  %v12213_v9 = vadd.f32 %v10307_v25, %v10225_v43 }
 0x144   : > { %v2123_v49 = vadd.f32 %v2122_v46, %v2121_v40  ;;  %v1405_v51 = vpop.f32.mrf.mxu0  ;;  %v1897_v19 = vpop.f32.mrf.mxu1 }
 0x145   : > { %v12209_v54 = vadd.f32 %v1881_v39, %v1405_v51  ;;  %16211 = vst [vmem:[#allocation18_spill] sm:$0xff] %v12213_v9  ;;  %v2132_v25 = vsel %vm2056_vm3, %v12213_v9, 0.0 }
 0x146   : > { %v2125_v58 = vadd.f32 %v2124_v53, %v2123_v49  ;;  %v10226_v63 = vpop.f32.mrf.mxu0  ;;  %v10312_v29 = vpop.f32.mrf.mxu1 }
 0x147   : > { %16210 = vst [vmem:[#allocation17_spill] sm:$0xff] %v12209_v54  ;;  %v2128_v13 = vsel %vm2056_vm3, %v12209_v54, 0.0  ;;  %v12219_v23 = vadd.f32 %v10308_v47, %v10226_v63 }
 0x148   : > { %v2127_v5 = vadd.f32 %v2126_v0, %v2125_v58  ;;  %v1408_v6 = vpop.f32.mrf.mxu0  ;;  %v1900_v43 = vpop.f32.mrf.mxu1 }
 0x149   : > { %v12217_v15 = vadd.f32 %v1884_v55, %v1408_v6  ;;  %16213 = vst [vmem:[#allocation20_spill] sm:$0xff] %v12219_v23  ;;  %v2134_v51 = vsel %vm2056_vm3, %v12219_v23, 0.0 }
 0x14a   : > { %v2129_v20 = vadd.f32 %v2128_v13, %v2127_v5  ;;  %v10229_v21 = vpop.f32.mrf.mxu0  ;;  %v10315_v53 = vpop.f32.mrf.mxu1 }
 0x14b   : > { %16212 = vst [vmem:[#allocation19_spill] sm:$0xff] %v12217_v15  ;;  %v2130_v27 = vsel %vm2056_vm3, %v12217_v15, 0.0  ;;  %v12229_v58 = vadd.f32 %v10311_v1, %v10229_v21 }
 0x14c   : > { %v2131_v33 = vadd.f32 %v2130_v27, %v2129_v20  ;;  %v1421_v39 = vpop.f32.mrf.mxu0  ;;  %v1913_v5 = vpop.f32.mrf.mxu1 }
 0x14d   : > { %v12225_v40 = vadd.f32 %v1897_v19, %v1421_v39  ;;  %16215 = vst [vmem:[#allocation22_spill] sm:$0xff] %v12229_v58  ;;  %v2140_v1 = vsel %vm2056_vm3, %v12229_v58, 0.0 }
 0x14e   : > { %v2133_v46 = vadd.f32 %v2132_v25, %v2131_v33  ;;  %v10230_v49 = vpop.f32.mrf.mxu0  ;;  %v10316_v27 = vpop.f32.mrf.mxu1 }
 0x14f   : > { %16214 = vst [vmem:[#allocation21_spill] sm:$0xff] %v12225_v40  ;;  %v2136_v63 = vsel %vm2056_vm3, %v12225_v40, 0.0  ;;  %v12235_v19 = vadd.f32 %v10312_v29, %v10230_v49 }
 0x150   : > { %v2135_v47 = vadd.f32 %v2134_v51, %v2133_v46  ;;  %v1424_v55 = vpop.f32.mrf.mxu0  ;;  %v1916_v25 = vpop.f32.mrf.mxu1 }
 0x151   : > { %v12233_v0 = vadd.f32 %v1900_v43, %v1424_v55  ;;  %16217 = vst [vmem:[#allocation24_spill] sm:$0xff] %v12235_v19  ;;  %v2142_v51 = vsel %vm2056_vm3, %v12235_v19, 0.0 }
 0x152   : > { %v2137_v6 = vadd.f32 %v2136_v63, %v2135_v47  ;;  %v10233_v13 = vpop.f32.mrf.mxu0  ;;  %v10319_v47 = vpop.f32.mrf.mxu1 }
 0x153   : > { %16216 = vst [vmem:[#allocation23_spill] sm:$0xff] %v12233_v0  ;;  %v2138_v20 = vsel %vm2056_vm3, %v12233_v0, 0.0  ;;  %v12245_v55 = vadd.f32 %v10315_v53, %v10233_v13 }
 0x154   : > { %v2139_v33 = vadd.f32 %v2138_v20, %v2137_v6  ;;  %v1437_v39 = vpop.f32.mrf.mxu0  ;;  %v1929_v20 = vpop.f32.mrf.mxu1 }
 0x155   : > { %v12241_v21 = vadd.f32 %v1913_v5, %v1437_v39  ;;  %16219 = vst [vmem:[#allocation26_spill] sm:$0xff] %v12245_v55  ;;  %v2148_v53 = vsel %vm2056_vm3, %v12245_v55, 0.0 }
 0x156   : > { %v2141_v46 = vadd.f32 %v2140_v1, %v2139_v33  ;;  %v10234_v43 = vpop.f32.mrf.mxu0  ;;  %v10320_v1 = vpop.f32.mrf.mxu1 }
 0x157   : > { %16218 = vst [vmem:[#allocation25_spill] sm:$0xff] %v12241_v21  ;;  %v2144_v63 = vsel %vm2056_vm3, %v12241_v21, 0.0  ;;  %v12251_v39 = vadd.f32 %v10316_v27, %v10234_v43 }
 0x158   : > { %v2143_v29 = vadd.f32 %v2142_v51, %v2141_v46  ;;  %v1440_v49 = vpop.f32.mrf.mxu0  ;;  %v1932_v46 = vpop.f32.mrf.mxu1 }
 0x159   : > { %v12249_v6 = vadd.f32 %v1916_v25, %v1440_v49  ;;  %16221 = vst [vmem:[#allocation28_spill] sm:$0xff] %v12251_v39 }
 0x15a   : > { %v2145_v3 = vadd.f32 %v2144_v63, %v2143_v29  ;;  %v10237_v5 = vpop.f32.mrf.mxu0  ;;  %v2150_v29 = vsel %vm2056_vm3, %v12251_v39, 0.0  ;;  %v10323_v49 = vpop.f32.mrf.mxu1 }
 0x15b   : > { %16220 = vst [vmem:[#allocation27_spill] sm:$0xff] %v12249_v6  ;;  %v2146_v33 = vsel %vm2056_vm3, %v12249_v6, 0.0  ;;  %v12261_v63 = vadd.f32 %v10319_v47, %v10237_v5 }
 0x15c   : > { %v2147_v19 = vadd.f32 %v2146_v33, %v2145_v3  ;;  %v1453_v58 = vpop.f32.mrf.mxu0  ;;  %v1945_v6 = vpop.f32.mrf.mxu1 }
 0x15d   : > { %v12257_v13 = vadd.f32 %v1929_v20, %v1453_v58  ;;  %16223 = vst [vmem:[#allocation30_spill] sm:$0xff] %v12261_v63  ;;  %v2156_v47 = vsel %vm2056_vm3, %v12261_v63, 0.0 }
 0x15e   : > { %v2149_v51 = vadd.f32 %v2148_v53, %v2147_v19  ;;  %v10238_v25 = vpop.f32.mrf.mxu0  ;;  %v10324_v53 = vpop.f32.mrf.mxu1 }
 0x15f   : > { %16222 = vst [vmem:[#allocation29_spill] sm:$0xff] %v12257_v13  ;;  %v2152_v3 = vsel %vm2056_vm3, %v12257_v13, 0.0  ;;  %v12267_v20 = vadd.f32 %v10320_v1, %v10238_v25 }
 0x160   : > { %v2151_v27 = vadd.f32 %v2150_v29, %v2149_v51  ;;  %v1456_v43 = vpop.f32.mrf.mxu0  ;;  %v1948_v51 = vpop.f32.mrf.mxu1 }
 0x161   : > { %v12265_v33 = vadd.f32 %v1932_v46, %v1456_v43  ;;  %16225 = vst [vmem:[#allocation32_spill] sm:$0xff] %v12267_v20 }
 0x162   : > { %v2153_v55 = vadd.f32 %v2152_v3, %v2151_v27  ;;  %v10241_v58 = vpop.f32.mrf.mxu0  ;;  %v2158_v27 = vsel %vm2056_vm3, %v12267_v20, 0.0  ;;  %v10327_v43 = vpop.f32.mrf.mxu1 }
 0x163   : > { %16224 = vst [vmem:[#allocation31_spill] sm:$0xff] %v12265_v33  ;;  %v2154_v19 = vsel %vm2056_vm3, %v12265_v33, 0.0  ;;  %v12277_v3 = vadd.f32 %v10323_v49, %v10241_v58 }
 0x164   : > { %v2155_v39 = vadd.f32 %v2154_v19, %v2153_v55  ;;  %v1469_v21 = vpop.f32.mrf.mxu0  ;;  %v1961_v33 = vpop.f32.mrf.mxu1 }
 0x165   : > { %v12273_v5 = vadd.f32 %v1945_v6, %v1469_v21  ;;  %16227 = vst [vmem:[#allocation34_spill] sm:$0xff] %v12277_v3  ;;  %v2164_v49 = vsel %vm2056_vm3, %v12277_v3, 0.0 }
 0x166   : > { %v2157_v29 = vadd.f32 %v2156_v47, %v2155_v39  ;;  %v10242_v46 = vpop.f32.mrf.mxu0  ;;  %v10328_v47 = vpop.f32.mrf.mxu1 }
 0x167   : > { %16226 = vst [vmem:[#allocation33_spill] sm:$0xff] %v12273_v5  ;;  %v2160_v55 = vsel %vm2056_vm3, %v12273_v5, 0.0  ;;  %v12283_v6 = vadd.f32 %v10324_v53, %v10242_v46 }
 0x168   : > { %v2159_v1 = vadd.f32 %v2158_v27, %v2157_v29  ;;  %v1472_v25 = vpop.f32.mrf.mxu0  ;;  %v1964_v29 = vpop.f32.mrf.mxu1 }
 0x169   : > { %v12281_v19 = vadd.f32 %v1948_v51, %v1472_v25  ;;  %16229 = vst [vmem:[#allocation36_spill] sm:$0xff] %v12283_v6 }
 0x16a   : > { %v2161_v63 = vadd.f32 %v2160_v55, %v2159_v1  ;;  %v10245_v21 = vpop.f32.mrf.mxu0  ;;  %v2166_v1 = vsel %vm2056_vm3, %v12283_v6, 0.0  ;;  %v10331_v25 = vpop.f32.mrf.mxu1 }
 0x16b   : > { %16228 = vst [vmem:[#allocation35_spill] sm:$0xff] %v12281_v19  ;;  %v2162_v39 = vsel %vm2056_vm3, %v12281_v19, 0.0  ;;  %v12293_v55 = vadd.f32 %v10327_v43, %v10245_v21 }
 0x16c   : > { %v2163_v20 = vadd.f32 %v2162_v39, %v2161_v63  ;;  %v1485_v13 = vpop.f32.mrf.mxu0  ;;  %v1977_v19 = vpop.f32.mrf.mxu1 }
 0x16d   : > { %v12289_v58 = vadd.f32 %v1961_v33, %v1485_v13  ;;  %16231 = vst [vmem:[#allocation38_spill] sm:$0xff] %v12293_v55  ;;  %v2172_v43 = vsel %vm2056_vm3, %v12293_v55, 0.0 }
 0x16e   : > { %v2165_v27 = vadd.f32 %v2164_v49, %v2163_v20  ;;  %v10246_v51 = vpop.f32.mrf.mxu0  ;;  %v10332_v49 = vpop.f32.mrf.mxu1 }
 0x16f   : > { %16230 = vst [vmem:[#allocation37_spill] sm:$0xff] %v12289_v58  ;;  %v2168_v63 = vsel %vm2056_vm3, %v12289_v58, 0.0  ;;  %v12299_v33 = vadd.f32 %v10328_v47, %v10246_v51 }
 0x170   : > { %v2167_v53 = vadd.f32 %v2166_v1, %v2165_v27  ;;  %v1488_v46 = vpop.f32.mrf.mxu0  ;;  %v1980_v27 = vpop.f32.mrf.mxu1 }
 0x171   : > { %v12297_v39 = vadd.f32 %v1964_v29, %v1488_v46  ;;  %16233 = vst [vmem:[#allocation40_spill] sm:$0xff] %v12299_v33 }
 0x172   : > { %v2169_v3 = vadd.f32 %v2168_v63, %v2167_v53  ;;  %v10249_v13 = vpop.f32.mrf.mxu0  ;;  %v2174_v53 = vsel %vm2056_vm3, %v12299_v33, 0.0  ;;  %v10335_v46 = vpop.f32.mrf.mxu1 }
 0x173   : > { %16232 = vst [vmem:[#allocation39_spill] sm:$0xff] %v12297_v39  ;;  %v2170_v20 = vsel %vm2056_vm3, %v12297_v39, 0.0  ;;  %v12309_v63 = vadd.f32 %v10331_v25, %v10249_v13 }
 0x174   : > { %v2171_v6 = vadd.f32 %v2170_v20, %v2169_v3  ;;  %v1501_v5 = vpop.f32.mrf.mxu0  ;;  %v1993_v39 = vpop.f32.mrf.mxu1 }
 0x175   : > { %v12305_v21 = vadd.f32 %v1977_v19, %v1501_v5  ;;  %16235 = vst [vmem:[#allocation42_spill] sm:$0xff] %v12309_v63  ;;  %v2180_v25 = vsel %vm2056_vm3, %v12309_v63, 0.0 }
 0x176   : > { %v2173_v1 = vadd.f32 %v2172_v43, %v2171_v6  ;;  %v10250_v29 = vpop.f32.mrf.mxu0  ;;  %v10336_v43 = vpop.f32.mrf.mxu1 }
 0x177   : > { %16234 = vst [vmem:[#allocation41_spill] sm:$0xff] %v12305_v21  ;;  %v2176_v3 = vsel %vm2056_vm3, %v12305_v21, 0.0  ;;  %v12315_v19 = vadd.f32 %v10332_v49, %v10250_v29 }
 0x178   : > { %v2175_v47 = vadd.f32 %v2174_v53, %v2173_v1  ;;  %v1504_v51 = vpop.f32.mrf.mxu0  ;;  %v1996_v1 = vpop.f32.mrf.mxu1 }
 0x179   : > { %v12313_v20 = vadd.f32 %v1980_v27, %v1504_v51  ;;  %16237 = vst [vmem:[#allocation44_spill] sm:$0xff] %v12315_v19 }
 0x17a   : > { %v2177_v55 = vadd.f32 %v2176_v3, %v2175_v47  ;;  %v10253_v5 = vpop.f32.mrf.mxu0  ;;  %v2182_v47 = vsel %vm2056_vm3, %v12315_v19, 0.0  ;;  %v10339_v51 = vpop.f32.mrf.mxu1 }
 0x17b   : > { %16236 = vst [vmem:[#allocation43_spill] sm:$0xff] %v12313_v20  ;;  %v2178_v6 = vsel %vm2056_vm3, %v12313_v20, 0.0  ;;  %v12325_v3 = vadd.f32 %v10335_v46, %v10253_v5 }
 0x17c   : > { %v2179_v33 = vadd.f32 %v2178_v6, %v2177_v55  ;;  %v1517_v58 = vpop.f32.mrf.mxu0  ;;  %v2009_v20 = vpop.f32.mrf.mxu1 }
 0x17d   : > { %v12321_v13 = vadd.f32 %v1993_v39, %v1517_v58  ;;  %16239 = vst [vmem:[#allocation46_spill] sm:$0xff] %v12325_v3  ;;  %v2188_v46 = vsel %vm2056_vm3, %v12325_v3, 0.0 }
 0x17e   : > { %v2181_v53 = vadd.f32 %v2180_v25, %v2179_v33  ;;  %v10254_v27 = vpop.f32.mrf.mxu0  ;;  %v10340_v25 = vpop.f32.mrf.mxu1 }
 0x17f   : > { %16238 = vst [vmem:[#allocation45_spill] sm:$0xff] %v12321_v13  ;;  %v2184_v55 = vsel %vm2056_vm3, %v12321_v13, 0.0  ;;  %v12331_v39 = vadd.f32 %v10336_v43, %v10254_v27 }
 0x180   : > { %v2183_v49 = vadd.f32 %v2182_v47, %v2181_v53  ;;  %v1520_v29 = vpop.f32.mrf.mxu0  ;;  %v2012_v53 = vpop.f32.mrf.mxu1 }
 0x181   : > { %v12329_v6 = vadd.f32 %v1996_v1, %v1520_v29 }
 0x182   : > { %v2185_v63 = vadd.f32 %v2184_v55, %v2183_v49  ;;  %v10257_v58 = vpop.f32.mrf.mxu0  ;;  %v2190_v49 = vsel %vm2056_vm3, %v12331_v39, 0.0  ;;  %v10343_v29 = vpop.f32.mrf.mxu1 }
 0x183   : > { %v2186_v33 = vsel %vm2056_vm3, %v12329_v6, 0.0  ;;  %v2018_v55 = vadd.f32 %v10339_v51, %v10257_v58 }
 0x184   : > { %v2187_v19 = vadd.f32 %v2186_v33, %v2185_v63  ;;  %v1533_v21 = vpop.f32.mrf.mxu0  ;;  %v2025_v33 = vpop.f32.mrf.mxu1 }
 0x185   : > { %v12337_v5 = vadd.f32 %v2009_v20, %v1533_v21  ;;  %v2196_v23 = vsel %vm2056_vm3, %v2018_v55, 0.0 }
 0x186   : > { %v2189_v47 = vadd.f32 %v2188_v46, %v2187_v19  ;;  %v10258_v1 = vpop.f32.mrf.mxu0  ;;  %v10344_v20 = vpop.f32.mrf.mxu1 }
 0x187   : > { %v2192_v13 = vsel %vm2056_vm3, %v12337_v5, 0.0  ;;  %v2021_v3 = vadd.f32 %v10340_v25, %v10258_v1 }
 0x188   : > { %v2191_v43 = vadd.f32 %v2190_v49, %v2189_v47  ;;  %v1536_v27 = vpop.f32.mrf.mxu0  ;;  %v2028_v15 = vpop.f32.mrf.mxu1 }
 0x189   : > { %v2013_v63 = vadd.f32 %v2012_v53, %v1536_v27  ;;  %v2198_v51 = vsel %vm2056_vm3, %v2021_v3, 0.0 }
 0x18a   : > { %v2193_v0 = vadd.f32 %v2192_v13, %v2191_v43  ;;  %v10261_v40 = vpop.f32.mrf.mxu0  ;;  %v10347_v58 = vpop.f32.mrf.mxu1 }
 0x18b   : > { %v2194_v21 = vsel %vm2056_vm3, %v2013_v63, 0.0  ;;  %v2034_v27 = vadd.f32 %v10343_v29, %v10261_v40 }
 0x18c   : > { %v2195_v19 = vadd.f32 %v2194_v21, %v2193_v0  ;;  %v1549_v46 = vpop.f32.mrf.mxu0  ;;  %v2041_v1 = vpop.f32.mrf.mxu1 }
 0x18d   : > { %v2026_v9 = vadd.f32 %v2025_v33, %v1549_v46 }
 0x18e   : > { %v2197_v47 = vadd.f32 %v2196_v23, %v2195_v19  ;;  %v10262_v49 = vpop.f32.mrf.mxu0  ;;  %v10348_v33 = vpop.f32.mrf.mxu1  ;;  %v2204_v23 = vsel %vm2056_vm3, %v2034_v27, 0.0 }
 0x18f   : > { %v2200_v13 = vsel %vm2056_vm3, %v2026_v9, 0.0  ;;  %v2037_v0 = vadd.f32 %v10344_v20, %v10262_v49 }
 0x190   : > { %v2199_v54 = vadd.f32 %v2198_v51, %v2197_v47  ;;  %v1552_v53 = vpop.f32.mrf.mxu0  ;;  %v2044_v29 = vpop.f32.mrf.mxu1 }
 0x191   : > { %v2029_v25 = vadd.f32 %v2028_v15, %v1552_v53  ;;  %v2206_v47 = vsel %vm2056_vm3, %v2037_v0, 0.0 }
 0x192   : > { %v2201_v43 = vadd.f32 %v2200_v13, %v2199_v54  ;;  %v10265_v44 = vpop.f32.mrf.mxu0 }
 0x193   : > { %v2202_v21 = vsel %vm2056_vm3, %v2029_v25, 0.0  ;;  %v2050_v15 = vadd.f32 %v10347_v58, %v10265_v44 }
 0x194   : > { %v2203_v31 = vadd.f32 %v2202_v21, %v2201_v43  ;;  %v1565_v46 = vpop.f32.mrf.mxu0 }
 0x195   : > { %v2042_v19 = vadd.f32 %v2041_v1, %v1565_v46  ;;  %v2212_v21 = vsel %vm2056_vm3, %v2050_v15, 0.0 }
 0x196   : > { %v2205_v38 = vadd.f32 %v2204_v23, %v2203_v31  ;;  %v10266_v18 = vpop.f32.mrf.mxu0 }
 0x197   : > { %v2208_v54 = vsel %vm2056_vm3, %v2042_v19, 0.0  ;;  %v2053_v49 = vadd.f32 %v10348_v33, %v10266_v18 }
 0x198   : > { %v2207_v40 = vadd.f32 %v2206_v47, %v2205_v38  ;;  %v1568_v51 = vpop.f32.mrf.mxu0 }
 0x199   : > { %v2045_v53 = vadd.f32 %v2044_v29, %v1568_v51  ;;  %v2215_v31 = vsel %vm2214_vm4, %v2053_v49, 0.0 }
 0x19a   : > { %v2209_v20 = vadd.f32 %v2208_v54, %v2207_v40 }
 0x19b   : > { %v2210_v13 = vsel %vm2056_vm3, %v2045_v53, 0.0 }
 0x19c   : > { %v2211_v43 = vadd.f32 %v2210_v13, %v2209_v20 }
 0x19e   : > { %v2213_v1 = vadd.f32 %v2212_v21, %v2211_v43 }
 0x1a0   : > { %v2216_v46 = vadd.f32 %v2215_v31, %v2213_v1 }
 0x1a2   : > { %v2217_v23 = vrot.slane %v2216_v46, 4 }
 0x1a4   : > { %v2218_v38 = vadd.f32 %v2217_v23, %v2216_v46 }
 0x1a6   : > { %v2219_v47 = vrot.slane %v2218_v38, 2 }
 0x1a8   : > { %v2220_v4 = vadd.f32 %v2219_v47, %v2218_v38 }
 0x1aa   : > { %v2221_v44 = vrot.slane %v2220_v4, 1 }
 0x1ac   : > { %v2222_v58 = vadd.f32 %v2221_v44, %v2220_v4 }
 0x1ae   : > { %v12354_v57 = vmul.f32 0.0015649452, %v2222_v58 }
 0x1b0   : > { %v12358_v18 = vsub.f32 %v12329_v6, %v12354_v57  ;;  %v12362_v33 = vsub.f32 %v12331_v39, %v12354_v57  ;;  %v12366_v40 = vsub.f32 %v12337_v5, %v12354_v57  ;;  %v12369_v29 = vsub.f32 %v2013_v63, %v12354_v57 }
 0x1b1   : > { %v12372_v51 = vsub.f32 %v2018_v55, %v12354_v57  ;;  %v12375_v4 = vsub.f32 %v2021_v3, %v12354_v57  ;;  %v12378_v6 = vsub.f32 %v2026_v9, %v12354_v57  ;;  %v12381_v54 = vsub.f32 %v2029_v25, %v12354_v57 }
 0x1b2   : > { %v12384_v39 = vsub.f32 %v2034_v27, %v12354_v57  ;;  %v12387_v5 = vsub.f32 %v2037_v0, %v12354_v57  ;;  %v12390_v63 = vsub.f32 %v2042_v19, %v12354_v57  ;;  %v12393_v55 = vsub.f32 %v2045_v53, %v12354_v57 }
 0x1b3   : > { %v12396_v3 = vsub.f32 %v2050_v15, %v12354_v57  ;;  %v12399_v9 = vsub.f32 %v2053_v49, %v12354_v57  ;;  %v12403_v25 = vsub.f32 %v12067_v8, %v12354_v57  ;;  %v12407_v27 = vsub.f32 %v12071_v12, %v12354_v57 }
 0x1b4   : > { %16240 = vst [vmem:[#allocation47_spill] sm:$0xff] %v12384_v39  ;;  %16241 = vst [vmem:[#allocation48_spill] sm:$0xff] %v12387_v5  ;;  %v12411_v0 = vsub.f32 %v12069_v11, %v12354_v57  ;;  %v12415_v19 = vsub.f32 %v12075_v16, %v12354_v57  ;;  %v12423_v8 = vsub.f32 %v12081_v22, %v12354_v57 }
 0x1b5   : > { %16242 = vst [vmem:[#allocation49_spill] sm:$0xff] %v12390_v63  ;;  %16243 = vst [vmem:[#allocation50_spill] sm:$0xff] %v12396_v3  ;;  %v2305_v15 = vmul.f32 %v12403_v25, %v12403_v25  ;;  %v2306_v53 = vmul.f32 %v12407_v27, %v12407_v27  ;;  %v12429_v11 = vsub.f32 %v12089_v32, %v12354_v57 }
 0x1b6   : > { %v2307_v12 = vmul.f32 %v12411_v0, %v12411_v0  ;;  %v2308_v16 = vmul.f32 %v12415_v19, %v12415_v19  ;;  %v12437_v43 = vsub.f32 %v12085_v30, %v12354_v57  ;;  %v2309_v22 = vmul.f32 %v12423_v8, %v12423_v8 }
 0x1b7   : > { %v2385_v20 = vsel %vm2056_vm3, %v2305_v15, 0.0  ;;  %v2386_v49 = vsel %vm2056_vm3, %v2306_v53, 0.0  ;;  %v12444_v32 = vsub.f32 %v12091_v36, %v12354_v57  ;;  %v2310_v31 = vmul.f32 %v12429_v11, %v12429_v11 }
 0x1b8   : > { %v2387_v13 = vadd.f32 %v2386_v49, %v2385_v20  ;;  %v2388_v21 = vsel %vm2056_vm3, %v2307_v12, 0.0  ;;  %v2390_v46 = vsel %vm2056_vm3, %v2308_v16, 0.0  ;;  %v12451_v30 = vsub.f32 %v12097_v42, %v12354_v57 }
 0x1b9   : > { %v2311_v38 = vmul.f32 %v12437_v43, %v12437_v43  ;;  %v2392_v47 = vsel %vm2056_vm3, %v2309_v22, 0.0  ;;  %v12458_v36 = vsub.f32 %v12105_v52, %v12354_v57  ;;  %v2312_v58 = vmul.f32 %v12444_v32, %v12444_v32 }
 0x1ba   : > { %v2389_v1 = vadd.f32 %v2388_v21, %v2387_v13  ;;  %v2394_v15 = vsel %vm2056_vm3, %v2310_v31, 0.0  ;;  %v12465_v42 = vsub.f32 %v12101_v50, %v12354_v57  ;;  %v2313_v12 = vmul.f32 %v12451_v30, %v12451_v30 }
 0x1bb   : > { %v2396_v16 = vsel %vm2056_vm3, %v2311_v38, 0.0  ;;  %v12472_v52 = vsub.f32 %v12107_v56, %v12354_v57  ;;  %v2314_v49 = vmul.f32 %v12458_v36, %v12458_v36  ;;  %v2398_v13 = vsel %vm2056_vm3, %v2312_v58, 0.0 }
 0x1bc   : > { %v2391_v23 = vadd.f32 %v2390_v46, %v2389_v1  ;;  %v12479_v50 = vsub.f32 %v12113_v62, %v12354_v57  ;;  %v2315_v21 = vmul.f32 %v12465_v42, %v12465_v42  ;;  %v2400_v1 = vsel %vm2056_vm3, %v2313_v12, 0.0 }
 0x1bd   : > { %v12486_v56 = vsub.f32 %v12121_v10, %v12354_v57  ;;  %v2316_v46 = vmul.f32 %v12472_v52, %v12472_v52  ;;  %v12493_v62 = vsub.f32 %v12117_v7, %v12354_v57  ;;  %v12500_v10 = vsub.f32 %v12123_v17, %v12354_v57 }
 0x1be   : > { %v2393_v44 = vadd.f32 %v2392_v47, %v2391_v23  ;;  %v2402_v23 = vsel %vm2056_vm3, %v2314_v49, 0.0  ;;  %v2317_v47 = vmul.f32 %v12479_v50, %v12479_v50  ;;  %v12507_v7 = vsub.f32 %v12129_v24, %v12354_v57 }
 0x1bf   : > { %v12514_v17 = vsub.f32 %v12137_v37, %v12354_v57  ;;  %v12521_v24 = vsub.f32 %v12133_v34, %v12354_v57  ;;  %v12528_v37 = vsub.f32 %v12139_v41, %v12354_v57  ;;  %v12535_v34 = vsub.f32 %v12145_v48, %v12354_v57 }
 0x1c0   : > { %v2395_v53 = vadd.f32 %v2394_v15, %v2393_v44  ;;  %v2404_v44 = vsel %vm2056_vm3, %v2315_v21, 0.0  ;;  %v2318_v15 = vmul.f32 %v12486_v56, %v12486_v56  ;;  %v12542_v41 = vsub.f32 %v12153_v61, %v12354_v57 }
 0x1c1   : > { %v12549_v48 = vsub.f32 %v12149_v59, %v12354_v57  ;;  %v12556_v61 = vsub.f32 %v12155_v2, %v12354_v57  ;;  %v12563_v59 = vsub.f32 %v12161_v14, %v12354_v57  ;;  %v12570_v2 = vsub.f32 %v12169_v28, %v12354_v57 }
 0x1c2   : > { %v2397_v20 = vadd.f32 %v2396_v16, %v2395_v53  ;;  %v2406_v53 = vsel %vm2056_vm3, %v2316_v46, 0.0  ;;  %v2319_v16 = vmul.f32 %v12493_v62, %v12493_v62  ;;  %v12577_v14 = vsub.f32 %v12165_v26, %v12354_v57 }
 0x1c3   : > { %v12584_v28 = vsub.f32 %v12171_v35, %v12354_v57  ;;  %v12591_v26 = vsub.f32 %v12177_v45, %v12354_v57  ;;  %v12598_v35 = vsub.f32 %v12185_v60, %v12354_v57 }
 0x1c4   : > { %v2399_v22 = vadd.f32 %v2398_v13, %v2397_v20  ;;  %v2408_v20 = vsel %vm2056_vm3, %v2317_v47, 0.0  ;;  %v2320_v13 = vmul.f32 %v12500_v10, %v12500_v10 }
 0x1c6   : > { %v2401_v31 = vadd.f32 %v2400_v1, %v2399_v22  ;;  %v2410_v22 = vsel %vm2056_vm3, %v2318_v15, 0.0  ;;  %v2321_v1 = vmul.f32 %v12507_v7, %v12507_v7 }
 0x1c8   : > { %v2403_v38 = vadd.f32 %v2402_v23, %v2401_v31  ;;  %v2412_v31 = vsel %vm2056_vm3, %v2319_v16, 0.0  ;;  %v2322_v23 = vmul.f32 %v12514_v17, %v12514_v17 }
 0x1ca   : > { %v2405_v58 = vadd.f32 %v2404_v44, %v2403_v38  ;;  %v2414_v38 = vsel %vm2056_vm3, %v2320_v13, 0.0  ;;  %v2323_v44 = vmul.f32 %v12521_v24, %v12521_v24 }
 0x1cc   : > { %v2407_v12 = vadd.f32 %v2406_v53, %v2405_v58  ;;  %v2416_v58 = vsel %vm2056_vm3, %v2321_v1, 0.0  ;;  %v2324_v53 = vmul.f32 %v12528_v37, %v12528_v37 }
 0x1ce   : > { %v2409_v49 = vadd.f32 %v2408_v20, %v2407_v12  ;;  %v2418_v12 = vsel %vm2056_vm3, %v2322_v23, 0.0  ;;  %v2325_v20 = vmul.f32 %v12535_v34, %v12535_v34 }
 0x1d0   : > { %v2411_v21 = vadd.f32 %v2410_v22, %v2409_v49  ;;  %v2420_v49 = vsel %vm2056_vm3, %v2323_v44, 0.0  ;;  %v2326_v22 = vmul.f32 %v12542_v41, %v12542_v41 }
 0x1d2   : > { %v2413_v46 = vadd.f32 %v2412_v31, %v2411_v21  ;;  %v2422_v21 = vsel %vm2056_vm3, %v2324_v53, 0.0  ;;  %v2327_v31 = vmul.f32 %v12549_v48, %v12549_v48 }
 0x1d4   : > { %v2415_v47 = vadd.f32 %v2414_v38, %v2413_v46  ;;  %v2424_v46 = vsel %vm2056_vm3, %v2325_v20, 0.0  ;;  %v2328_v38 = vmul.f32 %v12556_v61, %v12556_v61 }
 0x1d6   : > { %v2417_v15 = vadd.f32 %v2416_v58, %v2415_v47  ;;  %v2426_v47 = vsel %vm2056_vm3, %v2326_v22, 0.0  ;;  %v2329_v58 = vmul.f32 %v12563_v59, %v12563_v59 }
 0x1d8   : > { %v2419_v16 = vadd.f32 %v2418_v12, %v2417_v15  ;;  %v2428_v15 = vsel %vm2056_vm3, %v2327_v31, 0.0  ;;  %v2330_v12 = vmul.f32 %v12570_v2, %v12570_v2 }
 0x1da   : > { %v2421_v13 = vadd.f32 %v2420_v49, %v2419_v16  ;;  %v2430_v16 = vsel %vm2056_vm3, %v2328_v38, 0.0  ;;  %v2331_v49 = vmul.f32 %v12577_v14, %v12577_v14 }
 0x1dc   : > { %v2423_v1 = vadd.f32 %v2422_v21, %v2421_v13  ;;  %v2432_v13 = vsel %vm2056_vm3, %v2329_v58, 0.0  ;;  %v2332_v21 = vmul.f32 %v12584_v28, %v12584_v28  ;;  %v2436_v38 = vsel %vm2056_vm3, %v2331_v49, 0.0 }
 0x1dd   : > { %v2334_v58 = vmul.f32 %v12598_v35, %v12598_v35 }
 0x1de   : > { %v2425_v23 = vadd.f32 %v2424_v46, %v2423_v1  ;;  %v2434_v1 = vsel %vm2056_vm3, %v2330_v12, 0.0  ;;  %v16244_v46 = vld [vmem:[#allocation11_spill] sm:$0xff]  ;;  %v16246_v12 = vld [vmem:[#allocation13_spill] sm:$0xff] }
 0x1df   : > { %v12605_v45 = vsub.f32 %v16244_v46, %v12354_v57 }
 0x1e0   : > { %v2427_v44 = vadd.f32 %v2426_v47, %v2425_v23  ;;  %v2333_v23 = vmul.f32 %v12591_v26, %v12591_v26 }
 0x1e2   : > { %v2429_v53 = vadd.f32 %v2428_v15, %v2427_v44  ;;  %v16245_v44 = vld [vmem:[#allocation12_spill] sm:$0xff]  ;;  %v2438_v15 = vsel %vm2056_vm3, %v2332_v21, 0.0  ;;  %v2440_v49 = vsel %vm2056_vm3, %v2333_v23, 0.0  ;;  %v2442_v21 = vsel %vm2056_vm3, %v2334_v58, 0.0 }
 0x1e3   : > { %v12612_v60 = vsub.f32 %v16245_v44, %v12354_v57 }
 0x1e4   : > { %v2431_v20 = vadd.f32 %v2430_v16, %v2429_v53  ;;  %v12619_v16 = vsub.f32 %v16246_v12, %v12354_v57 }
 0x1e6   : > { %v2433_v22 = vadd.f32 %v2432_v13, %v2431_v20  ;;  %16247 = vst [vmem:[#allocation11_spill] sm:$0xff] %v12619_v16  ;;  %v2335_v20 = vmul.f32 %v12605_v45, %v12605_v45  ;;  %v2337_v44 = vmul.f32 %v12619_v16, %v12619_v16 }
 0x1e8   : > { %v2435_v31 = vadd.f32 %v2434_v1, %v2433_v22  ;;  %v16248_v22 = vld [vmem:[#allocation15_spill] sm:$0xff]  ;;  %v2444_v23 = vsel %vm2056_vm3, %v2335_v20, 0.0  ;;  %v2448_v20 = vsel %vm2056_vm3, %v2337_v44, 0.0 }
 0x1e9   : > { %v12626_v1 = vsub.f32 %v16248_v22, %v12354_v57  ;;  %v16254_v22 = vld [vmem:[#allocation17_spill] sm:$0xff] }
 0x1ea   : > { %v2437_v47 = vadd.f32 %v2436_v38, %v2435_v31  ;;  %v2336_v31 = vmul.f32 %v12612_v60, %v12612_v60  ;;  %v16250_v38 = vld [vmem:[#allocation14_spill] sm:$0xff] }
 0x1eb   : > { %16249 = vst [vmem:[#allocation12_spill] sm:$0xff] %v12626_v1 }
 0x1ec   : > { %v2439_v53 = vadd.f32 %v2438_v15, %v2437_v47  ;;  %v12633_v47 = vsub.f32 %v16250_v38, %v12354_v57  ;;  %v2446_v58 = vsel %vm2056_vm3, %v2336_v31, 0.0 }
 0x1ee   : > { %v2441_v13 = vadd.f32 %v2440_v49, %v2439_v53  ;;  %16251 = vst [vmem:[#allocation13_spill] sm:$0xff] %v12633_v47  ;;  %v16252_v53 = vld [vmem:[#allocation16_spill] sm:$0xff]  ;;  %v2338_v49 = vmul.f32 %v12626_v1, %v12626_v1  ;;  %v2339_v38 = vmul.f32 %v12633_v47, %v12633_v47 }
 0x1ef   : > { %v12640_v12 = vsub.f32 %v16252_v53, %v12354_v57 }
 0x1f0   : > { %v2443_v46 = vadd.f32 %v2442_v21, %v2441_v13  ;;  %v12647_v21 = vsub.f32 %v16254_v22, %v12354_v57  ;;  %v2450_v31 = vsel %vm2056_vm3, %v2338_v49, 0.0  ;;  %v2452_v44 = vsel %vm2056_vm3, %v2339_v38, 0.0 }
 0x1f1   : > { %16253 = vst [vmem:[#allocation15_spill] sm:$0xff] %v12640_v12  ;;  %v2340_v1 = vmul.f32 %v12640_v12, %v12640_v12 }
 0x1f2   : > { %v2445_v15 = vadd.f32 %v2444_v23, %v2443_v46  ;;  %16255 = vst [vmem:[#allocation14_spill] sm:$0xff] %v12647_v21  ;;  %v16256_v23 = vld [vmem:[#allocation19_spill] sm:$0xff]  ;;  %v2341_v47 = vmul.f32 %v12647_v21, %v12647_v21 }
 0x1f3   : > { %v12654_v53 = vsub.f32 %v16256_v23, %v12354_v57  ;;  %v2454_v49 = vsel %vm2056_vm3, %v2340_v1, 0.0 }
 0x1f4   : > { %v2447_v13 = vadd.f32 %v2446_v58, %v2445_v15  ;;  %v16258_v58 = vld [vmem:[#allocation18_spill] sm:$0xff]  ;;  %v2456_v38 = vsel %vm2056_vm3, %v2341_v47, 0.0 }
 0x1f5   : > { %16257 = vst [vmem:[#allocation16_spill] sm:$0xff] %v12654_v53  ;;  %v12661_v22 = vsub.f32 %v16258_v58, %v12354_v57  ;;  %v2342_v12 = vmul.f32 %v12654_v53, %v12654_v53 }
 0x1f6   : > { %v2449_v46 = vadd.f32 %v2448_v20, %v2447_v13  ;;  %v16260_v20 = vld [vmem:[#allocation20_spill] sm:$0xff] }
 0x1f7   : > { %16259 = vst [vmem:[#allocation17_spill] sm:$0xff] %v12661_v22  ;;  %v12668_v23 = vsub.f32 %v16260_v20, %v12354_v57  ;;  %v2343_v21 = vmul.f32 %v12661_v22, %v12661_v22  ;;  %v2458_v1 = vsel %vm2056_vm3, %v2342_v12, 0.0 }
 0x1f8   : > { %v2451_v15 = vadd.f32 %v2450_v31, %v2449_v46  ;;  %v16262_v31 = vld [vmem:[#allocation21_spill] sm:$0xff] }
 0x1f9   : > { %16261 = vst [vmem:[#allocation19_spill] sm:$0xff] %v12668_v23  ;;  %v12675_v58 = vsub.f32 %v16262_v31, %v12354_v57  ;;  %v2344_v53 = vmul.f32 %v12668_v23, %v12668_v23  ;;  %v2460_v47 = vsel %vm2056_vm3, %v2343_v21, 0.0 }
 0x1fa   : > { %v2453_v13 = vadd.f32 %v2452_v44, %v2451_v15  ;;  %v16264_v44 = vld [vmem:[#allocation23_spill] sm:$0xff] }
 0x1fb   : > { %16263 = vst [vmem:[#allocation18_spill] sm:$0xff] %v12675_v58  ;;  %v12682_v20 = vsub.f32 %v16264_v44, %v12354_v57  ;;  %v2345_v22 = vmul.f32 %v12675_v58, %v12675_v58  ;;  %v2462_v12 = vsel %vm2056_vm3, %v2344_v53, 0.0 }
 0x1fc   : > { %v2455_v46 = vadd.f32 %v2454_v49, %v2453_v13  ;;  %v16266_v49 = vld [vmem:[#allocation22_spill] sm:$0xff] }
 0x1fd   : > { %16265 = vst [vmem:[#allocation20_spill] sm:$0xff] %v12682_v20  ;;  %v12689_v31 = vsub.f32 %v16266_v49, %v12354_v57  ;;  %v2346_v23 = vmul.f32 %v12682_v20, %v12682_v20  ;;  %v2464_v21 = vsel %vm2056_vm3, %v2345_v22, 0.0 }
 0x1fe   : > { %v2457_v15 = vadd.f32 %v2456_v38, %v2455_v46  ;;  %v16268_v38 = vld [vmem:[#allocation24_spill] sm:$0xff] }
 0x1ff   : > { %16267 = vst [vmem:[#allocation21_spill] sm:$0xff] %v12689_v31  ;;  %v12696_v44 = vsub.f32 %v16268_v38, %v12354_v57  ;;  %v2347_v58 = vmul.f32 %v12689_v31, %v12689_v31  ;;  %v2466_v53 = vsel %vm2056_vm3, %v2346_v23, 0.0 }
 0x200   : > { %v2459_v13 = vadd.f32 %v2458_v1, %v2457_v15  ;;  %v16270_v1 = vld [vmem:[#allocation25_spill] sm:$0xff] }
 0x201   : > { %16269 = vst [vmem:[#allocation23_spill] sm:$0xff] %v12696_v44  ;;  %v12703_v49 = vsub.f32 %v16270_v1, %v12354_v57  ;;  %v2348_v20 = vmul.f32 %v12696_v44, %v12696_v44  ;;  %v2468_v22 = vsel %vm2056_vm3, %v2347_v58, 0.0 }
 0x202   : > { %v2461_v46 = vadd.f32 %v2460_v47, %v2459_v13  ;;  %v16272_v47 = vld [vmem:[#allocation27_spill] sm:$0xff] }
 0x203   : > { %16271 = vst [vmem:[#allocation22_spill] sm:$0xff] %v12703_v49  ;;  %v12710_v38 = vsub.f32 %v16272_v47, %v12354_v57  ;;  %v2349_v31 = vmul.f32 %v12703_v49, %v12703_v49  ;;  %v2470_v23 = vsel %vm2056_vm3, %v2348_v20, 0.0 }
 0x204   : > { %v2463_v15 = vadd.f32 %v2462_v12, %v2461_v46  ;;  %v16274_v12 = vld [vmem:[#allocation26_spill] sm:$0xff] }
 0x205   : > { %16273 = vst [vmem:[#allocation24_spill] sm:$0xff] %v12710_v38  ;;  %v12717_v1 = vsub.f32 %v16274_v12, %v12354_v57  ;;  %v2350_v44 = vmul.f32 %v12710_v38, %v12710_v38  ;;  %v2472_v58 = vsel %vm2056_vm3, %v2349_v31, 0.0 }
 0x206   : > { %v2465_v13 = vadd.f32 %v2464_v21, %v2463_v15  ;;  %v16276_v21 = vld [vmem:[#allocation28_spill] sm:$0xff] }
 0x207   : > { %16275 = vst [vmem:[#allocation25_spill] sm:$0xff] %v12717_v1  ;;  %v12724_v47 = vsub.f32 %v16276_v21, %v12354_v57  ;;  %v2351_v49 = vmul.f32 %v12717_v1, %v12717_v1  ;;  %v2474_v20 = vsel %vm2056_vm3, %v2350_v44, 0.0 }
 0x208   : > { %v2467_v46 = vadd.f32 %v2466_v53, %v2465_v13  ;;  %v16278_v53 = vld [vmem:[#allocation29_spill] sm:$0xff] }
 0x209   : > { %16277 = vst [vmem:[#allocation27_spill] sm:$0xff] %v12724_v47  ;;  %v12731_v12 = vsub.f32 %v16278_v53, %v12354_v57  ;;  %v2352_v38 = vmul.f32 %v12724_v47, %v12724_v47  ;;  %v2476_v31 = vsel %vm2056_vm3, %v2351_v49, 0.0 }
 0x20a   : > { %v2469_v15 = vadd.f32 %v2468_v22, %v2467_v46  ;;  %v16280_v22 = vld [vmem:[#allocation31_spill] sm:$0xff] }
 0x20b   : > { %16279 = vst [vmem:[#allocation26_spill] sm:$0xff] %v12731_v12  ;;  %v12738_v21 = vsub.f32 %v16280_v22, %v12354_v57  ;;  %v2353_v1 = vmul.f32 %v12731_v12, %v12731_v12  ;;  %v2478_v44 = vsel %vm2056_vm3, %v2352_v38, 0.0 }
 0x20c   : > { %v2471_v13 = vadd.f32 %v2470_v23, %v2469_v15  ;;  %v16282_v23 = vld [vmem:[#allocation30_spill] sm:$0xff] }
 0x20d   : > { %16281 = vst [vmem:[#allocation28_spill] sm:$0xff] %v12738_v21  ;;  %v12745_v53 = vsub.f32 %v16282_v23, %v12354_v57  ;;  %v2354_v47 = vmul.f32 %v12738_v21, %v12738_v21  ;;  %v2480_v49 = vsel %vm2056_vm3, %v2353_v1, 0.0 }
 0x20e   : > { %v2473_v46 = vadd.f32 %v2472_v58, %v2471_v13  ;;  %v16284_v58 = vld [vmem:[#allocation32_spill] sm:$0xff] }
 0x20f   : > { %16283 = vst [vmem:[#allocation29_spill] sm:$0xff] %v12745_v53  ;;  %v12752_v22 = vsub.f32 %v16284_v58, %v12354_v57  ;;  %v2355_v12 = vmul.f32 %v12745_v53, %v12745_v53  ;;  %v2482_v38 = vsel %vm2056_vm3, %v2354_v47, 0.0 }
 0x210   : > { %v2475_v15 = vadd.f32 %v2474_v20, %v2473_v46  ;;  %v16286_v20 = vld [vmem:[#allocation33_spill] sm:$0xff] }
 0x211   : > { %16285 = vst [vmem:[#allocation31_spill] sm:$0xff] %v12752_v22  ;;  %v12759_v23 = vsub.f32 %v16286_v20, %v12354_v57  ;;  %v2356_v21 = vmul.f32 %v12752_v22, %v12752_v22  ;;  %v2484_v1 = vsel %vm2056_vm3, %v2355_v12, 0.0 }
 0x212   : > { %v2477_v13 = vadd.f32 %v2476_v31, %v2475_v15  ;;  %v16288_v31 = vld [vmem:[#allocation35_spill] sm:$0xff] }
 0x213   : > { %16287 = vst [vmem:[#allocation30_spill] sm:$0xff] %v12759_v23  ;;  %v12766_v58 = vsub.f32 %v16288_v31, %v12354_v57  ;;  %v2357_v53 = vmul.f32 %v12759_v23, %v12759_v23  ;;  %v2486_v47 = vsel %vm2056_vm3, %v2356_v21, 0.0 }
 0x214   : > { %v2479_v46 = vadd.f32 %v2478_v44, %v2477_v13  ;;  %v16290_v44 = vld [vmem:[#allocation34_spill] sm:$0xff] }
 0x215   : > { %16289 = vst [vmem:[#allocation32_spill] sm:$0xff] %v12766_v58  ;;  %v12773_v20 = vsub.f32 %v16290_v44, %v12354_v57  ;;  %v2358_v22 = vmul.f32 %v12766_v58, %v12766_v58  ;;  %v2488_v12 = vsel %vm2056_vm3, %v2357_v53, 0.0 }
 0x216   : > { %v2481_v15 = vadd.f32 %v2480_v49, %v2479_v46  ;;  %v16292_v49 = vld [vmem:[#allocation36_spill] sm:$0xff] }
 0x217   : > { %16291 = vst [vmem:[#allocation33_spill] sm:$0xff] %v12773_v20  ;;  %v12780_v31 = vsub.f32 %v16292_v49, %v12354_v57  ;;  %v2359_v23 = vmul.f32 %v12773_v20, %v12773_v20  ;;  %v2490_v21 = vsel %vm2056_vm3, %v2358_v22, 0.0 }
 0x218   : > { %v2483_v13 = vadd.f32 %v2482_v38, %v2481_v15  ;;  %v16294_v38 = vld [vmem:[#allocation37_spill] sm:$0xff] }
 0x219   : > { %16293 = vst [vmem:[#allocation35_spill] sm:$0xff] %v12780_v31  ;;  %v12787_v44 = vsub.f32 %v16294_v38, %v12354_v57  ;;  %v2360_v58 = vmul.f32 %v12780_v31, %v12780_v31  ;;  %v2492_v53 = vsel %vm2056_vm3, %v2359_v23, 0.0 }
 0x21a   : > { %v2485_v46 = vadd.f32 %v2484_v1, %v2483_v13  ;;  %v16296_v1 = vld [vmem:[#allocation39_spill] sm:$0xff] }
 0x21b   : > { %16295 = vst [vmem:[#allocation34_spill] sm:$0xff] %v12787_v44  ;;  %v12794_v49 = vsub.f32 %v16296_v1, %v12354_v57  ;;  %v2361_v20 = vmul.f32 %v12787_v44, %v12787_v44  ;;  %v2494_v22 = vsel %vm2056_vm3, %v2360_v58, 0.0 }
 0x21c   : > { %v2487_v15 = vadd.f32 %v2486_v47, %v2485_v46  ;;  %v16298_v47 = vld [vmem:[#allocation38_spill] sm:$0xff] }
 0x21d   : > { %16297 = vst [vmem:[#allocation36_spill] sm:$0xff] %v12794_v49  ;;  %v12801_v38 = vsub.f32 %v16298_v47, %v12354_v57  ;;  %v2362_v31 = vmul.f32 %v12794_v49, %v12794_v49  ;;  %v2496_v23 = vsel %vm2056_vm3, %v2361_v20, 0.0 }
 0x21e   : > { %v2489_v13 = vadd.f32 %v2488_v12, %v2487_v15  ;;  %v16300_v12 = vld [vmem:[#allocation40_spill] sm:$0xff] }
 0x21f   : > { %16299 = vst [vmem:[#allocation37_spill] sm:$0xff] %v12801_v38  ;;  %v12808_v1 = vsub.f32 %v16300_v12, %v12354_v57  ;;  %v2363_v44 = vmul.f32 %v12801_v38, %v12801_v38  ;;  %v2498_v58 = vsel %vm2056_vm3, %v2362_v31, 0.0 }
 0x220   : > { %v2491_v46 = vadd.f32 %v2490_v21, %v2489_v13  ;;  %v16302_v21 = vld [vmem:[#allocation41_spill] sm:$0xff] }
 0x221   : > { %16301 = vst [vmem:[#allocation39_spill] sm:$0xff] %v12808_v1  ;;  %v12815_v47 = vsub.f32 %v16302_v21, %v12354_v57  ;;  %v2364_v49 = vmul.f32 %v12808_v1, %v12808_v1  ;;  %v2500_v20 = vsel %vm2056_vm3, %v2363_v44, 0.0 }
 0x222   : > { %v2493_v15 = vadd.f32 %v2492_v53, %v2491_v46  ;;  %v16304_v53 = vld [vmem:[#allocation43_spill] sm:$0xff] }
 0x223   : > { %16303 = vst [vmem:[#allocation38_spill] sm:$0xff] %v12815_v47  ;;  %v12822_v12 = vsub.f32 %v16304_v53, %v12354_v57  ;;  %v2365_v38 = vmul.f32 %v12815_v47, %v12815_v47  ;;  %v2502_v31 = vsel %vm2056_vm3, %v2364_v49, 0.0 }
 0x224   : > { %v2495_v13 = vadd.f32 %v2494_v22, %v2493_v15  ;;  %v16306_v22 = vld [vmem:[#allocation42_spill] sm:$0xff] }
 0x225   : > { %16305 = vst [vmem:[#allocation40_spill] sm:$0xff] %v12822_v12  ;;  %v12829_v21 = vsub.f32 %v16306_v22, %v12354_v57  ;;  %v2366_v1 = vmul.f32 %v12822_v12, %v12822_v12  ;;  %v2504_v44 = vsel %vm2056_vm3, %v2365_v38, 0.0  ;;  %v16310_v12 = vld [vmem:[#allocation46_spill] sm:$0xff]  ;;  %v2370_v38 = vmul.f32 %v12358_v18, %v12358_v18 }
 0x226   : > { %v2497_v46 = vadd.f32 %v2496_v23, %v2495_v13  ;;  %v16307_v23 = vld [vmem:[#allocation44_spill] sm:$0xff]  ;;  %v12853_v49 = vsub.f32 %v16310_v12, %v12354_v57 }
 0x227   : > { %v12836_v53 = vsub.f32 %v16307_v23, %v12354_v57  ;;  %v2367_v47 = vmul.f32 %v12829_v21, %v12829_v21  ;;  %v2506_v23 = vsel %vm2056_vm3, %v2366_v1, 0.0  ;;  %v2514_v12 = vsel %vm2056_vm3, %v2370_v38, 0.0 }
 0x228   : > { %v2499_v15 = vadd.f32 %v2498_v58, %v2497_v46  ;;  %v16308_v58 = vld [vmem:[#allocation45_spill] sm:$0xff]  ;;  %v2371_v1 = vmul.f32 %v12853_v49, %v12853_v49  ;;  %v2376_v38 = vmul.f32 %v12375_v4, %v12375_v4 }
 0x229   : > { %v12843_v22 = vsub.f32 %v16308_v58, %v12354_v57  ;;  %v2372_v57 = vmul.f32 %v12362_v33, %v12362_v33 }
 0x22a   : > { %v2501_v13 = vadd.f32 %v2500_v20, %v2499_v15  ;;  %v2368_v20 = vmul.f32 %v12836_v53, %v12836_v53 }
 0x22b   : > { %16309 = vst [vmem:[#allocation41_spill] sm:$0xff] %v12843_v22 }
 0x22c   : > { %v2503_v46 = vadd.f32 %v2502_v31, %v2501_v13  ;;  %v2369_v13 = vmul.f32 %v12843_v22, %v12843_v22  ;;  %v2508_v31 = vsel %vm2056_vm3, %v2367_v47, 0.0  ;;  %v2516_v47 = vsel %vm2056_vm3, %v2371_v1, 0.0 }
 0x22e   : > { %v2505_v15 = vadd.f32 %v2504_v44, %v2503_v46  ;;  %v2510_v46 = vsel %vm2056_vm3, %v2368_v20, 0.0  ;;  %v2374_v20 = vmul.f32 %v12369_v29, %v12369_v29 }
 0x230   : > { %v2507_v16 = vadd.f32 %v2506_v23, %v2505_v15  ;;  %v2512_v15 = vsel %vm2056_vm3, %v2369_v13, 0.0  ;;  %v2375_v13 = vmul.f32 %v12372_v51, %v12372_v51 }
 0x232   : > { %v2509_v58 = vadd.f32 %v2508_v31, %v2507_v16  ;;  %v2373_v16 = vmul.f32 %v12366_v40, %v12366_v40  ;;  %v2524_v1 = vsel %vm2056_vm3, %v2375_v13, 0.0  ;;  %v2381_v13 = vmul.f32 %v12390_v63, %v12390_v63 }
 0x234   : > { %v2511_v44 = vadd.f32 %v2510_v46, %v2509_v58  ;;  %v2518_v58 = vsel %vm2056_vm3, %v2372_v57, 0.0  ;;  %v2378_v57 = vmul.f32 %v12381_v54, %v12381_v54 }
 0x236   : > { %v2513_v23 = vadd.f32 %v2512_v15, %v2511_v44  ;;  %v2520_v44 = vsel %vm2056_vm3, %v2373_v16, 0.0  ;;  %v2379_v16 = vmul.f32 %v12384_v39, %v12384_v39 }
 0x238   : > { %v2515_v22 = vadd.f32 %v2514_v12, %v2513_v23  ;;  %v2522_v23 = vsel %vm2056_vm3, %v2374_v20, 0.0  ;;  %v2380_v20 = vmul.f32 %v12387_v5, %v12387_v5 }
 0x23a   : > { %v2517_v31 = vadd.f32 %v2516_v47, %v2515_v22  ;;  %v2377_v22 = vmul.f32 %v12378_v6, %v12378_v6 }
 0x23c   : > { %v2519_v46 = vadd.f32 %v2518_v58, %v2517_v31  ;;  %v2526_v31 = vsel %vm2056_vm3, %v2376_v38, 0.0  ;;  %v2382_v38 = vmul.f32 %v12393_v55, %v12393_v55 }
 0x23e   : > { %v2521_v15 = vadd.f32 %v2520_v44, %v2519_v46  ;;  %v2528_v46 = vsel %vm2056_vm3, %v2377_v22, 0.0  ;;  %v2383_v22 = vmul.f32 %v12396_v3, %v12396_v3 }
 0x240   : > { %v2523_v12 = vadd.f32 %v2522_v23, %v2521_v15  ;;  %v2530_v15 = vsel %vm2056_vm3, %v2378_v57, 0.0  ;;  %v2384_v57 = vmul.f32 %v12399_v9, %v12399_v9 }
 0x242   : > { %v2525_v47 = vadd.f32 %v2524_v1, %v2523_v12  ;;  %v2532_v12 = vsel %vm2056_vm3, %v2379_v16, 0.0  ;;  %v2540_v16 = vsel %vm2056_vm3, %v2383_v22, 0.0 }
 0x244   : > { %v2527_v58 = vadd.f32 %v2526_v31, %v2525_v47  ;;  %v2534_v47 = vsel %vm2056_vm3, %v2380_v20, 0.0 }
 0x246   : > { %v2529_v44 = vadd.f32 %v2528_v46, %v2527_v58  ;;  %v2536_v58 = vsel %vm2056_vm3, %v2381_v13, 0.0 }
 0x248   : > { %v2531_v23 = vadd.f32 %v2530_v15, %v2529_v44  ;;  %v2538_v44 = vsel %vm2056_vm3, %v2382_v38, 0.0  ;;  %v12910_v38 = vld [vmem:[%s16311_s12] ss:$0 sm:$0xff]  ;;  %s16441_s12 = sld [smem:[#allocation108_spill]] }
 0x24a   : > { %v2533_v1 = vadd.f32 %v2532_v12, %v2531_v23  ;;  %v2542_v12 = vsel %vm2214_vm4, %v2384_v57, 0.0 }
 0x24c   : > { %v2535_v31 = vadd.f32 %v2534_v47, %v2533_v1 }
 0x24e   : > { %v2537_v46 = vadd.f32 %v2536_v58, %v2535_v31 }
 0x250   : > { %v2539_v15 = vadd.f32 %v2538_v44, %v2537_v46 }
 0x252   : > { %v2541_v23 = vadd.f32 %v2540_v16, %v2539_v15 }
 0x254   : > { %v2543_v63 = vadd.f32 %v2542_v12, %v2541_v23  ;;  %v16314_v23 = vld [vmem:[#allocation11_spill] sm:$0xff]  ;;  %v16315_v12 = vld [vmem:[#allocation12_spill] sm:$0xff] }
 0x256   : > { %v2544_v20 = vrot.slane %v2543_v63, 4 }
 0x258   : > { %v2545_v1 = vadd.f32 %v2544_v20, %v2543_v63  ;;  %v16316_v20 = vld [vmem:[#allocation13_spill] sm:$0xff] }
 0x25a   : > { %v2546_v47 = vrot.slane %v2545_v1, 2 }
 0x25c   : > { %v2547_v5 = vadd.f32 %v2546_v47, %v2545_v1  ;;  %v16317_v1 = vld [vmem:[#allocation15_spill] sm:$0xff]  ;;  %v16318_v47 = vld [vmem:[#allocation14_spill] sm:$0xff] }
 0x25e   : > { %v2548_v3 = vrot.slane %v2547_v5, 1 }
 0x260   : > { %v2549_v39 = vadd.f32 %v2548_v3, %v2547_v5  ;;  %v12929_v3 = vld [vmem:[%s16312_s0] ss:$0 sm:$0xff]  ;;  %s16175_s0 = smov 96  }
 0x261   : > { %16313 = vst [vmem:[#allocation43_spill] sm:$0xff] %v12929_v3 }
 0x262   : > { %v2550_v13 = vmul.f32 0.0015649452, %v2549_v39 }
 0x264   : > { %v2551_v31 = vadd.f32 1e-05, %v2550_v13  ;;  %v16319_v13 = vld [vmem:[#allocation16_spill] sm:$0xff] }
 0x266   : > { %11127 = vrsqrt.f32 %v2551_v31 }
 0x273   : > { %v12905_v58 = vpop.eup %11127 }
 0x274   : > { %v2630_v22 = vmul.f32 %v12905_v58, %v12393_v55  ;;  %v12916_v63 = vmul.f32 %v12905_v58, %v12403_v25  ;;  %v12920_v5 = vmul.f32 %v12905_v58, %v12407_v27  ;;  %v12924_v39 = vmul.f32 %v12905_v58, %v12411_v0 }
 0x275   : > { %v12933_v55 = vmul.f32 %v12905_v58, %v12415_v19  ;;  %v12937_v25 = vmul.f32 %v12905_v58, %v12423_v8  ;;  %v12941_v27 = vmul.f32 %v12905_v58, %v12429_v11  ;;  %v12945_v0 = vmul.f32 %v12905_v58, %v12437_v43 }
 0x276   : > { %v2717_v46 = vmul.f32 %v12910_v38, %v2630_v22  ;;  %v12950_v57 = vmul.f32 %v12905_v58, %v12444_v32  ;;  %v12954_v19 = vmul.f32 %v12905_v58, %v12451_v30  ;;  %v12958_v8 = vmul.f32 %v12905_v58, %v12458_v36  ;;  %v16320_v22 = vld [vmem:[#allocation17_spill] sm:$0xff] }
 0x277   : > { %v12962_v11 = vmul.f32 %v12905_v58, %v12465_v42  ;;  %v12966_v43 = vmul.f32 %v12905_v58, %v12472_v52  ;;  %v12970_v32 = vmul.f32 %v12905_v58, %v12479_v50  ;;  %v12974_v30 = vmul.f32 %v12905_v58, %v12486_v56 }
 0x278   : > { %v2804_v44 = vadd.f32 %v12929_v3, %v2717_v46  ;;  %v12979_v36 = vmul.f32 %v12905_v58, %v12493_v62  ;;  %v12983_v42 = vmul.f32 %v12905_v58, %v12500_v10  ;;  %v12987_v52 = vmul.f32 %v12905_v58, %v12507_v7  ;;  %v16330_v3 = vld [vmem:[#allocation23_spill] sm:$0xff] }
 0x279   : > { %v12991_v50 = vmul.f32 %v12905_v58, %v12514_v17  ;;  %v12995_v56 = vmul.f32 %v12905_v58, %v12521_v24  ;;  %v12999_v62 = vmul.f32 %v12905_v58, %v12528_v37  ;;  %v13003_v10 = vmul.f32 %v12905_v58, %v12535_v34 }
 0x27a   : > { %v13005_v15 = vmul.f32 0.5, %v2804_v44  ;;  %v2964_v7 = vmul.f32 0.70710677, %v2804_v44  ;;  %v13009_v16 = vmul.f32 %v12905_v58, %v12542_v41  ;;  %v13013_v17 = vmul.f32 %v12905_v58, %v12549_v48  ;;  %v16322_v44 = vld [vmem:[#allocation19_spill] sm:$0xff] }
 0x27b   : > { %v13017_v24 = vmul.f32 %v12905_v58, %v12556_v61  ;;  %v13021_v37 = vmul.f32 %v12905_v58, %v12563_v59  ;;  %v13025_v34 = vmul.f32 %v12905_v58, %v12570_v2  ;;  %v13029_v41 = vmul.f32 %v12905_v58, %v12577_v14 }
 0x27c   : > { %11129 = verf.f32 %v2964_v7  ;;  %v13033_v48 = vmul.f32 %v12905_v58, %v12584_v28  ;;  %v13037_v61 = vmul.f32 %v12905_v58, %v12591_v26  ;;  %v13041_v59 = vmul.f32 %v12905_v58, %v12598_v35 }
 0x27d   : > { %v13045_v2 = vmul.f32 %v12905_v58, %v12605_v45  ;;  %v13049_v14 = vmul.f32 %v12905_v58, %v12612_v60  ;;  %v13053_v28 = vmul.f32 %v12905_v58, %v16314_v23  ;;  %v13057_v26 = vmul.f32 %v12905_v58, %v16315_v12  ;;  %v16324_v23 = vld [vmem:[#allocation18_spill] sm:$0xff] }
 0x27e   : > { %v13061_v35 = vmul.f32 %v12905_v58, %v16316_v20  ;;  %v13065_v45 = vmul.f32 %v12905_v58, %v16317_v1  ;;  %v13069_v60 = vmul.f32 %v12905_v58, %v16318_v47  ;;  %v13073_v31 = vmul.f32 %v12905_v58, %v16319_v13  ;;  %v16326_v20 = vld [vmem:[#allocation20_spill] sm:$0xff]  ;;  %v16328_v47 = vld [vmem:[#allocation21_spill] sm:$0xff] }
 0x27f   : > { %v13077_v46 = vmul.f32 %v12905_v58, %v16320_v22  ;;  %v13081_v7 = vmul.f32 %v12905_v58, %v16322_v44  ;;  %v13085_v12 = vmul.f32 %v12905_v58, %v16324_v23  ;;  %v13089_v1 = vmul.f32 %v12905_v58, %v16326_v20 }
 0x280   : > { %v13093_v13 = vmul.f32 %v12905_v58, %v16328_v47  ;;  %v13097_v22 = vmul.f32 %v12905_v58, %v16330_v3 }
 0x281   : > { %16321 = vst [vmem:[#allocation42_spill] sm:$0xff] %v13077_v46  ;;  %16323 = vst [vmem:[#allocation44_spill] sm:$0xff] %v13081_v7  ;;  %v16332_v46 = vld [vmem:[#allocation22_spill] sm:$0xff]  ;;  %v16334_v7 = vld [vmem:[#allocation24_spill] sm:$0xff] }
 0x282   : > { %16325 = vst [vmem:[#allocation45_spill] sm:$0xff] %v13085_v12  ;;  %16327 = vst [vmem:[#allocation46_spill] sm:$0xff] %v13089_v1  ;;  %v13101_v44 = vmul.f32 %v12905_v58, %v16332_v46  ;;  %v13105_v23 = vmul.f32 %v12905_v58, %v16334_v7  ;;  %v16336_v12 = vld [vmem:[#allocation25_spill] sm:$0xff]  ;;  %v16338_v1 = vld [vmem:[#allocation27_spill] sm:$0xff] }
 0x283   : > { %16329 = vst [vmem:[#allocation11_spill] sm:$0xff] %v13093_v13  ;;  %16331 = vst [vmem:[#allocation12_spill] sm:$0xff] %v13097_v22  ;;  %v13109_v20 = vmul.f32 %v12905_v58, %v16336_v12  ;;  %v13113_v47 = vmul.f32 %v12905_v58, %v16338_v1  ;;  %v16340_v13 = vld [vmem:[#allocation26_spill] sm:$0xff]  ;;  %v16342_v22 = vld [vmem:[#allocation28_spill] sm:$0xff] }
 0x284   : > { %16333 = vst [vmem:[#allocation13_spill] sm:$0xff] %v13101_v44  ;;  %16335 = vst [vmem:[#allocation15_spill] sm:$0xff] %v13105_v23  ;;  %v13117_v3 = vmul.f32 %v12905_v58, %v16340_v13  ;;  %v13121_v46 = vmul.f32 %v12905_v58, %v16342_v22  ;;  %v16344_v44 = vld [vmem:[#allocation29_spill] sm:$0xff]  ;;  %v16346_v23 = vld [vmem:[#allocation31_spill] sm:$0xff] }
 0x285   : > { %16337 = vst [vmem:[#allocation14_spill] sm:$0xff] %v13109_v20  ;;  %16339 = vst [vmem:[#allocation16_spill] sm:$0xff] %v13113_v47  ;;  %v13125_v7 = vmul.f32 %v12905_v58, %v16344_v44  ;;  %v13129_v12 = vmul.f32 %v12905_v58, %v16346_v23  ;;  %v16348_v20 = vld [vmem:[#allocation30_spill] sm:$0xff]  ;;  %v16350_v47 = vld [vmem:[#allocation32_spill] sm:$0xff] }
 0x286   : > { %16341 = vst [vmem:[#allocation17_spill] sm:$0xff] %v13117_v3  ;;  %16343 = vst [vmem:[#allocation19_spill] sm:$0xff] %v13121_v46  ;;  %v13133_v1 = vmul.f32 %v12905_v58, %v16348_v20  ;;  %v13137_v13 = vmul.f32 %v12905_v58, %v16350_v47  ;;  %v16352_v3 = vld [vmem:[#allocation33_spill] sm:$0xff]  ;;  %v16354_v46 = vld [vmem:[#allocation35_spill] sm:$0xff] }
 0x287   : > { %16345 = vst [vmem:[#allocation18_spill] sm:$0xff] %v13125_v7  ;;  %16347 = vst [vmem:[#allocation20_spill] sm:$0xff] %v13129_v12  ;;  %v13141_v22 = vmul.f32 %v12905_v58, %v16352_v3  ;;  %v13145_v44 = vmul.f32 %v12905_v58, %v16354_v46  ;;  %v16356_v7 = vld [vmem:[#allocation34_spill] sm:$0xff]  ;;  %v16357_v12 = vld [vmem:[#allocation36_spill] sm:$0xff] }
 0x288   : > { %16349 = vst [vmem:[#allocation21_spill] sm:$0xff] %v13133_v1  ;;  %16351 = vst [vmem:[#allocation23_spill] sm:$0xff] %v13137_v13  ;;  %v13149_v23 = vmul.f32 %v12905_v58, %v16356_v7  ;;  %v13153_v20 = vmul.f32 %v12905_v58, %v16357_v12  ;;  %v16358_v1 = vld [vmem:[#allocation37_spill] sm:$0xff]  ;;  %v16360_v13 = vld [vmem:[#allocation39_spill] sm:$0xff]  ;;  %v13173_v12 = vmul.f32 %v12905_v58, %v12829_v21 }
 0x289   : > { %16353 = vst [vmem:[#allocation22_spill] sm:$0xff] %v13141_v22  ;;  %16355 = vst [vmem:[#allocation24_spill] sm:$0xff] %v13145_v44  ;;  %v13157_v47 = vmul.f32 %v12905_v58, %v16358_v1  ;;  %v13161_v3 = vmul.f32 %v12905_v58, %v16360_v13  ;;  %v16361_v22 = vld [vmem:[#allocation38_spill] sm:$0xff]  ;;  %v16362_v44 = vld [vmem:[#allocation40_spill] sm:$0xff]  ;;  %v13177_v1 = vmul.f32 %v12905_v58, %v12836_v53 }
 0x28a   : > { %v13165_v46 = vmul.f32 %v12905_v58, %v16361_v22  ;;  %v13169_v7 = vmul.f32 %v12905_v58, %v16362_v44  ;;  %v13185_v22 = vmul.f32 %v12905_v58, %v12358_v18  ;;  %v13189_v44 = vmul.f32 %v12905_v58, %v12853_v49 }
 0x28b   : > { %16359 = vst [vmem:[#allocation25_spill] sm:$0xff] %v13157_v47  ;;  %v16363_v47 = vld [vmem:[#allocation41_spill] sm:$0xff]  ;;  %v13193_v21 = vmul.f32 %v12905_v58, %v12362_v33  ;;  %v13197_v53 = vmul.f32 %v12905_v58, %v12366_v40  ;;  %v13205_v18 = vmul.f32 %v12905_v58, %v12372_v51  ;;  %v13209_v49 = vmul.f32 %v12905_v58, %v12375_v4 }
 0x28c   : > { %v13181_v13 = vmul.f32 %v12905_v58, %v16363_v47  ;;  %v13201_v47 = vmul.f32 %v12905_v58, %v12369_v29  ;;  %v13213_v33 = vmul.f32 %v12905_v58, %v12378_v6  ;;  %v13217_v40 = vmul.f32 %v12905_v58, %v12381_v54 }
 0x28d   : > { %16364 = vst [vmem:[#allocation27_spill] sm:$0xff] %v13197_v53  ;;  %16366 = vst [vmem:[#allocation28_spill] sm:$0xff] %v13205_v18  ;;  %v16369_v53 = vld [vmem:[#allocation47_spill] sm:$0xff]  ;;  %v16371_v18 = vld [vmem:[#allocation49_spill] sm:$0xff]  ;;  %v13237_v54 = vmul.f32 %v12905_v58, %v12399_v9  ;;  %v13257_v9 = vmul.f32 %v12910_v38, %v12937_v25 }
 0x28e   : > { %16365 = vst [vmem:[#allocation26_spill] sm:$0xff] %v13201_v47  ;;  %16367 = vst [vmem:[#allocation29_spill] sm:$0xff] %v13209_v49  ;;  %v13221_v29 = vmul.f32 %v12905_v58, %v16369_v53  ;;  %v16370_v47 = vld [vmem:[#allocation48_spill] sm:$0xff]  ;;  %v13229_v4 = vmul.f32 %v12905_v58, %v16371_v18  ;;  %v16373_v49 = vld [vmem:[#allocation50_spill] sm:$0xff]  ;;  %v13241_v53 = vmul.f32 %v12910_v38, %v12916_v63 }
 0x28f   : > { %16368 = vst [vmem:[#allocation31_spill] sm:$0xff] %v13213_v33  ;;  %v13225_v51 = vmul.f32 %v12905_v58, %v16370_v47  ;;  %v13233_v6 = vmul.f32 %v12905_v58, %v16373_v49  ;;  %v11130_v33 = vpop.eup %11129  ;;  %v13245_v47 = vmul.f32 %v12910_v38, %v12920_v5  ;;  %v13249_v18 = vmul.f32 %v12910_v38, %v12924_v39 }
 0x290   : > { %16372 = vst [vmem:[#allocation30_spill] sm:$0xff] %v13229_v4  ;;  %v3124_v4 = vadd.f32 1.0, %v11130_v33  ;;  %v13253_v49 = vmul.f32 %v12910_v38, %v12933_v55  ;;  %v13261_v58 = vmul.f32 %v12910_v38, %v12941_v27  ;;  %v13265_v63 = vmul.f32 %v12910_v38, %v12945_v0  ;;  %v16378_v33 = vld [vmem:[#allocation44_spill] sm:$0xff] }
 0x291   : > { %v13269_v5 = vmul.f32 %v12910_v38, %v12950_v57  ;;  %v13273_v39 = vmul.f32 %v12910_v38, %v12954_v19  ;;  %v13277_v55 = vmul.f32 %v12910_v38, %v12958_v8  ;;  %v13282_v27 = vmul.f32 %v12910_v38, %v12962_v11 }
 0x292   : > { %v3204_v25 = vmul.f32 %v3124_v4, %v13005_v15  ;;  %v13286_v0 = vmul.f32 %v12910_v38, %v12966_v43  ;;  %v13290_v57 = vmul.f32 %v12910_v38, %v12970_v32  ;;  %v13294_v19 = vmul.f32 %v12910_v38, %v12974_v30  ;;  %v16380_v4 = vld [vmem:[#allocation45_spill] sm:$0xff] }
 0x293   : > { %v13298_v8 = vmul.f32 %v12910_v38, %v12979_v36  ;;  %v13302_v11 = vmul.f32 %v12910_v38, %v12983_v42  ;;  %v13306_v43 = vmul.f32 %v12910_v38, %v12987_v52  ;;  %v13311_v32 = vmul.f32 %v12910_v38, %v12991_v50 }
 0x294   : > { %3284 = vst.msk [vmem:[#allocation2 + $0x268] sm:$0xff] %vm2056_vm3, %v3204_v25  ;;  %v13315_v30 = vmul.f32 %v12910_v38, %v12995_v56  ;;  %v13319_v36 = vmul.f32 %v12910_v38, %v12999_v62  ;;  %v13323_v42 = vmul.f32 %v12910_v38, %v13003_v10  ;;  %v13327_v52 = vmul.f32 %v12910_v38, %v13009_v16  ;;  %v16382_v25 = vld [vmem:[#allocation46_spill] sm:$0xff] }
 0x295   : > { %v13331_v50 = vmul.f32 %v12910_v38, %v13013_v17  ;;  %v13335_v56 = vmul.f32 %v12910_v38, %v13017_v24  ;;  %v13339_v62 = vmul.f32 %v12910_v38, %v13021_v37  ;;  %v13343_v10 = vmul.f32 %v12910_v38, %v13025_v34 }
 0x296   : > { %v13347_v15 = vmul.f32 %v12910_v38, %v13029_v41  ;;  %v13351_v16 = vmul.f32 %v12910_v38, %v13033_v48  ;;  %v13355_v17 = vmul.f32 %v12910_v38, %v13037_v61  ;;  %v13359_v24 = vmul.f32 %v12910_v38, %v13041_v59 }
 0x297   : > { %v13363_v37 = vmul.f32 %v12910_v38, %v13045_v2  ;;  %v13367_v34 = vmul.f32 %v12910_v38, %v13049_v14  ;;  %v13371_v41 = vmul.f32 %v12910_v38, %v13053_v28  ;;  %v13375_v48 = vmul.f32 %v12910_v38, %v13057_v26  ;;  %v16376_v28 = vld [vmem:[#allocation42_spill] sm:$0xff] }
 0x298   : > { %v13379_v61 = vmul.f32 %v12910_v38, %v13061_v35  ;;  %v13383_v59 = vmul.f32 %v12910_v38, %v13065_v45  ;;  %v13387_v2 = vmul.f32 %v12910_v38, %v13069_v60  ;;  %v13391_v14 = vmul.f32 %v12910_v38, %v13073_v31 }
 0x299   : > { %v13395_v26 = vmul.f32 %v12910_v38, %v16376_v28  ;;  %v13399_v35 = vmul.f32 %v12910_v38, %v16378_v33  ;;  %v13403_v45 = vmul.f32 %v12910_v38, %v16380_v4  ;;  %v13407_v60 = vmul.f32 %v12910_v38, %v16382_v25 }
 0x29a   : > { %16374 = vst [vmem:[#allocation32_spill] sm:$0xff] %v13387_v2  ;;  %16375 = vst [vmem:[#allocation33_spill] sm:$0xff] %v13391_v14  ;;  %v16384_v2 = vld [vmem:[#allocation11_spill] sm:$0xff]  ;;  %v16386_v14 = vld [vmem:[#allocation12_spill] sm:$0xff] }
 0x29b   : > { %16377 = vst [vmem:[#allocation35_spill] sm:$0xff] %v13395_v26  ;;  %16379 = vst [vmem:[#allocation34_spill] sm:$0xff] %v13399_v35  ;;  %v13411_v31 = vmul.f32 %v12910_v38, %v16384_v2  ;;  %v13415_v28 = vmul.f32 %v12910_v38, %v16386_v14  ;;  %v16388_v26 = vld [vmem:[#allocation13_spill] sm:$0xff]  ;;  %v16390_v35 = vld [vmem:[#allocation15_spill] sm:$0xff] }
 0x29c   : > { %16381 = vst [vmem:[#allocation36_spill] sm:$0xff] %v13403_v45  ;;  %16383 = vst [vmem:[#allocation37_spill] sm:$0xff] %v13407_v60  ;;  %v13419_v33 = vmul.f32 %v12910_v38, %v16388_v26  ;;  %v13423_v4 = vmul.f32 %v12910_v38, %v16390_v35  ;;  %v16392_v45 = vld [vmem:[#allocation14_spill] sm:$0xff]  ;;  %v16394_v60 = vld [vmem:[#allocation16_spill] sm:$0xff] }
 0x29d   : > { %16385 = vst [vmem:[#allocation39_spill] sm:$0xff] %v13411_v31  ;;  %16387 = vst [vmem:[#allocation38_spill] sm:$0xff] %v13415_v28  ;;  %v13427_v25 = vmul.f32 %v12910_v38, %v16392_v45  ;;  %v13431_v2 = vmul.f32 %v12910_v38, %v16394_v60  ;;  %v16396_v31 = vld [vmem:[#allocation17_spill] sm:$0xff]  ;;  %v16398_v28 = vld [vmem:[#allocation19_spill] sm:$0xff] }
 0x29e   : > { %16389 = vst [vmem:[#allocation40_spill] sm:$0xff] %v13419_v33  ;;  %16391 = vst [vmem:[#allocation41_spill] sm:$0xff] %v13423_v4  ;;  %v13435_v14 = vmul.f32 %v12910_v38, %v16396_v31  ;;  %v13439_v26 = vmul.f32 %v12910_v38, %v16398_v28  ;;  %v16400_v33 = vld [vmem:[#allocation18_spill] sm:$0xff]  ;;  %v16401_v4 = vld [vmem:[#allocation20_spill] sm:$0xff] }
 0x29f   : > { %16393 = vst [vmem:[#allocation47_spill] sm:$0xff] %v13427_v25  ;;  %16395 = vst [vmem:[#allocation48_spill] sm:$0xff] %v13431_v2  ;;  %v13443_v35 = vmul.f32 %v12910_v38, %v16400_v33  ;;  %v13447_v45 = vmul.f32 %v12910_v38, %v16401_v4  ;;  %v16402_v25 = vld [vmem:[#allocation21_spill] sm:$0xff]  ;;  %v16404_v2 = vld [vmem:[#allocation23_spill] sm:$0xff]  ;;  %v13467_v4 = vmul.f32 %v12910_v38, %v13149_v23 }
 0x2a0   : > { %16397 = vst [vmem:[#allocation49_spill] sm:$0xff] %v13435_v14  ;;  %16399 = vst [vmem:[#allocation50_spill] sm:$0xff] %v13439_v26  ;;  %v13451_v60 = vmul.f32 %v12910_v38, %v16402_v25  ;;  %v13455_v31 = vmul.f32 %v12910_v38, %v16404_v2  ;;  %v16405_v14 = vld [vmem:[#allocation22_spill] sm:$0xff]  ;;  %v16406_v26 = vld [vmem:[#allocation24_spill] sm:$0xff]  ;;  %v13471_v25 = vmul.f32 %v12910_v38, %v13153_v20 }
 0x2a1   : > { %v13459_v28 = vmul.f32 %v12910_v38, %v16405_v14  ;;  %v13463_v33 = vmul.f32 %v12910_v38, %v16406_v26  ;;  %v13479_v14 = vmul.f32 %v12910_v38, %v13161_v3  ;;  %v13483_v26 = vmul.f32 %v12910_v38, %v13165_v46 }
 0x2a2   : > { %16403 = vst [vmem:[#allocation42_spill] sm:$0xff] %v13451_v60  ;;  %v16407_v60 = vld [vmem:[#allocation25_spill] sm:$0xff]  ;;  %v13487_v23 = vmul.f32 %v12910_v38, %v13169_v7  ;;  %v13491_v20 = vmul.f32 %v12910_v38, %v13173_v12  ;;  %v13499_v3 = vmul.f32 %v12910_v38, %v13181_v13  ;;  %v13503_v46 = vmul.f32 %v12910_v38, %v13185_v22 }
 0x2a3   : > { %v13475_v2 = vmul.f32 %v12910_v38, %v16407_v60  ;;  %v13495_v60 = vmul.f32 %v12910_v38, %v13177_v1  ;;  %v13507_v7 = vmul.f32 %v12910_v38, %v13189_v44  ;;  %v13511_v12 = vmul.f32 %v12910_v38, %v13193_v21 }
 0x2a4   : > { %16408 = vst [vmem:[#allocation44_spill] sm:$0xff] %v13491_v20  ;;  %16410 = vst [vmem:[#allocation46_spill] sm:$0xff] %v13499_v3  ;;  %v16413_v20 = vld [vmem:[#allocation27_spill] sm:$0xff]  ;;  %v16415_v3 = vld [vmem:[#allocation28_spill] sm:$0xff] }
 0x2a5   : > { %16409 = vst [vmem:[#allocation45_spill] sm:$0xff] %v13495_v60  ;;  %16411 = vst [vmem:[#allocation11_spill] sm:$0xff] %v13503_v46  ;;  %v13515_v1 = vmul.f32 %v12910_v38, %v16413_v20  ;;  %v16414_v60 = vld [vmem:[#allocation26_spill] sm:$0xff]  ;;  %v13523_v22 = vmul.f32 %v12910_v38, %v16415_v3  ;;  %v16417_v46 = vld [vmem:[#allocation29_spill] sm:$0xff]  ;;  %v13535_v20 = vmul.f32 %v12910_v38, %v13217_v40 }
 0x2a6   : > { %16412 = vst [vmem:[#allocation12_spill] sm:$0xff] %v13507_v7  ;;  %v13519_v13 = vmul.f32 %v12910_v38, %v16414_v60  ;;  %v13527_v44 = vmul.f32 %v12910_v38, %v16417_v46  ;;  %v16418_v7 = vld [vmem:[#allocation31_spill] sm:$0xff]  ;;  %v13539_v60 = vmul.f32 %v12910_v38, %v13221_v29  ;;  %v13543_v3 = vmul.f32 %v12910_v38, %v13225_v51 }
 0x2a7   : > { %16416 = vst [vmem:[#allocation13_spill] sm:$0xff] %v13523_v22  ;;  %v13531_v21 = vmul.f32 %v12910_v38, %v16418_v7  ;;  %16419 = vst [vmem:[#allocation15_spill] sm:$0xff] %v13535_v20  ;;  %v16420_v22 = vld [vmem:[#allocation30_spill] sm:$0xff]  ;;  %v13551_v7 = vmul.f32 %v12910_v38, %v13233_v6  ;;  %v13555_v40 = vmul.f32 %v12910_v38, %v13237_v54  ;;  %v16421_v20 = vld [vmem:[#allocation43_spill] sm:$0xff] }
 0x2a8   : > { %v13547_v46 = vmul.f32 %v12910_v38, %v16420_v22  ;;  %v13559_v29 = vadd.f32 %v16421_v20, %v13241_v53  ;;  %v13563_v51 = vadd.f32 %v16421_v20, %v13245_v47  ;;  %v13567_v22 = vadd.f32 %v16421_v20, %v13249_v18 }
 0x2a9   : > { %v13571_v6 = vadd.f32 %v16421_v20, %v13253_v49  ;;  %v13575_v38 = vadd.f32 %v16421_v20, %v13257_v9  ;;  %v13579_v54 = vadd.f32 %v16421_v20, %v13261_v58  ;;  %v13583_v53 = vadd.f32 %v16421_v20, %v13265_v63 }
 0x2aa   : > { %v13587_v47 = vadd.f32 %v16421_v20, %v13269_v5  ;;  %v13591_v18 = vadd.f32 %v16421_v20, %v13273_v39  ;;  %v13595_v49 = vadd.f32 %v16421_v20, %v13277_v55  ;;  %v13599_v9 = vadd.f32 %v16421_v20, %v13282_v27 }
 0x2ab   : > { %v13603_v58 = vadd.f32 %v16421_v20, %v13286_v0  ;;  %v13607_v63 = vadd.f32 %v16421_v20, %v13290_v57  ;;  %v13611_v5 = vadd.f32 %v16421_v20, %v13294_v19  ;;  %v13615_v39 = vadd.f32 %v16421_v20, %v13298_v8 }
 0x2ac   : > { %v13619_v55 = vadd.f32 %v16421_v20, %v13302_v11  ;;  %v13623_v27 = vadd.f32 %v16421_v20, %v13306_v43  ;;  %v13627_v0 = vadd.f32 %v16421_v20, %v13311_v32  ;;  %v13631_v57 = vadd.f32 %v16421_v20, %v13315_v30 }
 0x2ad   : > { %v13635_v19 = vadd.f32 %v16421_v20, %v13319_v36  ;;  %v13639_v8 = vadd.f32 %v16421_v20, %v13323_v42  ;;  %v13643_v11 = vadd.f32 %v16421_v20, %v13327_v52  ;;  %v13647_v43 = vadd.f32 %v16421_v20, %v13331_v50 }
 0x2ae   : > { %v13651_v32 = vadd.f32 %v16421_v20, %v13335_v56  ;;  %v13655_v30 = vadd.f32 %v16421_v20, %v13339_v62  ;;  %v13659_v36 = vadd.f32 %v16421_v20, %v13343_v10  ;;  %v13663_v42 = vadd.f32 %v16421_v20, %v13347_v15 }
 0x2af   : > { %v13667_v52 = vadd.f32 %v16421_v20, %v13351_v16  ;;  %v13671_v50 = vadd.f32 %v16421_v20, %v13355_v17  ;;  %v13675_v56 = vadd.f32 %v16421_v20, %v13359_v24  ;;  %v13679_v62 = vadd.f32 %v16421_v20, %v13363_v37  ;;  %v16429_v37 = vld [vmem:[#allocation32_spill] sm:$0xff] }
 0x2b0   : > { %v13683_v10 = vadd.f32 %v16421_v20, %v13367_v34  ;;  %v13687_v15 = vadd.f32 %v16421_v20, %v13371_v41  ;;  %v13691_v16 = vadd.f32 %v16421_v20, %v13375_v48  ;;  %v13695_v17 = vadd.f32 %v16421_v20, %v13379_v61 }
 0x2b1   : > { %16422 = vst [vmem:[#allocation14_spill] sm:$0xff] %v13675_v56  ;;  %16423 = vst [vmem:[#allocation16_spill] sm:$0xff] %v13679_v62  ;;  %v13699_v24 = vadd.f32 %v16421_v20, %v13383_v59  ;;  %v13703_v34 = vadd.f32 %v16421_v20, %v16429_v37  ;;  %v16449_v56 = vld [vmem:[#allocation48_spill] sm:$0xff] }
 0x2b2   : > { %16424 = vst [vmem:[#allocation17_spill] sm:$0xff] %v13683_v10  ;;  %16425 = vst [vmem:[#allocation19_spill] sm:$0xff] %v13687_v15  ;;  %v16431_v10 = vld [vmem:[#allocation33_spill] sm:$0xff]  ;;  %v16433_v15 = vld [vmem:[#allocation35_spill] sm:$0xff] }
 0x2b3   : > { %16426 = vst [vmem:[#allocation18_spill] sm:$0xff] %v13691_v16  ;;  %16427 = vst [vmem:[#allocation20_spill] sm:$0xff] %v13695_v17  ;;  %v13707_v41 = vadd.f32 %v16421_v20, %v16431_v10  ;;  %v13711_v48 = vadd.f32 %v16421_v20, %v16433_v15  ;;  %v16435_v16 = vld [vmem:[#allocation34_spill] sm:$0xff]  ;;  %v16437_v17 = vld [vmem:[#allocation36_spill] sm:$0xff] }
 0x2b4   : > { %16428 = vst [vmem:[#allocation21_spill] sm:$0xff] %v13699_v24  ;;  %16430 = vst [vmem:[#allocation23_spill] sm:$0xff] %v13703_v34  ;;  %v13715_v61 = vadd.f32 %v16421_v20, %v16435_v16  ;;  %v13719_v59 = vadd.f32 %v16421_v20, %v16437_v17  ;;  %v16439_v24 = vld [vmem:[#allocation37_spill] sm:$0xff]  ;;  %v11025_v10 = vld [vmem:[%s16441_s12 + $0x18] sm:$0xff]  }
 0x2b5   : > { %16432 = vst [vmem:[#allocation22_spill] sm:$0xff] %v13707_v41  ;;  %16434 = vst [vmem:[#allocation24_spill] sm:$0xff] %v13711_v48  ;;  %v13723_v37 = vadd.f32 %v16421_v20, %v16439_v24  ;;  %v11026_v15 = vld [vmem:[%s16441_s12 + $0x8] sm:$0xff]   ;;  %v16442_v48 = vld [vmem:[#allocation39_spill] sm:$0xff]  ;;  %10349 = vmatprep.subr.bf16.mxu0 %v11025_v10 }
 0x2b6   : > { %16436 = vst [vmem:[#allocation25_spill] sm:$0xff] %v13715_v61  ;;  %16438 = vst [vmem:[#allocation27_spill] sm:$0xff] %v13719_v59  ;;  %v13733_v16 = vadd.f32 %v16421_v20, %v16442_v48  ;;  %v16444_v61 = vld [vmem:[#allocation38_spill] sm:$0xff]  ;;  %v16446_v59 = vld [vmem:[#allocation40_spill] sm:$0xff]  ;;  %v13753_v48 = vadd.f32 %v16421_v20, %v16449_v56  ;;  %v13772_v56 = vadd.f32 %v16421_v20, %v13447_v45  ;;  %10350 = vmatpush3.bf16.msra.mxu0 %v11025_v10 }
 0x2b7   : > { %16440 = vst [vmem:[#allocation26_spill] sm:$0xff] %v13723_v37  ;;  %v13737_v17 = vadd.f32 %v16421_v20, %v16444_v61  ;;  %v13741_v24 = vadd.f32 %v16421_v20, %v16446_v59  ;;  %v16447_v37 = vld [vmem:[#allocation41_spill] sm:$0xff]  ;;  %v16448_v34 = vld [vmem:[#allocation47_spill] sm:$0xff]  ;;  %v13792_v45 = vadd.f32 %v16421_v20, %v13467_v4  ;;  %10393 = vmatprep.subr.bf16.mxu1 %v11026_v15  ;;  %v16462_v10 = vld [vmem:[#allocation44_spill] sm:$0xff] }
 0x2b8   : > { %16443 = vst [vmem:[#allocation28_spill] sm:$0xff] %v13733_v16  ;;  %v13745_v41 = vadd.f32 %v16421_v20, %v16447_v37  ;;  %v13749_v62 = vadd.f32 %v16421_v20, %v16448_v34  ;;  %16450 = vst [vmem:[#allocation31_spill] sm:$0xff] %v13753_v48  ;;  %v16451_v16 = vld [vmem:[#allocation49_spill] sm:$0xff]  ;;  %v11027_v37 = vld [vmem:[%s16441_s12 + $0x10] sm:$0xff]   ;;  %v13768_v34 = vadd.f32 %v16421_v20, %v13443_v35  ;;  %10394 = vmatpush3.bf16.msra.mxu1 %v11026_v15 }
 0x2b9   : > { %16445 = vst [vmem:[#allocation29_spill] sm:$0xff] %v13737_v17  ;;  %v13757_v61 = vadd.f32 %v16421_v20, %v16451_v16  ;;  %v16452_v17 = vld [vmem:[#allocation50_spill] sm:$0xff]  ;;  %v13788_v35 = vadd.f32 %v16421_v20, %v13463_v33  ;;  %16456 = vst [vmem:[#allocation32_spill] sm:$0xff] %v13792_v45  ;;  %v13807_v33 = vadd.f32 %v16421_v20, %v13479_v14  ;;  %v16464_v45 = vld [vmem:[#allocation45_spill] sm:$0xff]  ;;  %10351 = vmatprep.subr.bf16.mxu0 %v11027_v37 }
 0x2ba   : > { %v13761_v59 = vadd.f32 %v16421_v20, %v16452_v17  ;;  %v16454_v48 = vld [vmem:[#allocation42_spill] sm:$0xff]  ;;  %v13780_v17 = vadd.f32 %v16421_v20, %v13455_v31  ;;  %v11028_v31 = vld [vmem:[%s16441_s12] sm:$0xff]   ;;  %v13811_v4 = vadd.f32 %v16421_v20, %v13483_v26  ;;  %10352 = vmatpush3.bf16.msra.mxu0 %v11027_v37  ;;  %v13876_v37 = vadd.f32 %v16421_v20, %v13543_v3 }
 0x2bb   : > { %v13776_v16 = vadd.f32 %v16421_v20, %v16454_v48  ;;  %16455 = vst [vmem:[#allocation43_spill] sm:$0xff] %v13788_v35  ;;  %v13796_v48 = vadd.f32 %v16421_v20, %v13471_v25  ;;  %16459 = vst [vmem:[#allocation34_spill] sm:$0xff] %v13807_v33  ;;  %v13815_v25 = vadd.f32 %v16421_v20, %v13487_v23  ;;  %v16468_v33 = vld [vmem:[#allocation11_spill] sm:$0xff]  ;;  %v13836_v23 = vld [vmem:[%s16441_s12 + $0x28] sm:$0xff]   ;;  %10395 = vmatprep.subr.bf16.mxu1 %v11028_v31 }
 0x2bc   : > { %16453 = vst [vmem:[#allocation30_spill] sm:$0xff] %v13761_v59  ;;  %v13784_v59 = vadd.f32 %v16421_v20, %v13459_v28  ;;  %v13803_v28 = vadd.f32 %v16421_v20, %v13475_v2  ;;  %16460 = vst [vmem:[#allocation36_spill] sm:$0xff] %v13811_v4  ;;  %v13823_v2 = vadd.f32 %v16421_v20, %v16464_v45  ;;  %v16471_v15 = vld [vmem:[#allocation12_spill] sm:$0xff]  ;;  %10396 = vmatpush3.bf16.msra.mxu1 %v11028_v31 }
 0x2bd   : > { %16457 = vst [vmem:[#allocation33_spill] sm:$0xff] %v13796_v48  ;;  %16461 = vst [vmem:[#allocation37_spill] sm:$0xff] %v13815_v25  ;;  %v13819_v48 = vadd.f32 %v16421_v20, %v16462_v10  ;;  %v13831_v26 = vadd.f32 %v16421_v20, %v16468_v33  ;;  %v13840_v10 = vadd.f32 %v16421_v20, %v16471_v15  ;;  %10437 = vmatprep.subr.bf16.mxu0 %v13836_v23 }
 0x2be   : > { %16458 = vst [vmem:[#allocation35_spill] sm:$0xff] %v13803_v28  ;;  %16465 = vst [vmem:[#allocation38_spill] sm:$0xff] %v13823_v2  ;;  %v16466_v28 = vld [vmem:[#allocation46_spill] sm:$0xff]  ;;  %v13844_v45 = vadd.f32 %v16421_v20, %v13511_v12  ;;  %v13852_v33 = vadd.f32 %v16421_v20, %v13519_v13  ;;  %v13860_v15 = vadd.f32 %v16421_v20, %v13527_v44  ;;  %v13895_v3 = vmul.f32 0.5, %v13563_v51 }
 0x2bf   : > { %16463 = vst [vmem:[#allocation39_spill] sm:$0xff] %v13819_v48  ;;  %v13827_v14 = vadd.f32 %v16421_v20, %v16466_v28  ;;  %16469 = vst [vmem:[#allocation41_spill] sm:$0xff] %v13831_v26  ;;  %v13848_v28 = vadd.f32 %v16421_v20, %v13515_v1  ;;  %v16476_v26 = vld [vmem:[#allocation13_spill] sm:$0xff]  ;;  %v13864_v12 = vadd.f32 %v16421_v20, %v13531_v21  ;;  %v13913_v31 = vmul.f32 0.5, %v13587_v47  ;;  %v16549_v48 = vld [vmem:[#allocation31_spill] sm:$0xff] }
 0x2c0   : > { %16470 = vst [vmem:[#allocation47_spill] sm:$0xff] %v13836_v23  ;;  %16472 = vst [vmem:[#allocation48_spill] sm:$0xff] %v13840_v10  ;;  %v13872_v13 = vadd.f32 %v16421_v20, %v13539_v60  ;;  %v13880_v44 = vadd.f32 %v16421_v20, %v13547_v46  ;;  %v13884_v21 = vadd.f32 %v16421_v20, %v13551_v7  ;;  %v13892_v60 = vmul.f32 0.5, %v13559_v29  ;;  %v16542_v10 = vld [vmem:[#allocation28_spill] sm:$0xff]  ;;  %v16544_v2 = vld [vmem:[#allocation29_spill] sm:$0xff] }
 0x2c1   : > { %16467 = vst [vmem:[#allocation40_spill] sm:$0xff] %v13827_v14  ;;  %16473 = vst [vmem:[#allocation49_spill] sm:$0xff] %v13844_v45  ;;  %v13856_v14 = vadd.f32 %v16421_v20, %v16476_v26  ;;  %v16480_v45 = vld [vmem:[#allocation15_spill] sm:$0xff]  ;;  %v13888_v26 = vadd.f32 %v16421_v20, %v13555_v40  ;;  %v13898_v46 = vmul.f32 0.5, %v13567_v22  ;;  %v13904_v7 = vmul.f32 0.5, %v13575_v38 }
 0x2c2   : > { %16474 = vst [vmem:[#allocation50_spill] sm:$0xff] %v13848_v28  ;;  %16475 = vst [vmem:[#allocation42_spill] sm:$0xff] %v13852_v33  ;;  %v13868_v1 = vadd.f32 %v16421_v20, %v16480_v45  ;;  %v13901_v45 = vmul.f32 0.5, %v13571_v6  ;;  %v13907_v20 = vmul.f32 0.5, %v13579_v54  ;;  %v13910_v40 = vmul.f32 0.5, %v13583_v53  ;;  %v16538_v33 = vld [vmem:[#allocation27_spill] sm:$0xff] }
 0x2c3   : > { %16477 = vst [vmem:[#allocation44_spill] sm:$0xff] %v13856_v14  ;;  %16478 = vst [vmem:[#allocation45_spill] sm:$0xff] %v13860_v15  ;;  %v13925_v23 = vmul.f32 0.5, %v13603_v58  ;;  %v16534_v15 = vld [vmem:[#allocation24_spill] sm:$0xff]  ;;  %v16536_v14 = vld [vmem:[#allocation25_spill] sm:$0xff]  ;;  %v14052_v35 = vmul.f32 0.5, %v13776_v16 }
 0x2c4   : > { %16479 = vst [vmem:[#allocation46_spill] sm:$0xff] %v13864_v12  ;;  %16481 = vst [vmem:[#allocation11_spill] sm:$0xff] %v13868_v1  ;;  %v16530_v1 = vld [vmem:[#allocation23_spill] sm:$0xff]  ;;  %v16532_v12 = vld [vmem:[#allocation22_spill] sm:$0xff]  ;;  %v2888_v25 = vmul.f32 0.70710677, %v13563_v51 }
 0x2c5   : > { %16482 = vst [vmem:[#allocation12_spill] sm:$0xff] %v13872_v13  ;;  %16483 = vst [vmem:[#allocation13_spill] sm:$0xff] %v13876_v37  ;;  %v16526_v37 = vld [vmem:[#allocation20_spill] sm:$0xff]  ;;  %v16528_v13 = vld [vmem:[#allocation21_spill] sm:$0xff]  ;;  %v2892_v51 = vmul.f32 0.70710677, %v13579_v54 }
 0x2c6   : > { %16484 = vst [vmem:[#allocation15_spill] sm:$0xff] %v13880_v44  ;;  %16485 = vst [vmem:[#allocation51_spill] sm:$0xff] %v13884_v21  ;;  %v13919_v21 = vmul.f32 0.5, %v13595_v49  ;;  %v13922_v44 = vmul.f32 0.5, %v13599_v9  ;;  %v16540_v28 = vld [vmem:[#allocation26_spill] sm:$0xff] }
 0x2c7   : > { %16486 = vst [vmem:[#allocation52_spill] sm:$0xff] %v13888_v26  ;;  %16487 = vst [vmem:[#allocation53_spill] sm:$0xff] %v13892_v60  ;;  %v13916_v26 = vmul.f32 0.5, %v13591_v18  ;;  %v16524_v60 = vld [vmem:[#allocation18_spill] sm:$0xff]  ;;  %v2901_v54 = vmul.f32 0.70710677, %v13615_v39 }
 0x2c8   : > { %16488 = vst [vmem:[#allocation54_spill] sm:$0xff] %v13895_v3  ;;  %16489 = vst [vmem:[#allocation55_spill] sm:$0xff] %v13898_v46  ;;  %v16520_v46 = vld [vmem:[#allocation17_spill] sm:$0xff]  ;;  %v16522_v3 = vld [vmem:[#allocation19_spill] sm:$0xff] }
 0x2c9   : > { %16490 = vst [vmem:[#allocation56_spill] sm:$0xff] %v13901_v45  ;;  %16491 = vst [vmem:[#allocation57_spill] sm:$0xff] %v13904_v7  ;;  %v16516_v7 = vld [vmem:[#allocation14_spill] sm:$0xff]  ;;  %v16518_v45 = vld [vmem:[#allocation16_spill] sm:$0xff] }
 0x2ca   : > { %16492 = vst [vmem:[#allocation58_spill] sm:$0xff] %v13907_v20  ;;  %16493 = vst [vmem:[#allocation59_spill] sm:$0xff] %v13910_v40  ;;  %v13928_v20 = vmul.f32 0.5, %v13607_v63  ;;  %v13931_v40 = vmul.f32 0.5, %v13611_v5  ;;  %v16552_v4 = vld [vmem:[#allocation30_spill] sm:$0xff] }
 0x2cb   : > { %16494 = vst [vmem:[#allocation60_spill] sm:$0xff] %v13913_v31  ;;  %16495 = vst [vmem:[#allocation61_spill] sm:$0xff] %v13916_v26  ;;  %v13934_v31 = vmul.f32 0.5, %v13615_v39  ;;  %v13937_v26 = vmul.f32 0.5, %v13619_v55  ;;  %v14082_v39 = vmul.f32 0.70710677, %v13651_v32 }
 0x2cc   : > { %16496 = vst [vmem:[#allocation62_spill] sm:$0xff] %v13919_v21  ;;  %16497 = vst [vmem:[#allocation63_spill] sm:$0xff] %v13922_v44  ;;  %v13940_v21 = vmul.f32 0.5, %v13623_v27  ;;  %v13943_v44 = vmul.f32 0.5, %v13627_v0 }
 0x2cd   : > { %16498 = vst [vmem:[#allocation64_spill] sm:$0xff] %v13925_v23  ;;  %16499 = vst [vmem:[#allocation65_spill] sm:$0xff] %v13928_v20  ;;  %v13946_v23 = vmul.f32 0.5, %v13631_v57  ;;  %v13949_v20 = vmul.f32 0.5, %v13635_v19 }
 0x2ce   : > { %16500 = vst [vmem:[#allocation66_spill] sm:$0xff] %v13931_v40  ;;  %16501 = vst [vmem:[#allocation67_spill] sm:$0xff] %v13934_v31  ;;  %v13952_v40 = vmul.f32 0.5, %v13639_v8  ;;  %v13955_v31 = vmul.f32 0.5, %v13643_v11 }
 0x2cf   : > { %16502 = vst [vmem:[#allocation68_spill] sm:$0xff] %v13937_v26  ;;  %16503 = vst [vmem:[#allocation69_spill] sm:$0xff] %v13940_v21  ;;  %v13958_v26 = vmul.f32 0.5, %v13647_v43  ;;  %v13961_v21 = vmul.f32 0.5, %v13651_v32  ;;  %v14109_v32 = vmul.f32 0.70710677, %v16522_v3 }
 0x2d0   : > { %16504 = vst [vmem:[#allocation70_spill] sm:$0xff] %v13943_v44  ;;  %16505 = vst [vmem:[#allocation71_spill] sm:$0xff] %v13946_v23  ;;  %v13964_v44 = vmul.f32 0.5, %v13655_v30  ;;  %v13967_v23 = vmul.f32 0.5, %v13659_v36 }
 0x2d1   : > { %16506 = vst [vmem:[#allocation72_spill] sm:$0xff] %v13949_v20  ;;  %16507 = vst [vmem:[#allocation73_spill] sm:$0xff] %v13952_v40  ;;  %v13970_v20 = vmul.f32 0.5, %v13663_v42  ;;  %v13973_v40 = vmul.f32 0.5, %v13667_v52 }
 0x2d2   : > { %16508 = vst [vmem:[#allocation74_spill] sm:$0xff] %v13955_v31  ;;  %16509 = vst [vmem:[#allocation75_spill] sm:$0xff] %v13958_v26  ;;  %v13976_v31 = vmul.f32 0.5, %v13671_v50  ;;  %v13979_v26 = vmul.f32 0.5, %v16516_v7 }
 0x2d3   : > { %16510 = vst [vmem:[#allocation76_spill] sm:$0xff] %v13961_v21  ;;  %16511 = vst [vmem:[#allocation77_spill] sm:$0xff] %v13964_v44  ;;  %v13982_v21 = vmul.f32 0.5, %v16518_v45  ;;  %v13985_v44 = vmul.f32 0.5, %v16520_v46 }
 0x2d4   : > { %16512 = vst [vmem:[#allocation78_spill] sm:$0xff] %v13967_v23  ;;  %16513 = vst [vmem:[#allocation79_spill] sm:$0xff] %v13970_v20  ;;  %v13988_v23 = vmul.f32 0.5, %v16522_v3  ;;  %v13991_v20 = vmul.f32 0.5, %v16524_v60 }
 0x2d5   : > { %16514 = vst [vmem:[#allocation80_spill] sm:$0xff] %v13973_v40  ;;  %16515 = vst [vmem:[#allocation81_spill] sm:$0xff] %v13976_v31  ;;  %v13994_v40 = vmul.f32 0.5, %v16526_v37  ;;  %v13997_v31 = vmul.f32 0.5, %v16528_v13 }
 0x2d6   : > { %16517 = vst [vmem:[#allocation14_spill] sm:$0xff] %v13979_v26  ;;  %16519 = vst [vmem:[#allocation16_spill] sm:$0xff] %v13982_v21  ;;  %v14000_v26 = vmul.f32 0.5, %v16530_v1  ;;  %v14003_v21 = vmul.f32 0.5, %v16532_v12 }
 0x2d7   : > { %16521 = vst [vmem:[#allocation17_spill] sm:$0xff] %v13985_v44  ;;  %16523 = vst [vmem:[#allocation19_spill] sm:$0xff] %v13988_v23  ;;  %v14006_v44 = vmul.f32 0.5, %v16534_v15  ;;  %v14009_v23 = vmul.f32 0.5, %v16536_v14 }
 0x2d8   : > { %16525 = vst [vmem:[#allocation18_spill] sm:$0xff] %v13991_v20  ;;  %16527 = vst [vmem:[#allocation20_spill] sm:$0xff] %v13994_v40  ;;  %v14012_v20 = vmul.f32 0.5, %v16538_v33  ;;  %v14015_v40 = vmul.f32 0.5, %v16540_v28 }
 0x2d9   : > { %16529 = vst [vmem:[#allocation21_spill] sm:$0xff] %v13997_v31  ;;  %16531 = vst [vmem:[#allocation23_spill] sm:$0xff] %v14000_v26  ;;  %v14018_v31 = vmul.f32 0.5, %v16542_v10  ;;  %v14021_v26 = vmul.f32 0.5, %v16544_v2 }
 0x2da   : > { %16533 = vst [vmem:[#allocation22_spill] sm:$0xff] %v14003_v21  ;;  %16535 = vst [vmem:[#allocation24_spill] sm:$0xff] %v14006_v44  ;;  %v14024_v21 = vmul.f32 0.5, %v13741_v24  ;;  %v14027_v44 = vmul.f32 0.5, %v13745_v41 }
 0x2db   : > { %16537 = vst [vmem:[#allocation25_spill] sm:$0xff] %v14009_v23  ;;  %16539 = vst [vmem:[#allocation27_spill] sm:$0xff] %v14012_v20  ;;  %v14030_v23 = vmul.f32 0.5, %v13749_v62  ;;  %v14033_v20 = vmul.f32 0.5, %v16549_v48 }
 0x2dc   : > { %16541 = vst [vmem:[#allocation26_spill] sm:$0xff] %v14015_v40  ;;  %16543 = vst [vmem:[#allocation28_spill] sm:$0xff] %v14018_v31  ;;  %v14036_v40 = vmul.f32 0.5, %v13757_v61  ;;  %v2887_v31 = vmul.f32 0.70710677, %v13559_v29 }
 0x2dd   : > { %16545 = vst [vmem:[#allocation29_spill] sm:$0xff] %v14021_v26  ;;  %16546 = vst [vmem:[#allocation82_spill] sm:$0xff] %v14024_v21  ;;  %v2889_v26 = vmul.f32 0.70710677, %v13567_v22  ;;  %v14042_v21 = vmul.f32 0.5, %v16552_v4 }
 0x2de   : > { %16547 = vst [vmem:[#allocation83_spill] sm:$0xff] %v14027_v44  ;;  %16548 = vst [vmem:[#allocation84_spill] sm:$0xff] %v14030_v23  ;;  %v14045_v44 = vmul.f32 0.5, %v13768_v34  ;;  %v14048_v23 = vmul.f32 0.5, %v13772_v56  ;;  %v2891_v29 = vmul.f32 0.70710677, %v13575_v38  ;;  %11131 = verf.f32 %v2887_v31 }
 0x2df   : > { %16550 = vst [vmem:[#allocation31_spill] sm:$0xff] %v14033_v20  ;;  %16551 = vst [vmem:[#allocation85_spill] sm:$0xff] %v14036_v40  ;;  %v2890_v20 = vmul.f32 0.70710677, %v13571_v6  ;;  %v2893_v22 = vmul.f32 0.70710677, %v13583_v53  ;;  %11133 = verf.f32 %v2888_v25 }
 0x2e0   : > { %16553 = vst [vmem:[#allocation30_spill] sm:$0xff] %v14042_v21  ;;  %16554 = vst [vmem:[#allocation86_spill] sm:$0xff] %v14045_v44  ;;  %v2894_v21 = vmul.f32 0.70710677, %v13587_v47  ;;  %v2895_v40 = vmul.f32 0.70710677, %v13591_v18  ;;  %11135 = verf.f32 %v2889_v26 }
 0x2e1   : > { %16555 = vst [vmem:[#allocation87_spill] sm:$0xff] %v14048_v23  ;;  %16556 = vst [vmem:[#allocation88_spill] sm:$0xff] %v14052_v35  ;;  %v2896_v44 = vmul.f32 0.70710677, %v13595_v49  ;;  %v2897_v23 = vmul.f32 0.70710677, %v13599_v9  ;;  %11137 = verf.f32 %v2890_v20 }
 0x2e2   : > { %v2898_v6 = vmul.f32 0.70710677, %v13603_v58  ;;  %v2899_v35 = vmul.f32 0.70710677, %v13607_v63  ;;  %v2900_v38 = vmul.f32 0.70710677, %v13611_v5  ;;  %11139 = verf.f32 %v2891_v29 }
 0x2e3   : > { %v2902_v53 = vmul.f32 0.70710677, %v13619_v55  ;;  %v2903_v47 = vmul.f32 0.70710677, %v13623_v27  ;;  %v2904_v18 = vmul.f32 0.70710677, %v13627_v0  ;;  %11141 = verf.f32 %v2892_v51 }
 0x2e4   : > { %v2905_v49 = vmul.f32 0.70710677, %v13631_v57  ;;  %v14070_v9 = vmul.f32 0.70710677, %v13635_v19  ;;  %v14073_v58 = vmul.f32 0.70710677, %v13639_v8  ;;  %11143 = verf.f32 %v2893_v22 }
 0x2e5   : > { %v14076_v63 = vmul.f32 0.70710677, %v13643_v11  ;;  %v14079_v5 = vmul.f32 0.70710677, %v13647_v43  ;;  %v14085_v55 = vmul.f32 0.70710677, %v13655_v30  ;;  %11145 = verf.f32 %v2894_v21 }
 0x2e6   : > { %v14088_v27 = vmul.f32 0.70710677, %v13659_v36  ;;  %v14091_v0 = vmul.f32 0.70710677, %v13663_v42  ;;  %v14094_v57 = vmul.f32 0.70710677, %v13667_v52  ;;  %11147 = verf.f32 %v2895_v40 }
 0x2e7   : > { %v14097_v19 = vmul.f32 0.70710677, %v13671_v50  ;;  %v14100_v8 = vmul.f32 0.70710677, %v16516_v7  ;;  %v14103_v11 = vmul.f32 0.70710677, %v16518_v45  ;;  %11149 = verf.f32 %v2896_v44 }
 0x2e8   : > { %v14106_v43 = vmul.f32 0.70710677, %v16520_v46  ;;  %v14112_v30 = vmul.f32 0.70710677, %v16524_v60  ;;  %v14115_v36 = vmul.f32 0.70710677, %v16526_v37  ;;  %11151 = verf.f32 %v2897_v23 }
 0x2e9   : > { %v14118_v42 = vmul.f32 0.70710677, %v16528_v13  ;;  %v14121_v52 = vmul.f32 0.70710677, %v16530_v1  ;;  %v14124_v50 = vmul.f32 0.70710677, %v16532_v12  ;;  %11153 = verf.f32 %v2898_v6 }
 0x2ea   : > { %v14127_v25 = vmul.f32 0.70710677, %v16534_v15  ;;  %v14130_v44 = vmul.f32 0.70710677, %v16536_v14  ;;  %v14133_v37 = vmul.f32 0.70710677, %v16538_v33  ;;  %11155 = verf.f32 %v2899_v35 }
 0x2eb   : > { %v14136_v13 = vmul.f32 0.70710677, %v16540_v28  ;;  %v11132_v23 = vpop.eup %11131  ;;  %v14139_v1 = vmul.f32 0.70710677, %v16542_v10  ;;  %v14142_v12 = vmul.f32 0.70710677, %v16544_v2  ;;  %11157 = verf.f32 %v2900_v38 }
 0x2ec   : > { %v14145_v15 = vmul.f32 0.70710677, %v13741_v24  ;;  %v11134_v14 = vpop.eup %11133  ;;  %v14148_v21 = vmul.f32 0.70710677, %v13745_v41  ;;  %v14151_v33 = vmul.f32 0.70710677, %v13749_v62  ;;  %11159 = verf.f32 %v2901_v54 }
 0x2ed   : > { %v14154_v35 = vmul.f32 0.70710677, %v16549_v48  ;;  %v11136_v10 = vpop.eup %11135  ;;  %v14157_v28 = vmul.f32 0.70710677, %v13757_v61  ;;  %v14160_v2 = vmul.f32 0.70710677, %v16552_v4  ;;  %11161 = verf.f32 %v2902_v53 }
 0x2ee   : > { %v14163_v24 = vmul.f32 0.70710677, %v13768_v34  ;;  %v11138_v41 = vpop.eup %11137  ;;  %v14166_v26 = vmul.f32 0.70710677, %v13772_v56  ;;  %v14169_v62 = vmul.f32 0.70710677, %v13776_v16  ;;  %11163 = verf.f32 %v2903_v47 }
 0x2ef   : > { %v14172_v48 = vmul.f32 0.70710677, %v13780_v17  ;;  %v11140_v61 = vpop.eup %11139  ;;  %v14175_v60 = vmul.f32 0.70710677, %v13784_v59  ;;  %v16557_v4 = vld [vmem:[#allocation43_spill] sm:$0xff]  ;;  %v16558_v34 = vld [vmem:[#allocation32_spill] sm:$0xff]  ;;  %11165 = verf.f32 %v2904_v18 }
 0x2f0   : > { %v14178_v3 = vmul.f32 0.70710677, %v16557_v4  ;;  %v14181_v46 = vmul.f32 0.70710677, %v16558_v34  ;;  %v11142_v56 = vpop.eup %11141  ;;  %v16559_v45 = vld [vmem:[#allocation33_spill] sm:$0xff]  ;;  %v16561_v16 = vld [vmem:[#allocation35_spill] sm:$0xff]  ;;  %11167 = verf.f32 %v2905_v49 }
 0x2f1   : > { %v14184_v7 = vmul.f32 0.70710677, %v16559_v45  ;;  %v14187_v20 = vmul.f32 0.70710677, %v16561_v16  ;;  %v16563_v40 = vld [vmem:[#allocation34_spill] sm:$0xff]  ;;  %v11144_v29 = vpop.eup %11143  ;;  %v16565_v51 = vld [vmem:[#allocation36_spill] sm:$0xff]  ;;  %11169 = verf.f32 %v14070_v9 }
 0x2f2   : > { %v14190_v31 = vmul.f32 0.70710677, %v16563_v40  ;;  %v14193_v22 = vmul.f32 0.70710677, %v16565_v51  ;;  %v16567_v6 = vld [vmem:[#allocation37_spill] sm:$0xff]  ;;  %v16569_v54 = vld [vmem:[#allocation39_spill] sm:$0xff]  ;;  %v11146_v47 = vpop.eup %11145  ;;  %11171 = verf.f32 %v14073_v58 }
 0x2f3   : > { %16560 = vst [vmem:[#allocation43_spill] sm:$0xff] %v14184_v7  ;;  %16562 = vst [vmem:[#allocation32_spill] sm:$0xff] %v14187_v20  ;;  %v14196_v38 = vmul.f32 0.70710677, %v16567_v6  ;;  %v14199_v53 = vmul.f32 0.70710677, %v16569_v54  ;;  %v11148_v51 = vpop.eup %11147  ;;  %11173 = verf.f32 %v14076_v63 }
 0x2f4   : > { %16564 = vst [vmem:[#allocation89_spill] sm:$0xff] %v14190_v31  ;;  %16566 = vst [vmem:[#allocation90_spill] sm:$0xff] %v14193_v22  ;;  %v16571_v18 = vld [vmem:[#allocation38_spill] sm:$0xff]  ;;  %v16573_v20 = vld [vmem:[#allocation40_spill] sm:$0xff]  ;;  %11175 = verf.f32 %v14079_v5  ;;  %v3048_v5 = vadd.f32 1.0, %v11134_v14 }
 0x2f5   : > { %16568 = vst [vmem:[#allocation91_spill] sm:$0xff] %v14196_v38  ;;  %16570 = vst [vmem:[#allocation92_spill] sm:$0xff] %v14199_v53  ;;  %v14203_v16 = vmul.f32 0.70710677, %v16571_v18  ;;  %v14206_v40 = vmul.f32 0.70710677, %v16573_v20  ;;  %v11150_v18 = vpop.eup %11149  ;;  %11177 = verf.f32 %v14082_v39 }
 0x2f6   : > { %v16575_v49 = vld [vmem:[#allocation41_spill] sm:$0xff]  ;;  %v16577_v6 = vld [vmem:[#allocation48_spill] sm:$0xff]  ;;  %v16581_v9 = vld [vmem:[#allocation50_spill] sm:$0xff]  ;;  %11179 = verf.f32 %v14085_v55  ;;  %v3054_v39 = vadd.f32 1.0, %v11146_v47 }
 0x2f7   : > { %16572 = vst [vmem:[#allocation93_spill] sm:$0xff] %v14203_v16  ;;  %16574 = vst [vmem:[#allocation94_spill] sm:$0xff] %v14206_v40  ;;  %v14209_v31 = vmul.f32 0.70710677, %v16575_v49  ;;  %v14213_v38 = vmul.f32 0.70710677, %v16577_v6  ;;  %v11152_v6 = vpop.eup %11151  ;;  %11181 = verf.f32 %v14088_v27 }
 0x2f8   : > { %v16579_v54 = vld [vmem:[#allocation49_spill] sm:$0xff]  ;;  %v14219_v22 = vmul.f32 0.70710677, %v16581_v9  ;;  %v16583_v20 = vld [vmem:[#allocation42_spill] sm:$0xff]  ;;  %v16585_v49 = vld [vmem:[#allocation44_spill] sm:$0xff]  ;;  %11183 = verf.f32 %v14091_v0  ;;  %v3057_v55 = vadd.f32 1.0, %v11152_v6 }
 0x2f9   : > { %16576 = vst [vmem:[#allocation95_spill] sm:$0xff] %v14209_v31  ;;  %16578 = vst [vmem:[#allocation96_spill] sm:$0xff] %v14213_v38  ;;  %v14216_v53 = vmul.f32 0.70710677, %v16579_v54  ;;  %v14223_v40 = vmul.f32 0.70710677, %v16583_v20  ;;  %v11154_v20 = vpop.eup %11153  ;;  %11185 = verf.f32 %v14094_v57 }
 0x2fa   : > { %16582 = vst [vmem:[#allocation98_spill] sm:$0xff] %v14219_v22  ;;  %v14226_v31 = vmul.f32 0.70710677, %v16585_v49  ;;  %v16587_v58 = vld [vmem:[#allocation45_spill] sm:$0xff]  ;;  %v16589_v54 = vld [vmem:[#allocation46_spill] sm:$0xff]  ;;  %v16591_v9 = vld [vmem:[#allocation11_spill] sm:$0xff] }
 0x2fb   : > { %16580 = vst [vmem:[#allocation97_spill] sm:$0xff] %v14216_v53  ;;  %16584 = vst [vmem:[#allocation99_spill] sm:$0xff] %v14223_v40  ;;  %v14229_v16 = vmul.f32 0.70710677, %v16587_v58  ;;  %v14233_v53 = vmul.f32 0.70710677, %v16589_v54 }
 0x2fc   : > { %16586 = vst [vmem:[#allocation100_spill] sm:$0xff] %v14226_v31  ;;  %v14236_v22 = vmul.f32 0.70710677, %v16591_v9  ;;  %v16593_v63 = vld [vmem:[#allocation12_spill] sm:$0xff]  ;;  %v16595_v49 = vld [vmem:[#allocation13_spill] sm:$0xff]  ;;  %v3047_v58 = vadd.f32 1.0, %v11132_v23 }
 0x2fd   : > { %16588 = vst [vmem:[#allocation101_spill] sm:$0xff] %v14229_v16  ;;  %16590 = vst [vmem:[#allocation102_spill] sm:$0xff] %v14233_v53  ;;  %v14239_v38 = vmul.f32 0.70710677, %v16593_v63  ;;  %v14243_v31 = vmul.f32 0.70710677, %v16595_v49  ;;  %v11156_v16 = vpop.eup %11155  ;;  %11187 = verf.f32 %v14097_v19 }
 0x2fe   : > { %16592 = vst [vmem:[#allocation103_spill] sm:$0xff] %v14236_v22  ;;  %v3049_v54 = vadd.f32 1.0, %v11136_v10  ;;  %v3050_v53 = vadd.f32 1.0, %v11138_v41  ;;  %v3051_v9 = vadd.f32 1.0, %v11140_v61  ;;  %v11158_v22 = vpop.eup %11157  ;;  %v3052_v63 = vadd.f32 1.0, %v11142_v56  ;;  %v16597_v56 = vld [vmem:[#allocation53_spill] sm:$0xff] }
 0x2ff   : > { %16594 = vst [vmem:[#allocation104_spill] sm:$0xff] %v14239_v38  ;;  %16596 = vst [vmem:[#allocation105_spill] sm:$0xff] %v14243_v31  ;;  %v3053_v38 = vadd.f32 1.0, %v11144_v29  ;;  %v11160_v40 = vpop.eup %11159  ;;  %v3055_v49 = vadd.f32 1.0, %v11148_v51  ;;  %v3056_v31 = vadd.f32 1.0, %v11150_v18  ;;  %v3058_v14 = vadd.f32 1.0, %v11154_v20 }
 0x300   : > { %v11162_v23 = vpop.eup %11161  ;;  %v3059_v27 = vadd.f32 1.0, %v11156_v16  ;;  %v3060_v10 = vadd.f32 1.0, %v11158_v22  ;;  %11189 = verf.f32 %v14100_v8  ;;  %v3061_v61 = vadd.f32 1.0, %v11160_v40  ;;  %v16598_v51 = vld [vmem:[#allocation54_spill] sm:$0xff]  ;;  %v16599_v6 = vld [vmem:[#allocation55_spill] sm:$0xff]  ;;  %v16600_v16 = vld [vmem:[#allocation56_spill] sm:$0xff] }
 0x301   : > { %v11164_v41 = vpop.eup %11163  ;;  %v3062_v0 = vadd.f32 1.0, %v11162_v23  ;;  %v3127_v29 = vmul.f32 %v3047_v58, %v16597_v56  ;;  %11191 = verf.f32 %v14103_v11  ;;  %v3128_v18 = vmul.f32 %v3048_v5, %v16598_v51  ;;  %v16601_v22 = vld [vmem:[#allocation57_spill] sm:$0xff]  ;;  %v16602_v11 = vld [vmem:[#allocation58_spill] sm:$0xff] }
 0x302   : > { %v11166_v47 = vpop.eup %11165  ;;  %v3063_v57 = vadd.f32 1.0, %v11164_v41  ;;  %v3129_v45 = vmul.f32 %v3049_v54, %v16599_v6  ;;  %11193 = verf.f32 %v14106_v43  ;;  %v3130_v20 = vmul.f32 %v3050_v53, %v16600_v16  ;;  %v16603_v41 = vld [vmem:[#allocation59_spill] sm:$0xff]  ;;  %v16604_v53 = vld [vmem:[#allocation60_spill] sm:$0xff]  ;;  %v16605_v56 = vld [vmem:[#allocation61_spill] sm:$0xff] }
 0x303   : > { %v11168_v7 = vpop.eup %11167  ;;  %v3064_v19 = vadd.f32 1.0, %v11166_v47  ;;  %v3131_v8 = vmul.f32 %v3051_v9, %v16601_v22  ;;  %3207 = vst.msk [vmem:[#allocation2] sm:$0xff] %vm2056_vm3, %v3127_v29  ;;  %11195 = verf.f32 %v14109_v32  ;;  %v3132_v23 = vmul.f32 %v3052_v63, %v16602_v11  ;;  %3208 = vst.msk [vmem:[#allocation2 + $0x8] sm:$0xff] %vm2056_vm3, %v3128_v18  ;;  %v16607_v47 = vld [vmem:[#allocation63_spill] sm:$0xff]  ;;  %v16609_v18 = vld [vmem:[#allocation65_spill] sm:$0xff] }
 0x304   : > { %v11170_v40 = vpop.eup %11169  ;;  %v3065_v58 = vadd.f32 1.0, %v11168_v7  ;;  %v3133_v5 = vmul.f32 %v3053_v38, %v16603_v41  ;;  %3209 = vst.msk [vmem:[#allocation2 + $0x10] sm:$0xff] %vm2056_vm3, %v3129_v45  ;;  %11197 = verf.f32 %v14112_v30  ;;  %v3134_v9 = vmul.f32 %v3054_v39, %v16604_v53  ;;  %3210 = vst.msk [vmem:[#allocation2 + $0x18] sm:$0xff] %vm2056_vm3, %v3130_v20  ;;  %v16606_v38 = vld [vmem:[#allocation62_spill] sm:$0xff]  ;;  %v16608_v39 = vld [vmem:[#allocation64_spill] sm:$0xff] }
 0x305   : > { %v11172_v43 = vpop.eup %11171  ;;  %v3066_v54 = vadd.f32 1.0, %v11170_v40  ;;  %v3135_v29 = vmul.f32 %v3055_v49, %v16605_v56  ;;  %3211 = vst.msk [vmem:[#allocation2 + $0x20] sm:$0xff] %vm2056_vm3, %v3131_v8  ;;  %11199 = verf.f32 %v14115_v36  ;;  %v3136_v63 = vmul.f32 %v3056_v31, %v16606_v38  ;;  %3212 = vst.msk [vmem:[#allocation2 + $0x28] sm:$0xff] %vm2056_vm3, %v3132_v23  ;;  %v16611_v20 = vld [vmem:[#allocation67_spill] sm:$0xff]  ;;  %v16613_v40 = vld [vmem:[#allocation69_spill] sm:$0xff] }
 0x306   : > { %v11174_v32 = vpop.eup %11173  ;;  %v3067_v7 = vadd.f32 1.0, %v11172_v43  ;;  %v3137_v45 = vmul.f32 %v3057_v55, %v16607_v47  ;;  %3213 = vst.msk [vmem:[#allocation2 + $0x30] sm:$0xff] %vm2056_vm3, %v3133_v5  ;;  %11201 = verf.f32 %v14118_v42  ;;  %v3138_v51 = vmul.f32 %v3058_v14, %v16608_v39  ;;  %3214 = vst.msk [vmem:[#allocation2 + $0x38] sm:$0xff] %vm2056_vm3, %v3134_v9  ;;  %v16610_v55 = vld [vmem:[#allocation66_spill] sm:$0xff]  ;;  %v16615_v41 = vld [vmem:[#allocation71_spill] sm:$0xff] }
 0x307   : > { %v11176_v30 = vpop.eup %11175  ;;  %v3068_v49 = vadd.f32 1.0, %v11174_v32  ;;  %v3139_v6 = vmul.f32 %v3059_v27, %v16609_v18  ;;  %3215 = vst.msk [vmem:[#allocation2 + $0x40] sm:$0xff] %vm2056_vm3, %v3135_v29  ;;  %11203 = verf.f32 %v14121_v52  ;;  %v3140_v16 = vmul.f32 %v3060_v10, %v16610_v55  ;;  %3216 = vst.msk [vmem:[#allocation2 + $0x48] sm:$0xff] %vm2056_vm3, %v3136_v63  ;;  %v16612_v27 = vld [vmem:[#allocation68_spill] sm:$0xff]  ;;  %v16617_v53 = vld [vmem:[#allocation73_spill] sm:$0xff] }
 0x308   : > { %v11178_v36 = vpop.eup %11177  ;;  %v3069_v31 = vadd.f32 1.0, %v11176_v30  ;;  %v3141_v22 = vmul.f32 %v3061_v61, %v16611_v20  ;;  %3217 = vst.msk [vmem:[#allocation2 + $0x50] sm:$0xff] %vm2056_vm3, %v3137_v45  ;;  %11205 = verf.f32 %v14124_v50  ;;  %v3142_v8 = vmul.f32 %v3062_v0, %v16612_v27  ;;  %3218 = vst.msk [vmem:[#allocation2 + $0x58] sm:$0xff] %vm2056_vm3, %v3138_v51  ;;  %v16614_v61 = vld [vmem:[#allocation70_spill] sm:$0xff]  ;;  %v16619_v29 = vld [vmem:[#allocation75_spill] sm:$0xff] }
 0x309   : > { %v11180_v42 = vpop.eup %11179  ;;  %v3070_v14 = vadd.f32 1.0, %v11178_v36  ;;  %v3143_v11 = vmul.f32 %v3063_v57, %v16613_v40  ;;  %3219 = vst.msk [vmem:[#allocation2 + $0x60] sm:$0xff] %vm2056_vm3, %v3139_v6  ;;  %11207 = verf.f32 %v14127_v25  ;;  %v3144_v23 = vmul.f32 %v3064_v19, %v16614_v61  ;;  %3220 = vst.msk [vmem:[#allocation2 + $0x68] sm:$0xff] %vm2056_vm3, %v3140_v16  ;;  %v16616_v57 = vld [vmem:[#allocation72_spill] sm:$0xff]  ;;  %v16621_v45 = vld [vmem:[#allocation77_spill] sm:$0xff] }
 0x30a   : > { %v11182_v52 = vpop.eup %11181  ;;  %v3071_v10 = vadd.f32 1.0, %v11180_v42  ;;  %v3145_v5 = vmul.f32 %v3065_v58, %v16615_v41  ;;  %3221 = vst.msk [vmem:[#allocation2 + $0x70] sm:$0xff] %vm2056_vm3, %v3141_v22  ;;  %11209 = verf.f32 %v14130_v44  ;;  %v3146_v43 = vmul.f32 %v3066_v54, %v16616_v57  ;;  %3222 = vst.msk [vmem:[#allocation2 + $0x78] sm:$0xff] %vm2056_vm3, %v3142_v8  ;;  %v16618_v58 = vld [vmem:[#allocation74_spill] sm:$0xff]  ;;  %v16620_v63 = vld [vmem:[#allocation76_spill] sm:$0xff] }
 0x30b   : > { %v11184_v50 = vpop.eup %11183  ;;  %v3072_v0 = vadd.f32 1.0, %v11182_v52  ;;  %v3147_v9 = vmul.f32 %v3067_v7, %v16617_v53  ;;  %3223 = vst.msk [vmem:[#allocation2 + $0x80] sm:$0xff] %vm2056_vm3, %v3143_v11  ;;  %11211 = verf.f32 %v14133_v37  ;;  %v3148_v56 = vmul.f32 %v3068_v49, %v16618_v58  ;;  %3224 = vst.msk [vmem:[#allocation2 + $0x88] sm:$0xff] %vm2056_vm3, %v3144_v23  ;;  %v3399_v44 = vld [vmem:[#allocation2 + $0x1] ss:$2 sm:$0xff]  ;;  %v16623_v36 = vld [vmem:[#allocation79_spill] sm:$0xff] }
 0x30c   : > { %v11186_v25 = vpop.eup %11185  ;;  %v3073_v19 = vadd.f32 1.0, %v11184_v50  ;;  %v3149_v32 = vmul.f32 %v3069_v31, %v16619_v29  ;;  %3225 = vst.msk [vmem:[#allocation2 + $0x90] sm:$0xff] %vm2056_vm3, %v3145_v5  ;;  %v3401_v54 = vld [vmem:[#allocation2 + $0x11] ss:$2 sm:$0xff]  ;;  %11213 = verf.f32 %v14136_v13  ;;  %v3150_v47 = vmul.f32 %v3070_v14, %v16620_v63  ;;  %3226 = vst.msk [vmem:[#allocation2 + $0x98] sm:$0xff] %vm2056_vm3, %v3146_v43  ;;  %v16625_v11 = vld [vmem:[#allocation81_spill] sm:$0xff] }
 0x30d   : > { %v11188_v38 = vpop.eup %11187  ;;  %v3074_v7 = vadd.f32 1.0, %v11186_v25  ;;  %v3151_v30 = vmul.f32 %v3071_v10, %v16621_v45  ;;  %3227 = vst.msk [vmem:[#allocation2 + $0xa0] sm:$0xff] %vm2056_vm3, %v3147_v9  ;;  %v3299_v37 = vld [vmem:[#allocation2] ss:$2 sm:$0xff]  ;;  %v3301_v49 = vld [vmem:[#allocation2 + $0x10] ss:$2 sm:$0xff]  ;;  %11215 = verf.f32 %v14139_v1  ;;  %v3478_v1 = vpack.c.bf16 %v3401_v54, %v3399_v44 }
 0x30e   : > { %v11190_v39 = vpop.eup %11189  ;;  %v3075_v51 = vadd.f32 1.0, %v11188_v38  ;;  %v16622_v18 = vld [vmem:[#allocation78_spill] sm:$0xff]  ;;  %v3153_v31 = vmul.f32 %v3073_v19, %v16623_v36  ;;  %3228 = vst.msk [vmem:[#allocation2 + $0xa8] sm:$0xff] %vm2056_vm3, %v3148_v56  ;;  %3229 = vst.msk [vmem:[#allocation2 + $0xb0] sm:$0xff] %vm2056_vm3, %v3149_v32  ;;  %11217 = verf.f32 %v14142_v12  ;;  %v16624_v22 = vld [vmem:[#allocation80_spill] sm:$0xff]  ;;  %v3378_v12 = vpack.c.bf16 %v3301_v49, %v3299_v37 }
 0x30f   : > { %v3152_v6 = vmul.f32 %v3072_v0, %v16622_v18  ;;  %v3403_v13 = vld [vmem:[#allocation2 + $0x21] ss:$2 sm:$0xff]  ;;  %v3405_v55 = vld [vmem:[#allocation2 + $0x31] ss:$2 sm:$0xff]  ;;  %v11192_v16 = vpop.eup %11191  ;;  %v3076_v20 = vadd.f32 1.0, %v11190_v39  ;;  %v3154_v42 = vmul.f32 %v3074_v7, %v16624_v22  ;;  %3230 = vst.msk [vmem:[#allocation2 + $0xb8] sm:$0xff] %vm2056_vm3, %v3150_v47  ;;  %11219 = verf.f32 %v14145_v15  ;;  %10353 = vmatprep.mubr.msk.bf16.mxu0 %vm2056_vm3, %v3478_v1 }
 0x310   : > { %3231 = vst.msk [vmem:[#allocation2 + $0xc0] sm:$0xff] %vm2056_vm3, %v3151_v30  ;;  %v3303_v14 = vld [vmem:[#allocation2 + $0x20] ss:$2 sm:$0xff]  ;;  %v3305_v27 = vld [vmem:[#allocation2 + $0x30] ss:$2 sm:$0xff]  ;;  %v11194_v8 = vpop.eup %11193  ;;  %v3077_v40 = vadd.f32 1.0, %v11192_v16  ;;  %v3155_v52 = vmul.f32 %v3075_v51, %v16625_v11  ;;  %11221 = verf.f32 %v14148_v21  ;;  %v3479_v15 = vpack.c.bf16 %v3405_v55, %v3403_v13  ;;  %10397 = vmatprep.mubr.msk.bf16.mxu1 %vm2056_vm3, %v3378_v12 }
 0x311   : > { %3232 = vst.msk [vmem:[#allocation2 + $0xc8] sm:$0xff] %vm2056_vm3, %v3152_v6  ;;  %3233 = vst.msk [vmem:[#allocation2 + $0xd0] sm:$0xff] %vm2056_vm3, %v3153_v31  ;;  %v3407_v10 = vld [vmem:[#allocation2 + $0x41] ss:$2 sm:$0xff]  ;;  %v3409_v61 = vld [vmem:[#allocation2 + $0x51] ss:$2 sm:$0xff]  ;;  %v11196_v23 = vpop.eup %11195  ;;  %11223 = verf.f32 %v14151_v33  ;;  %v3379_v19 = vpack.c.bf16 %v3305_v27, %v3303_v14 }
 0x312   : > { %v3078_v41 = vadd.f32 1.0, %v11194_v8  ;;  %v16626_v5 = vld [vmem:[#allocation14_spill] sm:$0xff]  ;;  %3234 = vst.msk [vmem:[#allocation2 + $0xd8] sm:$0xff] %vm2056_vm3, %v3154_v42  ;;  %v11030_v43 = vld [vmem:[%s16441_s12 + $0x20] sm:$0xff]   ;;  %v11198_v53 = vpop.eup %11197  ;;  %v3079_v9 = vadd.f32 1.0, %v11196_v23  ;;  %3235 = vst.msk [vmem:[#allocation2 + $0xe0] sm:$0xff] %vm2056_vm3, %v3155_v52  ;;  %11225 = verf.f32 %v14154_v35  ;;  %10354 = vmatmul.mubr.msk.bf16.vlgmr.msra.gmra.mxu0 %vm2056_vm3, %v3479_v15  ;;  %v3480_v44 = vpack.c.bf16 %v3409_v61, %v3407_v10 }
 0x313   : > { %v3156_v50 = vmul.f32 %v3076_v20, %v16626_v5  ;;  %v3307_v0 = vld [vmem:[#allocation2 + $0x40] ss:$2 sm:$0xff]  ;;  %v3309_v57 = vld [vmem:[#allocation2 + $0x50] ss:$2 sm:$0xff]  ;;  %v11200_v58 = vpop.eup %11199  ;;  %v3080_v56 = vadd.f32 1.0, %v11198_v53  ;;  %11227 = verf.f32 %v14157_v28  ;;  %10398 = vmatmul.mubr.msk.bf16.vlgmr.msra.gmra.mxu1 %vm2056_vm3, %v3379_v19  ;;  %v14343_v45 = vmul.f32 0.5, %v13780_v17 }
 0x314   : > { %v16627_v25 = vld [vmem:[#allocation16_spill] sm:$0xff]  ;;  %v16628_v29 = vld [vmem:[#allocation17_spill] sm:$0xff]  ;;  %v11202_v33 = vpop.eup %11201  ;;  %v3081_v54 = vadd.f32 1.0, %v11200_v58  ;;  %v16629_v38 = vld [vmem:[#allocation19_spill] sm:$0xff]  ;;  %v3380_v63 = vpack.c.bf16 %v3309_v57, %v3307_v0  ;;  %11229 = verf.f32 %v14160_v2  ;;  %10357 = vmatprep.mubr.msk.bf16.mxu0 %vm2056_vm3, %v3480_v44  ;;  %v14350_v18 = vmul.f32 0.5, %v13784_v59 }
 0x315   : > { %v3157_v21 = vmul.f32 %v3077_v40, %v16627_v25  ;;  %v3158_v32 = vmul.f32 %v3078_v41, %v16628_v29  ;;  %3236 = vst.msk [vmem:[#allocation2 + $0xe8] sm:$0xff] %vm2056_vm3, %v3156_v50  ;;  %v3159_v7 = vmul.f32 %v3079_v9, %v16629_v38  ;;  %v16630_v35 = vld [vmem:[#allocation47_spill] sm:$0xff]  ;;  %v11204_v47 = vpop.eup %11203  ;;  %v3082_v30 = vadd.f32 1.0, %v11202_v33  ;;  %v16631_v37 = vld [vmem:[#allocation18_spill] sm:$0xff]  ;;  %v16632_v6 = vld [vmem:[#allocation20_spill] sm:$0xff] }
 0x316   : > { %10438 = vmatpush3.bf16.msra.mxu0 %v16630_v35  ;;  %v3160_v49 = vmul.f32 %v3080_v56, %v16631_v37  ;;  %v3411_v28 = vld [vmem:[#allocation2 + $0x61] ss:$2 sm:$0xff]  ;;  %v3413_v39 = vld [vmem:[#allocation2 + $0x71] ss:$2 sm:$0xff]  ;;  %v11206_v51 = vpop.eup %11205  ;;  %11231 = verf.f32 %v14163_v24  ;;  %v3083_v17 = vadd.f32 1.0, %v11204_v47  ;;  %v3161_v36 = vmul.f32 %v3081_v54, %v16632_v6  ;;  %10401 = vmatprep.mubr.msk.bf16.mxu1 %vm2056_vm3, %v3380_v63 }
 0x317   : > { %3237 = vst.msk [vmem:[#allocation2 + $0xf0] sm:$0xff] %vm2056_vm3, %v3157_v21  ;;  %3238 = vst.msk [vmem:[#allocation2 + $0xf8] sm:$0xff] %vm2056_vm3, %v3158_v32  ;;  %10439 = vmatprep.subr.bf16.mxu0 %v11030_v43  ;;  %v3311_v2 = vld [vmem:[#allocation2 + $0x60] ss:$2 sm:$0xff]  ;;  %v3313_v31 = vld [vmem:[#allocation2 + $0x70] ss:$2 sm:$0xff]  ;;  %v11208_v13 = vpop.eup %11207  ;;  %11233 = verf.f32 %v14166_v26  ;;  %v3481_v8 = vpack.c.bf16 %v3413_v39, %v3411_v28 }
 0x318   : > { %3239 = vst.msk [vmem:[#allocation2 + $0x100] sm:$0xff] %vm2056_vm3, %v3159_v7  ;;  %v14357_v55 = vmul.f32 0.5, %v16557_v4  ;;  %v3084_v16 = vadd.f32 1.0, %v11206_v51  ;;  %v16633_v59 = vld [vmem:[#allocation21_spill] sm:$0xff]  ;;  %3240 = vst.msk [vmem:[#allocation2 + $0x108] sm:$0xff] %vm2056_vm3, %v3160_v49  ;;  %v11210_v42 = vpop.eup %11209  ;;  %11235 = verf.f32 %v14169_v62  ;;  %v3085_v1 = vadd.f32 1.0, %v11208_v13 }
 0x319   : > { %v3162_v20 = vmul.f32 %v3082_v30, %v16633_v59  ;;  %v3415_v24 = vld [vmem:[#allocation2 + $0x81] ss:$2 sm:$0xff]  ;;  %v3417_v22 = vld [vmem:[#allocation2 + $0x91] ss:$2 sm:$0xff]  ;;  %3241 = vst.msk [vmem:[#allocation2 + $0x110] sm:$0xff] %vm2056_vm3, %v3161_v36  ;;  %v11212_v26 = vpop.eup %11211  ;;  %11237 = verf.f32 %v14172_v48  ;;  %v3086_v11 = vadd.f32 1.0, %v11210_v42  ;;  %v3381_v10 = vpack.c.bf16 %v3313_v31, %v3311_v2 }
 0x31a   : > { %v16634_v14 = vld [vmem:[#allocation23_spill] sm:$0xff]  ;;  %v3315_v4 = vld [vmem:[#allocation2 + $0x80] ss:$2 sm:$0xff]  ;;  %10440 = vmatpush3.bf16.msra.mxu0 %v11030_v43  ;;  %v11214_v61 = vpop.eup %11213  ;;  %11239 = verf.f32 %v14175_v60  ;;  %v3087_v62 = vadd.f32 1.0, %v11212_v26  ;;  %v3482_v5 = vpack.c.bf16 %v3417_v22, %v3415_v24  ;;  %v14384_v19 = vmul.f32 0.5, %v16558_v34 }
 0x31b   : > { %v3163_v27 = vmul.f32 %v3083_v17, %v16634_v14  ;;  %v3317_v40 = vld [vmem:[#allocation2 + $0x90] ss:$2 sm:$0xff]  ;;  %3242 = vst.msk [vmem:[#allocation2 + $0x118] sm:$0xff] %vm2056_vm3, %v3162_v20  ;;  %v11216_v50 = vpop.eup %11215  ;;  %11241 = verf.f32 %v14178_v3  ;;  %v3088_v15 = vadd.f32 1.0, %v11214_v61  ;;  %v16637_v48 = vld [vmem:[#allocation25_spill] sm:$0xff]  ;;  %10358 = vmatmul.mubr.msk.bf16.gmra.mxu0 %vm2056_vm3, %v3481_v8  ;;  %10402 = vmatmul.mubr.msk.bf16.gmra.mxu1 %vm2056_vm3, %v3381_v10 }
 0x31c   : > { %v16635_v52 = vld [vmem:[#allocation22_spill] sm:$0xff]  ;;  %v16636_v23 = vld [vmem:[#allocation24_spill] sm:$0xff]  ;;  %v3166_v0 = vmul.f32 %v3086_v11, %v16637_v48  ;;  %v3382_v57 = vpack.c.bf16 %v3317_v40, %v3315_v4  ;;  %v11218_v43 = vpop.eup %11217  ;;  %v16638_v53 = vld [vmem:[#allocation15_spill] sm:$0xff]  ;;  %11243 = verf.f32 %v14181_v46  ;;  %v3089_v9 = vadd.f32 1.0, %v11216_v50  ;;  %10361 = vmatprep.mubr.msk.bf16.mxu0 %vm2056_vm3, %v3482_v5 }
 0x31d   : > { %v3164_v12 = vmul.f32 %v3084_v16, %v16635_v52  ;;  %v3165_v41 = vmul.f32 %v3085_v1, %v16636_v23  ;;  %3243 = vst.msk [vmem:[#allocation2 + $0x120] sm:$0xff] %vm2056_vm3, %v3163_v27  ;;  %v14376_v60 = vmul.f32 0.70710677, %v16638_v53  ;;  %v16639_v25 = vld [vmem:[#allocation27_spill] sm:$0xff]  ;;  %v11220_v3 = vpop.eup %11219  ;;  %v3090_v56 = vadd.f32 1.0, %v11218_v43  ;;  %v16641_v29 = vld [vmem:[#allocation26_spill] sm:$0xff] }
 0x31e   : > { %v3167_v21 = vmul.f32 %v3087_v62, %v16639_v25  ;;  %v16640_v58 = vld [vmem:[#allocation43_spill] sm:$0xff]  ;;  %v3168_v32 = vmul.f32 %v3088_v15, %v16641_v29  ;;  %3246 = vst.msk [vmem:[#allocation2 + $0x138] sm:$0xff] %vm2056_vm3, %v3166_v0  ;;  %10405 = vmatprep.mubr.msk.bf16.mxu1 %vm2056_vm3, %v3382_v57  ;;  %v3419_v46 = vld [vmem:[#allocation2 + $0xa1] ss:$2 sm:$0xff]  ;;  %v11222_v33 = vpop.eup %11221  ;;  %v3091_v63 = vadd.f32 1.0, %v11220_v3 }
 0x31f   : > { %3244 = vst.msk [vmem:[#allocation2 + $0x128] sm:$0xff] %vm2056_vm3, %v3164_v12  ;;  %3245 = vst.msk [vmem:[#allocation2 + $0x130] sm:$0xff] %vm2056_vm3, %v3165_v41  ;;  %11245 = verf.f32 %v16640_v58  ;;  %v3421_v44 = vld [vmem:[#allocation2 + $0xb1] ss:$2 sm:$0xff]  ;;  %v16642_v54 = vld [vmem:[#allocation33_spill] sm:$0xff]  ;;  %v11224_v37 = vpop.eup %11223  ;;  %v3092_v51 = vadd.f32 1.0, %v11222_v33 }
 0x320   : > { %v14391_v38 = vmul.f32 0.5, %v16642_v54  ;;  %v16643_v7 = vld [vmem:[#allocation32_spill] sm:$0xff]  ;;  %3247 = vst.msk [vmem:[#allocation2 + $0x140] sm:$0xff] %vm2056_vm3, %v3167_v21  ;;  %v16645_v49 = vld [vmem:[#allocation35_spill] sm:$0xff]  ;;  %v16646_v39 = vld [vmem:[#allocation89_spill] sm:$0xff]  ;;  %v11226_v31 = vpop.eup %11225  ;;  %v3093_v16 = vadd.f32 1.0, %v11224_v37  ;;  %v3483_v24 = vpack.c.bf16 %v3421_v44, %v3419_v46 }
 0x321   : > { %11247 = verf.f32 %v16643_v7  ;;  %v16644_v34 = vld [vmem:[#allocation28_spill] sm:$0xff]  ;;  %v14397_v28 = vmul.f32 0.5, %v16645_v49  ;;  %v16647_v17 = vld [vmem:[#allocation29_spill] sm:$0xff]  ;;  %3248 = vst.msk [vmem:[#allocation2 + $0x148] sm:$0xff] %vm2056_vm3, %v3168_v32  ;;  %v16648_v13 = vld [vmem:[#allocation90_spill] sm:$0xff]  ;;  %v11228_v1 = vpop.eup %11227  ;;  %v3094_v27 = vadd.f32 1.0, %v11226_v31 }
 0x322   : > { %v3169_v35 = vmul.f32 %v3089_v9, %v16644_v34  ;;  %v3319_v47 = vld [vmem:[#allocation2 + $0xa0] ss:$2 sm:$0xff]  ;;  %v3321_v30 = vld [vmem:[#allocation2 + $0xb0] ss:$2 sm:$0xff]  ;;  %11249 = verf.f32 %v16646_v39  ;;  %v3170_v6 = vmul.f32 %v3090_v56, %v16647_v17  ;;  %v3423_v36 = vld [vmem:[#allocation2 + $0xc1] ss:$2 sm:$0xff]  ;;  %v11230_v26 = vpop.eup %11229 }
 0x323   : > { %v3425_v2 = vld [vmem:[#allocation2 + $0xd1] ss:$2 sm:$0xff]  ;;  %11251 = verf.f32 %v16648_v13  ;;  %v3323_v22 = vld [vmem:[#allocation2 + $0xc0] ss:$2 sm:$0xff]  ;;  %v3325_v42 = vld [vmem:[#allocation2 + $0xd0] ss:$2 sm:$0xff]  ;;  %v3383_v40 = vpack.c.bf16 %v3321_v30, %v3319_v47  ;;  %v11232_v62 = vpop.eup %11231  ;;  %10362 = vmatmul.mubr.msk.bf16.gmra.mxu0 %vm2056_vm3, %v3483_v24 }
 0x324   : > { %v16649_v59 = vld [vmem:[#allocation82_spill] sm:$0xff]  ;;  %3249 = vst.msk [vmem:[#allocation2 + $0x150] sm:$0xff] %vm2056_vm3, %v3169_v35  ;;  %v16650_v14 = vld [vmem:[#allocation91_spill] sm:$0xff]  ;;  %3250 = vst.msk [vmem:[#allocation2 + $0x158] sm:$0xff] %vm2056_vm3, %v3170_v6  ;;  %v3095_v52 = vadd.f32 1.0, %v11228_v1  ;;  %v3484_v61 = vpack.c.bf16 %v3425_v2, %v3423_v36  ;;  %v3096_v41 = vadd.f32 1.0, %v11230_v26  ;;  %v3384_v15 = vpack.c.bf16 %v3325_v42, %v3323_v22  ;;  %v11234_v48 = vpop.eup %11233 }
 0x325   : > { %v3171_v20 = vmul.f32 %v3091_v63, %v16649_v59  ;;  %11253 = verf.f32 %v16650_v14  ;;  %v16651_v8 = vld [vmem:[#allocation83_spill] sm:$0xff]  ;;  %v16652_v11 = vld [vmem:[#allocation92_spill] sm:$0xff]  ;;  %v16654_v23 = vld [vmem:[#allocation93_spill] sm:$0xff]  ;;  %v3097_v9 = vadd.f32 1.0, %v11232_v62  ;;  %10406 = vmatmul.mubr.msk.bf16.gmra.mxu1 %vm2056_vm3, %v3383_v40  ;;  %v11236_v3 = vpop.eup %11235  ;;  %v3098_v32 = vadd.f32 1.0, %v11234_v48 }
 0x326   : > { %v3172_v4 = vmul.f32 %v3092_v51, %v16651_v8  ;;  %11255 = verf.f32 %v16652_v11  ;;  %v16653_v12 = vld [vmem:[#allocation84_spill] sm:$0xff]  ;;  %v16655_v5 = vld [vmem:[#allocation31_spill] sm:$0xff]  ;;  %v16657_v43 = vld [vmem:[#allocation94_spill] sm:$0xff]  ;;  %10365 = vmatprep.mubr.msk.bf16.mxu0 %vm2056_vm3, %v3484_v61  ;;  %10409 = vmatprep.mubr.msk.bf16.mxu1 %vm2056_vm3, %v3384_v15  ;;  %v11238_v7 = vpop.eup %11237  ;;  %v3099_v47 = vadd.f32 1.0, %v11236_v3 }
 0x327   : > { %v3173_v10 = vmul.f32 %v3093_v16, %v16653_v12  ;;  %3251 = vst.msk [vmem:[#allocation2 + $0x160] sm:$0xff] %vm2056_vm3, %v3171_v20  ;;  %11257 = verf.f32 %v16654_v23  ;;  %v3174_v50 = vmul.f32 %v3094_v27, %v16655_v5  ;;  %v16656_v0 = vld [vmem:[#allocation51_spill] sm:$0xff]  ;;  %v16658_v25 = vld [vmem:[#allocation85_spill] sm:$0xff]  ;;  %v16659_v58 = vld [vmem:[#allocation34_spill] sm:$0xff]  ;;  %v11240_v51 = vpop.eup %11239  ;;  %v3100_v2 = vadd.f32 1.0, %v11238_v7 }
 0x328   : > { %3252 = vst.msk [vmem:[#allocation2 + $0x168] sm:$0xff] %vm2056_vm3, %v3172_v4  ;;  %v14416_v57 = vmul.f32 0.70710677, %v16656_v0  ;;  %11259 = verf.f32 %v16657_v43  ;;  %v3175_v21 = vmul.f32 %v3095_v52, %v16658_v25  ;;  %v14424_v56 = vmul.f32 0.5, %v16659_v58  ;;  %v16660_v29 = vld [vmem:[#allocation95_spill] sm:$0xff]  ;;  %v16661_v46 = vld [vmem:[#allocation30_spill] sm:$0xff]  ;;  %v11242_v20 = vpop.eup %11241 }
 0x329   : > { %3253 = vst.msk [vmem:[#allocation2 + $0x170] sm:$0xff] %vm2056_vm3, %v3173_v10  ;;  %11261 = verf.f32 %v16660_v29  ;;  %v3176_v44 = vmul.f32 %v3096_v41, %v16661_v46  ;;  %3254 = vst.msk [vmem:[#allocation2 + $0x178] sm:$0xff] %vm2056_vm3, %v3174_v50  ;;  %v3427_v33 = vld [vmem:[#allocation2 + $0xe1] ss:$2 sm:$0xff]  ;;  %v3429_v54 = vld [vmem:[#allocation2 + $0xf1] ss:$2 sm:$0xff]  ;;  %v11244_v4 = vpop.eup %11243  ;;  %v3180_v11 = vmul.f32 %v3100_v2, %v14343_v45 }
 0x32a   : > { %v16662_v63 = vld [vmem:[#allocation36_spill] sm:$0xff]  ;;  %v16664_v30 = vld [vmem:[#allocation86_spill] sm:$0xff]  ;;  %3255 = vst.msk [vmem:[#allocation2 + $0x180] sm:$0xff] %vm2056_vm3, %v3175_v21  ;;  %v16665_v17 = vld [vmem:[#allocation37_spill] sm:$0xff]  ;;  %v3101_v22 = vadd.f32 1.0, %v11240_v51  ;;  %v3485_v14 = vpack.c.bf16 %v3429_v54, %v3427_v33  ;;  %v3102_v26 = vadd.f32 1.0, %v11242_v20 }
 0x32b   : > { %v14431_v34 = vmul.f32 0.5, %v16662_v63  ;;  %v16663_v35 = vld [vmem:[#allocation96_spill] sm:$0xff]  ;;  %v3177_v37 = vmul.f32 %v3097_v9, %v16664_v30  ;;  %v14437_v6 = vmul.f32 0.5, %v16665_v17  ;;  %v16666_v36 = vld [vmem:[#allocation97_spill] sm:$0xff]  ;;  %v16667_v31 = vld [vmem:[#allocation87_spill] sm:$0xff]  ;;  %3256 = vst.msk [vmem:[#allocation2 + $0x188] sm:$0xff] %vm2056_vm3, %v3176_v44 }
 0x32c   : > { %11263 = verf.f32 %v16663_v35  ;;  %v3327_v49 = vld [vmem:[#allocation2 + $0xe0] ss:$2 sm:$0xff]  ;;  %v3329_v39 = vld [vmem:[#allocation2 + $0xf0] ss:$2 sm:$0xff]  ;;  %v3178_v13 = vmul.f32 %v3098_v32, %v16667_v31  ;;  %v3431_v16 = vld [vmem:[#allocation2 + $0x101] ss:$2 sm:$0xff]  ;;  %v11246_v12 = vpop.eup %11245  ;;  %v3181_v62 = vmul.f32 %v3101_v22, %v14350_v18  ;;  %v3182_v15 = vmul.f32 %v3102_v26, %v14357_v55  ;;  %10366 = vmatmul.mubr.msk.bf16.gmra.mxu0 %vm2056_vm3, %v3485_v14 }
 0x32d   : > { %11265 = verf.f32 %v16666_v36  ;;  %v3433_v59 = vld [vmem:[#allocation2 + $0x111] ss:$2 sm:$0xff]  ;;  %3257 = vst.msk [vmem:[#allocation2 + $0x190] sm:$0xff] %vm2056_vm3, %v3177_v37  ;;  %v3331_v27 = vld [vmem:[#allocation2 + $0x100] ss:$2 sm:$0xff]  ;;  %v3385_v52 = vpack.c.bf16 %v3329_v39, %v3327_v49  ;;  %v3103_v61 = vadd.f32 1.0, %v11244_v4 }
 0x32e   : > { %v16668_v24 = vld [vmem:[#allocation98_spill] sm:$0xff]  ;;  %v16669_v42 = vld [vmem:[#allocation88_spill] sm:$0xff]  ;;  %v16670_v40 = vld [vmem:[#allocation99_spill] sm:$0xff]  ;;  %3258 = vst.msk [vmem:[#allocation2 + $0x198] sm:$0xff] %vm2056_vm3, %v3178_v13  ;;  %v3486_v23 = vpack.c.bf16 %v3433_v59, %v3431_v16  ;;  %v11248_v41 = vpop.eup %11247  ;;  %v3104_v50 = vadd.f32 1.0, %v11246_v12 }
 0x32f   : > { %11267 = verf.f32 %v16668_v24  ;;  %v3179_v1 = vmul.f32 %v3099_v47, %v16669_v42  ;;  %v3333_v8 = vld [vmem:[#allocation2 + $0x110] ss:$2 sm:$0xff]  ;;  %v16672_v5 = vld [vmem:[#allocation101_spill] sm:$0xff]  ;;  %3260 = vst.msk [vmem:[#allocation2 + $0x1a8] sm:$0xff] %vm2056_vm3, %v3180_v11  ;;  %v11250_v48 = vpop.eup %11249  ;;  %v3105_v18 = vadd.f32 1.0, %v11248_v41  ;;  %v3183_v21 = vmul.f32 %v3103_v61, %v14384_v19  ;;  %3261 = vst.msk [vmem:[#allocation2 + $0x1b0] sm:$0xff] %vm2056_vm3, %v3181_v62  ;;  %10410 = vmatmul.mubr.msk.bf16.gmra.mxu1 %vm2056_vm3, %v3385_v52 }
 0x330   : > { %11269 = verf.f32 %v16670_v40  ;;  %v16671_v10 = vld [vmem:[#allocation100_spill] sm:$0xff]  ;;  %v3386_v45 = vpack.c.bf16 %v3333_v8, %v3331_v27  ;;  %v16674_v25 = vld [vmem:[#allocation102_spill] sm:$0xff]  ;;  %10369 = vmatprep.mubr.msk.bf16.mxu0 %vm2056_vm3, %v3486_v23  ;;  %v11252_v55 = vpop.eup %11251  ;;  %v16675_v3 = vld [vmem:[#allocation39_spill] sm:$0xff]  ;;  %v3106_v32 = vadd.f32 1.0, %v11250_v48  ;;  %v3184_v46 = vmul.f32 %v3104_v50, %v14391_v38  ;;  %3262 = vst.msk [vmem:[#allocation2 + $0x1b8] sm:$0xff] %vm2056_vm3, %v3182_v15 }
 0x331   : > { %11271 = verf.f32 %v16671_v10  ;;  %3259 = vst.msk [vmem:[#allocation2 + $0x1a0] sm:$0xff] %vm2056_vm3, %v3179_v1  ;;  %v16673_v43 = vld [vmem:[#allocation52_spill] sm:$0xff]  ;;  %v2869_v58 = vmul.f32 0.5, %v16675_v3  ;;  %v16676_v29 = vld [vmem:[#allocation103_spill] sm:$0xff]  ;;  %v16677_v54 = vld [vmem:[#allocation38_spill] sm:$0xff]  ;;  %v3107_v35 = vadd.f32 1.0, %v11252_v55  ;;  %v3185_v47 = vmul.f32 %v3105_v18, %v14397_v28 }
 0x332   : > { %11273 = verf.f32 %v16672_v5  ;;  %v2966_v9 = vmul.f32 0.70710677, %v16673_v43  ;;  %10413 = vmatprep.mubr.msk.bf16.mxu1 %vm2056_vm3, %v3386_v45  ;;  %v3435_v44 = vld [vmem:[#allocation2 + $0x121] ss:$2 sm:$0xff]  ;;  %v3437_v19 = vld [vmem:[#allocation2 + $0x131] ss:$2 sm:$0xff]  ;;  %v11254_v33 = vpop.eup %11253  ;;  %v3186_v36 = vmul.f32 %v3106_v32, %v14424_v56 }
 0x333   : > { %11275 = verf.f32 %v16674_v25  ;;  %v2870_v7 = vmul.f32 0.5, %v16677_v54  ;;  %v16678_v63 = vld [vmem:[#allocation104_spill] sm:$0xff]  ;;  %3263 = vst.msk [vmem:[#allocation2 + $0x1c0] sm:$0xff] %vm2056_vm3, %v3183_v21  ;;  %v11256_v49 = vpop.eup %11255  ;;  %v16680_v51 = vld [vmem:[#allocation105_spill] sm:$0xff]  ;;  %v3108_v17 = vadd.f32 1.0, %v11254_v33  ;;  %3264 = vst.msk [vmem:[#allocation2 + $0x1c8] sm:$0xff] %vm2056_vm3, %v3184_v46  ;;  %v3187_v16 = vmul.f32 %v3107_v35, %v14431_v34 }
 0x334   : > { %11277 = verf.f32 %v16676_v29  ;;  %v3335_v30 = vld [vmem:[#allocation2 + $0x120] ss:$2 sm:$0xff]  ;;  %v3337_v37 = vld [vmem:[#allocation2 + $0x130] ss:$2 sm:$0xff]  ;;  %v3439_v2 = vld [vmem:[#allocation2 + $0x141] ss:$2 sm:$0xff]  ;;  %v11258_v13 = vpop.eup %11257  ;;  %v3487_v59 = vpack.c.bf16 %v3437_v19, %v3435_v44 }
 0x335   : > { %11279 = verf.f32 %v16678_v63  ;;  %v16679_v38 = vld [vmem:[#allocation40_spill] sm:$0xff]  ;;  %v3109_v28 = vadd.f32 1.0, %v11256_v49  ;;  %3265 = vst.msk [vmem:[#allocation2 + $0x1d0] sm:$0xff] %vm2056_vm3, %v3185_v47  ;;  %v11260_v22 = vpop.eup %11259  ;;  %v3110_v42 = vadd.f32 1.0, %v11258_v13  ;;  %v3188_v56 = vmul.f32 %v3108_v17, %v14437_v6  ;;  %3266 = vst.msk [vmem:[#allocation2 + $0x1d8] sm:$0xff] %vm2056_vm3, %v3186_v36  ;;  %v16681_v4 = vld [vmem:[#allocation41_spill] sm:$0xff] }
 0x336   : > { %v2871_v39 = vmul.f32 0.5, %v16679_v38  ;;  %11281 = verf.f32 %v16680_v51  ;;  %v3441_v31 = vld [vmem:[#allocation2 + $0x151] ss:$2 sm:$0xff]  ;;  %v3339_v20 = vld [vmem:[#allocation2 + $0x140] ss:$2 sm:$0xff]  ;;  %v3387_v1 = vpack.c.bf16 %v3337_v37, %v3335_v30  ;;  %v11262_v14 = vpop.eup %11261  ;;  %3267 = vst.msk [vmem:[#allocation2 + $0x1e0] sm:$0xff] %vm2056_vm3, %v3187_v16  ;;  %10370 = vmatmul.mubr.msk.bf16.gmra.mxu0 %vm2056_vm3, %v3487_v59 }
 0x337   : > { %11283 = verf.f32 %v14376_v60  ;;  %v3341_v24 = vld [vmem:[#allocation2 + $0x150] ss:$2 sm:$0xff]  ;;  %v3111_v60 = vadd.f32 1.0, %v11260_v22  ;;  %v3189_v27 = vmul.f32 %v3109_v28, %v2869_v58  ;;  %v3488_v34 = vpack.c.bf16 %v3441_v31, %v3439_v2  ;;  %3268 = vst.msk [vmem:[#allocation2 + $0x1e8] sm:$0xff] %vm2056_vm3, %v3188_v56  ;;  %v16683_v10 = vld [vmem:[#allocation49_spill] sm:$0xff] }
 0x338   : > { %11285 = verf.f32 %v14416_v57  ;;  %v2872_v40 = vmul.f32 0.5, %v16681_v4  ;;  %v3112_v26 = vadd.f32 1.0, %v11262_v14  ;;  %v3190_v11 = vmul.f32 %v3110_v42, %v2870_v7  ;;  %v16682_v52 = vld [vmem:[#allocation48_spill] sm:$0xff]  ;;  %10414 = vmatmul.mubr.msk.bf16.gmra.mxu1 %vm2056_vm3, %v3387_v1  ;;  %v16684_v5 = vld [vmem:[#allocation50_spill] sm:$0xff]  ;;  %v16687_v35 = vld [vmem:[#allocation45_spill] sm:$0xff] }
 0x339   : > { %11287 = verf.f32 %v2966_v9  ;;  %v11264_v8 = vpop.eup %11263  ;;  %v3388_v57 = vpack.c.bf16 %v3341_v24, %v3339_v20  ;;  %v2873_v12 = vmul.f32 0.5, %v16682_v52  ;;  %v2874_v61 = vmul.f32 0.5, %v16683_v10  ;;  %3269 = vst.msk [vmem:[#allocation2 + $0x1f0] sm:$0xff] %vm2056_vm3, %v3189_v27  ;;  %10373 = vmatprep.mubr.msk.bf16.mxu0 %vm2056_vm3, %v3488_v34  ;;  %v3443_v48 = vld [vmem:[#allocation2 + $0x161] ss:$2 sm:$0xff]  ;;  %v16689_v22 = vld [vmem:[#allocation11_spill] sm:$0xff] }
 0x33a   : > { %v11266_v6 = vpop.eup %11265  ;;  %v3113_v62 = vadd.f32 1.0, %v11264_v8  ;;  %v3191_v23 = vmul.f32 %v3111_v60, %v2871_v39  ;;  %v2875_v50 = vmul.f32 0.5, %v16684_v5  ;;  %v3192_v45 = vmul.f32 %v3112_v26, %v2872_v40  ;;  %3270 = vst.msk [vmem:[#allocation2 + $0x1f8] sm:$0xff] %vm2056_vm3, %v3190_v11  ;;  %v3343_v9 = vld [vmem:[#allocation2 + $0x160] ss:$2 sm:$0xff] }
 0x33b   : > { %v3114_v15 = vadd.f32 1.0, %v11266_v6  ;;  %10417 = vmatprep.mubr.msk.bf16.mxu1 %vm2056_vm3, %v3388_v57  ;;  %v16685_v18 = vld [vmem:[#allocation42_spill] sm:$0xff]  ;;  %v16686_v46 = vld [vmem:[#allocation44_spill] sm:$0xff]  ;;  %v2878_v47 = vmul.f32 0.5, %v16687_v35  ;;  %v2880_v42 = vmul.f32 0.5, %v16689_v22  ;;  %v16691_v26 = vld [vmem:[#allocation13_spill] sm:$0xff] }
 0x33c   : > { %v11268_v41 = vpop.eup %11267  ;;  %v2876_v21 = vmul.f32 0.5, %v16685_v18  ;;  %v3193_v3 = vmul.f32 %v3113_v62, %v2873_v12  ;;  %3271 = vst.msk [vmem:[#allocation2 + $0x200] sm:$0xff] %vm2056_vm3, %v3191_v23  ;;  %v3445_v58 = vld [vmem:[#allocation2 + $0x171] ss:$2 sm:$0xff]  ;;  %v3345_v29 = vld [vmem:[#allocation2 + $0x170] ss:$2 sm:$0xff] }
 0x33d   : > { %v11270_v25 = vpop.eup %11269  ;;  %v3115_v55 = vadd.f32 1.0, %v11268_v41  ;;  %v2877_v44 = vmul.f32 0.5, %v16686_v46  ;;  %v3194_v33 = vmul.f32 %v3114_v15, %v2874_v61  ;;  %3272 = vst.msk [vmem:[#allocation2 + $0x208] sm:$0xff] %vm2056_vm3, %v3192_v45  ;;  %v3447_v54 = vld [vmem:[#allocation2 + $0x181] ss:$2 sm:$0xff]  ;;  %v3489_v31 = vpack.c.bf16 %v3445_v58, %v3443_v48 }
 0x33e   : > { %v11272_v32 = vpop.eup %11271  ;;  %v3116_v19 = vadd.f32 1.0, %v11270_v25  ;;  %v3449_v7 = vld [vmem:[#allocation2 + $0x191] ss:$2 sm:$0xff]  ;;  %3273 = vst.msk [vmem:[#allocation2 + $0x210] sm:$0xff] %vm2056_vm3, %v3193_v3  ;;  %v3347_v49 = vld [vmem:[#allocation2 + $0x180] ss:$2 sm:$0xff]  ;;  %v3389_v59 = vpack.c.bf16 %v3345_v29, %v3343_v9 }
 0x33f   : > { %v11274_v63 = vpop.eup %11273  ;;  %v3117_v30 = vadd.f32 1.0, %v11272_v32  ;;  %v3195_v37 = vmul.f32 %v3115_v55, %v2875_v50  ;;  %v3349_v38 = vld [vmem:[#allocation2 + $0x190] ss:$2 sm:$0xff]  ;;  %3274 = vst.msk [vmem:[#allocation2 + $0x218] sm:$0xff] %vm2056_vm3, %v3194_v33  ;;  %v3490_v20 = vpack.c.bf16 %v3449_v7, %v3447_v54  ;;  %10374 = vmatmul.mubr.msk.bf16.gmra.mxu0 %vm2056_vm3, %v3489_v31  ;;  %v2882_v11 = vmul.f32 0.5, %v16691_v26 }
 0x340   : > { %v11276_v39 = vpop.eup %11275  ;;  %v16688_v51 = vld [vmem:[#allocation46_spill] sm:$0xff]  ;;  %v3118_v36 = vadd.f32 1.0, %v11274_v63  ;;  %v3196_v2 = vmul.f32 %v3116_v19, %v2876_v21  ;;  %v3390_v14 = vpack.c.bf16 %v3349_v38, %v3347_v49  ;;  %v16690_v27 = vld [vmem:[#allocation12_spill] sm:$0xff]  ;;  %10418 = vmatmul.mubr.msk.bf16.gmra.mxu1 %vm2056_vm3, %v3389_v59  ;;  %v2883_v61 = vmul.f32 0.5, %v16638_v53 }
 0x341   : > { %v2879_v17 = vmul.f32 0.5, %v16688_v51  ;;  %v11278_v13 = vpop.eup %11277  ;;  %v3119_v28 = vadd.f32 1.0, %v11276_v39  ;;  %v3197_v16 = vmul.f32 %v3117_v30, %v2877_v44  ;;  %3275 = vst.msk [vmem:[#allocation2 + $0x220] sm:$0xff] %vm2056_vm3, %v3195_v37  ;;  %v2881_v34 = vmul.f32 0.5, %v16690_v27  ;;  %10377 = vmatprep.mubr.msk.bf16.mxu0 %vm2056_vm3, %v3490_v20  ;;  %v3451_v52 = vld [vmem:[#allocation2 + $0x1a1] ss:$2 sm:$0xff] }
 0x342   : > { %v11280_v24 = vpop.eup %11279  ;;  %v3120_v56 = vadd.f32 1.0, %v11278_v13  ;;  %v3198_v1 = vmul.f32 %v3118_v36, %v2878_v47  ;;  %3276 = vst.msk [vmem:[#allocation2 + $0x228] sm:$0xff] %vm2056_vm3, %v3196_v2  ;;  %10421 = vmatprep.mubr.msk.bf16.mxu1 %vm2056_vm3, %v3390_v14  ;;  %v3351_v12 = vld [vmem:[#allocation2 + $0x1a0] ss:$2 sm:$0xff]  ;;  %v3453_v41 = vld [vmem:[#allocation2 + $0x1b1] ss:$2 sm:$0xff] }
 0x343   : > { %v11282_v60 = vpop.eup %11281  ;;  %v3121_v8 = vadd.f32 1.0, %v11280_v24  ;;  %v3199_v4 = vmul.f32 %v3119_v28, %v2879_v17  ;;  %3277 = vst.msk [vmem:[#allocation2 + $0x230] sm:$0xff] %vm2056_vm3, %v3197_v16  ;;  %v3353_v5 = vld [vmem:[#allocation2 + $0x1b0] ss:$2 sm:$0xff]  ;;  %v2885_v15 = vmul.f32 0.5, %v16656_v0  ;;  %v2886_v18 = vmul.f32 0.5, %v16673_v43 }
 0x344   : > { %v11284_v40 = vpop.eup %11283  ;;  %v3122_v57 = vadd.f32 1.0, %v11282_v60  ;;  %v3200_v6 = vmul.f32 %v3120_v56, %v2880_v42  ;;  %3278 = vst.msk [vmem:[#allocation2 + $0x238] sm:$0xff] %vm2056_vm3, %v3198_v1  ;;  %v3455_v9 = vld [vmem:[#allocation2 + $0x1c1] ss:$2 sm:$0xff]  ;;  %v3457_v25 = vld [vmem:[#allocation2 + $0x1d1] ss:$2 sm:$0xff]  ;;  %v3491_v29 = vpack.c.bf16 %v3453_v41, %v3451_v52  ;;  %v3391_v0 = vpack.c.bf16 %v3353_v5, %v3351_v12 }
 0x345   : > { %v11286_v10 = vpop.eup %11285  ;;  %v3123_v62 = vadd.f32 1.0, %v11284_v40  ;;  %v3201_v23 = vmul.f32 %v3121_v8, %v2881_v34  ;;  %3279 = vst.msk [vmem:[#allocation2 + $0x240] sm:$0xff] %vm2056_vm3, %v3199_v4  ;;  %v3355_v53 = vld [vmem:[#allocation2 + $0x1c0] ss:$2 sm:$0xff]  ;;  %v3357_v3 = vld [vmem:[#allocation2 + $0x1d0] ss:$2 sm:$0xff]  ;;  %v3492_v46 = vpack.c.bf16 %v3457_v25, %v3455_v9 }
 0x346   : > { %v11288_v50 = vpop.eup %11287  ;;  %v3125_v45 = vadd.f32 1.0, %v11286_v10  ;;  %v3202_v48 = vmul.f32 %v3122_v57, %v2882_v11  ;;  %3280 = vst.msk [vmem:[#allocation2 + $0x248] sm:$0xff] %vm2056_vm3, %v3200_v6  ;;  %v3392_v43 = vpack.c.bf16 %v3357_v3, %v3355_v53  ;;  %v3459_v44 = vld [vmem:[#allocation2 + $0x1e1] ss:$2 sm:$0xff]  ;;  %v3461_v19 = vld [vmem:[#allocation2 + $0x1f1] ss:$2 sm:$0xff] }
 0x347   : > { %v3126_v21 = vadd.f32 1.0, %v11288_v50  ;;  %v3203_v55 = vmul.f32 %v3123_v62, %v2883_v61  ;;  %3281 = vst.msk [vmem:[#allocation2 + $0x250] sm:$0xff] %vm2056_vm3, %v3201_v23  ;;  %10378 = vmatmul.mubr.msk.bf16.gmra.mxu0 %vm2056_vm3, %v3491_v29  ;;  %v3359_v33 = vld [vmem:[#allocation2 + $0x1e0] ss:$2 sm:$0xff]  ;;  %v3361_v54 = vld [vmem:[#allocation2 + $0x1f0] ss:$2 sm:$0xff]  ;;  %v3493_v30 = vpack.c.bf16 %v3461_v19, %v3459_v44 }
 0x348   : > { %v3205_v58 = vmul.f32 %v3125_v45, %v2885_v15  ;;  %3282 = vst.msk [vmem:[#allocation2 + $0x258] sm:$0xff] %vm2056_vm3, %v3202_v48  ;;  %10422 = vmatmul.mubr.msk.bf16.gmra.mxu1 %vm2056_vm3, %v3391_v0  ;;  %10381 = vmatprep.mubr.msk.bf16.mxu0 %vm2056_vm3, %v3492_v46  ;;  %v3463_v7 = vld [vmem:[#allocation2 + $0x201] ss:$2 sm:$0xff]  ;;  %v3465_v63 = vld [vmem:[#allocation2 + $0x211] ss:$2 sm:$0xff]  ;;  %v3393_v37 = vpack.c.bf16 %v3361_v54, %v3359_v33 }
 0x349   : > { %v3206_v32 = vmul.f32 %v3126_v21, %v2886_v18  ;;  %3283 = vst.msk [vmem:[#allocation2 + $0x260] sm:$0xff] %vm2056_vm3, %v3203_v55  ;;  %10425 = vmatprep.mubr.msk.bf16.mxu1 %vm2056_vm3, %v3392_v43  ;;  %v3363_v35 = vld [vmem:[#allocation2 + $0x200] ss:$2 sm:$0xff]  ;;  %v3365_v47 = vld [vmem:[#allocation2 + $0x210] ss:$2 sm:$0xff]  ;;  %v3494_v49 = vpack.c.bf16 %v3465_v63, %v3463_v7 }
 0x34a   : > { %3285 = vst.msk [vmem:[#allocation2 + $0x270] sm:$0xff] %vm2056_vm3, %v3205_v58  ;;  %v3394_v38 = vpack.c.bf16 %v3365_v47, %v3363_v35  ;;  %v3467_v39 = vld [vmem:[#allocation2 + $0x221] ss:$2 sm:$0xff]  ;;  %v3367_v17 = vld [vmem:[#allocation2 + $0x220] ss:$2 sm:$0xff] }
 0x34b   : > { %3286 = vst.msk [vmem:[#allocation2 + $0x278] sm:$0x7f] %vm2214_vm4, %v3206_v32  ;;  %v3469_v51 = vld [vmem:[#allocation2 + $0x231] ss:$2 sm:$0xff]  ;;  %v3369_v36 = vld [vmem:[#allocation2 + $0x230] ss:$2 sm:$0xff] }
 0x34c   : > { %v3495_v16 = vpack.c.bf16 %v3469_v51, %v3467_v39  ;;  %v3395_v59 = vpack.c.bf16 %v3369_v36, %v3367_v17  ;;  %v4029_v22 = vld [vmem:[#allocation2 + $0x2] ss:$2 sm:$0xff]  ;;  %v4031_v42 = vld [vmem:[#allocation2 + $0x12] ss:$2 sm:$0xff] }
 0x34d   : > { %v3471_v2 = vld [vmem:[#allocation2 + $0x241] ss:$2 sm:$0xff]  ;;  %v3371_v13 = vld [vmem:[#allocation2 + $0x240] ss:$2 sm:$0xff]  ;;  %v4108_v8 = vpack.c.bf16 %v4031_v42, %v4029_v22 }
 0x34e   : > { %v4033_v4 = vld [vmem:[#allocation2 + $0x22] ss:$2 sm:$0xff]  ;;  %v4035_v40 = vld [vmem:[#allocation2 + $0x32] ss:$2 sm:$0xff] }
 0x34f   : > { %10382 = vmatmul.mubr.msk.bf16.gmra.mxu0 %vm2056_vm3, %v3493_v30  ;;  %v3473_v31 = vld [vmem:[#allocation2 + $0x251] ss:$2 sm:$0xff]  ;;  %v3373_v28 = vld [vmem:[#allocation2 + $0x250] ss:$2 sm:$0xff]  ;;  %v4109_v57 = vpack.c.bf16 %v4035_v40, %v4033_v4 }
 0x350   : > { %10426 = vmatmul.mubr.msk.bf16.gmra.mxu1 %vm2056_vm3, %v3393_v37  ;;  %10385 = vmatprep.mubr.msk.bf16.mxu0 %vm2056_vm3, %v3494_v49  ;;  %v3496_v20 = vpack.c.bf16 %v3473_v31, %v3471_v2  ;;  %v3396_v24 = vpack.c.bf16 %v3373_v28, %v3371_v13  ;;  %v3475_v56 = vld [vmem:[#allocation2 + $0x261] ss:$2 sm:$0xff]  ;;  %v3375_v14 = vld [vmem:[#allocation2 + $0x260] ss:$2 sm:$0xff] }
 0x351   : > { %10429 = vmatprep.mubr.msk.bf16.mxu1 %vm2056_vm3, %v3394_v38  ;;  %v4037_v26 = vld [vmem:[#allocation2 + $0x42] ss:$2 sm:$0xff]  ;;  %v4039_v11 = vld [vmem:[#allocation2 + $0x52] ss:$2 sm:$0xff] }
 0x352   : > { %v3477_v1 = vld [vmem:[#allocation2 + $0x271] ss:$2 sm:$0x7f]  ;;  %v3377_v60 = vld [vmem:[#allocation2 + $0x270] ss:$2 sm:$0x7f]  ;;  %v4110_v6 = vpack.c.bf16 %v4039_v11, %v4037_v26 }
 0x353   : > { %v3497_v27 = vpack.c.bf16 %v3477_v1, %v3475_v56  ;;  %v3397_v34 = vpack.c.bf16 %v3377_v60, %v3375_v14  ;;  %v4041_v52 = vld [vmem:[#allocation2 + $0x62] ss:$2 sm:$0xff]  ;;  %v4043_v12 = vld [vmem:[#allocation2 + $0x72] ss:$2 sm:$0xff] }
 0x354   : > { %v4045_v10 = vld [vmem:[#allocation2 + $0x82] ss:$2 sm:$0xff]  ;;  %v4047_v61 = vld [vmem:[#allocation2 + $0x92] ss:$2 sm:$0xff]  ;;  %v4111_v62 = vpack.c.bf16 %v4043_v12, %v4041_v52 }
 0x355   : > { %v4112_v23 = vpack.c.bf16 %v4047_v61, %v4045_v10  ;;  %v4049_v41 = vld [vmem:[#allocation2 + $0xa2] ss:$2 sm:$0xff]  ;;  %v4051_v5 = vld [vmem:[#allocation2 + $0xb2] ss:$2 sm:$0xff] }
 0x356   : > { %v4053_v50 = vld [vmem:[#allocation2 + $0xc2] ss:$2 sm:$0xff]  ;;  %v4055_v15 = vld [vmem:[#allocation2 + $0xd2] ss:$2 sm:$0xff]  ;;  %v4113_v45 = vpack.c.bf16 %v4051_v5, %v4049_v41 }
 0x357   : > { %10386 = vmatmul.mubr.msk.bf16.gmra.mxu0 %vm2056_vm3, %v3495_v16  ;;  %v4114_v48 = vpack.c.bf16 %v4055_v15, %v4053_v50  ;;  %v4057_v9 = vld [vmem:[#allocation2 + $0xe2] ss:$2 sm:$0xff]  ;;  %v4059_v25 = vld [vmem:[#allocation2 + $0xf2] ss:$2 sm:$0xff] }
 0x358   : > { %10430 = vmatmul.mubr.msk.bf16.gmra.mxu1 %vm2056_vm3, %v3395_v59  ;;  %10389 = vmatprep.mubr.msk.bf16.mxu0 %vm2056_vm3, %v3496_v20  ;;  %v4061_v18 = vld [vmem:[#allocation2 + $0x102] ss:$2 sm:$0xff]  ;;  %v4063_v21 = vld [vmem:[#allocation2 + $0x112] ss:$2 sm:$0xff]  ;;  %v4115_v55 = vpack.c.bf16 %v4059_v25, %v4057_v9 }
 0x359   : > { %10433 = vmatprep.mubr.msk.bf16.mxu1 %vm2056_vm3, %v3396_v24  ;;  %v4116_v53 = vpack.c.bf16 %v4063_v21, %v4061_v18  ;;  %v4065_v3 = vld [vmem:[#allocation2 + $0x122] ss:$2 sm:$0xff]  ;;  %v4067_v58 = vld [vmem:[#allocation2 + $0x132] ss:$2 sm:$0xff] }
 0x35a   : > { %v4069_v29 = vld [vmem:[#allocation2 + $0x142] ss:$2 sm:$0xff]  ;;  %v4071_v32 = vld [vmem:[#allocation2 + $0x152] ss:$2 sm:$0xff]  ;;  %v4117_v0 = vpack.c.bf16 %v4067_v58, %v4065_v3 }
 0x35b   : > { %v4118_v46 = vpack.c.bf16 %v4071_v32, %v4069_v29  ;;  %v4073_v43 = vld [vmem:[#allocation2 + $0x162] ss:$2 sm:$0xff]  ;;  %v4075_v44 = vld [vmem:[#allocation2 + $0x172] ss:$2 sm:$0xff] }
 0x35c   : > { %v4077_v19 = vld [vmem:[#allocation2 + $0x182] ss:$2 sm:$0xff]  ;;  %v4079_v33 = vld [vmem:[#allocation2 + $0x192] ss:$2 sm:$0xff]  ;;  %v4119_v54 = vpack.c.bf16 %v4075_v44, %v4073_v43 }
 0x35d   : > { %v4120_v7 = vpack.c.bf16 %v4079_v33, %v4077_v19  ;;  %v4081_v63 = vld [vmem:[#allocation2 + $0x1a2] ss:$2 sm:$0xff]  ;;  %v4083_v35 = vld [vmem:[#allocation2 + $0x1b2] ss:$2 sm:$0xff] }
 0x35e   : > { %v4085_v47 = vld [vmem:[#allocation2 + $0x1c2] ss:$2 sm:$0xff]  ;;  %v4087_v30 = vld [vmem:[#allocation2 + $0x1d2] ss:$2 sm:$0xff]  ;;  %v4121_v37 = vpack.c.bf16 %v4083_v35, %v4081_v63 }
 0x35f   : > { %10390 = vmatmul.mubr.msk.bf16.gmra.mxu0 %vm2056_vm3, %v3497_v27  ;;  %v4122_v49 = vpack.c.bf16 %v4087_v30, %v4085_v47  ;;  %v4089_v38 = vld [vmem:[#allocation2 + $0x1e2] ss:$2 sm:$0xff]  ;;  %v4091_v39 = vld [vmem:[#allocation2 + $0x1f2] ss:$2 sm:$0xff] }
 0x360   : > { %10434 = vmatmul.mubr.msk.bf16.gmra.mxu1 %vm2056_vm3, %v3397_v34  ;;  %10441 = vmatprep.mubr.msk.bf16.mxu0 %vm2056_vm3, %v4108_v8  ;;  %v4093_v51 = vld [vmem:[#allocation2 + $0x202] ss:$2 sm:$0xff]  ;;  %v4095_v17 = vld [vmem:[#allocation2 + $0x212] ss:$2 sm:$0xff]  ;;  %v4123_v36 = vpack.c.bf16 %v4091_v39, %v4089_v38 }
 0x361   : > { %v4124_v2 = vpack.c.bf16 %v4095_v17, %v4093_v51  ;;  %v4097_v31 = vld [vmem:[#allocation2 + $0x222] ss:$2 sm:$0xff]  ;;  %v4099_v13 = vld [vmem:[#allocation2 + $0x232] ss:$2 sm:$0xff] }
 0x362   : > { %v4101_v28 = vld [vmem:[#allocation2 + $0x242] ss:$2 sm:$0xff]  ;;  %v4103_v16 = vld [vmem:[#allocation2 + $0x252] ss:$2 sm:$0xff]  ;;  %v4125_v59 = vpack.c.bf16 %v4099_v13, %v4097_v31 }
 0x363   : > { %v4126_v20 = vpack.c.bf16 %v4103_v16, %v4101_v28  ;;  %v4105_v24 = vld [vmem:[#allocation2 + $0x262] ss:$2 sm:$0xff]  ;;  %v4107_v22 = vld [vmem:[#allocation2 + $0x272] ss:$2 sm:$0x7f] }
 0x364   : > { %v4127_v42 = vpack.c.bf16 %v4107_v22, %v4105_v24  ;;  %v11031_v56 = vld [vmem:[%s16441_s12 + $0x48] sm:$0xff]   ;;  %v11032_v61 = vld [vmem:[%s16441_s12 + $0x40] sm:$0xff]   ;;  %v11034_v15 = vld [vmem:[%s16441_s12 + $0x50] sm:$0xff]  }
 0x365   : > { %10481 = vmatprep.subr.bf16.mxu1 %v11031_v56  ;;  %v14654_v30 = vld [vmem:[%s16441_s12 + $0x38] sm:$0xff]  }
 0x366   : > { %10482 = vmatpush3.bf16.msra.mxu1 %v11031_v56 }
 0x367   : > { %10442 = vmatmul.mubr.msk.bf16.vlgmr.msra.gmra.mxu0 %vm2056_vm3, %v4109_v57  ;;  %10483 = vmatprep.subr.bf16.mxu1 %v11032_v61 }
 0x368   : > { %10445 = vmatprep.mubr.msk.bf16.mxu0 %vm2056_vm3, %v4110_v6 }
 0x36a   : > { %10484 = vmatpush3.bf16.msra.mxu1 %v11032_v61 }
 0x36b   : > { %10505 = vmatprep.subr.bf16.mxu1 %v14654_v30 }
 0x36f   : > { %10446 = vmatmul.mubr.msk.bf16.gmra.mxu0 %vm2056_vm3, %v4111_v62  ;;  %v11033_v62 = vld [vmem:[%s16441_s12 + $0x58] sm:$0xff]  }
 0x370   : > { %10449 = vmatprep.mubr.msk.bf16.mxu0 %vm2056_vm3, %v4112_v23  ;;  %10529 = vmatprep.subr.bf16.mxu0 %v11033_v62 }
 0x371   : > { %10530 = vmatpush3.bf16.msra.mxu0 %v11033_v62 }
 0x372   : > { %10531 = vmatprep.subr.bf16.mxu0 %v11034_v15 }
 0x375   : > { %10532 = vmatpush3.bf16.msra.mxu0 %v11034_v15 }
 0x377   : > { %10450 = vmatmul.mubr.msk.bf16.gmra.mxu0 %vm2056_vm3, %v4113_v45 }
 0x378   : > { %10453 = vmatprep.mubr.msk.bf16.mxu0 %vm2056_vm3, %v4114_v48 }
 0x37f   : > { %10454 = vmatmul.mubr.msk.bf16.gmra.mxu0 %vm2056_vm3, %v4115_v55 }
 0x380   : > { %10457 = vmatprep.mubr.msk.bf16.mxu0 %vm2056_vm3, %v4116_v53 }
 0x387   : > { %10458 = vmatmul.mubr.msk.bf16.gmra.mxu0 %vm2056_vm3, %v4117_v0 }
 0x388   : > { %10461 = vmatprep.mubr.msk.bf16.mxu0 %vm2056_vm3, %v4118_v46 }
 0x38f   : > { %10462 = vmatmul.mubr.msk.bf16.gmra.mxu0 %vm2056_vm3, %v4119_v54 }
 0x390   : > { %10465 = vmatprep.mubr.msk.bf16.mxu0 %vm2056_vm3, %v4120_v7 }
 0x397   : > { %10466 = vmatmul.mubr.msk.bf16.gmra.mxu0 %vm2056_vm3, %v4121_v37 }
 0x398   : > { %10469 = vmatprep.mubr.msk.bf16.mxu0 %vm2056_vm3, %v4122_v49 }
 0x39f   : > { %10470 = vmatmul.mubr.msk.bf16.gmra.mxu0 %vm2056_vm3, %v4123_v36 }
 0x3a0   : > { %10473 = vmatprep.mubr.msk.bf16.mxu0 %vm2056_vm3, %v4124_v2 }
 0x3a7   : > { %10474 = vmatmul.mubr.msk.bf16.gmra.mxu0 %vm2056_vm3, %v4125_v59 }
 0x3a8   : > { %10477 = vmatprep.mubr.msk.bf16.mxu0 %vm2056_vm3, %v4126_v20 }
 0x3af   : > { %10478 = vmatmul.mubr.msk.bf16.gmra.mxu0 %vm2056_vm3, %v4127_v42 }
 0x3d2   : > { %v14558_v1 = vpop.f32.mrf.mxu0 }
 0x3d3   : > { %v14560_v14 = vpop.f32.mrf.mxu1 }
 0x3d4   : > { %v14562_v60 = vpop.f32.mrf.mxu0  ;;  %v3878_v62 = vadd.f32 %v14560_v14, %v14558_v1 }
 0x3d5   : > { %v14564_v27 = vpop.f32.mrf.mxu1 }
 0x3d6   : > { %v14566_v34 = vpop.f32.mrf.mxu0 }
 0x3d7   : > { %v14568_v8 = vpop.f32.mrf.mxu1 }
 0x3d8   : > { %v14570_v4 = vpop.f32.mrf.mxu0 }
 0x3d9   : > { %v14574_v26 = vpop.f32.mrf.mxu1 }
 0x3db   : > { %v14572_v40 = vpop.f32.mrf.mxu0  ;;  %v14580_v6 = vpop.f32.mrf.mxu1 }
 0x3dd   : > { %v14576_v11 = vpop.f32.mrf.mxu0  ;;  %v14586_v10 = vpop.f32.mrf.mxu1 }
 0x3df   : > { %v14578_v57 = vpop.f32.mrf.mxu0  ;;  %v14598_v5 = vpop.f32.mrf.mxu1 }
 0x3e1   : > { %v14582_v52 = vpop.f32.mrf.mxu0  ;;  %v14607_v48 = vpop.f32.mrf.mxu1 }
 0x3e3   : > { %v14584_v12 = vpop.f32.mrf.mxu0 }
 0x3e5   : > { %v14594_v23 = vpop.f32.mrf.mxu0  ;;  %v14613_v18 = vpop.f32.mrf.mxu1 }
 0x3e7   : > { %v14596_v41 = vpop.f32.mrf.mxu0  ;;  %v14619_v53 = vpop.f32.mrf.mxu1 }
 0x3e9   : > { %v14600_v50 = vpop.f32.mrf.mxu0  ;;  %v14625_v29 = vpop.f32.mrf.mxu1 }
 0x3eb   : > { %v14631_v46 = vpop.f32.mrf.mxu1 }
 0x3ec   : > { %v14605_v45 = vpop.f32.mrf.mxu0 }
 0x3ee   : > { %v14609_v9 = vpop.f32.mrf.mxu0 }
 0x3ef   : > { %v14637_v19 = vpop.f32.mrf.mxu1 }
 0x3f0   : > { %v14611_v25 = vpop.f32.mrf.mxu0 }
 0x3f1   : > { %v14643_v7 = vpop.f32.mrf.mxu1 }
 0x3f2   : > { %v14615_v21 = vpop.f32.mrf.mxu0 }
 0x3f3   : > { %v14649_v47 = vpop.f32.mrf.mxu1 }
 0x3f5   : > { %v14661_v38 = vpop.f32.mrf.mxu1 }
 0x3f6   : > { %v14617_v55 = vpop.f32.mrf.mxu0 }
 0x3f8   : > { %v14621_v3 = vpop.f32.mrf.mxu0  ;;  %v14667_v17 = vpop.f32.mrf.mxu1 }
 0x3fa   : > { %v14623_v58 = vpop.f32.mrf.mxu0  ;;  %v14673_v31 = vpop.f32.mrf.mxu1 }
 0x3fc   : > { %v14627_v32 = vpop.f32.mrf.mxu0  ;;  %v14679_v16 = vpop.f32.mrf.mxu1 }
 0x3fe   : > { %v14685_v24 = vpop.f32.mrf.mxu1 }
 0x3ff   : > { %v14629_v0 = vpop.f32.mrf.mxu0 }
 0x400   : > { %v14691_v56 = vpop.f32.mrf.mxu1 }
 0x401   : > { %v14633_v43 = vpop.f32.mrf.mxu0 }
 0x403   : > { %v14635_v44 = vpop.f32.mrf.mxu0 }
 0x405   : > { %v14639_v33 = vpop.f32.mrf.mxu0 }
 0x407   : > { %v14641_v54 = vpop.f32.mrf.mxu0 }
 0x409   : > { %v14645_v63 = vpop.f32.mrf.mxu0 }
 0x40b   : > { %v14647_v35 = vpop.f32.mrf.mxu0 }
 0x40d   : > { %v14656_v37 = vpop.f32.mrf.mxu0 }
 0x40f   : > { %v14659_v49 = vpop.f32.mrf.mxu0 }
 0x411   : > { %v14663_v39 = vpop.f32.mrf.mxu0 }
 0x412   : > { %16692 = vst [vmem:[#allocation53_spill] sm:$0xff] %v14663_v39 }
 0x413   : > { %v14665_v51 = vpop.f32.mrf.mxu0 }
 0x414   : > { %16693 = vst [vmem:[#allocation54_spill] sm:$0xff] %v14665_v51 }
 0x415   : > { %v14669_v36 = vpop.f32.mrf.mxu0 }
 0x416   : > { %16694 = vst [vmem:[#allocation55_spill] sm:$0xff] %v14669_v36 }
 0x417   : > { %v14671_v2 = vpop.f32.mrf.mxu0 }
 0x418   : > { %16695 = vst [vmem:[#allocation56_spill] sm:$0xff] %v14671_v2 }
 0x419   : > { %v14675_v13 = vpop.f32.mrf.mxu0 }
 0x41a   : > { %16696 = vst [vmem:[#allocation57_spill] sm:$0xff] %v14675_v13 }
 0x41b   : > { %v14677_v28 = vpop.f32.mrf.mxu0 }
 0x41c   : > { %16697 = vst [vmem:[#allocation58_spill] sm:$0xff] %v14677_v28  ;;  %v3870_v28 = vadd.f32 %v14564_v27, %v14562_v60  ;;  %v3894_v60 = vadd.f32 %v14580_v6, %v14572_v40 }
 0x41d   : > { %v14681_v59 = vpop.f32.mrf.mxu0 }
 0x41e   : > { %16698 = vst [vmem:[#allocation59_spill] sm:$0xff] %v14681_v59  ;;  %v14699_v59 = vpop.f32.mrf.mxu1 }
 0x41f   : > { %v14683_v20 = vpop.f32.mrf.mxu0 }
 0x420   : > { %16699 = vst [vmem:[#allocation60_spill] sm:$0xff] %v14683_v20  ;;  %v14705_v51 = vpop.f32.mrf.mxu1 }
 0x421   : > { %v14687_v22 = vpop.f32.mrf.mxu0 }
 0x422   : > { %16700 = vst [vmem:[#allocation61_spill] sm:$0xff] %v14687_v22  ;;  %v3881_v22 = vadd.f32 %v14568_v8, %v14566_v34  ;;  %v3886_v34 = vadd.f32 %v14586_v10, %v14576_v11  ;;  %v14711_v8 = vpop.f32.mrf.mxu1 }
 0x423   : > { %v14689_v42 = vpop.f32.mrf.mxu0 }
 0x424   : > { %16701 = vst [vmem:[#allocation62_spill] sm:$0xff] %v14689_v42  ;;  %v14722_v11 = vpop.f32.mrf.mxu1 }
 0x425   : > { %v14693_v61 = vpop.f32.mrf.mxu0 }
 0x426   : > { %16702 = vst [vmem:[#allocation63_spill] sm:$0xff] %v14693_v61  ;;  %v3873_v61 = vadd.f32 %v14574_v26, %v14570_v4 }
 0x427   : > { %v10443_v15 = vpop.f32.mrf.mxu0 }
 0x428   : > { %v4395_v20 = vadd.f32 %v10443_v15, %v3878_v62 }
 0x429   : > { %v4234_v13 = vpop.f32.mrf.mxu0 }
 0x42a   : > { %v4475_v2 = vmul.f32 0.70710677, %v4395_v20  ;;  %v4393_v42 = vadd.f32 %v4234_v13, %v3870_v28  ;;  %v3889_v13 = vadd.f32 %v14607_v48, %v14582_v52 }
 0x42b   : > { %v10444_v36 = vpop.f32.mrf.mxu0 }
 0x42c   : > { %11289 = verf.f32 %v4475_v2  ;;  %v4473_v1 = vmul.f32 0.70710677, %v4393_v42  ;;  %v4396_v14 = vadd.f32 %v10444_v36, %v3881_v22  ;;  %v3897_v36 = vadd.f32 %v14598_v5, %v14578_v57 }
 0x42d   : > { %v4237_v39 = vpop.f32.mrf.mxu0  ;;  %v3910_v57 = vadd.f32 %v14613_v18, %v14584_v12  ;;  %v3913_v12 = vadd.f32 %v14625_v29, %v14596_v41  ;;  %v3905_v41 = vadd.f32 %v14631_v46, %v14600_v50  ;;  %v3926_v29 = vadd.f32 %v14637_v19, %v14605_v45 }
 0x42e   : > { %11291 = verf.f32 %v4473_v1  ;;  %v4476_v27 = vmul.f32 0.70710677, %v4396_v14  ;;  %v4394_v62 = vadd.f32 %v4237_v39, %v3873_v61 }
 0x42f   : > { %v10447_v15 = vpop.f32.mrf.mxu0 }
 0x430   : > { %11293 = verf.f32 %v4476_v27  ;;  %v4474_v4 = vmul.f32 0.70710677, %v4394_v62  ;;  %v14713_v26 = vadd.f32 %v10447_v15, %v3894_v60  ;;  %v14732_v60 = vpop.f32.mrf.mxu1  ;;  %v3902_v15 = vadd.f32 %v14619_v53, %v14594_v23 }
 0x431   : > { %v4250_v2 = vpop.f32.mrf.mxu0 }
 0x432   : > { %11295 = verf.f32 %v4474_v4  ;;  %v4479_v40 = vmul.f32 0.70710677, %v14713_v26  ;;  %v14718_v6 = vadd.f32 %v4250_v2, %v3886_v34  ;;  %v4435_v34 = vmul.f32 0.5, %v4395_v20 }
 0x433   : > { %v10448_v39 = vpop.f32.mrf.mxu0 }
 0x434   : > { %11297 = verf.f32 %v4479_v40  ;;  %v4477_v10 = vmul.f32 0.70710677, %v14718_v6  ;;  %v14725_v28 = vadd.f32 %v10448_v39, %v3897_v36  ;;  %v4433_v40 = vmul.f32 0.5, %v4393_v42 }
 0x435   : > { %v4253_v22 = vpop.f32.mrf.mxu0 }
 0x436   : > { %11299 = verf.f32 %v4477_v10  ;;  %v4480_v5 = vmul.f32 0.70710677, %v14725_v28  ;;  %v14730_v61 = vadd.f32 %v4253_v22, %v3889_v13  ;;  %v14744_v10 = vpop.f32.mrf.mxu1 }
 0x437   : > { %v10451_v1 = vpop.f32.mrf.mxu0 }
 0x438   : > { %11301 = verf.f32 %v4480_v5  ;;  %v4478_v52 = vmul.f32 0.70710677, %v14730_v61  ;;  %v14735_v48 = vadd.f32 %v10451_v1, %v3910_v57  ;;  %v4436_v1 = vmul.f32 0.5, %v4396_v14  ;;  %v14757_v50 = vpop.f32.mrf.mxu1 }
 0x439   : > { %v11290_v27 = vpop.eup %11289  ;;  %v4266_v18 = vpop.f32.mrf.mxu0  ;;  %v3918_v14 = vadd.f32 %v14643_v7, %v14609_v9 }
 0x43a   : > { %v4555_v4 = vadd.f32 1.0, %v11290_v27  ;;  %11303 = verf.f32 %v4478_v52  ;;  %v4483_v2 = vmul.f32 0.70710677, %v14735_v48  ;;  %v14742_v39 = vadd.f32 %v4266_v18, %v3902_v15  ;;  %v14773_v7 = vpop.f32.mrf.mxu1 }
 0x43b   : > { %v11292_v36 = vpop.eup %11291  ;;  %v10452_v13 = vpop.f32.mrf.mxu0 }
 0x43c   : > { %v4595_v22 = vmul.f32 %v4555_v4, %v4435_v34  ;;  %v4553_v57 = vadd.f32 1.0, %v11292_v36  ;;  %11305 = verf.f32 %v4483_v2  ;;  %v14746_v23 = vadd.f32 %v10452_v13, %v3913_v12 }
 0x43d   : > { %v11294_v53 = vpop.eup %11293  ;;  %v4481_v20 = vmul.f32 0.70710677, %v14742_v39  ;;  %v4269_v42 = vpop.f32.mrf.mxu0  ;;  %v4434_v12 = vmul.f32 0.5, %v4394_v62  ;;  %v3929_v62 = vadd.f32 %v14649_v47, %v14611_v25  ;;  %v4439_v13 = vmul.f32 0.5, %v14713_v26 }
 0x43e   : > { %4635 = vst.msk [vmem:[#allocation3 + $0x10] sm:$0xff] %vm2056_vm3, %v4595_v22  ;;  %v4593_v5 = vmul.f32 %v4553_v57, %v4433_v40  ;;  %v4556_v52 = vadd.f32 1.0, %v11294_v53  ;;  %v4484_v27 = vmul.f32 0.70710677, %v14746_v23  ;;  %v14755_v18 = vadd.f32 %v4269_v42, %v3905_v41 }
 0x43f   : > { %v11296_v15 = vpop.eup %11295  ;;  %11307 = verf.f32 %v4481_v20  ;;  %v10455_v34 = vpop.f32.mrf.mxu0  ;;  %v4437_v41 = vmul.f32 0.5, %v14718_v6  ;;  %v3921_v42 = vadd.f32 %v14661_v38, %v14615_v21  ;;  %v3942_v6 = vadd.f32 %v14667_v17, %v14617_v55 }
 0x440   : > { %4633 = vst.msk [vmem:[#allocation3] sm:$0xff] %vm2056_vm3, %v4593_v5  ;;  %v4596_v45 = vmul.f32 %v4556_v52, %v4436_v1  ;;  %v4554_v46 = vadd.f32 1.0, %v11296_v15  ;;  %11309 = verf.f32 %v4484_v27  ;;  %v14760_v19 = vadd.f32 %v10455_v34, %v3926_v29  ;;  %v14789_v38 = vpop.f32.mrf.mxu1 }
 0x441   : > { %v11298_v4 = vpop.eup %11297  ;;  %v4482_v2 = vmul.f32 0.70710677, %v14755_v18  ;;  %v4282_v36 = vpop.f32.mrf.mxu0  ;;  %v4440_v27 = vmul.f32 0.5, %v14725_v28 }
 0x442   : > { %4636 = vst.msk [vmem:[#allocation3 + $0x18] sm:$0xff] %vm2056_vm3, %v4596_v45  ;;  %v4594_v40 = vmul.f32 %v4554_v46, %v4434_v12  ;;  %v4559_v22 = vadd.f32 1.0, %v11298_v4  ;;  %v4487_v57 = vmul.f32 0.70710677, %v14760_v19  ;;  %v14771_v29 = vadd.f32 %v4282_v36, %v3918_v14 }
 0x443   : > { %v11300_v53 = vpop.eup %11299  ;;  %11311 = verf.f32 %v4482_v2  ;;  %v10456_v9 = vpop.f32.mrf.mxu0  ;;  %v4438_v45 = vmul.f32 0.5, %v14730_v61  ;;  %v3934_v14 = vadd.f32 %v14673_v31, %v14621_v3  ;;  %v3945_v61 = vadd.f32 %v14679_v16, %v14623_v58 }
 0x444   : > { %4634 = vst.msk [vmem:[#allocation3 + $0x8] sm:$0xff] %vm2056_vm3, %v4594_v40  ;;  %v4599_v25 = vmul.f32 %v4559_v22, %v4439_v13  ;;  %v4557_v47 = vadd.f32 1.0, %v11300_v53  ;;  %11313 = verf.f32 %v4487_v57  ;;  %v14776_v20 = vadd.f32 %v10456_v9, %v3929_v62 }
 0x445   : > { %v11302_v26 = vpop.eup %11301  ;;  %v4485_v5 = vmul.f32 0.70710677, %v14771_v29  ;;  %v4285_v1 = vpop.f32.mrf.mxu0  ;;  %v4443_v40 = vmul.f32 0.5, %v14735_v48  ;;  %v3937_v57 = vadd.f32 %v14685_v24, %v14627_v32 }
 0x446   : > { %4639 = vst.msk [vmem:[#allocation3 + $0x30] sm:$0xff] %vm2056_vm3, %v4599_v25  ;;  %v4597_v52 = vmul.f32 %v4557_v47, %v4437_v41  ;;  %v4560_v15 = vadd.f32 1.0, %v11302_v26  ;;  %v4488_v12 = vmul.f32 0.70710677, %v14776_v20  ;;  %v14787_v46 = vadd.f32 %v4285_v1, %v3921_v42  ;;  %v14806_v41 = vpop.f32.mrf.mxu1 }
 0x447   : > { %v11304_v34 = vpop.eup %11303  ;;  %11315 = verf.f32 %v4485_v5  ;;  %v10459_v21 = vpop.f32.mrf.mxu0  ;;  %v4441_v26 = vmul.f32 0.5, %v14742_v39  ;;  %v3950_v39 = vadd.f32 %v14699_v59, %v14633_v43 }
 0x448   : > { %4637 = vst.msk [vmem:[#allocation3 + $0x20] sm:$0xff] %vm2056_vm3, %v4597_v52  ;;  %v4600_v55 = vmul.f32 %v4560_v15, %v4440_v27  ;;  %v4558_v17 = vadd.f32 1.0, %v11304_v34  ;;  %11317 = verf.f32 %v4488_v12  ;;  %v14792_v4 = vadd.f32 %v10459_v21, %v3942_v6  ;;  %v14825_v21 = vpop.f32.mrf.mxu1 }
 0x449   : > { %v11306_v28 = vpop.eup %11305  ;;  %v4486_v62 = vmul.f32 0.70710677, %v14787_v46  ;;  %v4298_v2 = vpop.f32.mrf.mxu0  ;;  %v4738_v58 = vld [vmem:[#allocation3 + $0x11] ss:$2 sm:$0xff]  ;;  %v4444_v6 = vmul.f32 0.5, %v14746_v23  ;;  %v3958_v27 = vadd.f32 %v14691_v56, %v14629_v0  ;;  %v3961_v23 = vadd.f32 %v14705_v51, %v14635_v44 }
 0x44a   : > { %4640 = vst.msk [vmem:[#allocation3 + $0x38] sm:$0xff] %vm2056_vm3, %v4600_v55  ;;  %v4598_v36 = vmul.f32 %v4558_v17, %v4438_v45  ;;  %v4563_v13 = vadd.f32 1.0, %v11306_v28  ;;  %v4491_v22 = vmul.f32 0.70710677, %v14792_v4  ;;  %v14804_v53 = vadd.f32 %v4298_v2, %v3934_v14 }
 0x44b   : > { %11319 = verf.f32 %v4486_v62  ;;  %v10460_v3 = vpop.f32.mrf.mxu0  ;;  %v4736_v31 = vld [vmem:[#allocation3 + $0x1] ss:$2 sm:$0xff]  ;;  %v5096_v28 = vld [vmem:[#allocation3 + $0x2] ss:$2 sm:$0xff]  ;;  %v4442_v0 = vmul.f32 0.5, %v14755_v18  ;;  %v4447_v44 = vmul.f32 0.5, %v14760_v19  ;;  %v3953_v2 = vadd.f32 %v14711_v8, %v14639_v33 }
 0x44c   : > { %v11308_v16 = vpop.eup %11307  ;;  %4638 = vst.msk [vmem:[#allocation3 + $0x28] sm:$0xff] %vm2056_vm3, %v4598_v36  ;;  %v4603_v9 = vmul.f32 %v4563_v13, %v4443_v40  ;;  %11321 = verf.f32 %v4491_v22  ;;  %v14809_v48 = vadd.f32 %v10460_v3, %v3945_v61  ;;  %v4775_v25 = vpack.c.bf16 %v4738_v58, %v4736_v31  ;;  %v14842_v3 = vpop.f32.mrf.mxu1 }
 0x44d   : > { %v11310_v47 = vpop.eup %11309  ;;  %v4561_v32 = vadd.f32 1.0, %v11308_v16  ;;  %v4489_v24 = vmul.f32 0.70710677, %v14804_v53  ;;  %v4301_v42 = vpop.f32.mrf.mxu0  ;;  %v4445_v8 = vmul.f32 0.5, %v14771_v29 }
 0x44e   : > { %4643 = vst.msk [vmem:[#allocation3 + $0x50] sm:$0xff] %vm2056_vm3, %v4603_v9  ;;  %v4564_v5 = vadd.f32 1.0, %v11310_v47  ;;  %v4492_v1 = vmul.f32 0.70710677, %v14809_v48  ;;  %v14816_v52 = vadd.f32 %v4301_v42, %v3937_v57  ;;  %10485 = vmatprep.mubr.msk.bf16.mxu1 %vm2056_vm3, %v4775_v25  ;;  %v3974_v57 = vadd.f32 %v14722_v11, %v14641_v54  ;;  %v11036_v54 = vld [vmem:[%s16441_s12 + $0x30] sm:$0xff]  }
 0x44f   : > { %v4601_v15 = vmul.f32 %v4561_v32, %v4441_v26  ;;  %11323 = verf.f32 %v4489_v24  ;;  %v10463_v12 = vpop.f32.mrf.mxu0  ;;  %v5098_v34 = vld [vmem:[#allocation3 + $0x12] ss:$2 sm:$0xff]  ;;  %v4448_v11 = vmul.f32 0.5, %v14776_v20 }
 0x450   : > { %v11312_v45 = vpop.eup %11311  ;;  %v4604_v55 = vmul.f32 %v4564_v5, %v4444_v6  ;;  %11325 = verf.f32 %v4492_v1  ;;  %v4490_v17 = vmul.f32 0.70710677, %v14816_v52  ;;  %v14830_v59 = vadd.f32 %v10463_v12, %v3958_v27  ;;  %v14860_v1 = vpop.f32.mrf.mxu1 }
 0x451   : > { %v11314_v14 = vpop.eup %11313  ;;  %4641 = vst.msk [vmem:[#allocation3 + $0x40] sm:$0xff] %vm2056_vm3, %v4601_v15  ;;  %v4562_v43 = vadd.f32 1.0, %v11312_v45  ;;  %v4314_v56 = vpop.f32.mrf.mxu0  ;;  %v5135_v61 = vpack.c.bf16 %v5098_v34, %v5096_v28  ;;  %v4742_v16 = vld [vmem:[#allocation3 + $0x31] ss:$2 sm:$0xff]  ;;  %v3966_v5 = vadd.f32 %v14732_v60, %v14645_v63  ;;  %v4446_v34 = vmul.f32 0.5, %v14787_v46 }
 0x452   : > { %4644 = vst.msk [vmem:[#allocation3 + $0x58] sm:$0xff] %vm2056_vm3, %v4604_v55  ;;  %v4567_v51 = vadd.f32 1.0, %v11314_v14  ;;  %11327 = verf.f32 %v4490_v17  ;;  %v14834_v62 = vadd.f32 %v4314_v56, %v3950_v39  ;;  %v4495_v40 = vmul.f32 0.70710677, %v14830_v59 }
 0x453   : > { %v4602_v36 = vmul.f32 %v4562_v43, %v4442_v0  ;;  %10533 = vmatprep.mubr.msk.bf16.mxu0 %vm2056_vm3, %v5135_v61  ;;  %v10464_v18 = vpop.f32.mrf.mxu0  ;;  %v4740_v13 = vld [vmem:[#allocation3 + $0x21] ss:$2 sm:$0xff]  ;;  %v5100_v20 = vld [vmem:[#allocation3 + $0x22] ss:$2 sm:$0xff]  ;;  %v4451_v60 = vmul.f32 0.5, %v14792_v4  ;;  %v3969_v56 = vadd.f32 %v14757_v50, %v14656_v37  ;;  %v14878_v61 = vpop.f32.mrf.mxu1  ;;  %v4452_v37 = vmul.f32 0.5, %v14809_v48 }
 0x454   : > { %v11316_v22 = vpop.eup %11315  ;;  %v4607_v19 = vmul.f32 %v4567_v51, %v4447_v44  ;;  %v4493_v31 = vmul.f32 0.70710677, %v14834_v62  ;;  %v14845_v58 = vadd.f32 %v10464_v18, %v3961_v23  ;;  %11329 = verf.f32 %v4495_v40 }
 0x455   : > { %v11318_v33 = vpop.eup %11317  ;;  %4642 = vst.msk [vmem:[#allocation3 + $0x48] sm:$0xff] %vm2056_vm3, %v4602_v36  ;;  %v4565_v9 = vadd.f32 1.0, %v11316_v22  ;;  %v4317_v25 = vpop.f32.mrf.mxu0  ;;  %v4776_v47 = vpack.c.bf16 %v4742_v16, %v4740_v13 }
 0x456   : > { %4647 = vst.msk [vmem:[#allocation3 + $0x70] sm:$0xff] %vm2056_vm3, %v4607_v19  ;;  %v4568_v26 = vadd.f32 1.0, %v11318_v33  ;;  %11331 = verf.f32 %v4493_v31  ;;  %v4496_v32 = vmul.f32 0.70710677, %v14845_v58  ;;  %v14855_v42 = vadd.f32 %v4317_v25, %v3953_v2  ;;  %v16703_v31 = vld [vmem:[#allocation53_spill] sm:$0xff]  ;;  %v14895_v25 = vpop.f32.mrf.mxu1 }
 0x457   : > { %v4605_v24 = vmul.f32 %v4565_v9, %v4445_v8  ;;  %10486 = vmatmul.mubr.msk.bf16.vlgmr.msra.gmra.mxu1 %vm2056_vm3, %v4776_v47  ;;  %v10467_v29 = vpop.f32.mrf.mxu0  ;;  %v3990_v19 = vadd.f32 %v14773_v7, %v14659_v49  ;;  %v4450_v47 = vmul.f32 0.5, %v14816_v52 }
 0x458   : > { %v11320_v6 = vpop.eup %11319  ;;  %v4608_v27 = vmul.f32 %v4568_v26, %v4448_v11  ;;  %11333 = verf.f32 %v4496_v32  ;;  %v14862_v39 = vadd.f32 %v10467_v29, %v3974_v57  ;;  %v5102_v15 = vld [vmem:[#allocation3 + $0x32] ss:$2 sm:$0xff]  ;;  %10506 = vmatpush3.bf16.msra.mxu1 %v14654_v30  ;;  %v4494_v23 = vmul.f32 0.70710677, %v14855_v42 }
 0x459   : > { %v11322_v12 = vpop.eup %11321  ;;  %4645 = vst.msk [vmem:[#allocation3 + $0x60] sm:$0xff] %vm2056_vm3, %v4605_v24  ;;  %v4566_v45 = vadd.f32 1.0, %v11320_v6  ;;  %v4330_v55 = vpop.f32.mrf.mxu0  ;;  %v5136_v63 = vpack.c.bf16 %v5102_v15, %v5100_v20  ;;  %10507 = vmatprep.subr.bf16.mxu1 %v11036_v54  ;;  %v3977_v30 = vadd.f32 %v14744_v10, %v14647_v35  ;;  %v4746_v2 = vld [vmem:[#allocation3 + $0x51] ss:$2 sm:$0xff]  ;;  %v4449_v35 = vmul.f32 0.5, %v14804_v53 }
 0x45a   : > { %4648 = vst.msk [vmem:[#allocation3 + $0x78] sm:$0xff] %vm2056_vm3, %v4608_v27  ;;  %v4571_v17 = vadd.f32 1.0, %v11322_v12  ;;  %v4499_v28 = vmul.f32 0.70710677, %v14862_v39  ;;  %v14871_v14 = vadd.f32 %v4330_v55, %v3966_v5  ;;  %11335 = verf.f32 %v4494_v23  ;;  %v16704_v24 = vld [vmem:[#allocation54_spill] sm:$0xff]  ;;  %v16705_v27 = vld [vmem:[#allocation55_spill] sm:$0xff] }
 0x45b   : > { %v4606_v0 = vmul.f32 %v4566_v45, %v4446_v34  ;;  %10534 = vmatmul.mubr.msk.bf16.vlgmr.msra.gmra.mxu0 %vm2056_vm3, %v5136_v63  ;;  %v10468_v46 = vpop.f32.mrf.mxu0  ;;  %v3982_v53 = vadd.f32 %v14789_v38, %v16703_v31  ;;  %v3993_v29 = vadd.f32 %v14806_v41, %v16704_v24  ;;  %v3985_v20 = vadd.f32 %v14825_v21, %v16705_v27  ;;  %v10435_v41 = vpop.f32.mrf.mxu1 }
 0x45c   : > { %v11324_v43 = vpop.eup %11323  ;;  %v4611_v4 = vmul.f32 %v4571_v17, %v4451_v60  ;;  %11337 = verf.f32 %v4499_v28  ;;  %v4497_v44 = vmul.f32 0.70710677, %v14871_v14  ;;  %v4744_v51 = vld [vmem:[#allocation3 + $0x41] ss:$2 sm:$0xff]  ;;  %10508 = vmatpush3.bf16.msra.mxu1 %v11036_v54  ;;  %v14883_v40 = vadd.f32 %v10468_v46, %v3977_v30  ;;  %v5104_v9 = vld [vmem:[#allocation3 + $0x42] ss:$2 sm:$0xff] }
 0x45d   : > { %v11326_v36 = vpop.eup %11325  ;;  %4646 = vst.msk [vmem:[#allocation3 + $0x68] sm:$0xff] %vm2056_vm3, %v4606_v0  ;;  %v4569_v10 = vadd.f32 1.0, %v11324_v43  ;;  %v4333_v18 = vpop.f32.mrf.mxu0  ;;  %v4777_v13 = vpack.c.bf16 %v4746_v2, %v4744_v51  ;;  %v4455_v15 = vmul.f32 0.5, %v14830_v59  ;;  %v4453_v55 = vmul.f32 0.5, %v14834_v62  ;;  %v16706_v59 = vld [vmem:[#allocation56_spill] sm:$0xff] }
 0x45e   : > { %4651 = vst.msk [vmem:[#allocation3 + $0x90] sm:$0xff] %vm2056_vm3, %v4611_v4  ;;  %v4572_v50 = vadd.f32 1.0, %v11326_v36  ;;  %11339 = verf.f32 %v4497_v44  ;;  %v14887_v22 = vadd.f32 %v4333_v18, %v3969_v56  ;;  %v4500_v33 = vmul.f32 0.70710677, %v14883_v40 }
 0x45f   : > { %v11328_v57 = vpop.eup %11327  ;;  %v4609_v16 = vmul.f32 %v4569_v10, %v4449_v35  ;;  %10489 = vmatprep.mubr.msk.bf16.mxu1 %vm2056_vm3, %v4777_v13  ;;  %v10471_v8 = vpop.f32.mrf.mxu0  ;;  %v4006_v30 = vadd.f32 %v14842_v3, %v16706_v59  ;;  %v4456_v4 = vmul.f32 0.5, %v14845_v58  ;;  %v16707_v3 = vld [vmem:[#allocation57_spill] sm:$0xff]  ;;  %v16708_v10 = vld [vmem:[#allocation58_spill] sm:$0xff]  ;;  %v4457_v24 = vmul.f32 0.5, %v14871_v14 }
 0x460   : > { %v4612_v48 = vmul.f32 %v4572_v50, %v4452_v37  ;;  %v4570_v54 = vadd.f32 1.0, %v11328_v57  ;;  %v4498_v11 = vmul.f32 0.70710677, %v14887_v22  ;;  %v5106_v26 = vld [vmem:[#allocation3 + $0x52] ss:$2 sm:$0xff]  ;;  %11341 = verf.f32 %v4500_v33  ;;  %v4013_v13 = vpop.f32.mrf.mxu1 }
 0x461   : > { %4649 = vst.msk [vmem:[#allocation3 + $0x80] sm:$0xff] %vm2056_vm3, %v4609_v16  ;;  %v14900_v49 = vadd.f32 %v10471_v8, %v3990_v19  ;;  %v4346_v7 = vpop.f32.mrf.mxu0  ;;  %v5137_v38 = vpack.c.bf16 %v5106_v26, %v5104_v9  ;;  %v11330_v32 = vpop.eup %11329  ;;  %v4750_v23 = vld [vmem:[#allocation3 + $0x71] ss:$2 sm:$0xff]  ;;  %v3998_v35 = vadd.f32 %v14860_v1, %v16707_v3  ;;  %v4009_v18 = vadd.f32 %v14878_v61, %v16708_v10 }
 0x462   : > { %4652 = vst.msk [vmem:[#allocation3 + $0x98] sm:$0xff] %vm2056_vm3, %v4612_v48  ;;  %v4610_v6 = vmul.f32 %v4570_v54, %v4450_v47  ;;  %11343 = verf.f32 %v4498_v11  ;;  %v14905_v52 = vadd.f32 %v4346_v7, %v3982_v53  ;;  %v4575_v12 = vadd.f32 1.0, %v11330_v32  ;;  %v16709_v47 = vld [vmem:[#allocation59_spill] sm:$0xff] }
 0x463   : > { %v11332_v5 = vpop.eup %11331  ;;  %v4503_v34 = vmul.f32 0.70710677, %v14900_v49  ;;  %10537 = vmatprep.mubr.msk.bf16.mxu0 %vm2056_vm3, %v5137_v38  ;;  %v10472_v45 = vpop.f32.mrf.mxu0  ;;  %v4454_v19 = vmul.f32 0.5, %v14855_v42  ;;  %v4459_v1 = vmul.f32 0.5, %v14862_v39  ;;  %v4001_v54 = vadd.f32 %v14895_v25, %v16709_v47  ;;  %v16713_v10 = vld [vmem:[#allocation63_spill] sm:$0xff] }
 0x464   : > { %4650 = vst.msk [vmem:[#allocation3 + $0x88] sm:$0xff] %vm2056_vm3, %v4610_v6  ;;  %v4573_v63 = vadd.f32 1.0, %v11332_v5  ;;  %v4501_v60 = vmul.f32 0.70710677, %v14905_v52  ;;  %v14915_v17 = vadd.f32 %v10472_v45, %v3993_v29  ;;  %v4748_v21 = vld [vmem:[#allocation3 + $0x61] ss:$2 sm:$0xff]  ;;  %v4615_v0 = vmul.f32 %v4575_v12, %v4455_v15  ;;  %v10436_v38 = vpop.f32.mrf.mxu1 }
 0x465   : > { %v11334_v28 = vpop.eup %11333  ;;  %11345 = verf.f32 %v4503_v34  ;;  %v4349_v46 = vpop.f32.mrf.mxu0  ;;  %v4778_v43 = vpack.c.bf16 %v4750_v23, %v4748_v21  ;;  %v5108_v9 = vld [vmem:[#allocation3 + $0x62] ss:$2 sm:$0xff]  ;;  %v16710_v15 = vld [vmem:[#allocation60_spill] sm:$0xff]  ;;  %v4460_v23 = vmul.f32 0.5, %v14883_v40 }
 0x466   : > { %v4613_v56 = vmul.f32 %v4573_v63, %v4453_v55  ;;  %v4576_v44 = vadd.f32 1.0, %v11334_v28  ;;  %11347 = verf.f32 %v4501_v60  ;;  %4655 = vst.msk [vmem:[#allocation3 + $0xb0] sm:$0xff] %vm2056_vm3, %v4615_v0  ;;  %v4504_v62 = vmul.f32 0.70710677, %v14915_v17  ;;  %v4016_v28 = vpop.f32.mrf.mxu1  ;;  %v16711_v40 = vld [vmem:[#allocation61_spill] sm:$0xff] }
 0x467   : > { %v14922_v51 = vadd.f32 %v4349_v46, %v3985_v20  ;;  %10490 = vmatmul.mubr.msk.bf16.gmra.mxu1 %vm2056_vm3, %v4778_v43  ;;  %v10475_v2 = vpop.f32.mrf.mxu0  ;;  %v11336_v36 = vpop.eup %11335  ;;  %v4022_v12 = vadd.f32 %v10435_v41, %v16710_v15  ;;  %v4458_v41 = vmul.f32 0.5, %v14887_v22  ;;  %v4014_v43 = vadd.f32 %v4013_v13, %v16711_v40 }
 0x468   : > { %4653 = vst.msk [vmem:[#allocation3 + $0xa0] sm:$0xff] %vm2056_vm3, %v4613_v56  ;;  %v4616_v58 = vmul.f32 %v4576_v44, %v4456_v4  ;;  %v14930_v37 = vadd.f32 %v10475_v2, %v4006_v30  ;;  %v5110_v50 = vld [vmem:[#allocation3 + $0x72] ss:$2 sm:$0xff]  ;;  %v4574_v31 = vadd.f32 1.0, %v11336_v36  ;;  %11349 = verf.f32 %v4504_v62  ;;  %v16712_v2 = vld [vmem:[#allocation62_spill] sm:$0xff] }
 0x469   : > { %v11338_v57 = vpop.eup %11337  ;;  %v4502_v53 = vmul.f32 0.70710677, %v14922_v51  ;;  %v4362_v16 = vpop.f32.mrf.mxu0  ;;  %v5138_v11 = vpack.c.bf16 %v5110_v50, %v5108_v9  ;;  %v4754_v29 = vld [vmem:[#allocation3 + $0x91] ss:$2 sm:$0xff]  ;;  %v4025_v36 = vadd.f32 %v10436_v38, %v16712_v2 }
 0x46a   : > { %4656 = vst.msk [vmem:[#allocation3 + $0xb8] sm:$0xff] %vm2056_vm3, %v4616_v58  ;;  %v4579_v61 = vadd.f32 1.0, %v11338_v57  ;;  %v4507_v33 = vmul.f32 0.70710677, %v14930_v37  ;;  %v14937_v8 = vadd.f32 %v4362_v16, %v3998_v35  ;;  %v4614_v42 = vmul.f32 %v4574_v31, %v4454_v19 }
 0x46b   : > { %v11340_v48 = vpop.eup %11339  ;;  %11351 = verf.f32 %v4502_v53  ;;  %v10476_v26 = vpop.f32.mrf.mxu0  ;;  %v4752_v7 = vld [vmem:[#allocation3 + $0x81] ss:$2 sm:$0xff]  ;;  %10538 = vmatmul.mubr.msk.bf16.gmra.mxu0 %vm2056_vm3, %v5138_v11  ;;  %v5112_v46 = vld [vmem:[#allocation3 + $0x82] ss:$2 sm:$0xff]  ;;  %v4463_v58 = vmul.f32 0.5, %v14900_v49  ;;  %v4461_v19 = vmul.f32 0.5, %v14905_v52 }
 0x46c   : > { %v4619_v32 = vmul.f32 %v4579_v61, %v4459_v1  ;;  %v4577_v39 = vadd.f32 1.0, %v11340_v48  ;;  %11353 = verf.f32 %v4507_v33  ;;  %4654 = vst.msk [vmem:[#allocation3 + $0xa8] sm:$0xff] %vm2056_vm3, %v4614_v42  ;;  %v4505_v6 = vmul.f32 0.70710677, %v14937_v8 }
 0x46d   : > { %v14945_v5 = vadd.f32 %v10476_v26, %v4009_v18  ;;  %v4365_v25 = vpop.f32.mrf.mxu0  ;;  %v4779_v27 = vpack.c.bf16 %v4754_v29, %v4752_v7  ;;  %v11342_v20 = vpop.eup %11341  ;;  %v4017_v18 = vadd.f32 %v4016_v28, %v16713_v10  ;;  %v4464_v52 = vmul.f32 0.5, %v14915_v17 }
 0x46e   : > { %4659 = vst.msk [vmem:[#allocation3 + $0xd0] sm:$0xff] %vm2056_vm3, %v4619_v32  ;;  %v4617_v34 = vmul.f32 %v4577_v39, %v4457_v24  ;;  %v14949_v14 = vadd.f32 %v4365_v25, %v4001_v54  ;;  %v4580_v55 = vadd.f32 1.0, %v11342_v20  ;;  %11355 = verf.f32 %v4505_v6 }
 0x46f   : > { %v11344_v45 = vpop.eup %11343  ;;  %v4508_v63 = vmul.f32 0.70710677, %v14945_v5  ;;  %10493 = vmatprep.mubr.msk.bf16.mxu1 %vm2056_vm3, %v4779_v27  ;;  %v10479_v60 = vpop.f32.mrf.mxu0  ;;  %v5114_v21 = vld [vmem:[#allocation3 + $0x92] ss:$2 sm:$0xff]  ;;  %v4462_v6 = vmul.f32 0.5, %v14922_v51  ;;  %v4467_v17 = vmul.f32 0.5, %v14930_v37 }
 0x470   : > { %4657 = vst.msk [vmem:[#allocation3 + $0xc0] sm:$0xff] %vm2056_vm3, %v4617_v34  ;;  %v4578_v59 = vadd.f32 1.0, %v11344_v45  ;;  %v4506_v30 = vmul.f32 0.70710677, %v14949_v14  ;;  %v14957_v0 = vadd.f32 %v10479_v60, %v4022_v12  ;;  %v4620_v56 = vmul.f32 %v4580_v55, %v4460_v23 }
 0x471   : > { %11357 = verf.f32 %v4508_v63  ;;  %v4378_v4 = vpop.f32.mrf.mxu0  ;;  %v5139_v44 = vpack.c.bf16 %v5114_v21, %v5112_v46  ;;  %v4758_v1 = vld [vmem:[#allocation3 + $0xb1] ss:$2 sm:$0xff]  ;;  %v4465_v55 = vmul.f32 0.5, %v14937_v8  ;;  %v4468_v21 = vmul.f32 0.5, %v14945_v5 }
 0x472   : > { %v11346_v62 = vpop.eup %11345  ;;  %v4618_v3 = vmul.f32 %v4578_v59, %v4458_v41  ;;  %11359 = verf.f32 %v4506_v30  ;;  %v4511_v35 = vmul.f32 0.70710677, %v14957_v0  ;;  %4660 = vst.msk [vmem:[#allocation3 + $0xd8] sm:$0xff] %vm2056_vm3, %v4620_v56  ;;  %v14965_v13 = vadd.f32 %v4378_v4, %v4014_v43 }
 0x473   : > { %v11348_v22 = vpop.eup %11347  ;;  %v4583_v50 = vadd.f32 1.0, %v11346_v62  ;;  %10541 = vmatprep.mubr.msk.bf16.mxu0 %vm2056_vm3, %v5139_v44  ;;  %v10480_v57 = vpop.f32.mrf.mxu0  ;;  %v4756_v16 = vld [vmem:[#allocation3 + $0xa1] ss:$2 sm:$0xff]  ;;  %v5116_v26 = vld [vmem:[#allocation3 + $0xa2] ss:$2 sm:$0xff]  ;;  %v4466_v30 = vmul.f32 0.5, %v14949_v14 }
 0x474   : > { %4658 = vst.msk [vmem:[#allocation3 + $0xc8] sm:$0xff] %vm2056_vm3, %v4618_v3  ;;  %v4581_v31 = vadd.f32 1.0, %v11348_v22  ;;  %11361 = verf.f32 %v4511_v35  ;;  %v14970_v53 = vadd.f32 %v10480_v57, %v4025_v36  ;;  %v4509_v33 = vmul.f32 0.70710677, %v14965_v13 }
 0x475   : > { %v4623_v61 = vmul.f32 %v4583_v50, %v4463_v58  ;;  %v4381_v49 = vpop.f32.mrf.mxu0  ;;  %v4780_v9 = vpack.c.bf16 %v4758_v1, %v4756_v16  ;;  %v11350_v48 = vpop.eup %11349  ;;  %v4471_v4 = vmul.f32 0.5, %v14957_v0  ;;  %v4469_v3 = vmul.f32 0.5, %v14965_v13 }
 0x476   : > { %v4621_v47 = vmul.f32 %v4581_v31, %v4461_v19  ;;  %v4512_v54 = vmul.f32 0.70710677, %v14970_v53  ;;  %v14974_v42 = vadd.f32 %v4381_v49, %v4017_v18  ;;  %v4584_v11 = vadd.f32 1.0, %v11350_v48 }
 0x477   : > { %4663 = vst.msk [vmem:[#allocation3 + $0xf0] sm:$0xff] %vm2056_vm3, %v4623_v61  ;;  %11363 = verf.f32 %v4509_v33  ;;  %10494 = vmatmul.mubr.msk.bf16.gmra.mxu1 %vm2056_vm3, %v4780_v9  ;;  %v5118_v7 = vld [vmem:[#allocation3 + $0xb2] ss:$2 sm:$0xff]  ;;  %v4472_v0 = vmul.f32 0.5, %v14970_v53 }
 0x478   : > { %v11352_v38 = vpop.eup %11351  ;;  %4661 = vst.msk [vmem:[#allocation3 + $0xe0] sm:$0xff] %vm2056_vm3, %v4621_v47  ;;  %11365 = verf.f32 %v4512_v54  ;;  %v4510_v32 = vmul.f32 0.70710677, %v14974_v42  ;;  %v5140_v24 = vpack.c.bf16 %v5118_v7, %v5116_v26  ;;  %v4624_v29 = vmul.f32 %v4584_v11, %v4464_v52  ;;  %v4686_v47 = vld [vmem:[#allocation3] ss:$2 sm:$0xff] }
 0x479   : > { %v11354_v39 = vpop.eup %11353  ;;  %v4582_v25 = vadd.f32 1.0, %v11352_v38  ;;  %v4762_v12 = vld [vmem:[#allocation3 + $0xd1] ss:$2 sm:$0xff]  ;;  %v4470_v57 = vmul.f32 0.5, %v14974_v42  ;;  %v4688_v38 = vld [vmem:[#allocation3 + $0x10] ss:$2 sm:$0xff] }
 0x47a   : > { %v4587_v27 = vadd.f32 1.0, %v11354_v39  ;;  %11367 = verf.f32 %v4510_v32  ;;  %10542 = vmatmul.mubr.msk.bf16.gmra.mxu0 %vm2056_vm3, %v5140_v24  ;;  %4664 = vst.msk [vmem:[#allocation3 + $0xf8] sm:$0xff] %vm2056_vm3, %v4624_v29  ;;  %v4725_v32 = vpack.c.bf16 %v4688_v38, %v4686_v47  ;;  %v4690_v24 = vld [vmem:[#allocation3 + $0x20] ss:$2 sm:$0xff]  ;;  %v4692_v29 = vld [vmem:[#allocation3 + $0x30] ss:$2 sm:$0xff] }
 0x47b   : > { %v4622_v20 = vmul.f32 %v4582_v25, %v4462_v6  ;;  %v4760_v15 = vld [vmem:[#allocation3 + $0xc1] ss:$2 sm:$0xff]  ;;  %v11356_v34 = vpop.eup %11355  ;;  %v5120_v41 = vld [vmem:[#allocation3 + $0xc2] ss:$2 sm:$0xff]  ;;  %v4726_v6 = vpack.c.bf16 %v4692_v29, %v4690_v24 }
 0x47c   : > { %v4627_v45 = vmul.f32 %v4587_v27, %v4467_v17  ;;  %v4781_v23 = vpack.c.bf16 %v4762_v12, %v4760_v15  ;;  %v4585_v51 = vadd.f32 1.0, %v11356_v34  ;;  %v4694_v39 = vld [vmem:[#allocation3 + $0x40] ss:$2 sm:$0xff]  ;;  %v4696_v25 = vld [vmem:[#allocation3 + $0x50] ss:$2 sm:$0xff] }
 0x47d   : > { %4662 = vst.msk [vmem:[#allocation3 + $0xe8] sm:$0xff] %vm2056_vm3, %v4622_v20  ;;  %v4727_v17 = vpack.c.bf16 %v4696_v25, %v4694_v39  ;;  %v4698_v27 = vld [vmem:[#allocation3 + $0x60] ss:$2 sm:$0xff]  ;;  %v4700_v15 = vld [vmem:[#allocation3 + $0x70] ss:$2 sm:$0xff] }
 0x47e   : > { %v11358_v63 = vpop.eup %11357  ;;  %4667 = vst.msk [vmem:[#allocation3 + $0x110] sm:$0xff] %vm2056_vm3, %v4627_v45  ;;  %10497 = vmatprep.mubr.msk.bf16.mxu1 %vm2056_vm3, %v4781_v23  ;;  %v4625_v60 = vmul.f32 %v4585_v51, %v4465_v55  ;;  %v4702_v20 = vld [vmem:[#allocation3 + $0x80] ss:$2 sm:$0xff]  ;;  %v4728_v12 = vpack.c.bf16 %v4700_v15, %v4698_v27  ;;  %v4704_v34 = vld [vmem:[#allocation3 + $0x90] ss:$2 sm:$0xff] }
 0x47f   : > { %v11360_v37 = vpop.eup %11359  ;;  %v4588_v28 = vadd.f32 1.0, %v11358_v63  ;;  %v5122_v59 = vld [vmem:[#allocation3 + $0xd2] ss:$2 sm:$0xff]  ;;  %v4729_v45 = vpack.c.bf16 %v4704_v34, %v4702_v20 }
 0x480   : > { %v4586_v46 = vadd.f32 1.0, %v11360_v37  ;;  %v5141_v40 = vpack.c.bf16 %v5122_v59, %v5120_v41  ;;  %4665 = vst.msk [vmem:[#allocation3 + $0x100] sm:$0xff] %vm2056_vm3, %v4625_v60  ;;  %v4706_v23 = vld [vmem:[#allocation3 + $0xa0] ss:$2 sm:$0xff]  ;;  %v4708_v51 = vld [vmem:[#allocation3 + $0xb0] ss:$2 sm:$0xff] }
 0x481   : > { %v11362_v43 = vpop.eup %11361  ;;  %v4628_v8 = vmul.f32 %v4588_v28, %v4468_v21  ;;  %v4766_v14 = vld [vmem:[#allocation3 + $0xf1] ss:$2 sm:$0xff]  ;;  %v4710_v55 = vld [vmem:[#allocation3 + $0xc0] ss:$2 sm:$0xff]  ;;  %v4730_v63 = vpack.c.bf16 %v4708_v51, %v4706_v23  ;;  %v4712_v37 = vld [vmem:[#allocation3 + $0xd0] ss:$2 sm:$0xff] }
 0x482   : > { %v4626_v56 = vmul.f32 %v4586_v46, %v4466_v30  ;;  %v4591_v44 = vadd.f32 1.0, %v11362_v43  ;;  %10545 = vmatprep.mubr.msk.bf16.mxu0 %vm2056_vm3, %v5141_v40  ;;  %v4731_v60 = vpack.c.bf16 %v4712_v37, %v4710_v55  ;;  %v4716_v41 = vld [vmem:[#allocation3 + $0xf0] ss:$2 sm:$0xff] }
 0x483   : > { %4668 = vst.msk [vmem:[#allocation3 + $0x118] sm:$0xff] %vm2056_vm3, %v4628_v8 }
 0x484   : > { %v11364_v5 = vpop.eup %11363  ;;  %4666 = vst.msk [vmem:[#allocation3 + $0x108] sm:$0xff] %vm2056_vm3, %v4626_v56  ;;  %v4631_v62 = vmul.f32 %v4591_v44, %v4471_v4  ;;  %v4764_v2 = vld [vmem:[#allocation3 + $0xe1] ss:$2 sm:$0xff]  ;;  %v5124_v31 = vld [vmem:[#allocation3 + $0xe2] ss:$2 sm:$0xff]  ;;  %v11612_v56 = vmov 0.0  }
 0x485   : > { %v11366_v36 = vpop.eup %11365  ;;  %v4589_v35 = vadd.f32 1.0, %v11364_v5  ;;  %v4782_v22 = vpack.c.bf16 %v4766_v14, %v4764_v2  ;;  %v4714_v21 = vld [vmem:[#allocation3 + $0xe0] ss:$2 sm:$0xff]  ;;  %10553 = vmatprep.subr.bf16.mxu1 %v11612_v56  ;;  %10577 = vmatprep.subr.bf16.mxu0 %v11612_v56  ;;  %v11037_v4 = vld [vmem:[%s16441_s12 + $0x78] sm:$0xff]   ;;  %v11038_v44 = vld [vmem:[%s16441_s12 + $0x70] sm:$0xff]   ;;  %6596 = vst.msk [vmem:[#allocation4] sm:$0xff] %vm6595_vm8, %v11612_v56 }
 0x486   : > { %4671 = vst.msk [vmem:[#allocation3 + $0x130] sm:$0xff] %vm2056_vm3, %v4631_v62  ;;  %v4592_v10 = vadd.f32 1.0, %v11366_v36  ;;  %v4732_v59 = vpack.c.bf16 %v4716_v41, %v4714_v21  ;;  %v11039_v5 = vld [vmem:[%s16441_s12 + $0x68] sm:$0xff]   ;;  %v11040_v2 = vld [vmem:[%s16441_s12 + $0x60] sm:$0xff]  }
 0x487   : > { %v11368_v18 = vpop.eup %11367  ;;  %v4629_v58 = vmul.f32 %v4589_v35, %v4469_v3  ;;  %10498 = vmatmul.mubr.msk.bf16.gmra.mxu1 %vm2056_vm3, %v4782_v22  ;;  %v5126_v16 = vld [vmem:[#allocation3 + $0xf2] ss:$2 sm:$0xff]  ;;  %10578 = vmatpush3.bf16.msra.mxu0 %v11039_v5  ;;  %6597 = vst.msk [vmem:[#allocation4 + $0x8] sm:$0xff] %vm6595_vm8, %v11612_v56 }
 0x488   : > { %v4632_v50 = vmul.f32 %v4592_v10, %v4472_v0  ;;  %v4590_v19 = vadd.f32 1.0, %v11368_v18  ;;  %v5142_v13 = vpack.c.bf16 %v5126_v16, %v5124_v31  ;;  %10579 = vmatprep.subr.bf16.mxu0 %v11612_v56 }
 0x489   : > { %4669 = vst.msk [vmem:[#allocation3 + $0x120] sm:$0xff] %vm2056_vm3, %v4629_v58 }
 0x48a   : > { %4672 = vst.msk [vmem:[#allocation3 + $0x138] sm:$0x7f] %vm2214_vm4, %v4632_v50  ;;  %v4630_v1 = vmul.f32 %v4590_v19, %v4470_v57  ;;  %10546 = vmatmul.mubr.msk.bf16.gmra.mxu0 %vm2056_vm3, %v5142_v13  ;;  %v4770_v61 = vld [vmem:[#allocation3 + $0x111] ss:$2 sm:$0xff]  ;;  %v4720_v30 = vld [vmem:[#allocation3 + $0x110] ss:$2 sm:$0xff] }
 0x48b   : > { %v4768_v53 = vld [vmem:[#allocation3 + $0x101] ss:$2 sm:$0xff]  ;;  %v5128_v49 = vld [vmem:[#allocation3 + $0x102] ss:$2 sm:$0xff]  ;;  %10580 = vmatpush3.bf16.msra.mxu0 %v11040_v2 }
 0x48c   : > { %4670 = vst.msk [vmem:[#allocation3 + $0x128] sm:$0xff] %vm2056_vm3, %v4630_v1  ;;  %v4783_v33 = vpack.c.bf16 %v4770_v61, %v4768_v53  ;;  %v4718_v28 = vld [vmem:[#allocation3 + $0x100] ss:$2 sm:$0xff]  ;;  %10625 = vmatprep.subr.bf16.mxu0 %v11612_v56 }
 0x48d   : > { %v4733_v46 = vpack.c.bf16 %v4720_v30, %v4718_v28 }
 0x48e   : > { %10501 = vmatprep.mubr.msk.bf16.mxu1 %vm2056_vm3, %v4783_v33 }
 0x490   : > { %v5130_v9 = vld [vmem:[#allocation3 + $0x112] ss:$2 sm:$0xff] }
 0x491   : > { %v5143_v48 = vpack.c.bf16 %v5130_v9, %v5128_v49  ;;  %v4774_v54 = vld [vmem:[#allocation3 + $0x131] ss:$2 sm:$0x7f]  ;;  %v5134_v42 = vld [vmem:[#allocation3 + $0x132] ss:$2 sm:$0x7f] }
 0x492   : > { %v4724_v43 = vld [vmem:[#allocation3 + $0x130] ss:$2 sm:$0x7f] }
 0x493   : > { %10549 = vmatprep.mubr.msk.bf16.mxu0 %vm2056_vm3, %v5143_v48  ;;  %v4772_v52 = vld [vmem:[#allocation3 + $0x121] ss:$2 sm:$0xff]  ;;  %v5132_v11 = vld [vmem:[#allocation3 + $0x122] ss:$2 sm:$0xff] }
 0x494   : > { %v4784_v26 = vpack.c.bf16 %v4774_v54, %v4772_v52  ;;  %v5144_v7 = vpack.c.bf16 %v5134_v42, %v5132_v11  ;;  %v4722_v40 = vld [vmem:[#allocation3 + $0x120] ss:$2 sm:$0xff] }
 0x495   : > { %v4734_v8 = vpack.c.bf16 %v4724_v43, %v4722_v40 }
 0x496   : > { %10502 = vmatmul.mubr.msk.bf16.gmra.mxu1 %vm2056_vm3, %v4784_v26  ;;  %10550 = vmatmul.mubr.msk.bf16.gmra.mxu0 %vm2056_vm3, %v5144_v7 }
 0x497   : > { %10509 = vmatprep.mubr.msk.bf16.mxu1 %vm2056_vm3, %v4725_v32  ;;  %10581 = vmatprep.mubr.msk.bf16.mxu0 %vm11613_vm5, %v11612_v56 }
 0x49e   : > { %10510 = vmatmul.mubr.msk.bf16.vlgmr.msra.gmra.mxu1 %vm2056_vm3, %v4726_v6 }
 0x49f   : > { %10513 = vmatprep.mubr.msk.bf16.mxu1 %vm2056_vm3, %v4727_v17  ;;  %10554 = vmatpush3.bf16.msra.mxu1 %v11037_v4 }
 0x4a0   : > { %10555 = vmatprep.subr.bf16.mxu1 %v11612_v56 }
 0x4a3   : > { %10556 = vmatpush3.bf16.msra.mxu1 %v11038_v44 }
 0x4a4   : > { %10601 = vmatprep.subr.bf16.mxu1 %v11612_v56 }
 0x4a6   : > { %10514 = vmatmul.mubr.msk.bf16.gmra.mxu1 %vm2056_vm3, %v4728_v12 }
 0x4a7   : > { %10517 = vmatprep.mubr.msk.bf16.mxu1 %vm2056_vm3, %v4729_v45 }
 0x4ae   : > { %10518 = vmatmul.mubr.msk.bf16.gmra.mxu1 %vm2056_vm3, %v4730_v63 }
 0x4af   : > { %10521 = vmatprep.mubr.msk.bf16.mxu1 %vm2056_vm3, %v4731_v60 }
 0x4b6   : > { %10522 = vmatmul.mubr.msk.bf16.gmra.mxu1 %vm2056_vm3, %v4732_v59 }
 0x4b7   : > { %10525 = vmatprep.mubr.msk.bf16.mxu1 %vm2056_vm3, %v4733_v46 }
 0x4be   : > { %10526 = vmatmul.mubr.msk.bf16.gmra.mxu1 %vm2056_vm3, %v4734_v8 }
 0x4bf   : > { %10557 = vmatprep.mubr.msk.bf16.mxu1 %vm11613_vm5, %v11612_v56 }
 0x517   : > { %v10487_v62 = vpop.f32.mrf.mxu1 }
 0x519   : > { %v4861_v14 = vpop.f32.mrf.mxu1 }
 0x51b   : > { %v10488_v36 = vpop.f32.mrf.mxu1  ;;  %v10535_v57 = vpop.f32.mrf.mxu0 }
 0x51d   : > { %v4864_v3 = vpop.f32.mrf.mxu1  ;;  %v5221_v31 = vpop.f32.mrf.mxu0 }
 0x51f   : > { %v10536_v13 = vpop.f32.mrf.mxu0 }
 0x521   : > { %v5224_v53 = vpop.f32.mrf.mxu0 }
 0x527   : > { %v10491_v35 = vpop.f32.mrf.mxu1 }
 0x529   : > { %v4877_v22 = vpop.f32.mrf.mxu1 }
 0x52b   : > { %v10492_v0 = vpop.f32.mrf.mxu1  ;;  %v10539_v33 = vpop.f32.mrf.mxu0 }
 0x52d   : > { %v4880_v10 = vpop.f32.mrf.mxu1  ;;  %v5237_v9 = vpop.f32.mrf.mxu0 }
 0x52f   : > { %v10540_v54 = vpop.f32.mrf.mxu0 }
 0x531   : > { %v5240_v11 = vpop.f32.mrf.mxu0 }
 0x537   : > { %v10495_v18 = vpop.f32.mrf.mxu1 }
 0x539   : > { %v15041_v58 = vpop.f32.mrf.mxu1 }
 0x53a   : > { %v10543_v38 = vpop.f32.mrf.mxu0 }
 0x53b   : > { %v15043_v50 = vpop.f32.mrf.mxu1 }
 0x53c   : > { %v5253_v27 = vpop.f32.mrf.mxu0 }
 0x53d   : > { %v15045_v19 = vpop.f32.mrf.mxu1 }
 0x53e   : > { %v10544_v51 = vpop.f32.mrf.mxu0 }
 0x540   : > { %v5256_v40 = vpop.f32.mrf.mxu0 }
 0x547   : > { %v15047_v16 = vpop.f32.mrf.mxu1 }
 0x549   : > { %v15049_v1 = vpop.f32.mrf.mxu1 }
 0x54a   : > { %v10547_v44 = vpop.f32.mrf.mxu0 }
 0x54b   : > { %v15051_v61 = vpop.f32.mrf.mxu1 }
 0x54d   : > { %v15053_v49 = vpop.f32.mrf.mxu1 }
 0x556   : > { %v15055_v48 = vpop.f32.mrf.mxu1 }
 0x558   : > { %v15057_v47 = vpop.f32.mrf.mxu1 }
 0x55a   : > { %v15059_v42 = vpop.f32.mrf.mxu1 }
 0x55c   : > { %v15061_v52 = vpop.f32.mrf.mxu1 }
 0x55e   : > { %v10511_v26 = vpop.f32.mrf.mxu1 }
 0x55f   : > { %v5025_v7 = vadd.f32 %v10511_v26, %v10487_v62 }
 0x560   : > { %v5016_v32 = vpop.f32.mrf.mxu1 }
 0x561   : > { %v5302_v24 = vadd.f32 %v10535_v57, %v5025_v7  ;;  %v5017_v39 = vadd.f32 %v5016_v32, %v4861_v14  ;;  %v5269_v57 = vpop.f32.mrf.mxu0 }
 0x562   : > { %v10512_v29 = vpop.f32.mrf.mxu1 }
 0x563   : > { %v5342_v6 = vmul.f32 0.70710677, %v5302_v24  ;;  %v5300_v25 = vadd.f32 %v5221_v31, %v5017_v39  ;;  %v5028_v17 = vadd.f32 %v10512_v29, %v10488_v36  ;;  %v10548_v32 = vpop.f32.mrf.mxu0 }
 0x564   : > { %v5019_v20 = vpop.f32.mrf.mxu1 }
 0x565   : > { %11369 = verf.f32 %v5342_v6  ;;  %v5340_v15 = vmul.f32 0.70710677, %v5300_v25  ;;  %v5303_v12 = vadd.f32 %v10536_v13, %v5028_v17  ;;  %v5020_v34 = vadd.f32 %v5019_v20, %v4864_v3 }
 0x566   : > { %v10515_v45 = vpop.f32.mrf.mxu1  ;;  %v5320_v7 = vmul.f32 0.5, %v5300_v25 }
 0x567   : > { %11371 = verf.f32 %v5340_v15  ;;  %v5343_v23 = vmul.f32 0.70710677, %v5303_v12  ;;  %v5041_v55 = vadd.f32 %v10515_v45, %v10491_v35  ;;  %v15063_v63 = vadd.f32 %v5224_v53, %v5020_v34 }
 0x568   : > { %v5032_v37 = vpop.f32.mrf.mxu1  ;;  %v5322_v53 = vmul.f32 0.5, %v5302_v24 }
 0x569   : > { %11373 = verf.f32 %v5343_v23  ;;  %v15065_v60 = vadd.f32 %v10539_v33, %v5041_v55  ;;  %v5033_v21 = vadd.f32 %v5032_v37, %v4877_v22  ;;  %v5341_v28 = vmul.f32 0.70710677, %v15063_v63  ;;  %v5272_v37 = vpop.f32.mrf.mxu0 }
 0x56a   : > { %v10516_v41 = vpop.f32.mrf.mxu1 }
 0x56b   : > { %v5346_v59 = vmul.f32 0.70710677, %v15065_v60  ;;  %v15069_v30 = vadd.f32 %v5237_v9, %v5033_v21  ;;  %v5044_v46 = vadd.f32 %v10516_v41, %v10492_v0  ;;  %11375 = verf.f32 %v5341_v28 }
 0x56c   : > { %v5035_v43 = vpop.f32.mrf.mxu1  ;;  %v5326_v41 = vmul.f32 0.5, %v15065_v60 }
 0x56d   : > { %11377 = verf.f32 %v5346_v59  ;;  %v5344_v8 = vmul.f32 0.70710677, %v15069_v30  ;;  %v15072_v4 = vadd.f32 %v10540_v54, %v5044_v46  ;;  %v5036_v5 = vadd.f32 %v5035_v43, %v4880_v10 }
 0x56e   : > { %v10519_v62 = vpop.f32.mrf.mxu1 }
 0x56f   : > { %11379 = verf.f32 %v5344_v8  ;;  %v5347_v2 = vmul.f32 0.70710677, %v15072_v4  ;;  %v5057_v14 = vadd.f32 %v10519_v62, %v10495_v18  ;;  %v15075_v36 = vadd.f32 %v5240_v11, %v5036_v5 }
 0x570   : > { %v5048_v3 = vpop.f32.mrf.mxu1  ;;  %v5324_v62 = vmul.f32 0.5, %v15069_v30 }
 0x571   : > { %11381 = verf.f32 %v5347_v2  ;;  %v15077_v35 = vadd.f32 %v10543_v38, %v5057_v14  ;;  %v5049_v22 = vadd.f32 %v5048_v3, %v15041_v58  ;;  %v5345_v31 = vmul.f32 0.70710677, %v15075_v36 }
 0x572   : > { %v11370_v0 = vpop.eup %11369  ;;  %v10520_v13 = vpop.f32.mrf.mxu1 }
 0x573   : > { %v5382_v10 = vadd.f32 1.0, %v11370_v0  ;;  %v5350_v33 = vmul.f32 0.70710677, %v15077_v35  ;;  %v15082_v9 = vadd.f32 %v5253_v27, %v5049_v22  ;;  %11383 = verf.f32 %v5345_v31 }
 0x574   : > { %v11372_v18 = vpop.eup %11371  ;;  %v5060_v54 = vadd.f32 %v10520_v13, %v15043_v50  ;;  %v5051_v11 = vpop.f32.mrf.mxu1  ;;  %v5323_v27 = vmul.f32 0.5, %v5303_v12  ;;  %v5321_v12 = vmul.f32 0.5, %v15063_v63 }
 0x575   : > { %v5402_v26 = vmul.f32 %v5382_v10, %v5322_v53  ;;  %v5380_v38 = vadd.f32 1.0, %v11372_v18  ;;  %11385 = verf.f32 %v5350_v33  ;;  %v5348_v39 = vmul.f32 0.70710677, %v15082_v9 }
 0x576   : > { %v11374_v58 = vpop.eup %11373  ;;  %v15086_v29 = vadd.f32 %v10544_v51, %v5060_v54  ;;  %v5052_v24 = vadd.f32 %v5051_v11, %v15045_v19  ;;  %v10523_v6 = vpop.f32.mrf.mxu1 }
 0x577   : > { %5422 = vst.msk [vmem:[#allocation2 + $0x10] sm:$0xff] %vm2056_vm3, %v5402_v26  ;;  %v5400_v17 = vmul.f32 %v5380_v38, %v5320_v7  ;;  %v5383_v20 = vadd.f32 1.0, %v11374_v58  ;;  %v5073_v50 = vadd.f32 %v10523_v6, %v15047_v16  ;;  %11387 = verf.f32 %v5348_v39 }
 0x578   : > { %v5351_v25 = vmul.f32 0.70710677, %v15086_v29  ;;  %v15092_v15 = vadd.f32 %v5256_v40, %v5052_v24  ;;  %v5064_v34 = vpop.f32.mrf.mxu1  ;;  %v11376_v45 = vpop.eup %11375  ;;  %v5330_v58 = vmul.f32 0.5, %v15077_v35 }
 0x579   : > { %5420 = vst.msk [vmem:[#allocation2] sm:$0xff] %vm2056_vm3, %v5400_v17  ;;  %v5403_v23 = vmul.f32 %v5383_v20, %v5323_v27  ;;  %v15095_v55 = vadd.f32 %v10547_v44, %v5073_v50  ;;  %v5065_v19 = vadd.f32 %v5064_v34, %v15049_v1  ;;  %v5381_v21 = vadd.f32 1.0, %v11376_v45  ;;  %v10551_v1 = vpop.f32.mrf.mxu0  ;;  %v11041_v20 = vld [vmem:[%s16441_s12 + $0x88] sm:$0xff]  }
 0x57a   : > { %v11378_v51 = vpop.eup %11377  ;;  %11389 = verf.f32 %v5351_v25  ;;  %v5349_v16 = vmul.f32 0.70710677, %v15092_v15  ;;  %v10524_v28 = vpop.f32.mrf.mxu1 }
 0x57b   : > { %5423 = vst.msk [vmem:[#allocation2 + $0x18] sm:$0xff] %vm2056_vm3, %v5403_v23  ;;  %v5386_v59 = vadd.f32 1.0, %v11378_v51  ;;  %v5354_v46 = vmul.f32 0.70710677, %v15095_v55  ;;  %v15103_v40 = vadd.f32 %v5269_v57, %v5065_v19  ;;  %v5401_v8 = vmul.f32 %v5381_v21, %v5321_v12  ;;  %v5285_v13 = vpop.f32.mrf.mxu0 }
 0x57c   : > { %v11380_v43 = vpop.eup %11379  ;;  %11391 = verf.f32 %v5349_v16  ;;  %v5076_v63 = vadd.f32 %v10524_v28, %v15051_v61  ;;  %v5067_v44 = vpop.f32.mrf.mxu1  ;;  %v5327_v61 = vmul.f32 0.5, %v15072_v4  ;;  %v5325_v4 = vmul.f32 0.5, %v15075_v36 }
 0x57d   : > { %v5406_v5 = vmul.f32 %v5386_v59, %v5326_v41  ;;  %v5384_v2 = vadd.f32 1.0, %v11380_v43  ;;  %11393 = verf.f32 %v5354_v46  ;;  %5421 = vst.msk [vmem:[#allocation2 + $0x8] sm:$0xff] %vm2056_vm3, %v5401_v8  ;;  %v5352_v60 = vmul.f32 0.70710677, %v15103_v40  ;;  %v10552_v6 = vpop.f32.mrf.mxu0 }
 0x57e   : > { %v11382_v14 = vpop.eup %11381  ;;  %v15109_v3 = vadd.f32 %v10548_v32, %v5076_v63  ;;  %v5068_v22 = vadd.f32 %v5067_v44, %v15053_v49  ;;  %v10527_v0 = vpop.f32.mrf.mxu1  ;;  %v5331_v41 = vmul.f32 0.5, %v15086_v29  ;;  %v5329_v29 = vmul.f32 0.5, %v15092_v15 }
 0x57f   : > { %5426 = vst.msk [vmem:[#allocation2 + $0x30] sm:$0xff] %vm2056_vm3, %v5406_v5  ;;  %v5404_v57 = vmul.f32 %v5384_v2, %v5324_v62  ;;  %v5387_v31 = vadd.f32 1.0, %v11382_v14  ;;  %v5089_v30 = vadd.f32 %v10527_v0, %v15055_v48  ;;  %11395 = verf.f32 %v5352_v60  ;;  %v5288_v16 = vpop.f32.mrf.mxu0 }
 0x580   : > { %v5355_v53 = vmul.f32 0.70710677, %v15109_v3  ;;  %v15116_v10 = vadd.f32 %v5272_v37, %v5068_v22  ;;  %v5080_v33 = vpop.f32.mrf.mxu1  ;;  %v11384_v18 = vpop.eup %11383  ;;  %v5334_v5 = vmul.f32 0.5, %v15095_v55  ;;  %v5332_v55 = vmul.f32 0.5, %v15103_v40 }
 0x581   : > { %5424 = vst.msk [vmem:[#allocation2 + $0x20] sm:$0xff] %vm2056_vm3, %v5404_v57  ;;  %v5407_v49 = vmul.f32 %v5387_v31, %v5327_v61  ;;  %v15119_v54 = vadd.f32 %v10551_v1, %v5089_v30  ;;  %v5081_v11 = vadd.f32 %v5080_v33, %v15057_v47  ;;  %v5385_v7 = vadd.f32 1.0, %v11384_v18 }
 0x582   : > { %v11386_v26 = vpop.eup %11385  ;;  %11397 = verf.f32 %v5355_v53  ;;  %v5353_v48 = vmul.f32 0.70710677, %v15116_v10  ;;  %v10528_v38 = vpop.f32.mrf.mxu1  ;;  %v5328_v47 = vmul.f32 0.5, %v15082_v9  ;;  %v5469_v45 = vld [vmem:[#allocation2 + $0x11] ss:$2 sm:$0xff]  ;;  %v5335_v18 = vmul.f32 0.5, %v15109_v3 }
 0x583   : > { %5427 = vst.msk [vmem:[#allocation2 + $0x38] sm:$0xff] %vm2056_vm3, %v5407_v49  ;;  %v5390_v32 = vadd.f32 1.0, %v11386_v26  ;;  %v5358_v39 = vmul.f32 0.70710677, %v15119_v54  ;;  %v15127_v24 = vadd.f32 %v5285_v13, %v5081_v11  ;;  %v5405_v17 = vmul.f32 %v5385_v7, %v5325_v4  ;;  %v5454_v37 = vld [vmem:[#allocation2 + $0x10] ss:$2 sm:$0xff] }
 0x584   : > { %11399 = verf.f32 %v5353_v48  ;;  %v5092_v36 = vadd.f32 %v10528_v38, %v15059_v42  ;;  %v5083_v27 = vpop.f32.mrf.mxu1  ;;  %v11388_v50 = vpop.eup %11387  ;;  %v5468_v34 = vld [vmem:[#allocation2 + $0x1] ss:$2 sm:$0xff]  ;;  %v5453_v51 = vld [vmem:[#allocation2] ss:$2 sm:$0xff]  ;;  %v5333_v4 = vmul.f32 0.5, %v15116_v10  ;;  %v5338_v3 = vmul.f32 0.5, %v15119_v54 }
 0x585   : > { %v5410_v25 = vmul.f32 %v5390_v32, %v5330_v58  ;;  %11401 = verf.f32 %v5358_v39  ;;  %v5356_v35 = vmul.f32 0.70710677, %v15127_v24  ;;  %5425 = vst.msk [vmem:[#allocation2 + $0x28] sm:$0xff] %vm2056_vm3, %v5405_v17  ;;  %v5388_v23 = vadd.f32 1.0, %v11388_v50 }
 0x586   : > { %v15136_v19 = vadd.f32 %v10552_v6, %v5092_v36  ;;  %v5084_v9 = vadd.f32 %v5083_v27, %v15061_v52  ;;  %v5478_v42 = vpack.c.bf16 %v5469_v45, %v5468_v34  ;;  %v5463_v21 = vpack.c.bf16 %v5454_v37, %v5453_v51  ;;  %v11042_v52 = vld [vmem:[%s16441_s12 + $0x80] sm:$0xff]  }
 0x587   : > { %v11390_v12 = vpop.eup %11389  ;;  %5430 = vst.msk [vmem:[#allocation2 + $0x50] sm:$0xff] %vm2056_vm3, %v5410_v25  ;;  %11403 = verf.f32 %v5356_v35  ;;  %v5408_v28 = vmul.f32 %v5388_v23, %v5328_v47  ;;  %v5336_v17 = vmul.f32 0.5, %v15127_v24 }
 0x588   : > { %v5391_v59 = vadd.f32 1.0, %v11390_v12  ;;  %v5359_v46 = vmul.f32 0.70710677, %v15136_v19  ;;  %10558 = vmatmul.mubr.msk.bf16.vlgmr.msra.gmra.mxu1 %vm2056_vm3, %v5478_v42  ;;  %v15143_v1 = vadd.f32 %v5288_v16, %v5084_v9  ;;  %10582 = vmatmul.mubr.msk.bf16.vlgmr.msra.gmra.mxu0 %vm2056_vm3, %v5463_v21  ;;  %v5339_v25 = vmul.f32 0.5, %v15136_v19 }
 0x589   : > { %v11392_v43 = vpop.eup %11391  ;;  %10602 = vmatpush3.bf16.msra.mxu1 %v11041_v20  ;;  %5428 = vst.msk [vmem:[#allocation2 + $0x40] sm:$0xff] %vm2056_vm3, %v5408_v28  ;;  %10561 = vmatprep.mubr.msk.bf16.mxu1 %vm11613_vm5, %v11612_v56 }
 0x58a   : > { %v11394_v8 = vpop.eup %11393  ;;  %v5411_v63 = vmul.f32 %v5391_v59, %v5331_v41  ;;  %v5389_v44 = vadd.f32 1.0, %v11392_v43  ;;  %11405 = verf.f32 %v5359_v46  ;;  %10585 = vmatprep.mubr.msk.bf16.mxu0 %vm11613_vm5, %v11612_v56  ;;  %v5357_v2 = vmul.f32 0.70710677, %v15143_v1  ;;  %10603 = vmatprep.subr.bf16.mxu1 %v11612_v56  ;;  %v5471_v60 = vld [vmem:[#allocation2 + $0x31] ss:$2 sm:$0xff] }
 0x58b   : > { %v5394_v62 = vadd.f32 1.0, %v11394_v8  ;;  %v5456_v61 = vld [vmem:[#allocation2 + $0x30] ss:$2 sm:$0xff]  ;;  %v5337_v45 = vmul.f32 0.5, %v15143_v1 }
 0x58c   : > { %5431 = vst.msk [vmem:[#allocation2 + $0x58] sm:$0xff] %vm2056_vm3, %v5411_v63  ;;  %v5409_v14 = vmul.f32 %v5389_v44, %v5329_v29  ;;  %v11396_v15 = vpop.eup %11395  ;;  %11407 = verf.f32 %v5357_v2  ;;  %v5470_v0 = vld [vmem:[#allocation2 + $0x21] ss:$2 sm:$0xff]  ;;  %v5455_v57 = vld [vmem:[#allocation2 + $0x20] ss:$2 sm:$0xff] }
 0x58d   : > { %v5414_v22 = vmul.f32 %v5394_v62, %v5334_v5  ;;  %10604 = vmatpush3.bf16.msra.mxu1 %v11042_v52  ;;  %v5392_v31 = vadd.f32 1.0, %v11396_v15  ;;  %v5479_v30 = vpack.c.bf16 %v5471_v60, %v5470_v0  ;;  %v5464_v13 = vpack.c.bf16 %v5456_v61, %v5455_v57  ;;  %v5684_v1 = vld [vmem:[#allocation2 + $0x12] ss:$2 sm:$0xff]  ;;  %v5683_v52 = vld [vmem:[#allocation2 + $0x2] ss:$2 sm:$0xff] }
 0x58e   : > { %5429 = vst.msk [vmem:[#allocation2 + $0x48] sm:$0xff] %vm2056_vm3, %v5409_v14  ;;  %10641 = vmatprep.subr.bf16.mxu1 %v11612_v56  ;;  %v5693_v8 = vpack.c.bf16 %v5684_v1, %v5683_v52  ;;  %v5685_v29 = vld [vmem:[#allocation2 + $0x22] ss:$2 sm:$0xff] }
 0x58f   : > { %v11398_v53 = vpop.eup %11397  ;;  %5434 = vst.msk [vmem:[#allocation2 + $0x70] sm:$0xff] %vm2056_vm3, %v5414_v22  ;;  %v5412_v33 = vmul.f32 %v5392_v31, %v5332_v55  ;;  %v11043_v61 = vld [vmem:[%s16441_s12 + $0xa8] sm:$0xff]   ;;  %v11044_v55 = vld [vmem:[%s16441_s12 + $0xa0] sm:$0xff]   ;;  %v11045_v31 = vld [vmem:[%s16441_s12 + $0x98] sm:$0xff]  }
 0x590   : > { %v5395_v49 = vadd.f32 1.0, %v11398_v53  ;;  %10562 = vmatmul.mubr.msk.bf16.gmra.mxu1 %vm2056_vm3, %v5479_v30  ;;  %10586 = vmatmul.mubr.msk.bf16.gmra.mxu0 %vm2056_vm3, %v5464_v13  ;;  %v5686_v63 = vld [vmem:[#allocation2 + $0x32] ss:$2 sm:$0xff] }
 0x591   : > { %v11400_v11 = vpop.eup %11399  ;;  %10565 = vmatprep.mubr.msk.bf16.mxu1 %vm11613_vm5, %v11612_v56  ;;  %5432 = vst.msk [vmem:[#allocation2 + $0x60] sm:$0xff] %vm2056_vm3, %v5412_v33  ;;  %10589 = vmatprep.mubr.msk.bf16.mxu0 %vm11613_vm5, %v11612_v56  ;;  %v5694_v44 = vpack.c.bf16 %v5686_v63, %v5685_v29  ;;  %v11046_v30 = vld [vmem:[%s16441_s12 + $0x90] sm:$0xff]  }
 0x592   : > { %v11402_v40 = vpop.eup %11401  ;;  %v5415_v26 = vmul.f32 %v5395_v49, %v5335_v18  ;;  %v5393_v7 = vadd.f32 1.0, %v11400_v11  ;;  %10626 = vmatpush3.bf16.msra.mxu0 %v11043_v61 }
 0x593   : > { %v5398_v48 = vadd.f32 1.0, %v11402_v40  ;;  %v5473_v32 = vld [vmem:[#allocation2 + $0x51] ss:$2 sm:$0xff]  ;;  %v5458_v39 = vld [vmem:[#allocation2 + $0x50] ss:$2 sm:$0xff]  ;;  %10627 = vmatprep.subr.bf16.mxu0 %v11612_v56 }
 0x594   : > { %v11404_v38 = vpop.eup %11403  ;;  %5435 = vst.msk [vmem:[#allocation2 + $0x78] sm:$0xff] %vm2056_vm3, %v5415_v26  ;;  %v5413_v58 = vmul.f32 %v5393_v7, %v5333_v4 }
 0x595   : > { %v5418_v6 = vmul.f32 %v5398_v48, %v5338_v3  ;;  %v5396_v47 = vadd.f32 1.0, %v11404_v38  ;;  %v5472_v36 = vld [vmem:[#allocation2 + $0x41] ss:$2 sm:$0xff]  ;;  %v5457_v27 = vld [vmem:[#allocation2 + $0x40] ss:$2 sm:$0xff] }
 0x596   : > { %5433 = vst.msk [vmem:[#allocation2 + $0x68] sm:$0xff] %vm2056_vm3, %v5413_v58  ;;  %v5480_v10 = vpack.c.bf16 %v5473_v32, %v5472_v36  ;;  %v5465_v20 = vpack.c.bf16 %v5458_v39, %v5457_v27  ;;  %v5687_v62 = vld [vmem:[#allocation2 + $0x42] ss:$2 sm:$0xff]  ;;  %10628 = vmatpush3.bf16.msra.mxu0 %v11044_v55 }
 0x597   : > { %v11406_v50 = vpop.eup %11405  ;;  %5438 = vst.msk [vmem:[#allocation2 + $0x90] sm:$0xff] %vm2056_vm3, %v5418_v6  ;;  %v5416_v54 = vmul.f32 %v5396_v47, %v5336_v17  ;;  %10657 = vmatprep.subr.bf16.mxu0 %v11612_v56 }
 0x598   : > { %v5399_v35 = vadd.f32 1.0, %v11406_v50  ;;  %10566 = vmatmul.mubr.msk.bf16.gmra.mxu1 %vm2056_vm3, %v5480_v10  ;;  %10590 = vmatmul.mubr.msk.bf16.gmra.mxu0 %vm2056_vm3, %v5465_v20  ;;  %v5688_v5 = vld [vmem:[#allocation2 + $0x52] ss:$2 sm:$0xff] }
 0x599   : > { %5436 = vst.msk [vmem:[#allocation2 + $0x80] sm:$0xff] %vm2056_vm3, %v5416_v54  ;;  %10569 = vmatprep.mubr.msk.bf16.mxu1 %vm11613_vm5, %v11612_v56  ;;  %v11408_v24 = vpop.eup %11407  ;;  %10593 = vmatprep.mubr.msk.bf16.mxu0 %vm11613_vm5, %v11612_v56  ;;  %v5695_v2 = vpack.c.bf16 %v5688_v5, %v5687_v62 }
 0x59a   : > { %v5419_v34 = vmul.f32 %v5399_v35, %v5339_v25  ;;  %v5397_v23 = vadd.f32 1.0, %v11408_v24 }
 0x59b   : > { %v5475_v19 = vld [vmem:[#allocation2 + $0x71] ss:$2 sm:$0xff]  ;;  %v5460_v37 = vld [vmem:[#allocation2 + $0x70] ss:$2 sm:$0xff] }
 0x59c   : > { %5439 = vst.msk [vmem:[#allocation2 + $0x98] sm:$0x7f] %vm2214_vm4, %v5419_v34  ;;  %v5417_v9 = vmul.f32 %v5397_v23, %v5337_v45 }
 0x59d   : > { %v5474_v42 = vld [vmem:[#allocation2 + $0x61] ss:$2 sm:$0xff]  ;;  %v5459_v51 = vld [vmem:[#allocation2 + $0x60] ss:$2 sm:$0xff] }
 0x59e   : > { %v5481_v12 = vpack.c.bf16 %v5475_v19, %v5474_v42  ;;  %v5466_v21 = vpack.c.bf16 %v5460_v37, %v5459_v51  ;;  %5437 = vst.msk [vmem:[#allocation2 + $0x88] sm:$0xff] %vm2056_vm3, %v5417_v9  ;;  %v5689_v60 = vld [vmem:[#allocation2 + $0x62] ss:$2 sm:$0xff] }
 0x5a0   : > { %10570 = vmatmul.mubr.msk.bf16.gmra.mxu1 %vm2056_vm3, %v5481_v12  ;;  %10594 = vmatmul.mubr.msk.bf16.gmra.mxu0 %vm2056_vm3, %v5466_v21  ;;  %v5690_v14 = vld [vmem:[#allocation2 + $0x72] ss:$2 sm:$0xff] }
 0x5a1   : > { %10573 = vmatprep.mubr.msk.bf16.mxu1 %vm11613_vm5, %v11612_v56  ;;  %10597 = vmatprep.mubr.msk.bf16.mxu0 %vm11613_vm5, %v11612_v56  ;;  %v5696_v15 = vpack.c.bf16 %v5690_v14, %v5689_v60 }
 0x5a3   : > { %v5477_v16 = vld [vmem:[#allocation2 + $0x91] ss:$2 sm:$0x7f]  ;;  %v5462_v28 = vld [vmem:[#allocation2 + $0x90] ss:$2 sm:$0x7f] }
 0x5a4   : > { %v5692_v0 = vld [vmem:[#allocation2 + $0x92] ss:$2 sm:$0x7f] }
 0x5a5   : > { %v5476_v41 = vld [vmem:[#allocation2 + $0x81] ss:$2 sm:$0xff]  ;;  %v5461_v59 = vld [vmem:[#allocation2 + $0x80] ss:$2 sm:$0xff] }
 0x5a6   : > { %v5482_v46 = vpack.c.bf16 %v5477_v16, %v5476_v41  ;;  %v5467_v43 = vpack.c.bf16 %v5462_v28, %v5461_v59  ;;  %v5691_v22 = vld [vmem:[#allocation2 + $0x82] ss:$2 sm:$0xff] }
 0x5a7   : > { %v5697_v57 = vpack.c.bf16 %v5692_v0, %v5691_v22 }
 0x5a8   : > { %10574 = vmatmul.mubr.msk.bf16.gmra.mxu1 %vm2056_vm3, %v5482_v46  ;;  %10598 = vmatmul.mubr.msk.bf16.gmra.mxu0 %vm2056_vm3, %v5467_v43 }
 0x5a9   : > { %10605 = vmatprep.mubr.msk.bf16.mxu1 %vm11613_vm5, %v11612_v56  ;;  %10629 = vmatprep.mubr.msk.bf16.mxu0 %vm11613_vm5, %v11612_v56 }
 0x5b0   : > { %10606 = vmatmul.mubr.msk.bf16.vlgmr.msra.gmra.mxu1 %vm2056_vm3, %v5693_v8 }
 0x5b1   : > { %10609 = vmatprep.mubr.msk.bf16.mxu1 %vm11613_vm5, %v11612_v56  ;;  %10642 = vmatpush3.bf16.msra.mxu1 %v11045_v31 }
 0x5b2   : > { %10643 = vmatprep.subr.bf16.mxu1 %v11612_v56 }
 0x5b5   : > { %10644 = vmatpush3.bf16.msra.mxu1 %v11046_v30 }
 0x5b8   : > { %10610 = vmatmul.mubr.msk.bf16.gmra.mxu1 %vm2056_vm3, %v5694_v44 }
 0x5b9   : > { %10613 = vmatprep.mubr.msk.bf16.mxu1 %vm11613_vm5, %v11612_v56 }
 0x5c0   : > { %10614 = vmatmul.mubr.msk.bf16.gmra.mxu1 %vm2056_vm3, %v5695_v2 }
 0x5c1   : > { %10617 = vmatprep.mubr.msk.bf16.mxu1 %vm11613_vm5, %v11612_v56 }
 0x5c8   : > { %10618 = vmatmul.mubr.msk.bf16.gmra.mxu1 %vm2056_vm3, %v5696_v15 }
 0x5c9   : > { %10621 = vmatprep.mubr.msk.bf16.mxu1 %vm11613_vm5, %v11612_v56 }
 0x5d0   : > { %10622 = vmatmul.mubr.msk.bf16.gmra.mxu1 %vm2056_vm3, %v5697_v57 }
 0x5d1   : > { %10645 = vmatprep.mubr.msk.bf16.mxu1 %vm11613_vm5, %v11612_v56 }
 0x648   : > { %v5544_v13 = vpop.f32.mrf.mxu1  ;;  %v5644_v53 = vpop.f32.mrf.mxu0 }
 0x649   : > { %v5645_v41 = vadd.f32 %v5644_v53, %v5544_v13 }
 0x64a   : > { %v10559_v33 = vpop.f32.mrf.mxu1  ;;  %v10583_v18 = vpop.f32.mrf.mxu0 }
 0x64c   : > { %v5547_v49 = vpop.f32.mrf.mxu1  ;;  %v5647_v11 = vpop.f32.mrf.mxu0 }
 0x64d   : > { %v5648_v1 = vadd.f32 %v5647_v11, %v5547_v49 }
 0x64e   : > { %v10560_v40 = vpop.f32.mrf.mxu1  ;;  %v10584_v26 = vpop.f32.mrf.mxu0 }
 0x650   : > { %v5552_v4 = vpop.f32.mrf.mxu1  ;;  %v5652_v7 = vpop.f32.mrf.mxu0 }
 0x651   : > { %v5653_v44 = vadd.f32 %v5652_v7, %v5552_v4 }
 0x652   : > { %v10563_v3 = vpop.f32.mrf.mxu1  ;;  %v10587_v48 = vpop.f32.mrf.mxu0 }
 0x654   : > { %v5555_v38 = vpop.f32.mrf.mxu1  ;;  %v5655_v58 = vpop.f32.mrf.mxu0 }
 0x655   : > { %v5656_v60 = vadd.f32 %v5655_v58, %v5555_v38 }
 0x656   : > { %v10564_v32 = vpop.f32.mrf.mxu1  ;;  %v10588_v39 = vpop.f32.mrf.mxu0 }
 0x658   : > { %v5560_v6 = vpop.f32.mrf.mxu1  ;;  %v5660_v17 = vpop.f32.mrf.mxu0 }
 0x659   : > { %v5661_v61 = vadd.f32 %v5660_v17, %v5560_v6 }
 0x65a   : > { %v10567_v47 = vpop.f32.mrf.mxu1  ;;  %v10591_v36 = vpop.f32.mrf.mxu0 }
 0x65c   : > { %v5563_v27 = vpop.f32.mrf.mxu1  ;;  %v5663_v10 = vpop.f32.mrf.mxu0 }
 0x65d   : > { %v5664_v33 = vadd.f32 %v5663_v10, %v5563_v27 }
 0x65e   : > { %v10568_v20 = vpop.f32.mrf.mxu1  ;;  %v10592_v50 = vpop.f32.mrf.mxu0 }
 0x660   : > { %v5568_v54 = vpop.f32.mrf.mxu1  ;;  %v5668_v25 = vpop.f32.mrf.mxu0 }
 0x661   : > { %v5669_v48 = vadd.f32 %v5668_v25, %v5568_v54 }
 0x662   : > { %v10571_v35 = vpop.f32.mrf.mxu1  ;;  %v10595_v24 = vpop.f32.mrf.mxu0 }
 0x664   : > { %v5571_v34 = vpop.f32.mrf.mxu1  ;;  %v5671_v45 = vpop.f32.mrf.mxu0 }
 0x665   : > { %v5672_v27 = vadd.f32 %v5671_v45, %v5571_v34 }
 0x666   : > { %v10572_v23 = vpop.f32.mrf.mxu1  ;;  %v10596_v19 = vpop.f32.mrf.mxu0 }
 0x668   : > { %v15230_v9 = vpop.f32.mrf.mxu1  ;;  %v15232_v42 = vpop.f32.mrf.mxu0 }
 0x669   : > { %v5677_v19 = vadd.f32 %v15232_v42, %v15230_v9 }
 0x66a   : > { %v10575_v51 = vpop.f32.mrf.mxu1  ;;  %v10599_v37 = vpop.f32.mrf.mxu0 }
 0x66c   : > { %v15234_v12 = vpop.f32.mrf.mxu1  ;;  %v15236_v21 = vpop.f32.mrf.mxu0 }
 0x66e   : > { %v10576_v16 = vpop.f32.mrf.mxu1  ;;  %v10600_v28 = vpop.f32.mrf.mxu0 }
 0x670   : > { %v5759_v59 = vpop.f32.mrf.mxu1 }
 0x671   : > { %v5798_v46 = vadd.f32 %v5759_v59, %v5645_v41 }
 0x672   : > { %v10607_v43 = vpop.f32.mrf.mxu1 }
 0x673   : > { %v5818_v52 = vmul.f32 0.70710677, %v5798_v46  ;;  %v5808_v18 = vmul.f32 0.5, %v5798_v46  ;;  %v5680_v46 = vadd.f32 %v15236_v21, %v15234_v12  ;;  %v11047_v12 = vld [vmem:[%s16441_s12 + $0xb8] sm:$0xff]  }
 0x674   : > { %v5762_v8 = vpop.f32.mrf.mxu1 }
 0x675   : > { %11409 = verf.f32 %v5818_v52  ;;  %v5799_v63 = vadd.f32 %v5762_v8, %v5648_v1 }
 0x676   : > { %v10608_v29 = vpop.f32.mrf.mxu1 }
 0x677   : > { %v5819_v5 = vmul.f32 0.70710677, %v5799_v63  ;;  %v5809_v38 = vmul.f32 0.5, %v5799_v63 }
 0x678   : > { %v5767_v62 = vpop.f32.mrf.mxu1 }
 0x679   : > { %11411 = verf.f32 %v5819_v5  ;;  %v5800_v2 = vadd.f32 %v5767_v62, %v5653_v44 }
 0x67a   : > { %v10611_v14 = vpop.f32.mrf.mxu1 }
 0x67b   : > { %v5820_v15 = vmul.f32 0.70710677, %v5800_v2  ;;  %v5810_v10 = vmul.f32 0.5, %v5800_v2 }
 0x67c   : > { %v5770_v22 = vpop.f32.mrf.mxu1 }
 0x67d   : > { %11413 = verf.f32 %v5820_v15  ;;  %v5801_v0 = vadd.f32 %v5770_v22, %v5656_v60 }
 0x67e   : > { %v10612_v57 = vpop.f32.mrf.mxu1 }
 0x67f   : > { %v5821_v55 = vmul.f32 0.70710677, %v5801_v0  ;;  %v5811_v51 = vmul.f32 0.5, %v5801_v0 }
 0x680   : > { %v5775_v31 = vpop.f32.mrf.mxu1 }
 0x681   : > { %11415 = verf.f32 %v5821_v55  ;;  %v5802_v30 = vadd.f32 %v5775_v31, %v5661_v61 }
 0x682   : > { %v11410_v13 = vpop.eup %11409  ;;  %v10615_v53 = vpop.f32.mrf.mxu1 }
 0x683   : > { %v5838_v49 = vadd.f32 1.0, %v11410_v13  ;;  %v5822_v11 = vmul.f32 0.70710677, %v5802_v30  ;;  %v5812_v43 = vmul.f32 0.5, %v5802_v30  ;;  %v11048_v13 = vld [vmem:[%s16441_s12 + $0xb0] sm:$0xff]   ;;  %s16720_s12 = sld [smem:[#allocation117_spill]] }
 0x684   : > { %v5778_v40 = vpop.f32.mrf.mxu1 }
 0x685   : > { %v5848_v26 = vmul.f32 %v5838_v49, %v5808_v18  ;;  %11417 = verf.f32 %v5822_v11  ;;  %v5803_v4 = vadd.f32 %v5778_v40, %v5664_v33 }
 0x686   : > { %v11412_v7 = vpop.eup %11411  ;;  %v10616_v3 = vpop.f32.mrf.mxu1 }
 0x687   : > { %5858 = vst.msk [vmem:[#allocation3] sm:$0xff] %vm2056_vm3, %v5848_v26  ;;  %v5839_v58 = vadd.f32 1.0, %v11412_v7  ;;  %v5823_v32 = vmul.f32 0.70710677, %v5803_v4  ;;  %v5813_v44 = vmul.f32 0.5, %v5803_v4 }
 0x688   : > { %v5783_v39 = vpop.f32.mrf.mxu1 }
 0x689   : > { %v5849_v6 = vmul.f32 %v5839_v58, %v5809_v38  ;;  %11419 = verf.f32 %v5823_v32  ;;  %v5804_v17 = vadd.f32 %v5783_v39, %v5669_v48 }
 0x68a   : > { %v11414_v47 = vpop.eup %11413  ;;  %v10619_v36 = vpop.f32.mrf.mxu1 }
 0x68b   : > { %5859 = vst.msk [vmem:[#allocation3 + $0x8] sm:$0xff] %vm2056_vm3, %v5849_v6  ;;  %v5840_v20 = vadd.f32 1.0, %v11414_v47  ;;  %v5824_v50 = vmul.f32 0.70710677, %v5804_v17  ;;  %v5814_v0 = vmul.f32 0.5, %v5804_v17 }
 0x68c   : > { %v5786_v35 = vpop.f32.mrf.mxu1 }
 0x68d   : > { %v5850_v24 = vmul.f32 %v5840_v20, %v5810_v10  ;;  %11421 = verf.f32 %v5824_v50  ;;  %v5805_v54 = vadd.f32 %v5786_v35, %v5672_v27 }
 0x68e   : > { %v11416_v25 = vpop.eup %11415  ;;  %v10620_v23 = vpop.f32.mrf.mxu1 }
 0x68f   : > { %5860 = vst.msk [vmem:[#allocation3 + $0x10] sm:$0xff] %vm2056_vm3, %v5850_v24  ;;  %v5841_v37 = vadd.f32 1.0, %v11416_v25  ;;  %v5825_v16 = vmul.f32 0.70710677, %v5805_v54  ;;  %v5815_v53 = vmul.f32 0.5, %v5805_v54 }
 0x690   : > { %v5791_v34 = vpop.f32.mrf.mxu1 }
 0x691   : > { %v5851_v45 = vmul.f32 %v5841_v37, %v5811_v51  ;;  %11423 = verf.f32 %v5825_v16  ;;  %v5806_v28 = vadd.f32 %v5791_v34, %v5677_v19  ;;  %v11049_v51 = vld [vmem:[%s16714_s4 + $0x18] sm:$0xff]   ;;  %v11050_v37 = vld [vmem:[%s16714_s4 + $0x10] sm:$0xff]   ;;  %v15294_v16 = vld [vmem:[%s16714_s4 + $0x8] sm:$0xff]  }
 0x692   : > { %v11418_v41 = vpop.eup %11417  ;;  %v10623_v59 = vpop.f32.mrf.mxu1  ;;  %v5889_v14 = vld [vmem:[#allocation3 + $0x1] ss:$2 sm:$0xff]  ;;  %v5881_v15 = vld [vmem:[#allocation3] ss:$2 sm:$0xff]  ;;  %10673 = vmatprep.subr.bf16.mxu1 %v11049_v51 }
 0x693   : > { %5861 = vst.msk [vmem:[#allocation3 + $0x18] sm:$0xff] %vm2056_vm3, %v5851_v45  ;;  %v5842_v1 = vadd.f32 1.0, %v11418_v41  ;;  %v5826_v52 = vmul.f32 0.70710677, %v5806_v28  ;;  %v5816_v11 = vmul.f32 0.5, %v5806_v28 }
 0x694   : > { %v5794_v9 = vpop.f32.mrf.mxu1 }
 0x695   : > { %v5852_v42 = vmul.f32 %v5842_v1, %v5812_v43  ;;  %11425 = verf.f32 %v5826_v52  ;;  %v5807_v8 = vadd.f32 %v5794_v9, %v5680_v46 }
 0x696   : > { %v11420_v63 = vpop.eup %11419  ;;  %v10624_v29 = vpop.f32.mrf.mxu1  ;;  %v6051_v50 = vld [vmem:[#allocation3 + $0x2] ss:$2 sm:$0xff] }
 0x697   : > { %5862 = vst.msk [vmem:[#allocation3 + $0x20] sm:$0xff] %vm2056_vm3, %v5852_v42  ;;  %v5843_v5 = vadd.f32 1.0, %v11420_v63  ;;  %v5827_v62 = vmul.f32 0.70710677, %v5807_v8  ;;  %v5817_v7 = vmul.f32 0.5, %v5807_v8 }
 0x699   : > { %v5853_v2 = vmul.f32 %v5843_v5, %v5813_v44  ;;  %11427 = verf.f32 %v5827_v62 }
 0x69a   : > { %v11422_v21 = vpop.eup %11421  ;;  %v5890_v60 = vld [vmem:[#allocation3 + $0x11] ss:$2 sm:$0xff]  ;;  %v5882_v22 = vld [vmem:[#allocation3 + $0x10] ss:$2 sm:$0xff] }
 0x69b   : > { %5863 = vst.msk [vmem:[#allocation3 + $0x28] sm:$0xff] %vm2056_vm3, %v5853_v2  ;;  %v5844_v57 = vadd.f32 1.0, %v11422_v21  ;;  %v5894_v61 = vpack.c.bf16 %v5890_v60, %v5889_v14  ;;  %v5886_v55 = vpack.c.bf16 %v5882_v22, %v5881_v15 }
 0x69d   : > { %v5854_v31 = vmul.f32 %v5844_v57, %v5814_v0  ;;  %10630 = vmatmul.mubr.msk.bf16.vlgmr.msra.gmra.mxu0 %vm2056_vm3, %v5894_v61  ;;  %10646 = vmatmul.mubr.msk.bf16.vlgmr.msra.gmra.mxu1 %vm2056_vm3, %v5886_v55 }
 0x69e   : > { %v11424_v30 = vpop.eup %11423  ;;  %10658 = vmatpush3.bf16.msra.mxu0 %v11047_v12  ;;  %10633 = vmatprep.mubr.msk.bf16.mxu0 %vm11613_vm5, %v11612_v56  ;;  %v6052_v20 = vld [vmem:[#allocation3 + $0x12] ss:$2 sm:$0xff] }
 0x69f   : > { %5864 = vst.msk [vmem:[#allocation3 + $0x30] sm:$0xff] %vm2056_vm3, %v5854_v31  ;;  %v5845_v33 = vadd.f32 1.0, %v11424_v30  ;;  %10649 = vmatprep.mubr.msk.bf16.mxu1 %vm11613_vm5, %v11612_v56  ;;  %10659 = vmatprep.subr.bf16.mxu0 %v11612_v56  ;;  %v6056_v35 = vpack.c.bf16 %v6052_v20, %v6051_v50 }
 0x6a0   : > { %10674 = vmatpush3.bf16.msra.mxu1 %v11049_v51 }
 0x6a1   : > { %v5855_v18 = vmul.f32 %v5845_v33, %v5815_v53  ;;  %10675 = vmatprep.subr.bf16.mxu1 %v11050_v37 }
 0x6a2   : > { %v11426_v49 = vpop.eup %11425  ;;  %10660 = vmatpush3.bf16.msra.mxu0 %v11048_v13  ;;  %v5891_v38 = vld [vmem:[#allocation3 + $0x21] ss:$2 sm:$0xff]  ;;  %v5883_v32 = vld [vmem:[#allocation3 + $0x20] ss:$2 sm:$0xff] }
 0x6a3   : > { %5865 = vst.msk [vmem:[#allocation3 + $0x38] sm:$0xff] %vm2056_vm3, %v5855_v18  ;;  %v5846_v40 = vadd.f32 1.0, %v11426_v49  ;;  %10697 = vmatprep.subr.bf16.mxu0 %v11612_v56 }
 0x6a4   : > { %10676 = vmatpush3.bf16.msra.mxu1 %v11050_v37 }
 0x6a5   : > { %v5856_v26 = vmul.f32 %v5846_v40, %v5816_v11  ;;  %10681 = vmatprep.subr.bf16.mxu1 %v15294_v16 }
 0x6a6   : > { %v11428_v4 = vpop.eup %11427  ;;  %v6053_v54 = vld [vmem:[#allocation3 + $0x22] ss:$2 sm:$0xff] }
 0x6a7   : > { %5866 = vst.msk [vmem:[#allocation3 + $0x40] sm:$0xff] %vm2056_vm3, %v5856_v26  ;;  %v5847_v3 = vadd.f32 1.0, %v11428_v4 }
 0x6a9   : > { %v5857_v48 = vmul.f32 %v5847_v3, %v5817_v7 }
 0x6aa   : > { %v5892_v58 = vld [vmem:[#allocation3 + $0x31] ss:$2 sm:$0xff]  ;;  %v5884_v39 = vld [vmem:[#allocation3 + $0x30] ss:$2 sm:$0xff] }
 0x6ab   : > { %5867 = vst.msk [vmem:[#allocation3 + $0x48] sm:$0x7f] %vm2214_vm4, %v5857_v48  ;;  %v5895_v6 = vpack.c.bf16 %v5892_v58, %v5891_v38  ;;  %v5887_v17 = vpack.c.bf16 %v5884_v39, %v5883_v32 }
 0x6ad   : > { %10634 = vmatmul.mubr.msk.bf16.gmra.mxu0 %vm2056_vm3, %v5895_v6  ;;  %10650 = vmatmul.mubr.msk.bf16.gmra.mxu1 %vm2056_vm3, %v5887_v17 }
 0x6ae   : > { %10637 = vmatprep.mubr.msk.bf16.mxu0 %vm11613_vm5, %v11612_v56  ;;  %10653 = vmatprep.mubr.msk.bf16.mxu1 %vm11613_vm5, %v11612_v56  ;;  %v6054_v24 = vld [vmem:[#allocation3 + $0x32] ss:$2 sm:$0xff] }
 0x6af   : > { %v6057_v25 = vpack.c.bf16 %v6054_v24, %v6053_v54 }
 0x6b2   : > { %v5893_v47 = vld [vmem:[#allocation3 + $0x41] ss:$2 sm:$0x7f]  ;;  %v5885_v36 = vld [vmem:[#allocation3 + $0x40] ss:$2 sm:$0x7f] }
 0x6b3   : > { %v5896_v27 = vpack.c.bf16 %v5893_v47, %v5893_v47  ;;  %v5888_v10 = vpack.c.bf16 %v5885_v36, %v5885_v36  ;;  %v6055_v23 = vld [vmem:[#allocation3 + $0x42] ss:$2 sm:$0x7f] }
 0x6b4   : > { %v6058_v19 = vpack.c.bf16 %v6055_v23, %v6055_v23 }
 0x6b5   : > { %10638 = vmatmul.mubr.msk.bf16.gmra.mxu0 %vm2056_vm3, %v5896_v27  ;;  %10654 = vmatmul.mubr.msk.bf16.gmra.mxu1 %vm2056_vm3, %v5888_v10 }
 0x6b6   : > { %10661 = vmatprep.mubr.msk.bf16.mxu0 %vm11613_vm5, %v11612_v56 }
 0x6bd   : > { %10662 = vmatmul.mubr.msk.bf16.vlgmr.msra.gmra.mxu0 %vm2056_vm3, %v6056_v35 }
 0x6be   : > { %10665 = vmatprep.mubr.msk.bf16.mxu0 %vm11613_vm5, %v11612_v56 }
 0x6c5   : > { %10666 = vmatmul.mubr.msk.bf16.gmra.mxu0 %vm2056_vm3, %v6057_v25 }
 0x6c6   : > { %10669 = vmatprep.mubr.msk.bf16.mxu0 %vm11613_vm5, %v11612_v56 }
 0x6cd   : > { %10670 = vmatmul.mubr.msk.bf16.gmra.mxu0 %vm2056_vm3, %v6058_v19 }
 0x6ce   : > { %10701 = vmatprep.mubr.msk.bf16.mxu0 %vm11613_vm5, %v11612_v56 }
 0x75d   : > { %v5952_v34 = vpop.f32.mrf.mxu0  ;;  %v6029_v45 = vpop.f32.mrf.mxu1 }
 0x75e   : > { %v6030_v0 = vadd.f32 %v6029_v45, %v5952_v34 }
 0x75f   : > { %v10631_v28 = vpop.f32.mrf.mxu0  ;;  %v10647_v41 = vpop.f32.mrf.mxu1 }
 0x761   : > { %v5955_v59 = vpop.f32.mrf.mxu0  ;;  %v6032_v46 = vpop.f32.mrf.mxu1 }
 0x762   : > { %v6033_v31 = vadd.f32 %v6032_v46, %v5955_v59 }
 0x763   : > { %v10632_v43 = vpop.f32.mrf.mxu0  ;;  %v10648_v1 = vpop.f32.mrf.mxu1 }
 0x76d   : > { %v5960_v52 = vpop.f32.mrf.mxu0  ;;  %v6037_v9 = vpop.f32.mrf.mxu1 }
 0x76e   : > { %v6038_v18 = vadd.f32 %v6037_v9, %v5960_v52 }
 0x76f   : > { %v10635_v42 = vpop.f32.mrf.mxu0  ;;  %v10651_v8 = vpop.f32.mrf.mxu1 }
 0x771   : > { %v5963_v63 = vpop.f32.mrf.mxu0  ;;  %v6040_v29 = vpop.f32.mrf.mxu1 }
 0x772   : > { %v6041_v4 = vadd.f32 %v6040_v29, %v5963_v63 }
 0x773   : > { %v10636_v44 = vpop.f32.mrf.mxu0  ;;  %v10652_v5 = vpop.f32.mrf.mxu1 }
 0x775   : > { %v5968_v62 = vpop.f32.mrf.mxu0  ;;  %v6045_v2 = vpop.f32.mrf.mxu1 }
 0x776   : > { %v6046_v58 = vadd.f32 %v6045_v2, %v5968_v62  ;;  %v11052_v62 = vld [vmem:[%s16714_s4] sm:$0xff]  }
 0x777   : > { %v10639_v14 = vpop.f32.mrf.mxu0  ;;  %v10655_v12 = vpop.f32.mrf.mxu1 }
 0x779   : > { %v5971_v21 = vpop.f32.mrf.mxu0  ;;  %v6048_v60 = vpop.f32.mrf.mxu1 }
 0x77a   : > { %v11053_v21 = vld [vmem:[%s16714_s4 + $0x28] sm:$0xff]   ;;  %v11055_v60 = vld [vmem:[%s16714_s4 + $0x20] sm:$0xff]  }
 0x77b   : > { %v10640_v15 = vpop.f32.mrf.mxu0  ;;  %v10656_v22 = vpop.f32.mrf.mxu1  ;;  %10698 = vmatpush3.bf16.msra.mxu0 %v11053_v21 }
 0x77c   : > { %v11056_v15 = vld [vmem:[%s16714_s4 + $0x30] sm:$0xff]   ;;  %10699 = vmatprep.subr.bf16.mxu0 %v11612_v56 }
 0x77d   : > { %v6114_v57 = vpop.f32.mrf.mxu0 }
 0x77e   : > { %v6136_v61 = vadd.f32 %v6114_v57, %v6030_v0 }
 0x77f   : > { %v10663_v55 = vpop.f32.mrf.mxu0  ;;  %10700 = vmatpush3.bf16.msra.mxu0 %v11055_v60 }
 0x780   : > { %v6146_v30 = vmul.f32 0.70710677, %v6136_v61  ;;  %v6141_v36 = vmul.f32 0.5, %v6136_v61  ;;  %10713 = vmatprep.subr.bf16.mxu0 %v11612_v56 }
 0x781   : > { %v6117_v13 = vpop.f32.mrf.mxu0 }
 0x782   : > { %11429 = verf.f32 %v6146_v30  ;;  %v6137_v53 = vadd.f32 %v6117_v13, %v6033_v31 }
 0x783   : > { %v10664_v33 = vpop.f32.mrf.mxu0 }
 0x784   : > { %v6147_v49 = vmul.f32 0.70710677, %v6137_v53  ;;  %v6142_v54 = vmul.f32 0.5, %v6137_v53 }
 0x785   : > { %v6122_v11 = vpop.f32.mrf.mxu0 }
 0x786   : > { %11431 = verf.f32 %v6147_v49  ;;  %v6138_v40 = vadd.f32 %v6122_v11, %v6038_v18 }
 0x787   : > { %v10667_v26 = vpop.f32.mrf.mxu0 }
 0x788   : > { %v6148_v7 = vmul.f32 0.70710677, %v6138_v40  ;;  %v6143_v51 = vmul.f32 0.5, %v6138_v40 }
 0x789   : > { %v6125_v3 = vpop.f32.mrf.mxu0 }
 0x78a   : > { %11433 = verf.f32 %v6148_v7  ;;  %v6139_v48 = vadd.f32 %v6125_v3, %v6041_v4 }
 0x78b   : > { %v10668_v38 = vpop.f32.mrf.mxu0 }
 0x78c   : > { %v6149_v32 = vmul.f32 0.70710677, %v6139_v48  ;;  %v6144_v28 = vmul.f32 0.5, %v6139_v48 }
 0x78d   : > { %v6130_v39 = vpop.f32.mrf.mxu0 }
 0x78e   : > { %11435 = verf.f32 %v6149_v32  ;;  %v6140_v6 = vadd.f32 %v6130_v39, %v6046_v58 }
 0x78f   : > { %v11430_v17 = vpop.eup %11429  ;;  %v10671_v47 = vpop.f32.mrf.mxu0 }
 0x790   : > { %v6156_v27 = vadd.f32 1.0, %v11430_v17  ;;  %v6150_v10 = vmul.f32 0.70710677, %v6140_v6  ;;  %v6145_v43 = vmul.f32 0.5, %v6140_v6 }
 0x791   : > { %v6133_v20 = vpop.f32.mrf.mxu0 }
 0x792   : > { %v6161_v50 = vmul.f32 %v6156_v27, %v6141_v36  ;;  %11437 = verf.f32 %v6150_v10 }
 0x793   : > { %v11432_v35 = vpop.eup %11431  ;;  %v10672_v24 = vpop.f32.mrf.mxu0 }
 0x794   : > { %6166 = vst.msk [vmem:[#allocation2] sm:$0xff] %vm2056_vm3, %v6161_v50  ;;  %v6157_v25 = vadd.f32 1.0, %v11432_v35 }
 0x796   : > { %v6162_v23 = vmul.f32 %v6157_v25, %v6142_v54 }
 0x797   : > { %v11434_v19 = vpop.eup %11433 }
 0x798   : > { %6167 = vst.msk [vmem:[#allocation2 + $0x8] sm:$0xff] %vm2056_vm3, %v6162_v23  ;;  %v6158_v37 = vadd.f32 1.0, %v11434_v19 }
 0x79a   : > { %v6163_v34 = vmul.f32 %v6158_v37, %v6143_v51 }
 0x79b   : > { %v11436_v45 = vpop.eup %11435 }
 0x79c   : > { %6168 = vst.msk [vmem:[#allocation2 + $0x10] sm:$0xff] %vm2056_vm3, %v6163_v34  ;;  %v6159_v41 = vadd.f32 1.0, %v11436_v45 }
 0x79e   : > { %v6164_v59 = vmul.f32 %v6159_v41, %v6144_v28 }
 0x79f   : > { %v11438_v46 = vpop.eup %11437  ;;  %v6184_v9 = vld [vmem:[#allocation2 + $0x1] ss:$2 sm:$0xff]  ;;  %v6179_v5 = vld [vmem:[#allocation2] ss:$2 sm:$0xff] }
 0x7a0   : > { %6169 = vst.msk [vmem:[#allocation2 + $0x18] sm:$0xff] %vm2056_vm3, %v6164_v59  ;;  %v6160_v1 = vadd.f32 1.0, %v11438_v46 }
 0x7a2   : > { %v6165_v52 = vmul.f32 %v6160_v1, %v6145_v43 }
 0x7a4   : > { %6170 = vst.msk [vmem:[#allocation2 + $0x20] sm:$0x7f] %vm2214_vm4, %v6165_v52 }
 0x7a7   : > { %v6185_v42 = vld [vmem:[#allocation2 + $0x11] ss:$2 sm:$0xff]  ;;  %v6180_v63 = vld [vmem:[#allocation2 + $0x10] ss:$2 sm:$0xff] }
 0x7a8   : > { %v6187_v8 = vpack.c.bf16 %v6185_v42, %v6184_v9  ;;  %v6182_v2 = vpack.c.bf16 %v6180_v63, %v6179_v5 }
 0x7aa   : > { %10677 = vmatprep.mubr.msk.bf16.mxu1 %vm2056_vm3, %v6187_v8 }
 0x7ab   : > { %v6186_v29 = vld [vmem:[#allocation2 + $0x21] ss:$2 sm:$0x7]  ;;  %v6181_v14 = vld [vmem:[#allocation2 + $0x20] ss:$2 sm:$0x7] }
 0x7ac   : > { %v6188_v44 = vpack.c.bf16 %v6186_v29, %v6186_v29  ;;  %v6183_v12 = vpack.c.bf16 %v6181_v14, %v6181_v14 }
 0x7ae   : > { %10678 = vmatmul.mubr.msk.bf16.vlgmr.msra.gmra.mxu1 %vm2056_vm3, %v6188_v44 }
 0x7af   : > { %10682 = vmatpush3.bf16.msra.mxu1 %v15294_v16  ;;  %10685 = vmatprep.mubr.msk.bf16.mxu1 %vm2056_vm3, %v6182_v2  ;;  %v11054_v16 = vld [vmem:[%s16714_s4 + $0x38] sm:$0xff]   ;;  %s16177_s4 = smov 112  }
 0x7b0   : > { %10683 = vmatprep.subr.bf16.mxu1 %v11052_v62 }
 0x7b3   : > { %10684 = vmatpush3.bf16.msra.mxu1 %v11052_v62 }
 0x7b4   : > { %10689 = vmatprep.subr.bf16.mxu1 %v11612_v56 }
 0x7b6   : > { %10686 = vmatmul.mubr.msk.bf16.vlgmr.msra.gmra.mxu1 %vm2056_vm3, %v6183_v12 }
 0x7b7   : > { %10693 = vmatprep.mubr.msk.bf16.mxu1 %vm11613_vm5, %v11612_v56  ;;  %10690 = vmatpush3.bf16.msra.mxu1 %v11054_v16 }
 0x7b8   : > { %10691 = vmatprep.subr.bf16.mxu1 %v11612_v56 }
 0x7bb   : > { %10692 = vmatpush3.bf16.msra.mxu1 %v11056_v15 }
 0x7bc   : > { %10705 = vmatprep.subr.bf16.mxu1 %v11612_v56 }
 0x86e   : > { %v10679_v22 = vpop.f32.mrf.mxu1 }
 0x870   : > { %v6241_v0 = vpop.f32.mrf.mxu1 }
 0x872   : > { %v10680_v57 = vpop.f32.mrf.mxu1 }
 0x874   : > { %v6244_v61 = vpop.f32.mrf.mxu1 }
 0x876   : > { %v10687_v55 = vpop.f32.mrf.mxu1 }
 0x877   : > { %v6316_v31 = vadd.f32 %v10687_v55, %v10679_v22  ;;  %v11058_v55 = vld [vmem:[%s16715_s11] sm:$0xff]  }
 0x878   : > { %v6307_v30 = vpop.f32.mrf.mxu1 }
 0x879   : > { %v6326_v13 = vmul.f32 0.70710677, %v6316_v31  ;;  %v6308_v53 = vadd.f32 %v6307_v30, %v6241_v0  ;;  %v6323_v4 = vmul.f32 0.5, %v6316_v31 }
 0x87a   : > { %v10688_v33 = vpop.f32.mrf.mxu1 }
 0x87b   : > { %11439 = verf.f32 %v6326_v13  ;;  %v6324_v18 = vmul.f32 0.70710677, %v6308_v53  ;;  %v6321_v38 = vmul.f32 0.5, %v6308_v53 }
 0x87c   : > { %v6310_v49 = vpop.f32.mrf.mxu1 }
 0x87d   : > { %11441 = verf.f32 %v6324_v18  ;;  %v6311_v11 = vadd.f32 %v6310_v49, %v6244_v61  ;;  %v11057_v61 = vld [vmem:[%s16715_s11 + $0x8] sm:$0xff]   ;;  %s16718_s11 = sld [smem:[#allocation116_spill]] }
 0x87f   : > { %v6325_v40 = vmul.f32 0.70710677, %v6311_v11  ;;  %v6322_v6 = vmul.f32 0.5, %v6311_v11 }
 0x881   : > { %11443 = verf.f32 %v6325_v40  ;;  %v9682_v40 = vld [vmem:[%s16716_s29] ss:$0 sm:$0xff]  ;;  %s16173_s29 = smov 80  }
 0x888   : > { %v11440_v26 = vpop.eup %11439 }
 0x889   : > { %v6332_v7 = vadd.f32 1.0, %v11440_v26 }
 0x88a   : > { %v11442_v3 = vpop.eup %11441 }
 0x88b   : > { %v6335_v48 = vmul.f32 %v6332_v7, %v6323_v4  ;;  %v6330_v58 = vadd.f32 1.0, %v11442_v3  ;;  %v9683_v3 = vld [vmem:[%s16717_s9] ss:$0 sm:$0xff]  ;;  %s16722_s9 = sld [smem:[#allocation118_spill]] }
 0x88d   : > { %v6333_v32 = vmul.f32 %v6330_v58, %v6321_v38  ;;  %6339 = vst.msk [vmem:[#allocation3 + $0x10] sm:$0x7] %vm6338_vm6, %v6335_v48 }
 0x88e   : > { %v11444_v39 = vpop.eup %11443 }
 0x88f   : > { %6336 = vst.msk [vmem:[#allocation3] sm:$0xff] %vm2056_vm3, %v6333_v32  ;;  %v6331_v17 = vadd.f32 1.0, %v11444_v39  ;;  %v11059_v32 = vld [vmem:[%s16718_s11 + $0x18] sm:$0xff]  }
 0x891   : > { %v6334_v47 = vmul.f32 %v6331_v17, %v6322_v6  ;;  %v11060_v6 = vld [vmem:[%s16718_s11 + $0x38] sm:$0xff]   ;;  %v11061_v17 = vld [vmem:[%s16718_s11 + $0x10] sm:$0xff]  }
 0x893   : > { %6337 = vst.msk [vmem:[#allocation3 + $0x8] sm:$0xff] %vm2056_vm3, %v6334_v47  ;;  %v11062_v47 = vld [vmem:[%s16718_s11 + $0x30] sm:$0xff]  }
 0x894   : > { %v6353_v36 = vld [vmem:[#allocation3 + $0x11] ss:$2 sm:$0x1]  ;;  %v6350_v27 = vld [vmem:[#allocation3 + $0x10] ss:$2 sm:$0x1] }
 0x89a   : > { %v6352_v10 = vld [vmem:[#allocation3 + $0x1] ss:$2 sm:$0xff]  ;;  %v6349_v20 = vld [vmem:[#allocation3] ss:$2 sm:$0xff] }
 0x89b   : > { %v6354_v50 = vpack.c.bf16 %v6353_v36, %v6352_v10  ;;  %v6351_v35 = vpack.c.bf16 %v6350_v27, %v6349_v20  ;;  %v11063_v36 = vld [vmem:[%s16718_s11 + $0x8] sm:$0xff]   ;;  %v11065_v10 = vld [vmem:[%s16718_s11] sm:$0xff]  }
 0x89c   : > { %v11064_v27 = vld [vmem:[%s16718_s11 + $0x28] sm:$0xff]   ;;  %v11066_v20 = vld [vmem:[%s16718_s11 + $0x20] sm:$0xff]  }
 0x89d   : > { %10694 = vmatmul.mubr.msk.bf16.vlgmr.msra.gmra.mxu1 %vm2056_vm3, %v6354_v50  ;;  %10702 = vmatmul.mubr.msk.bf16.vlgmr.msra.gmra.mxu0 %vm2056_vm3, %v6351_v35  ;;  %v9684_v50 = vld [vmem:[%s16719_s1] ss:$0 sm:$0xff] }
 0x89e   : > { %10709 = vmatprep.mubr.msk.bf16.mxu1 %vm11613_vm5, %v11612_v56  ;;  %10721 = vmatprep.mubr.msk.bf16.mxu0 %vm11613_vm5, %v11612_v56 }
 0x89f   : > { %10706 = vmatpush3.bf16.msra.mxu1 %v11057_v61  ;;  %10714 = vmatpush3.bf16.msra.mxu0 %v11060_v6 }
 0x8a0   : > { %10707 = vmatprep.subr.bf16.mxu1 %v11612_v56  ;;  %10715 = vmatprep.subr.bf16.mxu0 %v11612_v56 }
 0x8a3   : > { %10708 = vmatpush3.bf16.msra.mxu1 %v11058_v55  ;;  %10716 = vmatpush3.bf16.msra.mxu0 %v11062_v47 }
 0x8a4   : > { %10725 = vmatprep.subr.bf16.mxu1 %v11612_v56  ;;  %10717 = vmatprep.subr.bf16.mxu0 %v11612_v56 }
 0x8a7   : > { %10718 = vmatpush3.bf16.msra.mxu0 %v11064_v27 }
 0x8a8   : > { %10719 = vmatprep.subr.bf16.mxu0 %v11612_v56 }
 0x8ab   : > { %10720 = vmatpush3.bf16.msra.mxu0 %v11066_v20 }
 0x8ac   : > { %10737 = vmatprep.subr.bf16.mxu0 %v11612_v56 }
 0x95d   : > { %v6404_v24 = vpop.f32.mrf.mxu1  ;;  %v6460_v54 = vpop.f32.mrf.mxu0 }
 0x95e   : > { %v6461_v25 = vadd.f32 %v6460_v54, %v6404_v24 }
 0x95f   : > { %v10695_v23 = vpop.f32.mrf.mxu1  ;;  %v10703_v19 = vpop.f32.mrf.mxu0 }
 0x960   : > { %v6469_v51 = vmul.f32 0.70710677, %v6461_v25  ;;  %v6467_v43 = vmul.f32 0.5, %v6461_v25 }
 0x961   : > { %v6407_v37 = vpop.f32.mrf.mxu1  ;;  %v6463_v34 = vpop.f32.mrf.mxu0 }
 0x962   : > { %11445 = verf.f32 %v6469_v51  ;;  %v6464_v45 = vadd.f32 %v6463_v34, %v6407_v37 }
 0x963   : > { %v10696_v28 = vpop.f32.mrf.mxu1  ;;  %v10704_v41 = vpop.f32.mrf.mxu0 }
 0x964   : > { %v6470_v59 = vmul.f32 0.70710677, %v6464_v45  ;;  %v6468_v42 = vmul.f32 0.5, %v6464_v45  ;;  %v11067_v41 = vld [vmem:[%s16718_s11 + $0x58] sm:$0xff]  }
 0x966   : > { %11447 = verf.f32 %v6470_v59 }
 0x96f   : > { %v11446_v46 = vpop.eup %11445 }
 0x970   : > { %v6473_v1 = vadd.f32 1.0, %v11446_v46  ;;  %v11068_v46 = vld [vmem:[%s16718_s11 + $0x50] sm:$0xff]  }
 0x972   : > { %v6475_v52 = vmul.f32 %v6473_v1, %v6467_v43  ;;  %v11069_v43 = vld [vmem:[%s16718_s11 + $0x48] sm:$0xff]   ;;  %v11070_v1 = vld [vmem:[%s16718_s11 + $0x40] sm:$0xff]  }
 0x973   : > { %v11448_v9 = vpop.eup %11447 }
 0x974   : > { %6477 = vst.msk [vmem:[#allocation2] sm:$0xff] %vm2056_vm3, %v6475_v52  ;;  %v6474_v8 = vadd.f32 1.0, %v11448_v9  ;;  %v6768_v9 = vld [vmem:[#allocation4 + $0xa] sm:$0x1] }
 0x976   : > { %v6476_v63 = vmul.f32 %v6474_v8, %v6468_v42 }
 0x978   : > { %6479 = vst.msk [vmem:[#allocation2 + $0x8] sm:$0x1] %vm6478_vm7, %v6476_v63 }
 0x97b   : > { %v6480_v29 = vld [vmem:[#allocation2] sm:$0xff] }
 0x97c   : > { %v6484_v44 = vsel %vm2056_vm3, %v6480_v29, 0.0 }
 0x97d   : > { %6485 = vadd.xlane.f32.xlu0 %v6484_v44 }
 0x97f   : > { %v6481_v5 = vld [vmem:[#allocation2 + $0x8] sm:$0x1] }
 0x980   : > { %v6487_v62 = vsel %vm6478_vm7, %v6481_v5, 0.0 }
 0x981   : > { %6488 = vadd.xlane.f32.xlu0 %v6487_v62 }
 0xa06   : > { %v6486_v2 = vpop.xlane.xlu0 %6485 }
 0xa07   : > { %v6491_v14 = vmul.f32 0.03125, %v6486_v2 }
 0xa09   : > { %v6493_v12 = vsub.f32 %v6480_v29, %v6491_v14 }
 0xa0a   : > { %v6489_v21 = vpop.xlane.xlu0 %6488 }
 0xa0b   : > { %v6492_v16 = vmul.f32 0.03125, %v6489_v21  ;;  %v6495_v60 = vmul.f32 %v6493_v12, %v6493_v12 }
 0xa0d   : > { %v6494_v15 = vsub.f32 %v6481_v5, %v6492_v16  ;;  %v6497_v22 = vsel %vm2056_vm3, %v6495_v60, 0.0  ;;  %v9703_v16 = vld [vmem:[%s16720_s12] ss:$0 sm:$0xff]  ;;  %s16179_s12 = smov 64  }
 0xa0e   : > { %6498 = vadd.xlane.f32.xlu1 %v6497_v22 }
 0xa0f   : > { %v6496_v0 = vmul.f32 %v6494_v15, %v6494_v15 }
 0xa11   : > { %v6500_v57 = vsel %vm6478_vm7, %v6496_v0, 0.0 }
 0xa12   : > { %6501 = vadd.xlane.f32.xlu1 %v6500_v57 }
 0xa97   : > { %v6499_v31 = vpop.xlane.xlu1 %6498 }
 0xa98   : > { %v6503_v30 = vmul.f32 0.03125, %v6499_v31 }
 0xa9a   : > { %v6505_v13 = vadd.f32 1e-05, %v6503_v30 }
 0xa9b   : > { %v6502_v53 = vpop.xlane.xlu1 %6501 }
 0xa9c   : > { %11449 = vrsqrt.f32 %v6505_v13  ;;  %v6504_v33 = vmul.f32 0.03125, %v6502_v53 }
 0xa9e   : > { %v6506_v18 = vadd.f32 1e-05, %v6504_v33 }
 0xaa0   : > { %11451 = vrsqrt.f32 %v6506_v18 }
 0xaa9   : > { %v11450_v49 = vpop.eup %11449 }
 0xaaa   : > { %v6509_v11 = vmul.f32 %v11450_v49, %v6493_v12 }
 0xaac   : > { %v6517_v4 = vmul.f32 %v9682_v40, %v6509_v11 }
 0xaad   : > { %v11452_v26 = vpop.eup %11451 }
 0xaae   : > { %v6510_v7 = vmul.f32 %v11452_v26, %v6494_v15  ;;  %v6525_v38 = vadd.f32 %v9683_v3, %v6517_v4 }
 0xab0   : > { %v6518_v48 = vmul.f32 %v9682_v40, %v6510_v7 }
 0xab2   : > { %v6526_v58 = vadd.f32 %v9683_v3, %v6518_v48 }
 0xab4   : > { %v6527_v39 = vpack.c.bf16 %v6526_v58, %v6525_v38 }
 0xab6   : > { %10710 = vmatmul.mubr.msk.bf16.vlgmr.msra.gmra.mxu1 %vm2056_vm3, %v6527_v39 }
 0xab7   : > { %10726 = vmatpush3.bf16.msra.mxu1 %v11059_v32  ;;  %10733 = vmatprep.mubr.msk.bf16.mxu1 %vm11613_vm5, %v11612_v56 }
 0xab8   : > { %10727 = vmatprep.subr.bf16.mxu1 %v11612_v56 }
 0xabb   : > { %10728 = vmatpush3.bf16.msra.mxu1 %v11061_v17 }
 0xabc   : > { %10729 = vmatprep.subr.bf16.mxu1 %v11612_v56 }
 0xabf   : > { %10730 = vmatpush3.bf16.msra.mxu1 %v11063_v36 }
 0xac0   : > { %10731 = vmatprep.subr.bf16.mxu1 %v11612_v56 }
 0xac3   : > { %10732 = vmatpush3.bf16.msra.mxu1 %v11065_v10 }
 0xb76   : > { %v6588_v35 = vpop.f32.mrf.mxu1 }
 0xb77   : > { %v15398_v24 = vadd.f32 %v9684_v50, %v6588_v35  ;;  %v11073_v35 = vld [vmem:[%s16721_s14 + $0x34] ss:$8 sps:$4 sm:$0xff]  }
 0xb78   : > { %v10711_v54 = vpop.f32.mrf.mxu1  ;;  %6978 = vmatprep.subr.bf16.mxu1 %v11073_v35 }
 0xb79   : > { %6598 = vst.msk [vmem:[#allocation4 + $0x1] sm:$0xff] %vm6595_vm8, %v15398_v24  ;;  %v11074_v54 = vld [vmem:[%s16721_s14 + $0x20] ss:$8 sps:$4 sm:$0xff]  }
 0xb7a   : > { %v6591_v25 = vpop.f32.mrf.mxu1 }
 0xb7b   : > { %v15402_v23 = vadd.f32 %v9684_v50, %v6591_v25  ;;  %v11071_v50 = vld [vmem:[%s16721_s14 + $0x30] ss:$8 sps:$4 sm:$0xff]   ;;  %v11614_v25 = vmov 0  }
 0xb7c   : > { %v10712_v19 = vpop.f32.mrf.mxu1 }
 0xb7d   : > { %6600 = vst.msk [vmem:[#allocation4 + $0x9] sm:$0x1] %vm6599_vm9, %v15402_v23  ;;  %v11077_v19 = vld [vmem:[%s16721_s14 + $0x10] ss:$8 sps:$4 sm:$0xff]  }
 0xb80   : > { %v6625_v51 = vld [vmem:[#allocation4] sm:$0xff]  ;;  %v6626_v37 = vld [vmem:[#allocation4 + $0x8] sm:$0x1] }
 0xb81   : > { %v6627_v34 = vpack.c.bf16 %v6626_v37, %v6625_v51  ;;  %v6628_v45 = vld [vmem:[#allocation4 + $0x1] sm:$0xff] }
 0xb82   : > { %v11082_v51 = vld [vmem:[%s16721_s14 + $0x4] ss:$8 sps:$4 sm:$0xff]   ;;  %v11080_v37 = vld [vmem:[%s16721_s14] ss:$8 sps:$4 sm:$0xff]  }
 0xb83   : > { %10734 = vmatmul.mubr.msk.bf16.vlgmr.msra.gmra.mxu1 %vm6595_vm8, %v6627_v34 }
 0xb84   : > { %v6629_v28 = vld [vmem:[#allocation4 + $0x9] sm:$0x1]  ;;  %6979 = vmatpush1.bf16.msra.mxu1 %v11071_v50  ;;  %7002 = vmatprep.mubr.bf16.mxu1 %v11614_v25 }
 0xb85   : > { %v6630_v59 = vpack.c.bf16 %v6629_v28, %v6628_v45  ;;  %v6767_v52 = vld [vmem:[#allocation4 + $0x2] sm:$0xff] }
 0xb86   : > { %v6769_v42 = vpack.c.bf16 %v6768_v9, %v6767_v52  ;;  %v9704_v52 = vld [vmem:[%s16722_s9] ss:$0 sm:$0xff]  ;;  %s836_s9 = sand.u32 1, %s11601_s5  }
 0xb87   : > { %10722 = vmatmul.mubr.msk.bf16.vlgmr.msra.gmra.mxu0 %vm6595_vm8, %v6630_v59  ;;  %s9331_s11 = scalar_lea.sflag [#allocation6], %s836_s9 }
 0xb88   : > { %10738 = vmatpush3.bf16.msra.mxu0 %v11067_v41  ;;  %10745 = vmatprep.mubr.msk.bf16.mxu0 %vm11613_vm5, %v11612_v56 }
 0xb89   : > { %10739 = vmatprep.subr.bf16.mxu0 %v11612_v56 }
 0xb8c   : > { %10740 = vmatpush3.bf16.msra.mxu0 %v11068_v46 }
 0xb8d   : > { %10741 = vmatprep.subr.bf16.mxu0 %v11612_v56 }
 0xb90   : > { %10742 = vmatpush3.bf16.msra.mxu0 %v11069_v43 }
 0xb91   : > { %10743 = vmatprep.subr.bf16.mxu0 %v11612_v56 }
 0xb94   : > { %10744 = vmatpush3.bf16.msra.mxu0 %v11070_v1 }
 0xb95   : > { %10749 = vmatprep.subr.bf16.mxu0 %v11612_v56 }
 0xb97   : > { %10746 = vmatmul.mubr.msk.bf16.vlgmr.msra.gmra.mxu0 %vm6595_vm8, %v6769_v42 }
 0xb98   : > { %10751 = vmatprep.mubr.msk.bf16.mxu0 %vm11613_vm5, %v11612_v56 }
 0xc43   : > { %v6760_v8 = vpop.f32.mrf.mxu1 }
 0xc45   : > { %v10735_v63 = vpop.f32.mrf.mxu1 }
 0xc46   : > { %v9705_v63 = vld [vmem:[%s16723_s13] ss:$0 sm:$0xff]  ;;  %s15981_s13 = scalar_lea.hbm %s16044_s28, %s9845_s6 }
 0xc47   : > { %v6692_v29 = vpop.f32.mrf.mxu0  ;;  %v6763_v44 = vpop.f32.mrf.mxu1 }
 0xc48   : > { %v6761_v12 = vadd.f32 %v6760_v8, %v6692_v29 }
 0xc49   : > { %v10723_v5 = vpop.f32.mrf.mxu0  ;;  %v10736_v62 = vpop.f32.mrf.mxu1 }
 0xc4b   : > { %v6695_v2 = vpop.f32.mrf.mxu0 }
 0xc4c   : > { %v6764_v22 = vadd.f32 %v6763_v44, %v6695_v2  ;;  %v6917_v2 = vlaneseq }
 0xc4d   : > { %v10724_v14 = vpop.f32.mrf.mxu0 }
 0xc4e   : > { %v15479_v14 = vshrl.u32 %v6917_v2, 7 }
 0xc57   : > { %v6831_v21 = vpop.f32.mrf.mxu0 }
 0xc58   : > { %v6838_v60 = vadd.f32 %v6831_v21, %v6761_v12  ;;  %v6919_v12 = vsub.s32 0, %v15479_v14  ;;  %v6915_v21 = vld [vmem:[%s16031_s15] sm:$0x3] }
 0xc59   : > { %v10747_v15 = vpop.f32.mrf.mxu0 }
 0xc5a   : > { %v6847_v0 = vadd.f32 %v9703_v16, %v6838_v60  ;;  %v6923_v60 = vsub.s32 1, %v15479_v14 }
 0xc5b   : > { %v6834_v57 = vpop.f32.mrf.mxu0 }
 0xc5c   : > { %v6851_v61 = vmul.f32 0.70710677, %v6847_v0  ;;  %v6839_v55 = vadd.f32 %v6834_v57, %v6764_v22  ;;  %v6849_v33 = vmul.f32 0.5, %v6847_v0  ;;  %v6924_v57 = vrot.slane %v6915_v21, %v6923_v60 }
 0xc5d   : > { %v10748_v31 = vpop.f32.mrf.mxu0 }
 0xc5e   : > { %11453 = verf.f32 %v6851_v61  ;;  %v6848_v30 = vadd.f32 %v9703_v16, %v6839_v55  ;;  %v6920_v16 = vrot.slane %v6915_v21, %v6919_v12  ;;  %v16724_v55 = vmov 65535  }
 0xc5f   : > { %v7144_v31 = vsel %vm7142_vm10, 4294967295, %v16724_v55 }
 0xc60   : > { %v6852_v13 = vmul.f32 0.70710677, %v6848_v30  ;;  %v6850_v40 = vmul.f32 0.5, %v6848_v30 }
 0xc62   : > { %11455 = verf.f32 %v6852_v13 }
 0xc6b   : > { %v11454_v53 = vpop.eup %11453 }
 0xc6c   : > { %v6855_v18 = vadd.f32 1.0, %v11454_v53 }
 0xc6e   : > { %v6857_v49 = vmul.f32 %v6855_v18, %v6849_v33  ;;  %v15493_v18 = vsel %vm7143_vm11, %v7144_v31, 0 }
 0xc6f   : > { %v11456_v11 = vpop.eup %11455 }
 0xc70   : > { %v6859_v26 = vadd.f32 %v6857_v49, %v15398_v24  ;;  %v6856_v4 = vadd.f32 1.0, %v11456_v11  ;;  %v11076_v24 = vld [vmem:[%s16721_s14 + $0x24] ss:$8 sps:$4 sm:$0xff]  }
 0xc71   : > { %6980 = vmatprep.subr.bf16.mxu1 %v11076_v24 }
 0xc72   : > { %v6863_v7 = vsel %vm6595_vm8, %v6859_v26, 0.0  ;;  %v6858_v3 = vmul.f32 %v6856_v4, %v6850_v40  ;;  %6981 = vmatpush1.bf16.msra.mxu1 %v11074_v54 }
 0xc73   : > { %6864 = vadd.xlane.f32.xlu0 %v6863_v7 }
 0xc74   : > { %v6860_v48 = vadd.f32 %v6858_v3, %v15402_v23  ;;  %v11079_v23 = vld [vmem:[%s16721_s14 + $0x14] ss:$8 sps:$4 sm:$0xff]  }
 0xc75   : > { %6982 = vmatprep.subr.bf16.mxu1 %v11079_v23 }
 0xc76   : > { %v6866_v38 = vsel %vm6599_vm9, %v6860_v48, 0.0  ;;  %6983 = vmatpush1.bf16.msra.mxu1 %v11077_v19 }
 0xc77   : > { %6867 = vadd.xlane.f32.xlu1 %v6866_v38  ;;  %6984 = vmatprep.subr.bf16.mxu1 %v11082_v51 }
 0xc7a   : > { %6985 = vmatpush1.bf16.msra.mxu1 %v11080_v37 }
 0xc7b   : > { %10755 = vmatprep.subr.bf16.mxu1 %v11612_v56 }
 0xcfc   : > { %v6865_v58 = vpop.xlane.xlu0 %6864 }
 0xcfd   : > { %v6870_v32 = vmul.f32 0.015625, %v6865_v58 }
 0xcff   : > { %v6872_v39 = vsub.f32 %v6859_v26, %v6870_v32 }
 0xd00   : > { %v6868_v6 = vpop.xlane.xlu1 %6867 }
 0xd01   : > { %v6871_v17 = vmul.f32 0.015625, %v6868_v6  ;;  %v6874_v47 = vmul.f32 %v6872_v39, %v6872_v39 }
 0xd03   : > { %v6873_v36 = vsub.f32 %v6860_v48, %v6871_v17  ;;  %v6876_v27 = vsel %vm6595_vm8, %v6874_v47, 0.0 }
 0xd04   : > { %6877 = vadd.xlane.f32.xlu0 %v6876_v27 }
 0xd05   : > { %v6875_v10 = vmul.f32 %v6873_v36, %v6873_v36 }
 0xd07   : > { %v6879_v20 = vsel %vm6599_vm9, %v6875_v10, 0.0 }
 0xd08   : > { %6880 = vadd.xlane.f32.xlu1 %v6879_v20 }
 0xd8d   : > { %v6878_v34 = vpop.xlane.xlu0 %6877 }
 0xd8e   : > { %v6882_v45 = vmul.f32 0.015625, %v6878_v34 }
 0xd90   : > { %v6884_v28 = vadd.f32 1e-05, %v6882_v45 }
 0xd91   : > { %v6881_v41 = vpop.xlane.xlu1 %6880 }
 0xd92   : > { %11457 = vrsqrt.f32 %v6884_v28  ;;  %v6883_v59 = vmul.f32 0.015625, %v6881_v41 }
 0xd94   : > { %v6885_v46 = vadd.f32 1e-05, %v6883_v59 }
 0xd96   : > { %11459 = vrsqrt.f32 %v6885_v46 }
 0xd9f   : > { %v11458_v43 = vpop.eup %11457 }
 0xda0   : > { %v6888_v1 = vmul.f32 %v11458_v43, %v6872_v39 }
 0xda2   : > { %v6896_v42 = vmul.f32 %v9704_v52, %v6888_v1 }
 0xda3   : > { %v11460_v9 = vpop.eup %11459 }
 0xda4   : > { %v6889_v8 = vmul.f32 %v11460_v9, %v6873_v36  ;;  %v15470_v44 = vadd.f32 %v9705_v63, %v6896_v42 }
 0xda6   : > { %v6897_v29 = vmul.f32 %v9704_v52, %v6889_v8 }
 0xda8   : > { %v15472_v5 = vadd.f32 %v9705_v63, %v6897_v29 }
 0xdaa   : > { %v6906_v62 = vpack.c.bf16 %v15472_v5, %v15470_v44 }
 0xdac   : > { %9714 = vmatmul.mubr.msk.bf16.vlgmr.msra.gmra.mxu1 %vm6595_vm8, %v6906_v62 }
 0xdad   : > { %10757 = vmatprep.mubr.msk.bf16.mxu1 %vm11613_vm5, %v11612_v56 }
 0xe6c   : > { %v7004_v15 = vpop.f32.mrf.mxu1 }
 0xe6d   : > { %v7005_v22 = vadd.f32 %v7004_v15, %v6920_v16 }
 0xe6e   : > { %v7006_v0 = vpop.f32.mrf.mxu1 }
 0xe6f   : > { %7015 = vrot.lane.b32.xlu0 %v7005_v22, %s16179_s12  ;;  %v7007_v53 = vadd.f32 %v7006_v0, %v6924_v57 }
 0xe70   : > { %v7008_v61 = vpop.f32.mrf.mxu1 }
 0xe71   : > { %v7009_v30 = vadd.f32 %v7008_v61, %v6920_v16 }
 0xe72   : > { %v7010_v13 = vpop.f32.mrf.mxu1 }
 0xe73   : > { %v7011_v33 = vadd.f32 %v7010_v13, %v6924_v57  ;;  %7017 = vrot.lane.b32.xlu1 %v7009_v30, %s16179_s12  ;;  %v15495_v49 = vpack.c.bf16 %v7009_v30, %v7005_v22  ;;  %s16725_s12 = smov 64  }
 0xe75   : > { %v15497_v11 = vpack.c.bf16 %v7011_v33, %v7007_v53 }
 0xe77   : > { %7192 = vrot.lane.b32.xlu1 %v15495_v49, %s16177_s4  ;;  %v7147_v40 = vand.u32 %v15493_v18, %v15497_v11 }
 0xe79   : > { %10756 = vmatpush3.bf16.msra.mxu1 %v7147_v40 }
 0xe7a   : > { %10767 = vmatprep.subr.bf16.mxu1 %v11612_v56 }
 0xee1   : > { %v7016_v26 = vpop.permute.xlu0 %7015 }
 0xee2   : > { %7021 = vxpose.xlu1.b32.start [1/2] (short) (narrow) %v7016_v26, 64 }
 0xee5   : > { %v7018_v4 = vpop.permute.xlu1 %7017 }
 0xee6   : > { %7022 = vxpose.xlu1.b32.end [2/2] (short) (narrow) %v7018_v4, 64 }
 0xee9   : > { %v7193_v7 = vpop.permute.xlu1 %7192 }
 0xf5e   : > { %v7037_v3 = vpop.trf.xlu1 }
 0xf62   : > { %v7038_v48 = vpop.trf.xlu1 }
 0xf63   : > { %v7053_v38 = vpack.c.bf16 %v7038_v48, %v7037_v3 }
 0xf65   : > { %10750 = vmatpush3.bf16.msra.mxu0 %v7053_v38 }
 0xf66   : > { %v7039_v58 = vpop.trf.xlu1  ;;  %10761 = vmatprep.subr.bf16.mxu0 %v11612_v56 }
 0xf68   : > { %10752 = vmatmul.mubr.msk.bf16.vlgmr.msra.gmra.mxu0 %vm7067_vm12, %v15495_v49 }
 0xf69   : > { %10763 = vmatprep.mubr.msk.bf16.mxu0 %vm11613_vm5, %v11612_v56 }
 0xf6a   : > { %v7040_v32 = vpop.trf.xlu1 }
 0xf6b   : > { %v7054_v39 = vpack.c.bf16 %v7040_v32, %v7039_v58 }
 0xf6d   : > { %10762 = vmatpush3.bf16.msra.mxu0 %v7054_v39 }
 0xf6e   : > { %10773 = vmatprep.subr.bf16.mxu0 %v11612_v56  ;;  %v15517_v45 = vpop.trf.xlu1 }
 0xf70   : > { %10764 = vmatmul.mubr.msk.bf16.vlgmr.msra.gmra.mxu0 %vm7067_vm12, %v7193_v7 }
 0xf71   : > { %10775 = vmatprep.mubr.msk.bf16.mxu0 %vm11613_vm5, %v11612_v56 }
 0xf72   : > { %v15519_v28 = vpop.trf.xlu1 }
 0xf73   : > { %v7055_v41 = vpack.c.bf16 %v15519_v28, %v15517_v45 }
 0xf76   : > { %v15531_v31 = vpop.trf.xlu1 }
 0xf7a   : > { %v15533_v30 = vpop.trf.xlu1 }
0x1028   : > { %v7105_v6 = vpop.f32.mrf.mxu0 }
0x1029   : > { %v7112_v17 = vmul.f32 0.25, %v7105_v6 }
0x102a   : > { %v10753_v47 = vpop.f32.mrf.mxu0 }
0x102b   : > { %v7115_v36 = vsel %vm7114_vm13, %v7112_v17, -inf }
0x102c   : > { %7116 = vmax.xlane.f32.xlu0 %v7115_v36  ;;  %v7108_v27 = vpop.f32.mrf.mxu0  ;;  %v11083_v36 = vld [vmem:[%s16032_s16] sm:$0xff]  }
0x102d   : > { %v7113_v10 = vmul.f32 0.25, %v7108_v27  ;;  %v11084_v27 = vld [vmem:[%s16032_s16 + $0x8] sm:$0xff]  }
0x102e   : > { %v10754_v20 = vpop.f32.mrf.mxu0  ;;  %10774 = vmatpush3.bf16.msra.mxu0 %v11084_v27 }
0x102f   : > { %v7119_v50 = vsel %vm7118_vm14, %v7113_v10, -inf  ;;  %10785 = vmatprep.subr.bf16.mxu0 %v11612_v56 }
0x1030   : > { %7120 = vmax.xlane.f32.xlu0 %v7119_v50  ;;  %v7231_v35 = vpop.f32.mrf.mxu0 }
0x1031   : > { %v7238_v24 = vmul.f32 0.25, %v7231_v35 }
0x1032   : > { %v10765_v54 = vpop.f32.mrf.mxu0 }
0x1033   : > { %v7240_v23 = vsel %vm7114_vm13, %v7238_v24, -inf }
0x1034   : > { %7241 = vmax.xlane.f32.xlu0 %v7240_v23  ;;  %v7234_v19 = vpop.f32.mrf.mxu0 }
0x1035   : > { %v7239_v51 = vmul.f32 0.25, %v7234_v19 }
0x1036   : > { %v10766_v37 = vpop.f32.mrf.mxu0 }
0x1037   : > { %v7243_v34 = vsel %vm7118_vm14, %v7239_v51, -inf }
0x1038   : > { %7244 = vmax.xlane.f32.xlu0 %v7243_v34 }
0x10b5   : > { %v7117_v59 = vpop.xlane.xlu0 %7116 }
0x10b6   : > { %v7122_v46 = vsub.f32 %v7112_v17, %v7117_v59 }
0x10b8   : > { %v7124_v43 = vmul.f32 1.442695, %v7122_v46 }
0x10b9   : > { %v7121_v1 = vpop.xlane.xlu0 %7120 }
0x10ba   : > { %11461 = vpow2.f32 %v7124_v43  ;;  %v7123_v52 = vsub.f32 %v7113_v10, %v7121_v1 }
0x10bc   : > { %v7126_v9 = vmul.f32 1.442695, %v7123_v52 }
0x10bd   : > { %v7242_v42 = vpop.xlane.xlu0 %7241 }
0x10be   : > { %11463 = vpow2.f32 %v7126_v9  ;;  %v7246_v8 = vsub.f32 %v7238_v24, %v7242_v42 }
0x10c0   : > { %v7248_v63 = vmul.f32 1.442695, %v7246_v8 }
0x10c1   : > { %v7245_v29 = vpop.xlane.xlu0 %7244 }
0x10c2   : > { %11465 = vpow2.f32 %v7248_v63  ;;  %v7247_v62 = vsub.f32 %v7239_v51, %v7245_v29 }
0x10c4   : > { %v7250_v2 = vmul.f32 1.442695, %v7247_v62 }
0x10c6   : > { %11467 = vpow2.f32 %v7250_v2 }
0x10c7   : > { %v11462_v21 = vpop.eup %11461 }
0x10c8   : > { %v7128_v16 = vsel %vm7114_vm13, %v11462_v21, 0.0 }
0x10c9   : > { %7129 = vadd.xlane.f32.xlu0 %v7128_v16 }
0x10cb   : > { %v11464_v15 = vpop.eup %11463 }
0x10cc   : > { %v7131_v22 = vsel %vm7118_vm14, %v11464_v15, 0.0 }
0x10cd   : > { %7132 = vadd.xlane.f32.xlu1 %v7131_v22 }
0x10cf   : > { %v11466_v0 = vpop.eup %11465 }
0x10d0   : > { %v7252_v57 = vsel %vm7114_vm13, %v11466_v0, 0.0 }
0x10d1   : > { %7253 = vadd.xlane.f32.xlu0 %v7252_v57 }
0x10d3   : > { %v11468_v61 = vpop.eup %11467 }
0x10d4   : > { %v7255_v55 = vsel %vm7118_vm14, %v11468_v61, 0.0 }
0x10d5   : > { %7256 = vadd.xlane.f32.xlu0 %v7255_v55 }
0x10eb   : > { %7264 = vrot.lane.b32.xlu0 %v15497_v11, %s16177_s4  ;;  %s16726_s4 = smov 112  }
0x10ef   : > { %7414 = vrot.lane.b32.xlu0 %v15495_v49, %s16175_s0 }
0x1152   : > { %v7130_v13 = vpop.xlane.xlu0 %7129 }
0x1153   : > { %11469 = vrcp.f32 %v7130_v13 }
0x1156   : > { %v7133_v53 = vpop.xlane.xlu1 %7132 }
0x1157   : > { %11471 = vrcp.f32 %v7133_v53 }
0x115a   : > { %v7254_v33 = vpop.xlane.xlu0 %7253 }
0x115b   : > { %11473 = vrcp.f32 %v7254_v33 }
0x115e   : > { %v7257_v40 = vpop.xlane.xlu0 %7256 }
0x115f   : > { %11475 = vrcp.f32 %v7257_v40 }
0x1160   : > { %v11470_v26 = vpop.eup %11469 }
0x1161   : > { %v7136_v7 = vmul.f32 %v11470_v26, %v11462_v21 }
0x1162   : > { %v7265_v48 = vpop.permute.xlu0 %7264 }
0x1163   : > { %v7270_v58 = vand.u32 %v7265_v48, %v15493_v18 }
0x1164   : > { %v11472_v4 = vpop.eup %11471 }
0x1165   : > { %v7137_v3 = vmul.f32 %v11472_v4, %v11464_v15 }
0x1166   : > { %v7415_v34 = vpop.permute.xlu0 %7414 }
0x1167   : > { %v7138_v38 = vpack.c.bf16 %v7137_v3, %v7136_v7 }
0x1168   : > { %v11474_v32 = vpop.eup %11473 }
0x1169   : > { %10758 = vmatmul.mubr.msk.bf16.vlgmr.msra.gmra.mxu1 %vm7114_vm13, %v7138_v38  ;;  %v7260_v6 = vmul.f32 %v11474_v32, %v11466_v0 }
0x116a   : > { %10768 = vmatpush3.bf16.msra.mxu1 %v7270_v58  ;;  %10769 = vmatprep.mubr.msk.bf16.mxu1 %vm11613_vm5, %v11612_v56 }
0x116b   : > { %10779 = vmatprep.subr.bf16.mxu1 %v11612_v56 }
0x116c   : > { %v11476_v39 = vpop.eup %11475 }
0x116d   : > { %v7261_v17 = vmul.f32 %v11476_v39, %v11468_v61 }
0x116f   : > { %v7262_v47 = vpack.c.bf16 %v7261_v17, %v7260_v6  ;;  %v7056_v17 = vpack.c.bf16 %v15533_v30, %v15531_v31 }
0x1171   : > { %10770 = vmatmul.mubr.msk.bf16.vlgmr.msra.gmra.mxu1 %vm7114_vm13, %v7262_v47  ;;  %v11085_v47 = vld [vmem:[%s16032_s16 + $0x10] sm:$0xff]  }
0x1172   : > { %10781 = vmatprep.mubr.msk.bf16.mxu1 %vm11613_vm5, %v11612_v56  ;;  %10780 = vmatpush3.bf16.msra.mxu1 %v11083_v36 }
0x1173   : > { %10791 = vmatprep.subr.bf16.mxu1 %v11612_v56 }
0x1229   : > { %v7183_v10 = vpop.f32.mrf.mxu1 }
0x122b   : > { %v10759_v20 = vpop.f32.mrf.mxu1 }
0x122d   : > { %v7186_v50 = vpop.f32.mrf.mxu1 }
0x122e   : > { %v7190_v35 = vpack.c.bf16 %v7186_v50, %v7183_v10 }
0x122f   : > { %v10760_v24 = vpop.f32.mrf.mxu1 }
0x1230   : > { %10782 = vmatmul.mubr.msk.bf16.vlgmr.msra.gmra.mxu1 %vm7067_vm12, %v7190_v35 }
0x1231   : > { %v7306_v54 = vpop.f32.mrf.mxu1  ;;  %10793 = vmatprep.mubr.msk.bf16.mxu1 %vm11613_vm5, %v11612_v56 }
0x1233   : > { %v10771_v23 = vpop.f32.mrf.mxu1 }
0x1235   : > { %v7309_v19 = vpop.f32.mrf.mxu1 }
0x1236   : > { %v7313_v51 = vpack.c.bf16 %v7309_v19, %v7306_v54 }
0x1237   : > { %v10772_v37 = vpop.f32.mrf.mxu1 }
0x1238   : > { %10776 = vmatmul.mubr.msk.bf16.vlgmr.msra.gmra.mxu0 %vm7067_vm12, %v7313_v51 }
0x1239   : > { %10786 = vmatpush3.bf16.msra.mxu0 %v7055_v41  ;;  %10787 = vmatprep.mubr.msk.bf16.mxu0 %vm11613_vm5, %v11612_v56 }
0x123a   : > { %10797 = vmatprep.subr.bf16.mxu0 %v11612_v56 }
0x1240   : > { %10788 = vmatmul.mubr.msk.bf16.vlgmr.msra.gmra.mxu0 %vm7067_vm12, %v7415_v34 }
0x1241   : > { %10799 = vmatprep.mubr.msk.bf16.mxu0 %vm11613_vm5, %v11612_v56  ;;  %10798 = vmatpush3.bf16.msra.mxu0 %v11085_v47 }
0x1242   : > { %10809 = vmatprep.subr.bf16.mxu0 %v11612_v56 }
0x12f0   : > { %v7407_v59 = vpop.f32.mrf.mxu1 }
0x12f2   : > { %v10783_v46 = vpop.f32.mrf.mxu1 }
0x12f4   : > { %v7410_v43 = vpop.f32.mrf.mxu1 }
0x12f6   : > { %v10784_v1 = vpop.f32.mrf.mxu1 }
0x12f8   : > { %v7357_v52 = vpop.f32.mrf.mxu0 }
0x12f9   : > { %v15564_v9 = vadd.f32 %v7407_v59, %v7357_v52 }
0x12fa   : > { %v10777_v45 = vpop.f32.mrf.mxu0 }
0x12fc   : > { %v7360_v28 = vpop.f32.mrf.mxu0 }
0x12fd   : > { %v15566_v41 = vadd.f32 %v7410_v43, %v7360_v28 }
0x12fe   : > { %v10778_v42 = vpop.f32.mrf.mxu0 }
0x1300   : > { %v7453_v8 = vpop.f32.mrf.mxu0 }
0x1301   : > { %v7460_v63 = vmul.f32 0.25, %v7453_v8 }
0x1302   : > { %v10789_v29 = vpop.f32.mrf.mxu0 }
0x1303   : > { %v7462_v62 = vsel %vm7114_vm13, %v7460_v63, -inf }
0x1304   : > { %7463 = vmax.xlane.f32.xlu0 %v7462_v62  ;;  %v7456_v2 = vpop.f32.mrf.mxu0 }
0x1305   : > { %v7461_v21 = vmul.f32 0.25, %v7456_v2 }
0x1306   : > { %v10790_v16 = vpop.f32.mrf.mxu0 }
0x1307   : > { %v7465_v15 = vsel %vm7118_vm14, %v7461_v21, -inf }
0x1308   : > { %7466 = vmax.xlane.f32.xlu1 %v7465_v15 }
0x138d   : > { %v7464_v22 = vpop.xlane.xlu0 %7463 }
0x138e   : > { %v7468_v0 = vsub.f32 %v7460_v63, %v7464_v22 }
0x1390   : > { %v7470_v57 = vmul.f32 1.442695, %v7468_v0 }
0x1391   : > { %v7467_v61 = vpop.xlane.xlu1 %7466 }
0x1392   : > { %11477 = vpow2.f32 %v7470_v57  ;;  %v7469_v55 = vsub.f32 %v7461_v21, %v7467_v61 }
0x1394   : > { %v7472_v13 = vmul.f32 1.442695, %v7469_v55 }
0x1396   : > { %11479 = vpow2.f32 %v7472_v13 }
0x139f   : > { %v11478_v53 = vpop.eup %11477 }
0x13a0   : > { %v7474_v33 = vsel %vm7114_vm13, %v11478_v53, 0.0 }
0x13a1   : > { %7475 = vadd.xlane.f32.xlu1 %v7474_v33 }
0x13a3   : > { %v11480_v40 = vpop.eup %11479 }
0x13a4   : > { %v7477_v26 = vsel %vm7118_vm14, %v11480_v40, 0.0 }
0x13a5   : > { %7478 = vadd.xlane.f32.xlu0 %v7477_v26 }
0x13b2   : > { %7485 = vrot.lane.b32.xlu1 %v15497_v11, %s16175_s0  ;;  %s16727_s0 = smov 96  }
0x13bb   : > { %7587 = vrot.lane.b32.xlu0 %v15495_v49, %s16173_s29 }
0x142a   : > { %v7476_v4 = vpop.xlane.xlu1 %7475 }
0x142b   : > { %11481 = vrcp.f32 %v7476_v4 }
0x142e   : > { %v7479_v7 = vpop.xlane.xlu0 %7478  ;;  %v7486_v3 = vpop.permute.xlu1 %7485 }
0x142f   : > { %11483 = vrcp.f32 %v7479_v7  ;;  %v7491_v48 = vand.u32 %v7486_v3, %v15493_v18 }
0x1431   : > { %10792 = vmatpush3.bf16.msra.mxu1 %v7491_v48  ;;  %v9731_v48 = vld [vmem:[%s16033_s17] ss:$0 sm:$0xff] }
0x1432   : > { %10803 = vmatprep.subr.bf16.mxu1 %v11612_v56  ;;  %v7588_v49 = vpop.permute.xlu0 %7587 }
0x1438   : > { %v11482_v38 = vpop.eup %11481 }
0x1439   : > { %v7482_v32 = vmul.f32 %v11482_v38, %v11478_v53 }
0x143c   : > { %v11484_v58 = vpop.eup %11483 }
0x143d   : > { %v7483_v39 = vmul.f32 %v11484_v58, %v11480_v40 }
0x143f   : > { %v7484_v6 = vpack.c.bf16 %v7483_v39, %v7482_v32 }
0x1441   : > { %10794 = vmatmul.mubr.msk.bf16.vlgmr.msra.gmra.mxu1 %vm7114_vm13, %v7484_v6 }
0x1442   : > { %10804 = vmatpush3.bf16.msra.mxu1 %v7056_v17  ;;  %10805 = vmatprep.mubr.msk.bf16.mxu1 %vm11613_vm5, %v11612_v56 }
0x1443   : > { %10815 = vmatprep.subr.bf16.mxu1 %v11612_v56 }
0x1449   : > { %10806 = vmatmul.mubr.msk.bf16.vlgmr.msra.gmra.mxu1 %vm7067_vm12, %v7588_v49 }
0x144a   : > { %10817 = vmatprep.mubr.msk.bf16.mxu1 %vm11613_vm5, %v11612_v56 }
0x1501   : > { %v7527_v31 = vpop.f32.mrf.mxu1 }
0x1503   : > { %v10795_v30 = vpop.f32.mrf.mxu1 }
0x1505   : > { %v7530_v36 = vpop.f32.mrf.mxu1 }
0x1506   : > { %v7534_v27 = vpack.c.bf16 %v7530_v36, %v7527_v31 }
0x1507   : > { %v10796_v10 = vpop.f32.mrf.mxu1 }
0x1508   : > { %10800 = vmatmul.mubr.msk.bf16.vlgmr.msra.gmra.mxu0 %vm7067_vm12, %v7534_v27 }
0x1509   : > { %v7626_v20 = vpop.f32.mrf.mxu1  ;;  %10811 = vmatprep.mubr.msk.bf16.mxu0 %vm11613_vm5, %v11612_v56 }
0x150a   : > { %v7633_v50 = vmul.f32 0.25, %v7626_v20 }
0x150b   : > { %v10807_v35 = vpop.f32.mrf.mxu1 }
0x150c   : > { %v7635_v24 = vsel %vm7114_vm13, %v7633_v50, -inf }
0x150d   : > { %7636 = vmax.xlane.f32.xlu1 %v7635_v24  ;;  %v7629_v54 = vpop.f32.mrf.mxu1 }
0x150e   : > { %v7634_v23 = vmul.f32 0.25, %v7629_v54  ;;  %v11087_v54 = vld [vmem:[%s16036_s20 + $0x18] sm:$0xff]  }
0x150f   : > { %v10808_v19 = vpop.f32.mrf.mxu1 }
0x1510   : > { %v7638_v51 = vsel %vm7118_vm14, %v7634_v23, -inf  ;;  %v11089_v19 = vld [vmem:[%s16036_s20 + $0x8] sm:$0xff]  }
0x1511   : > { %7639 = vmax.xlane.f32.xlu0 %v7638_v51  ;;  %v11091_v51 = vld [vmem:[%s16038_s22 + $0x38] sm:$0xff]  }
0x1596   : > { %v7637_v37 = vpop.xlane.xlu1 %7636 }
0x1597   : > { %v7641_v34 = vsub.f32 %v7633_v50, %v7637_v37  ;;  %v11090_v37 = vld [vmem:[%s16036_s20] sm:$0xff]  }
0x1599   : > { %v7643_v59 = vmul.f32 1.442695, %v7641_v34 }
0x159a   : > { %v7640_v46 = vpop.xlane.xlu0 %7639 }
0x159b   : > { %11485 = vpow2.f32 %v7643_v59  ;;  %v7642_v43 = vsub.f32 %v7634_v23, %v7640_v46  ;;  %v11088_v23 = vld [vmem:[%s16036_s20 + $0x10] sm:$0xff]  }
0x159d   : > { %v7645_v1 = vmul.f32 1.442695, %v7642_v43 }
0x159f   : > { %11487 = vpow2.f32 %v7645_v1 }
0x15a8   : > { %v11486_v52 = vpop.eup %11485 }
0x15a9   : > { %v7647_v45 = vsel %vm7114_vm13, %v11486_v52, 0.0 }
0x15aa   : > { %7648 = vadd.xlane.f32.xlu1 %v7647_v45 }
0x15ac   : > { %v11488_v28 = vpop.eup %11487 }
0x15ad   : > { %v7650_v42 = vsel %vm7118_vm14, %v11488_v28, 0.0 }
0x15ae   : > { %7651 = vadd.xlane.f32.xlu0 %v7650_v42  ;;  %v9732_v42 = vld [vmem:[%s16034_s18] ss:$0 sm:$0xff] }
0x15bb   : > { %7658 = vrot.lane.b32.xlu1 %v15497_v11, %s16173_s29 }
0x15c8   : > { %v7578_v8 = vpop.f32.mrf.mxu0 }
0x15c9   : > { %v7585_v63 = vadd.f32 %v7578_v8, %v15564_v9 }
0x15ca   : > { %v10801_v29 = vpop.f32.mrf.mxu0 }
0x15cc   : > { %v7581_v62 = vpop.f32.mrf.mxu0 }
0x15cd   : > { %v7586_v2 = vadd.f32 %v7581_v62, %v15566_v41  ;;  %v11086_v41 = vld [vmem:[%s16032_s16 + $0x18] sm:$0xff]   ;;  %v9733_v62 = vld [vmem:[%s16035_s19] ss:$0 sm:$0xff] }
0x15ce   : > { %v10802_v21 = vpop.f32.mrf.mxu0  ;;  %10816 = vmatpush3.bf16.msra.mxu1 %v11086_v41 }
0x15cf   : > { %10833 = vmatprep.subr.bf16.mxu1 %v11612_v56 }
0x1633   : > { %v7649_v16 = vpop.xlane.xlu1 %7648 }
0x1634   : > { %11489 = vrcp.f32 %v7649_v16 }
0x1637   : > { %v7659_v15 = vpop.permute.xlu1 %7658  ;;  %v7652_v22 = vpop.xlane.xlu0 %7651 }
0x1638   : > { %v7664_v0 = vand.u32 %v7659_v15, %v15493_v18  ;;  %11491 = vrcp.f32 %v7652_v22  ;;  %v11092_v22 = vld [vmem:[%s16038_s22 + $0x30] sm:$0xff]  }
0x163a   : > { %10810 = vmatpush3.bf16.msra.mxu0 %v7664_v0  ;;  %v11093_v0 = vld [vmem:[%s16038_s22 + $0x28] sm:$0xff]  }
0x163b   : > { %10821 = vmatprep.subr.bf16.mxu0 %v11612_v56 }
0x1641   : > { %v11490_v57 = vpop.eup %11489 }
0x1642   : > { %v7655_v61 = vmul.f32 %v11490_v57, %v11486_v52  ;;  %v11094_v57 = vld [vmem:[%s16038_s22 + $0x20] sm:$0xff]  }
0x1645   : > { %v11492_v11 = vpop.eup %11491 }
0x1646   : > { %v7656_v55 = vmul.f32 %v11492_v11, %v11488_v28  ;;  %v11096_v11 = vld [vmem:[%s16038_s22 + $0x10] sm:$0xff]  }
0x1648   : > { %v7657_v9 = vpack.c.bf16 %v7656_v55, %v7655_v61  ;;  %v11097_v61 = vld [vmem:[%s16038_s22 + $0x8] sm:$0xff]   ;;  %v11098_v55 = vld [vmem:[%s16038_s22] sm:$0xff]  }
0x164a   : > { %10812 = vmatmul.mubr.msk.bf16.vlgmr.msra.gmra.mxu0 %vm7114_vm13, %v7657_v9  ;;  %v9734_v9 = vld [vmem:[%s16037_s21] ss:$0 sm:$0xff] }
0x164b   : > { %10829 = vmatprep.mubr.msk.bf16.mxu0 %vm11613_vm5, %v11612_v56  ;;  %10822 = vmatpush3.bf16.msra.mxu0 %v11087_v54 }
0x164c   : > { %10823 = vmatprep.subr.bf16.mxu0 %v11612_v56 }
0x164f   : > { %10824 = vmatpush3.bf16.msra.mxu0 %v11088_v23 }
0x1650   : > { %10825 = vmatprep.subr.bf16.mxu0 %v11612_v56 }
0x1653   : > { %10826 = vmatpush3.bf16.msra.mxu0 %v11089_v19 }
0x1654   : > { %10827 = vmatprep.subr.bf16.mxu0 %v11612_v56 }
0x1657   : > { %10828 = vmatpush3.bf16.msra.mxu0 %v11090_v37 }
0x170a   : > { %v7700_v13 = vpop.f32.mrf.mxu0 }
0x170c   : > { %v10813_v53 = vpop.f32.mrf.mxu0 }
0x170e   : > { %v7703_v33 = vpop.f32.mrf.mxu0 }
0x170f   : > { %v7707_v40 = vpack.c.bf16 %v7703_v33, %v7700_v13 }
0x1710   : > { %v10814_v26 = vpop.f32.mrf.mxu0 }
0x1711   : > { %10818 = vmatmul.mubr.msk.bf16.vlgmr.msra.gmra.mxu1 %vm7067_vm12, %v7707_v40 }
0x1712   : > { %10849 = vmatprep.mubr.msk.bf16.mxu1 %vm11613_vm5, %v11612_v56  ;;  %10834 = vmatpush3.bf16.msra.mxu1 %v11091_v51 }
0x1713   : > { %10835 = vmatprep.subr.bf16.mxu1 %v11612_v56 }
0x1716   : > { %10836 = vmatpush3.bf16.msra.mxu1 %v11092_v22 }
0x1717   : > { %10837 = vmatprep.subr.bf16.mxu1 %v11612_v56 }
0x171a   : > { %10838 = vmatpush3.bf16.msra.mxu1 %v11093_v0 }
0x171b   : > { %10839 = vmatprep.subr.bf16.mxu1 %v11612_v56 }
0x171e   : > { %10840 = vmatpush3.bf16.msra.mxu1 %v11094_v57 }
0x171f   : > { %10841 = vmatprep.subr.bf16.mxu1 %v11612_v56 }
0x17d1   : > { %v7751_v4 = vpop.f32.mrf.mxu1 }
0x17d2   : > { %v7758_v7 = vadd.f32 %v7751_v4, %v7585_v63 }
0x17d3   : > { %v10819_v3 = vpop.f32.mrf.mxu1 }
0x17d4   : > { %v7760_v38 = vadd.f32 %v7758_v7, %v15470_v44 }
0x17d5   : > { %v7754_v58 = vpop.f32.mrf.mxu1 }
0x17d6   : > { %v7759_v32 = vadd.f32 %v7754_v58, %v7586_v2  ;;  %v7769_v39 = vadd.f32 %v9731_v48, %v7760_v38 }
0x17d7   : > { %v10820_v6 = vpop.f32.mrf.mxu1 }
0x17d8   : > { %v7761_v17 = vadd.f32 %v7759_v32, %v15472_v5  ;;  %v7773_v49 = vsel %vm6595_vm8, %v7769_v39, 0.0 }
0x17d9   : > { %7774 = vadd.xlane.f32.xlu0 %v7773_v49 }
0x17da   : > { %v7770_v47 = vadd.f32 %v9731_v48, %v7761_v17 }
0x17dc   : > { %v7776_v31 = vsel %vm6599_vm9, %v7770_v47, 0.0 }
0x17dd   : > { %7777 = vadd.xlane.f32.xlu0 %v7776_v31 }
0x1862   : > { %v7775_v30 = vpop.xlane.xlu0 %7774 }
0x1863   : > { %v7779_v36 = vmul.f32 0.015625, %v7775_v30 }
0x1865   : > { %v7781_v27 = vsub.f32 %v7769_v39, %v7779_v36 }
0x1866   : > { %v7778_v10 = vpop.xlane.xlu0 %7777 }
0x1867   : > { %v7780_v20 = vmul.f32 0.015625, %v7778_v10  ;;  %v7783_v50 = vmul.f32 %v7781_v27, %v7781_v27 }
0x1869   : > { %v7782_v44 = vsub.f32 %v7770_v47, %v7780_v20  ;;  %v7785_v35 = vsel %vm6595_vm8, %v7783_v50, 0.0  ;;  %v9740_v47 = vld [vmem:[%s16039_s23] ss:$0 sm:$0xff] }
0x186a   : > { %7786 = vadd.xlane.f32.xlu0 %v7785_v35 }
0x186b   : > { %v7784_v24 = vmul.f32 %v7782_v44, %v7782_v44 }
0x186d   : > { %v7788_v5 = vsel %vm6599_vm9, %v7784_v24, 0.0 }
0x186e   : > { %7789 = vadd.xlane.f32.xlu0 %v7788_v5 }
0x18f3   : > { %v7787_v34 = vpop.xlane.xlu0 %7786 }
0x18f4   : > { %v7791_v59 = vmul.f32 0.015625, %v7787_v34 }
0x18f6   : > { %v7793_v46 = vadd.f32 1e-05, %v7791_v59 }
0x18f7   : > { %v7790_v43 = vpop.xlane.xlu0 %7789 }
0x18f8   : > { %11493 = vrsqrt.f32 %v7793_v46  ;;  %v7792_v1 = vmul.f32 0.015625, %v7790_v43 }
0x18fa   : > { %v7794_v52 = vadd.f32 1e-05, %v7792_v1  ;;  %v11099_v1 = vld [vmem:[%s16721_s14 + $0x70] ss:$8 sps:$4 sm:$0xff]  }
0x18fc   : > { %11495 = vrsqrt.f32 %v7794_v52  ;;  %v11101_v52 = vld [vmem:[%s16721_s14 + $0x74] ss:$8 sps:$4 sm:$0xff]  }
0x18fd   : > { %8142 = vmatprep.subr.bf16.mxu0 %v11101_v52 }
0x1905   : > { %v11494_v45 = vpop.eup %11493 }
0x1906   : > { %v7797_v28 = vmul.f32 %v11494_v45, %v7781_v27  ;;  %v11104_v45 = vld [vmem:[%s16721_s14 + $0x64] ss:$8 sps:$4 sm:$0xff]  }
0x1908   : > { %v7805_v63 = vmul.f32 %v9732_v42, %v7797_v28  ;;  %v11102_v28 = vld [vmem:[%s16721_s14 + $0x60] ss:$8 sps:$4 sm:$0xff]  }
0x1909   : > { %v11496_v8 = vpop.eup %11495 }
0x190a   : > { %v7798_v29 = vmul.f32 %v11496_v8, %v7782_v44  ;;  %v7813_v21 = vadd.f32 %v9733_v62, %v7805_v63  ;;  %v11105_v8 = vld [vmem:[%s16721_s14 + $0x50] ss:$8 sps:$4 sm:$0xff]   ;;  %v11110_v63 = vld [vmem:[%s16721_s14 + $0x44] ss:$8 sps:$4 sm:$0xff]  }
0x190c   : > { %v7806_v2 = vmul.f32 %v9732_v42, %v7798_v29  ;;  %v11107_v42 = vld [vmem:[%s16721_s14 + $0x54] ss:$8 sps:$4 sm:$0xff]   ;;  %v11108_v29 = vld [vmem:[%s16721_s14 + $0x40] ss:$8 sps:$4 sm:$0xff]  }
0x190e   : > { %v7814_v16 = vadd.f32 %v9733_v62, %v7806_v2 }
0x1910   : > { %v7815_v15 = vpack.c.bf16 %v7814_v16, %v7813_v21 }
0x1912   : > { %10830 = vmatmul.mubr.msk.bf16.vlgmr.msra.gmra.mxu0 %vm6595_vm8, %v7815_v15 }
0x1913   : > { %8166 = vmatprep.mubr.bf16.mxu0 %v11614_v25  ;;  %v11095_v25 = vld [vmem:[%s16038_s22 + $0x18] sm:$0xff]   ;;  %8143 = vmatpush1.bf16.msra.mxu0 %v11099_v1 }
0x1914   : > { %10842 = vmatpush3.bf16.msra.mxu1 %v11095_v25  ;;  %8144 = vmatprep.subr.bf16.mxu0 %v11104_v45  ;;  %v9749_v25 = vld [vmem:[%s16040_s24] ss:$0 sm:$0xff] }
0x1915   : > { %10843 = vmatprep.subr.bf16.mxu1 %v11612_v56 }
0x1917   : > { %8145 = vmatpush1.bf16.msra.mxu0 %v11102_v28 }
0x1918   : > { %10844 = vmatpush3.bf16.msra.mxu1 %v11096_v11  ;;  %8146 = vmatprep.subr.bf16.mxu0 %v11107_v42 }
0x1919   : > { %10845 = vmatprep.subr.bf16.mxu1 %v11612_v56 }
0x191b   : > { %8147 = vmatpush1.bf16.msra.mxu0 %v11105_v8 }
0x191c   : > { %10846 = vmatpush3.bf16.msra.mxu1 %v11097_v61  ;;  %8148 = vmatprep.subr.bf16.mxu0 %v11110_v63 }
0x191d   : > { %10847 = vmatprep.subr.bf16.mxu1 %v11612_v56 }
0x191f   : > { %8149 = vmatpush1.bf16.msra.mxu0 %v11108_v29 }
0x1920   : > { %10848 = vmatpush3.bf16.msra.mxu1 %v11098_v55  ;;  %10853 = vmatprep.subr.bf16.mxu0 %v11612_v56 }
0x1921   : > { %10859 = vmatprep.subr.bf16.mxu1 %v11612_v56 }
0x19d2   : > { %v7892_v41 = vpop.f32.mrf.mxu0 }
0x19d3   : > { %v7893_v13 = vadd.f32 %v9734_v9, %v7892_v41 }
0x19d4   : > { %v10831_v53 = vpop.f32.mrf.mxu0 }
0x19d5   : > { %v7901_v33 = vmul.f32 0.70710677, %v7893_v13  ;;  %v7899_v58 = vmul.f32 0.5, %v7893_v13 }
0x19d6   : > { %v7895_v40 = vpop.f32.mrf.mxu0 }
0x19d7   : > { %11497 = verf.f32 %v7901_v33  ;;  %v7896_v26 = vadd.f32 %v9734_v9, %v7895_v40  ;;  %v9750_v9 = vld [vmem:[%s16041_s25] ss:$0 sm:$0xff]  ;;  %v9759_v40 = vld [vmem:[%s16031_s15 + $0x2] sm:$0x3] }
0x19d8   : > { %v10832_v4 = vpop.f32.mrf.mxu0 }
0x19d9   : > { %v7902_v7 = vmul.f32 0.70710677, %v7896_v26  ;;  %v7900_v32 = vmul.f32 0.5, %v7896_v26  ;;  %v8084_v26 = vrot.slane %v9759_v40, %v6919_v12 }
0x19db   : > { %11499 = verf.f32 %v7902_v7 }
0x19e4   : > { %v11498_v3 = vpop.eup %11497 }
0x19e5   : > { %v7905_v48 = vadd.f32 1.0, %v11498_v3 }
0x19e7   : > { %v7907_v6 = vmul.f32 %v7905_v48, %v7899_v58  ;;  %v8088_v48 = vrot.slane %v9759_v40, %v6923_v60 }
0x19e8   : > { %v11500_v38 = vpop.eup %11499 }
0x19e9   : > { %v7906_v39 = vadd.f32 1.0, %v11500_v38 }
0x19eb   : > { %v7908_v17 = vmul.f32 %v7906_v39, %v7900_v32 }
0x19ed   : > { %v7909_v49 = vpack.c.bf16 %v7908_v17, %v7907_v6 }
0x19ef   : > { %10850 = vmatmul.mubr.bf16.vlgmr.msra.gmra.mxu1 %v7909_v49 }
0x19f0   : > { %10861 = vmatprep.mubr.msk.bf16.mxu1 %vm11613_vm5, %v11612_v56 }
0x1aaf   : > { %v8015_v31 = vpop.f32.mrf.mxu1 }
0x1ab0   : > { %v8016_v30 = vadd.f32 %v9740_v47, %v8015_v31 }
0x1ab1   : > { %v10851_v36 = vpop.f32.mrf.mxu1 }
0x1ab2   : > { %v8022_v27 = vadd.f32 %v8016_v30, %v7813_v21 }
0x1ab3   : > { %v8018_v10 = vpop.f32.mrf.mxu1 }
0x1ab4   : > { %v8019_v20 = vadd.f32 %v9740_v47, %v8018_v10  ;;  %v8026_v50 = vsel %vm6595_vm8, %v8022_v27, 0.0 }
0x1ab5   : > { %8027 = vadd.xlane.f32.xlu0 %v8026_v50  ;;  %v10852_v44 = vpop.f32.mrf.mxu1 }
0x1ab6   : > { %v8023_v35 = vadd.f32 %v8019_v20, %v7814_v16 }
0x1ab8   : > { %v8029_v24 = vsel %vm6599_vm9, %v8023_v35, 0.0 }
0x1ab9   : > { %8030 = vadd.xlane.f32.xlu1 %v8029_v24 }
0x1b3e   : > { %v8028_v5 = vpop.xlane.xlu0 %8027 }
0x1b3f   : > { %v8032_v54 = vmul.f32 0.015625, %v8028_v5 }
0x1b41   : > { %v8034_v23 = vsub.f32 %v8022_v27, %v8032_v54 }
0x1b42   : > { %v8031_v19 = vpop.xlane.xlu1 %8030 }
0x1b43   : > { %v8033_v51 = vmul.f32 0.015625, %v8031_v19  ;;  %v8036_v37 = vmul.f32 %v8034_v23, %v8034_v23 }
0x1b45   : > { %v8035_v34 = vsub.f32 %v8023_v35, %v8033_v51  ;;  %v8038_v59 = vsel %vm6595_vm8, %v8036_v37, 0.0 }
0x1b46   : > { %8039 = vadd.xlane.f32.xlu0 %v8038_v59 }
0x1b47   : > { %v8037_v46 = vmul.f32 %v8035_v34, %v8035_v34 }
0x1b49   : > { %v8041_v43 = vsel %vm6599_vm9, %v8037_v46, 0.0 }
0x1b4a   : > { %8042 = vadd.xlane.f32.xlu0 %v8041_v43 }
0x1bcf   : > { %v8040_v62 = vpop.xlane.xlu0 %8039 }
0x1bd0   : > { %v8044_v2 = vmul.f32 0.015625, %v8040_v62 }
0x1bd2   : > { %v8046_v21 = vadd.f32 1e-05, %v8044_v2 }
0x1bd3   : > { %v8043_v16 = vpop.xlane.xlu0 %8042 }
0x1bd4   : > { %11501 = vrsqrt.f32 %v8046_v21  ;;  %v8045_v15 = vmul.f32 0.015625, %v8043_v16 }
0x1bd6   : > { %v8047_v22 = vadd.f32 1e-05, %v8045_v15 }
0x1bd8   : > { %11503 = vrsqrt.f32 %v8047_v22 }
0x1be1   : > { %v11502_v0 = vpop.eup %11501 }
0x1be2   : > { %v8050_v57 = vmul.f32 %v11502_v0, %v8034_v23 }
0x1be4   : > { %v8058_v61 = vmul.f32 %v9749_v25, %v8050_v57 }
0x1be5   : > { %v11504_v11 = vpop.eup %11503 }
0x1be6   : > { %v8051_v55 = vmul.f32 %v11504_v11, %v8035_v34  ;;  %v15721_v13 = vadd.f32 %v9750_v9, %v8058_v61 }
0x1be8   : > { %v8059_v41 = vmul.f32 %v9749_v25, %v8051_v55 }
0x1bea   : > { %v15723_v53 = vadd.f32 %v9750_v9, %v8059_v41 }
0x1bec   : > { %v8068_v33 = vpack.c.bf16 %v15723_v53, %v15721_v13 }
0x1bee   : > { %9768 = vmatmul.mubr.msk.bf16.vlgmr.msra.gmra.mxu0 %vm6595_vm8, %v8068_v33 }
0x1bef   : > { %10855 = vmatprep.mubr.msk.bf16.mxu0 %vm11613_vm5, %v11612_v56 }
0x1cae   : > { %v8168_v4 = vpop.f32.mrf.mxu0 }
0x1caf   : > { %v8169_v7 = vadd.f32 %v8168_v4, %v8084_v26 }
0x1cb0   : > { %v8170_v3 = vpop.f32.mrf.mxu0 }
0x1cb1   : > { %8179 = vrot.lane.b32.xlu0 %v8169_v7, %s16725_s12  ;;  %v8171_v39 = vadd.f32 %v8170_v3, %v8088_v48 }
0x1cb2   : > { %v8172_v38 = vpop.f32.mrf.mxu0 }
0x1cb3   : > { %v8173_v58 = vadd.f32 %v8172_v38, %v8084_v26 }
0x1cb4   : > { %v8174_v32 = vpop.f32.mrf.mxu0 }
0x1cb5   : > { %v15738_v6 = vpack.c.bf16 %v8173_v58, %v8169_v7  ;;  %v8175_v17 = vadd.f32 %v8174_v32, %v8088_v48  ;;  %8181 = vrot.lane.b32.xlu0 %v8173_v58, %s16725_s12  ;;  %s837_s12 = scalar_lea.vmem [#allocation5], %s836_s9 }
0x1cb7   : > { %v15741_v49 = vpack.c.bf16 %v8175_v17, %v8171_v39  ;;  %8350 = vrot.lane.b32.xlu1 %v15738_v6, %s16726_s4 }
0x1cb9   : > { %v8305_v14 = vand.u32 %v15741_v49, %v15493_v18 }
0x1cbb   : > { %10860 = vmatpush3.bf16.msra.mxu1 %v8305_v14 }
0x1cbc   : > { %10871 = vmatprep.subr.bf16.mxu1 %v11612_v56 }
0x1d23   : > { %v8180_v12 = vpop.permute.xlu0 %8179 }
0x1d24   : > { %8185 = vxpose.xlu0.b32.start [1/2] (short) (narrow) %v8180_v12, 64 }
0x1d27   : > { %v8182_v60 = vpop.permute.xlu0 %8181 }
0x1d28   : > { %8186 = vxpose.xlu0.b32.end [2/2] (short) (narrow) %v8182_v60, 64 }
0x1d29   : > { %v8351_v20 = vpop.permute.xlu1 %8350 }
0x1da0   : > { %v8201_v47 = vpop.trf.xlu0 }
0x1da4   : > { %v8202_v31 = vpop.trf.xlu0 }
0x1da5   : > { %v8217_v30 = vpack.c.bf16 %v8202_v31, %v8201_v47 }
0x1da7   : > { %10854 = vmatpush3.bf16.msra.mxu0 %v8217_v30 }
0x1da8   : > { %v8203_v36 = vpop.trf.xlu0  ;;  %10865 = vmatprep.subr.bf16.mxu0 %v11612_v56 }
0x1daa   : > { %10856 = vmatmul.mubr.msk.bf16.vlgmr.msra.gmra.mxu0 %vm7067_vm12, %v15738_v6 }
0x1dab   : > { %10867 = vmatprep.mubr.msk.bf16.mxu0 %vm11613_vm5, %v11612_v56 }
0x1dac   : > { %v8204_v27 = vpop.trf.xlu0 }
0x1dad   : > { %v8218_v10 = vpack.c.bf16 %v8204_v27, %v8203_v36 }
0x1daf   : > { %10866 = vmatpush3.bf16.msra.mxu0 %v8218_v10 }
0x1db0   : > { %10877 = vmatprep.subr.bf16.mxu0 %v11612_v56  ;;  %v15757_v50 = vpop.trf.xlu0 }
0x1db2   : > { %10868 = vmatmul.mubr.msk.bf16.vlgmr.msra.gmra.mxu0 %vm7067_vm12, %v8351_v20  ;;  %v11111_v20 = vld [vmem:[%s16032_s16 + $0x20] sm:$0xff]  }
0x1db3   : > { %10879 = vmatprep.mubr.msk.bf16.mxu0 %vm11613_vm5, %v11612_v56 }
0x1db4   : > { %v15759_v44 = vpop.trf.xlu0 }
0x1db5   : > { %v8219_v35 = vpack.c.bf16 %v15759_v44, %v15757_v50 }
0x1db8   : > { %v15767_v8 = vpop.trf.xlu0 }
0x1dbc   : > { %v15769_v63 = vpop.trf.xlu0 }
0x1e6a   : > { %v8269_v24 = vpop.f32.mrf.mxu0 }
0x1e6b   : > { %v8276_v5 = vmul.f32 0.25, %v8269_v24  ;;  %v11112_v24 = vld [vmem:[%s16032_s16 + $0x28] sm:$0xff]  }
0x1e6c   : > { %v10857_v54 = vpop.f32.mrf.mxu0  ;;  %10878 = vmatpush3.bf16.msra.mxu0 %v11112_v24 }
0x1e6d   : > { %v8278_v23 = vsel %vm7114_vm13, %v8276_v5, -inf  ;;  %10889 = vmatprep.subr.bf16.mxu0 %v11612_v56 }
0x1e6e   : > { %8279 = vmax.xlane.f32.xlu1 %v8278_v23  ;;  %v8272_v19 = vpop.f32.mrf.mxu0 }
0x1e6f   : > { %v8277_v51 = vmul.f32 0.25, %v8272_v19 }
0x1e70   : > { %v10858_v37 = vpop.f32.mrf.mxu0 }
0x1e71   : > { %v8281_v34 = vsel %vm7118_vm14, %v8277_v51, -inf }
0x1e72   : > { %8282 = vmax.xlane.f32.xlu0 %v8281_v34  ;;  %v8389_v59 = vpop.f32.mrf.mxu0 }
0x1e73   : > { %v8396_v46 = vmul.f32 0.25, %v8389_v59 }
0x1e74   : > { %v10869_v43 = vpop.f32.mrf.mxu0 }
0x1e75   : > { %v8398_v1 = vsel %vm7114_vm13, %v8396_v46, -inf }
0x1e76   : > { %8399 = vmax.xlane.f32.xlu1 %v8398_v1  ;;  %v8392_v52 = vpop.f32.mrf.mxu0 }
0x1e77   : > { %v8397_v45 = vmul.f32 0.25, %v8392_v52 }
0x1e78   : > { %v10870_v28 = vpop.f32.mrf.mxu0 }
0x1e79   : > { %v8401_v42 = vsel %vm7118_vm14, %v8397_v45, -inf }
0x1e7a   : > { %8402 = vmax.xlane.f32.xlu1 %v8401_v42 }
0x1ef7   : > { %v8280_v29 = vpop.xlane.xlu1 %8279 }
0x1ef8   : > { %v8284_v62 = vsub.f32 %v8276_v5, %v8280_v29 }
0x1efa   : > { %v8286_v2 = vmul.f32 1.442695, %v8284_v62 }
0x1efb   : > { %v8283_v21 = vpop.xlane.xlu0 %8282 }
0x1efc   : > { %11505 = vpow2.f32 %v8286_v2  ;;  %v8285_v16 = vsub.f32 %v8277_v51, %v8283_v21 }
0x1efe   : > { %v8288_v15 = vmul.f32 1.442695, %v8285_v16 }
0x1eff   : > { %v8400_v22 = vpop.xlane.xlu1 %8399 }
0x1f00   : > { %11507 = vpow2.f32 %v8288_v15  ;;  %v8404_v0 = vsub.f32 %v8396_v46, %v8400_v22 }
0x1f02   : > { %v8406_v57 = vmul.f32 1.442695, %v8404_v0 }
0x1f03   : > { %v8403_v25 = vpop.xlane.xlu1 %8402 }
0x1f04   : > { %11509 = vpow2.f32 %v8406_v57  ;;  %v8405_v11 = vsub.f32 %v8397_v45, %v8403_v25 }
0x1f06   : > { %v8408_v61 = vmul.f32 1.442695, %v8405_v11 }
0x1f08   : > { %11511 = vpow2.f32 %v8408_v61 }
0x1f09   : > { %v11506_v55 = vpop.eup %11505 }
0x1f0a   : > { %v8290_v9 = vsel %vm7114_vm13, %v11506_v55, 0.0 }
0x1f0b   : > { %8291 = vadd.xlane.f32.xlu1 %v8290_v9 }
0x1f0d   : > { %v11508_v41 = vpop.eup %11507 }
0x1f0e   : > { %v8293_v33 = vsel %vm7118_vm14, %v11508_v41, 0.0 }
0x1f0f   : > { %8294 = vadd.xlane.f32.xlu1 %v8293_v33 }
0x1f11   : > { %v11510_v40 = vpop.eup %11509 }
0x1f12   : > { %v8410_v26 = vsel %vm7114_vm13, %v11510_v40, 0.0 }
0x1f13   : > { %8411 = vadd.xlane.f32.xlu1 %v8410_v26 }
0x1f15   : > { %v11512_v4 = vpop.eup %11511 }
0x1f16   : > { %v8413_v7 = vsel %vm7118_vm14, %v11512_v4, 0.0 }
0x1f17   : > { %8414 = vadd.xlane.f32.xlu1 %v8413_v7 }
0x1f28   : > { %8422 = vrot.lane.b32.xlu1 %v15741_v49, %s16726_s4  ;;  %s9343_s4 = sshll.u32 %s837_s12, 4  ;;  %s9344_s4 = int_to_ptr.vmem [resolvable:$true] %s9343_s4 }
0x1f29   : > { %s11549_s14 = scalar_lea.vmem %s9344_s4, 16 }
0x1f2a   : > { %p11550_p11 = scmp.ne.s32.totalorder %s9344_s4, %s11549_s14 }
0x1f2c   : > { %8572 = vrot.lane.b32.xlu1 %v15738_v6, %s16727_s0  ;;  %p11551_p12 = pnand %p11550_p11, %p11803_p5 }
0x1f2e   : > { %p11552_p13 = pneg %p11551_p12 }
0x1f94   : > { %v8292_v3 = vpop.xlane.xlu1 %8291 }
0x1f95   : > { %11513 = vrcp.f32 %v8292_v3 }
0x1f98   : > { %v8295_v48 = vpop.xlane.xlu1 %8294 }
0x1f99   : > { %11515 = vrcp.f32 %v8295_v48 }
0x1f9c   : > { %v8412_v38 = vpop.xlane.xlu1 %8411 }
0x1f9d   : > { %11517 = vrcp.f32 %v8412_v38 }
0x1fa0   : > { %v8415_v58 = vpop.xlane.xlu1 %8414 }
0x1fa1   : > { %11519 = vrcp.f32 %v8415_v58 }
0x1fa2   : > { %v11514_v32 = vpop.eup %11513 }
0x1fa3   : > { %v8298_v17 = vmul.f32 %v11514_v32, %v11506_v55 }
0x1fa4   : > { %v8423_v12 = vpop.permute.xlu1 %8422 }
0x1fa5   : > { %v8428_v47 = vand.u32 %v8423_v12, %v15493_v18 }
0x1fa6   : > { %v11516_v39 = vpop.eup %11515 }
0x1fa7   : > { %v8299_v14 = vmul.f32 %v11516_v39, %v11508_v41 }
0x1fa8   : > { %v8573_v1 = vpop.permute.xlu1 %8572 }
0x1fa9   : > { %v8300_v60 = vpack.c.bf16 %v8299_v14, %v8298_v17 }
0x1faa   : > { %v11518_v31 = vpop.eup %11517 }
0x1fab   : > { %10862 = vmatmul.mubr.msk.bf16.vlgmr.msra.gmra.mxu1 %vm7114_vm13, %v8300_v60  ;;  %v8418_v36 = vmul.f32 %v11518_v31, %v11510_v40  ;;  %v8220_v60 = vpack.c.bf16 %v15769_v63, %v15767_v8  ;;  %v11113_v31 = vld [vmem:[%s16032_s16 + $0x30] sm:$0xff]  }
0x1fac   : > { %10872 = vmatpush3.bf16.msra.mxu1 %v8428_v47  ;;  %10873 = vmatprep.mubr.msk.bf16.mxu1 %vm11613_vm5, %v11612_v56 }
0x1fad   : > { %10883 = vmatprep.subr.bf16.mxu1 %v11612_v56 }
0x1fae   : > { %v11520_v30 = vpop.eup %11519 }
0x1faf   : > { %v8419_v27 = vmul.f32 %v11520_v30, %v11512_v4 }
0x1fb1   : > { %v8420_v10 = vpack.c.bf16 %v8419_v27, %v8418_v36 }
0x1fb3   : > { %10874 = vmatmul.mubr.msk.bf16.vlgmr.msra.gmra.mxu1 %vm7114_vm13, %v8420_v10 }
0x1fb4   : > { %10885 = vmatprep.mubr.msk.bf16.mxu1 %vm11613_vm5, %v11612_v56  ;;  %10884 = vmatpush3.bf16.msra.mxu1 %v11111_v20 }
0x1fb5   : > { %10895 = vmatprep.subr.bf16.mxu1 %v11612_v56 }
0x206b   : > { %v8341_v5 = vpop.f32.mrf.mxu1 }
0x206d   : > { %v10863_v54 = vpop.f32.mrf.mxu1 }
0x206f   : > { %v8344_v23 = vpop.f32.mrf.mxu1 }
0x2070   : > { %v8348_v19 = vpack.c.bf16 %v8344_v23, %v8341_v5 }
0x2071   : > { %v10864_v51 = vpop.f32.mrf.mxu1 }
0x2072   : > { %10886 = vmatmul.mubr.msk.bf16.vlgmr.msra.gmra.mxu1 %vm7067_vm12, %v8348_v19 }
0x2073   : > { %v8464_v37 = vpop.f32.mrf.mxu1  ;;  %10897 = vmatprep.mubr.msk.bf16.mxu1 %vm11613_vm5, %v11612_v56 }
0x2075   : > { %v10875_v34 = vpop.f32.mrf.mxu1 }
0x2077   : > { %v8467_v59 = vpop.f32.mrf.mxu1 }
0x2078   : > { %v8471_v46 = vpack.c.bf16 %v8467_v59, %v8464_v37 }
0x2079   : > { %v10876_v43 = vpop.f32.mrf.mxu1 }
0x207a   : > { %10880 = vmatmul.mubr.msk.bf16.vlgmr.msra.gmra.mxu0 %vm7067_vm12, %v8471_v46 }
0x207b   : > { %10890 = vmatpush3.bf16.msra.mxu0 %v8219_v35  ;;  %10891 = vmatprep.mubr.msk.bf16.mxu0 %vm11613_vm5, %v11612_v56 }
0x207c   : > { %10901 = vmatprep.subr.bf16.mxu0 %v11612_v56 }
0x2082   : > { %10892 = vmatmul.mubr.msk.bf16.vlgmr.msra.gmra.mxu0 %vm7067_vm12, %v8573_v1 }
0x2083   : > { %10903 = vmatprep.mubr.msk.bf16.mxu0 %vm11613_vm5, %v11612_v56  ;;  %10902 = vmatpush3.bf16.msra.mxu0 %v11113_v31 }
0x2084   : > { %10913 = vmatprep.subr.bf16.mxu0 %v11612_v56 }
0x2132   : > { %v8565_v52 = vpop.f32.mrf.mxu1 }
0x2134   : > { %v10887_v45 = vpop.f32.mrf.mxu1 }
0x2136   : > { %v8568_v28 = vpop.f32.mrf.mxu1 }
0x2138   : > { %v10888_v42 = vpop.f32.mrf.mxu1 }
0x213a   : > { %v8515_v29 = vpop.f32.mrf.mxu0 }
0x213b   : > { %v15808_v62 = vadd.f32 %v8565_v52, %v8515_v29 }
0x213c   : > { %v10881_v50 = vpop.f32.mrf.mxu0 }
0x213e   : > { %v8518_v44 = vpop.f32.mrf.mxu0 }
0x213f   : > { %v15810_v35 = vadd.f32 %v8568_v28, %v8518_v44 }
0x2140   : > { %v10882_v2 = vpop.f32.mrf.mxu0 }
0x2142   : > { %v8611_v21 = vpop.f32.mrf.mxu0 }
0x2143   : > { %v8618_v16 = vmul.f32 0.25, %v8611_v21 }
0x2144   : > { %v10893_v15 = vpop.f32.mrf.mxu0 }
0x2145   : > { %v8620_v22 = vsel %vm7114_vm13, %v8618_v16, -inf }
0x2146   : > { %8621 = vmax.xlane.f32.xlu1 %v8620_v22  ;;  %v8614_v0 = vpop.f32.mrf.mxu0 }
0x2147   : > { %v8619_v57 = vmul.f32 0.25, %v8614_v0 }
0x2148   : > { %v10894_v25 = vpop.f32.mrf.mxu0 }
0x2149   : > { %v8623_v11 = vsel %vm7118_vm14, %v8619_v57, -inf }
0x214a   : > { %8624 = vmax.xlane.f32.xlu0 %v8623_v11 }
0x2157   : > { %8745 = vrot.lane.b32.xlu1 %v15738_v6, %s16728_s10 }
0x21cf   : > { %v8622_v61 = vpop.xlane.xlu1 %8621 }
0x21d0   : > { %v8626_v55 = vsub.f32 %v8618_v16, %v8622_v61 }
0x21d2   : > { %v8628_v9 = vmul.f32 1.442695, %v8626_v55 }
0x21d3   : > { %v8625_v41 = vpop.xlane.xlu0 %8624  ;;  %v8746_v47 = vpop.permute.xlu1 %8745 }
0x21d4   : > { %11521 = vpow2.f32 %v8628_v9  ;;  %v8627_v33 = vsub.f32 %v8619_v57, %v8625_v41 }
0x21d6   : > { %v8630_v40 = vmul.f32 1.442695, %v8627_v33 }
0x21d8   : > { %11523 = vpow2.f32 %v8630_v40 }
0x21e1   : > { %v11522_v26 = vpop.eup %11521 }
0x21e2   : > { %v8632_v4 = vsel %vm7114_vm13, %v11522_v26, 0.0 }
0x21e3   : > { %8633 = vadd.xlane.f32.xlu0 %v8632_v4 }
0x21e5   : > { %v11524_v7 = vpop.eup %11523 }
0x21e6   : > { %v8635_v3 = vsel %vm7118_vm14, %v11524_v7, 0.0 }
0x21e7   : > { %8636 = vadd.xlane.f32.xlu0 %v8635_v3 }
0x21fd   : > { %8643 = vrot.lane.b32.xlu0 %v15741_v49, %s16727_s0 }
0x226c   : > { %v8634_v6 = vpop.xlane.xlu0 %8633 }
0x226d   : > { %11525 = vrcp.f32 %v8634_v6 }
0x2270   : > { %v8637_v48 = vpop.xlane.xlu0 %8636 }
0x2271   : > { %11527 = vrcp.f32 %v8637_v48 }
0x2274   : > { %v8644_v38 = vpop.permute.xlu0 %8643 }
0x2275   : > { %v8649_v58 = vand.u32 %v8644_v38, %v15493_v18 }
0x2277   : > { %10896 = vmatpush3.bf16.msra.mxu1 %v8649_v58 }
0x2278   : > { %10907 = vmatprep.subr.bf16.mxu1 %v11612_v56 }
0x227a   : > { %v11526_v32 = vpop.eup %11525 }
0x227b   : > { %v8640_v17 = vmul.f32 %v11526_v32, %v11522_v26 }
0x227e   : > { %v11528_v39 = vpop.eup %11527 }
0x227f   : > { %v8641_v14 = vmul.f32 %v11528_v39, %v11524_v7  ;;  %v9794_v7 = vld [vmem:[%s16033_s17 + $0x1] ss:$0 sm:$0xff] }
0x2281   : > { %v8642_v12 = vpack.c.bf16 %v8641_v14, %v8640_v17 }
0x2283   : > { %10898 = vmatmul.mubr.msk.bf16.vlgmr.msra.gmra.mxu1 %vm7114_vm13, %v8642_v12 }
0x2284   : > { %10908 = vmatpush3.bf16.msra.mxu1 %v8220_v60  ;;  %10909 = vmatprep.mubr.msk.bf16.mxu1 %vm11613_vm5, %v11612_v56 }
0x2285   : > { %10919 = vmatprep.subr.bf16.mxu1 %v11612_v56 }
0x228b   : > { %10910 = vmatmul.mubr.msk.bf16.vlgmr.msra.gmra.mxu1 %vm7067_vm12, %v8746_v47 }
0x228c   : > { %10921 = vmatprep.mubr.msk.bf16.mxu1 %vm11613_vm5, %v11612_v56 }
0x2343   : > { %v8685_v8 = vpop.f32.mrf.mxu1 }
0x2345   : > { %v10899_v63 = vpop.f32.mrf.mxu1 }
0x2347   : > { %v8688_v30 = vpop.f32.mrf.mxu1 }
0x2348   : > { %v8692_v36 = vpack.c.bf16 %v8688_v30, %v8685_v8 }
0x2349   : > { %v10900_v27 = vpop.f32.mrf.mxu1 }
0x234a   : > { %10904 = vmatmul.mubr.msk.bf16.vlgmr.msra.gmra.mxu0 %vm7067_vm12, %v8692_v36  ;;  %v11115_v27 = vld [vmem:[%s16036_s20 + $0x38] sm:$0xff]  }
0x234b   : > { %v8784_v10 = vpop.f32.mrf.mxu1  ;;  %10915 = vmatprep.mubr.msk.bf16.mxu0 %vm11613_vm5, %v11612_v56 }
0x234c   : > { %v8791_v20 = vmul.f32 0.25, %v8784_v10  ;;  %v11116_v10 = vld [vmem:[%s16036_s20 + $0x30] sm:$0xff]  }
0x234d   : > { %v10911_v24 = vpop.f32.mrf.mxu1 }
0x234e   : > { %v8793_v5 = vsel %vm7114_vm13, %v8791_v20, -inf  ;;  %v11119_v24 = vld [vmem:[%s16038_s22 + $0x78] sm:$0xff]  }
0x234f   : > { %8794 = vmax.xlane.f32.xlu0 %v8793_v5  ;;  %v8787_v54 = vpop.f32.mrf.mxu1  ;;  %v11118_v5 = vld [vmem:[%s16036_s20 + $0x20] sm:$0xff]  }
0x2350   : > { %v8792_v23 = vmul.f32 0.25, %v8787_v54 }
0x2351   : > { %v10912_v19 = vpop.f32.mrf.mxu1 }
0x2352   : > { %v8796_v51 = vsel %vm7118_vm14, %v8792_v23, -inf }
0x2353   : > { %8797 = vmax.xlane.f32.xlu1 %v8796_v51 }
0x23d8   : > { %v8795_v37 = vpop.xlane.xlu0 %8794 }
0x23d9   : > { %v8799_v34 = vsub.f32 %v8791_v20, %v8795_v37  ;;  %v11117_v20 = vld [vmem:[%s16036_s20 + $0x28] sm:$0xff]  }
0x23db   : > { %v8801_v59 = vmul.f32 1.442695, %v8799_v34 }
0x23dc   : > { %v8798_v46 = vpop.xlane.xlu1 %8797 }
0x23dd   : > { %11529 = vpow2.f32 %v8801_v59  ;;  %v8800_v43 = vsub.f32 %v8792_v23, %v8798_v46 }
0x23df   : > { %v8803_v1 = vmul.f32 1.442695, %v8800_v43  ;;  %v9797_v43 = vld [vmem:[%s16034_s18 + $0x1] ss:$0 sm:$0xff] }
0x23e1   : > { %11531 = vpow2.f32 %v8803_v1 }
0x23ea   : > { %v11530_v52 = vpop.eup %11529 }
0x23eb   : > { %v8805_v45 = vsel %vm7114_vm13, %v11530_v52, 0.0 }
0x23ec   : > { %8806 = vadd.xlane.f32.xlu0 %v8805_v45 }
0x23ee   : > { %v11532_v28 = vpop.eup %11531 }
0x23ef   : > { %v8808_v42 = vsel %vm7118_vm14, %v11532_v28, 0.0 }
0x23f0   : > { %8809 = vadd.xlane.f32.xlu0 %v8808_v42 }
0x2406   : > { %8816 = vrot.lane.b32.xlu0 %v15741_v49, %s16728_s10  ;;  %s11553_s10 = sshll.u32 %s11619_s3, 4  ;;  %s11554_s10 = int_to_ptr.vmem [resolvable:$false] %s11553_s10 }
0x2407   : > { %s11555_s1 = scalar_lea.vmem %s11554_s10, 32  ;;  %p11556_p0 = scmp.lt.s32.totalorder %s9344_s4, %s11554_s10 }
0x2408   : > { %p11557_p1 = scmp.lt.s32.totalorder %s11555_s1, %s11549_s14 }
0x240a   : > { %v8736_v29 = vpop.f32.mrf.mxu0  ;;  %p11558_p2 = por %p11557_p1, %p11556_p0 }
0x240b   : > { %v8743_v50 = vadd.f32 %v8736_v29, %v15808_v62 }
0x240c   : > { %v10905_v44 = vpop.f32.mrf.mxu0  ;;  %p11559_p3 = pnand %p11558_p2, %p11552_p13 }
0x240e   : > { %v8739_v2 = vpop.f32.mrf.mxu0 }
0x240f   : > { %v8744_v21 = vadd.f32 %v8739_v2, %v15810_v35  ;;  %v11114_v35 = vld [vmem:[%s16032_s16 + $0x38] sm:$0xff]   ;;  %v11120_v2 = vld [vmem:[%s16038_s22 + $0x70] sm:$0xff]  }
0x2410   : > { %v10906_v16 = vpop.f32.mrf.mxu0  ;;  %10920 = vmatpush3.bf16.msra.mxu1 %v11114_v35 }
0x2411   : > { %10937 = vmatprep.subr.bf16.mxu1 %v11612_v56  ;;  %v11122_v16 = vld [vmem:[%s16038_s22 + $0x60] sm:$0xff]  }
0x2475   : > { %v8807_v15 = vpop.xlane.xlu0 %8806 }
0x2476   : > { %11533 = vrcp.f32 %v8807_v15  ;;  %v11123_v15 = vld [vmem:[%s16038_s22 + $0x58] sm:$0xff]  }
0x2479   : > { %v8810_v22 = vpop.xlane.xlu0 %8809 }
0x247a   : > { %11535 = vrcp.f32 %v8810_v22  ;;  %v11124_v22 = vld [vmem:[%s16038_s22 + $0x50] sm:$0xff]  }
0x247d   : > { %v8817_v0 = vpop.permute.xlu0 %8816 }
0x247e   : > { %v8822_v57 = vand.u32 %v8817_v0, %v15493_v18  ;;  %v11125_v0 = vld [vmem:[%s16038_s22 + $0x48] sm:$0xff]  }
0x2480   : > { %10914 = vmatpush3.bf16.msra.mxu0 %v8822_v57  ;;  %v11126_v57 = vld [vmem:[%s16038_s22 + $0x40] sm:$0xff]  }
0x2481   : > { %10925 = vmatprep.subr.bf16.mxu0 %v11612_v56 }
0x2483   : > { %v11534_v25 = vpop.eup %11533 }
0x2484   : > { %v8813_v11 = vmul.f32 %v11534_v25, %v11530_v52  ;;  %v9808_v25 = vld [vmem:[%s16037_s21 + $0x1] ss:$0 sm:$0xff] }
0x2487   : > { %v11536_v49 = vpop.eup %11535 }
0x2488   : > { %v8814_v61 = vmul.f32 %v11536_v49, %v11532_v28  ;;  %v9798_v28 = vld [vmem:[%s16035_s19 + $0x1] ss:$0 sm:$0xff] }
0x248a   : > { %v8815_v62 = vpack.c.bf16 %v8814_v61, %v8813_v11 }
0x248c   : > { %10916 = vmatmul.mubr.msk.bf16.vlgmr.msra.gmra.mxu0 %vm7114_vm13, %v8815_v62 }
0x248d   : > { %10933 = vmatprep.mubr.msk.bf16.mxu0 %vm11613_vm5, %v11612_v56  ;;  %10926 = vmatpush3.bf16.msra.mxu0 %v11115_v27 }
0x248e   : > { %10927 = vmatprep.subr.bf16.mxu0 %v11612_v56 }
0x2491   : > { %10928 = vmatpush3.bf16.msra.mxu0 %v11116_v10 }
0x2492   : > { %10929 = vmatprep.subr.bf16.mxu0 %v11612_v56 }
0x2495   : > { %10930 = vmatpush3.bf16.msra.mxu0 %v11117_v20 }
0x2496   : > { %10931 = vmatprep.subr.bf16.mxu0 %v11612_v56 }
0x2499   : > { %10932 = vmatpush3.bf16.msra.mxu0 %v11118_v5 }
0x249a   : > { %10957 = vmatprep.subr.mxu0 %v11612_v56 }
0x254c   : > { %v8858_v18 = vpop.f32.mrf.mxu0 }
0x254e   : > { %v10917_v55 = vpop.f32.mrf.mxu0 }
0x2550   : > { %v8861_v9 = vpop.f32.mrf.mxu0 }
0x2551   : > { %v8865_v41 = vpack.c.bf16 %v8861_v9, %v8858_v18 }
0x2552   : > { %v10918_v33 = vpop.f32.mrf.mxu0 }
0x2553   : > { %10922 = vmatmul.mubr.msk.bf16.vlgmr.msra.gmra.mxu1 %vm7067_vm12, %v8865_v41 }
0x2554   : > { %10953 = vmatprep.mubr.msk.bf16.mxu1 %vm11613_vm5, %v11612_v56  ;;  %10938 = vmatpush3.bf16.msra.mxu1 %v11119_v24 }
0x2555   : > { %10939 = vmatprep.subr.bf16.mxu1 %v11612_v56 }
0x2558   : > { %10940 = vmatpush3.bf16.msra.mxu1 %v11120_v2 }
0x2559   : > { %10941 = vmatprep.subr.bf16.mxu1 %v11612_v56 }
0x2613   : > { %v8909_v40 = vpop.f32.mrf.mxu1 }
0x2614   : > { %v8916_v26 = vadd.f32 %v8909_v40, %v8743_v50 }
0x2615   : > { %v10923_v4 = vpop.f32.mrf.mxu1 }
0x2616   : > { %v8918_v3 = vadd.f32 %v8916_v26, %v15721_v13 }
0x2617   : > { %v8912_v6 = vpop.f32.mrf.mxu1 }
0x2618   : > { %v8917_v48 = vadd.f32 %v8912_v6, %v8744_v21  ;;  %v8928_v38 = vadd.f32 %v9794_v7, %v8918_v3  ;;  %v11121_v21 = vld [vmem:[%s16038_s22 + $0x68] sm:$0xff]  }
0x2619   : > { %v10924_v58 = vpop.f32.mrf.mxu1  ;;  %10942 = vmatpush3.bf16.msra.mxu1 %v11121_v21 }
0x261a   : > { %v8919_v32 = vadd.f32 %v8917_v48, %v15723_v53  ;;  %v8934_v39 = vsel %vm6595_vm8, %v8928_v38, 0.0  ;;  %10943 = vmatprep.subr.bf16.mxu1 %v11612_v56 }
0x261b   : > { %8935 = vadd.xlane.f32.xlu1 %v8934_v39 }
0x261c   : > { %v8929_v17 = vadd.f32 %v9794_v7, %v8919_v32 }
0x261d   : > { %10944 = vmatpush3.bf16.msra.mxu1 %v11122_v16 }
0x261e   : > { %v8937_v14 = vsel %vm6599_vm9, %v8929_v17, 0.0  ;;  %10945 = vmatprep.subr.bf16.mxu1 %v11612_v56 }
0x261f   : > { %8938 = vadd.xlane.f32.xlu1 %v8937_v14 }
0x2621   : > { %10946 = vmatpush3.bf16.msra.mxu1 %v11123_v15 }
0x2622   : > { %10947 = vmatprep.subr.bf16.mxu1 %v11612_v56 }
0x2625   : > { %10948 = vmatpush3.bf16.msra.mxu1 %v11124_v22 }
0x2626   : > { %10949 = vmatprep.subr.bf16.mxu1 %v11612_v56 }
0x2629   : > { %10950 = vmatpush3.bf16.msra.mxu1 %v11125_v0 }
0x262a   : > { %10951 = vmatprep.subr.bf16.mxu1 %v11612_v56 }
0x262d   : > { %10952 = vmatpush3.bf16.msra.mxu1 %v11126_v57 }
0x26a4   : > { %v8936_v12 = vpop.xlane.xlu1 %8935 }
0x26a5   : > { %v8940_v60 = vmul.f32 0.015625, %v8936_v12 }
0x26a7   : > { %v8942_v47 = vsub.f32 %v8928_v38, %v8940_v60  ;;  %v9831_v38 = vld [vmem:[%s16039_s23 + $0x1] ss:$0 sm:$0xff] }
0x26a8   : > { %v8939_v31 = vpop.xlane.xlu1 %8938 }
0x26a9   : > { %v8941_v8 = vmul.f32 0.015625, %v8939_v31  ;;  %v8944_v63 = vmul.f32 %v8942_v47, %v8942_v47 }
0x26ab   : > { %v8943_v13 = vsub.f32 %v8929_v17, %v8941_v8  ;;  %v8946_v30 = vsel %vm6595_vm8, %v8944_v63, 0.0 }
0x26ac   : > { %8947 = vadd.xlane.f32.xlu1 %v8946_v30 }
0x26ad   : > { %v8945_v36 = vmul.f32 %v8943_v13, %v8943_v13 }
0x26af   : > { %v8949_v53 = vsel %vm6599_vm9, %v8945_v36, 0.0 }
0x26b0   : > { %8950 = vadd.xlane.f32.xlu1 %v8949_v53 }
0x2735   : > { %v8948_v54 = vpop.xlane.xlu1 %8947 }
0x2736   : > { %v8952_v23 = vmul.f32 0.015625, %v8948_v54  ;;  %v9253_v54 = vld [vmem:[%s16042_s26 + $0x38] sm:$0xff] }
0x2738   : > { %v8954_v19 = vadd.f32 1e-05, %v8952_v23  ;;  %v9252_v23 = vld [vmem:[%s16042_s26 + $0x30] sm:$0xff] }
0x2739   : > { %v8951_v51 = vpop.xlane.xlu1 %8950 }
0x273a   : > { %11537 = vrsqrt.f32 %v8954_v19  ;;  %v8953_v37 = vmul.f32 0.015625, %v8951_v51  ;;  %v9251_v19 = vld [vmem:[%s16042_s26 + $0x28] sm:$0xff]  ;;  %v9250_v51 = vld [vmem:[%s16042_s26 + $0x20] sm:$0xff] }
0x273c   : > { %v8955_v34 = vadd.f32 1e-05, %v8953_v37  ;;  %v9249_v37 = vld [vmem:[%s16042_s26 + $0x18] sm:$0xff] }
0x273e   : > { %11539 = vrsqrt.f32 %v8955_v34  ;;  %v9248_v34 = vld [vmem:[%s16042_s26 + $0x10] sm:$0xff] }
0x2747   : > { %v11538_v59 = vpop.eup %11537 }
0x2748   : > { %v8958_v46 = vmul.f32 %v11538_v59, %v8942_v47  ;;  %v9247_v59 = vld [vmem:[%s16042_s26 + $0x8] sm:$0xff] }
0x274a   : > { %v8966_v52 = vmul.f32 %v9797_v43, %v8958_v46  ;;  %v9246_v46 = vld [vmem:[%s16042_s26] sm:$0xff] }
0x274b   : > { %v11540_v1 = vpop.eup %11539 }
0x274c   : > { %v8959_v45 = vmul.f32 %v11540_v1, %v8943_v13  ;;  %v8974_v29 = vadd.f32 %v9798_v28, %v8966_v52 }
0x274e   : > { %v8967_v42 = vmul.f32 %v9797_v43, %v8959_v45 }
0x2750   : > { %v8975_v50 = vadd.f32 %v9798_v28, %v8967_v42 }
0x2752   : > { %v8976_v44 = vpack.c.bf16 %v8975_v50, %v8974_v29 }
0x2754   : > { %10934 = vmatmul.mubr.msk.bf16.vlgmr.msra.gmra.mxu0 %vm6595_vm8, %v8976_v44 }
0x2755   : > { %10973 = vmatprep.mubr.msk.f32.mxu0 %vm11613_vm5, %v11612_v56  ;;  %10958 = vmatpush3.msra.mxu0 %v9253_v54 }
0x2756   : > { %10959 = vmatprep.subr.mxu0 %v11612_v56 }
0x2757   : > { %10960 = vmatpush3.msra.mxu0 %v9252_v23 }
0x2758   : > { %10961 = vmatprep.subr.mxu0 %v11612_v56 }
0x2759   : > { %10962 = vmatpush3.msra.mxu0 %v9251_v19 }
0x275a   : > { %10963 = vmatprep.subr.mxu0 %v11612_v56 }
0x275b   : > { %10964 = vmatpush3.msra.mxu0 %v9250_v51 }
0x275c   : > { %10965 = vmatprep.subr.mxu0 %v11612_v56 }
0x275d   : > { %10966 = vmatpush3.msra.mxu0 %v9249_v37 }
0x275e   : > { %10967 = vmatprep.subr.mxu0 %v11612_v56 }
0x275f   : > { %10968 = vmatpush3.msra.mxu0 %v9248_v34 }
0x2760   : > { %10969 = vmatprep.subr.mxu0 %v11612_v56 }
0x2761   : > { %10970 = vmatpush3.msra.mxu0 %v9247_v59 }
0x2762   : > { %10971 = vmatprep.subr.mxu0 %v11612_v56  ;;  %v9843_v56 = vld [vmem:[%s16041_s25 + $0x1] ss:$0 sm:$0xff] }
0x2763   : > { %10972 = vmatpush3.msra.mxu0 %v9246_v46 }
0x2814   : > { %v9055_v49 = vpop.f32.mrf.mxu0 }
0x2815   : > { %v9056_v11 = vadd.f32 %v9808_v25, %v9055_v49 }
0x2816   : > { %v10935_v61 = vpop.f32.mrf.mxu0 }
0x2817   : > { %v9064_v62 = vmul.f32 0.70710677, %v9056_v11  ;;  %v9062_v26 = vmul.f32 0.5, %v9056_v11 }
0x2818   : > { %v9058_v35 = vpop.f32.mrf.mxu0 }
0x2819   : > { %11541 = verf.f32 %v9064_v62  ;;  %v9059_v18 = vadd.f32 %v9808_v25, %v9058_v35 }
0x281a   : > { %v10936_v55 = vpop.f32.mrf.mxu0 }
0x281b   : > { %v9065_v9 = vmul.f32 0.70710677, %v9059_v18  ;;  %v9063_v4 = vmul.f32 0.5, %v9059_v18 }
0x281d   : > { %11543 = verf.f32 %v9065_v9 }
0x2826   : > { %v11542_v41 = vpop.eup %11541 }
0x2827   : > { %v9068_v33 = vadd.f32 1.0, %v11542_v41  ;;  %v9254_v41 = vld [vmem:[%s16043_s27] sm:$0x1] }
0x2829   : > { %v9070_v3 = vmul.f32 %v9068_v33, %v9062_v26 }
0x282a   : > { %v11544_v40 = vpop.eup %11543 }
0x282b   : > { %v9069_v7 = vadd.f32 1.0, %v11544_v40 }
0x282d   : > { %v9071_v6 = vmul.f32 %v9069_v7, %v9063_v4 }
0x282f   : > { %v9072_v48 = vpack.c.bf16 %v9071_v6, %v9070_v3 }
0x2831   : > { %10954 = vmatmul.mubr.bf16.vlgmr.msra.gmra.mxu1 %v9072_v48 }
0x28f1   : > { %v9180_v58 = vpop.f32.mrf.mxu1 }
0x28f2   : > { %v9181_v32 = vadd.f32 %v9831_v38, %v9180_v58 }
0x28f3   : > { %v10955_v39 = vpop.f32.mrf.mxu1 }
0x28f4   : > { %v9187_v17 = vadd.f32 %v9181_v32, %v8974_v29 }
0x28f5   : > { %v9183_v14 = vpop.f32.mrf.mxu1 }
0x28f6   : > { %v9184_v12 = vadd.f32 %v9831_v38, %v9183_v14  ;;  %v9193_v60 = vsel %vm6595_vm8, %v9187_v17, 0.0 }
0x28f7   : > { %9194 = vadd.xlane.f32.xlu0 %v9193_v60  ;;  %v10956_v47 = vpop.f32.mrf.mxu1 }
0x28f8   : > { %v9188_v31 = vadd.f32 %v9184_v12, %v8975_v50  ;;  %v9842_v50 = vld [vmem:[%s16040_s24 + $0x1] ss:$0 sm:$0xff] }
0x28fa   : > { %v9196_v8 = vsel %vm6599_vm9, %v9188_v31, 0.0 }
0x28fb   : > { %9197 = vadd.xlane.f32.xlu1 %v9196_v8 }
0x2980   : > { %v9195_v63 = vpop.xlane.xlu0 %9194 }
0x2981   : > { %v9199_v13 = vmul.f32 0.015625, %v9195_v63 }
0x2983   : > { %v9201_v30 = vsub.f32 %v9187_v17, %v9199_v13 }
0x2984   : > { %v9198_v36 = vpop.xlane.xlu1 %9197 }
0x2985   : > { %v9200_v53 = vmul.f32 0.015625, %v9198_v36  ;;  %v9203_v27 = vmul.f32 %v9201_v30, %v9201_v30 }
0x2987   : > { %v9202_v10 = vsub.f32 %v9188_v31, %v9200_v53  ;;  %v9205_v20 = vsel %vm6595_vm8, %v9203_v27, 0.0 }
0x2988   : > { %9206 = vadd.xlane.f32.xlu1 %v9205_v20 }
0x2989   : > { %v9204_v24 = vmul.f32 %v9202_v10, %v9202_v10 }
0x298b   : > { %v9208_v5 = vsel %vm6599_vm9, %v9204_v24, 0.0 }
0x298c   : > { %9209 = vadd.xlane.f32.xlu1 %v9208_v5 }
0x2a11   : > { %v9207_v43 = vpop.xlane.xlu1 %9206 }
0x2a12   : > { %v9211_v1 = vmul.f32 0.015625, %v9207_v43 }
0x2a14   : > { %v9213_v52 = vadd.f32 1e-05, %v9211_v1 }
0x2a15   : > { %v9210_v45 = vpop.xlane.xlu1 %9209 }
0x2a16   : > { %11545 = vrsqrt.f32 %v9213_v52  ;;  %v9212_v28 = vmul.f32 0.015625, %v9210_v45 }
0x2a18   : > { %v9214_v42 = vadd.f32 1e-05, %v9212_v28 }
0x2a1a   : > { %11547 = vrsqrt.f32 %v9214_v42 }
0x2a23   : > { %v11546_v29 = vpop.eup %11545 }
0x2a24   : > { %v9217_v44 = vmul.f32 %v11546_v29, %v9201_v30 }
0x2a26   : > { %v9225_v2 = vmul.f32 %v9842_v50, %v9217_v44 }
0x2a27   : > { %v11548_v21 = vpop.eup %11547 }
0x2a28   : > { %v9218_v16 = vmul.f32 %v11548_v21, %v9202_v10  ;;  %v9233_v15 = vadd.f32 %v9843_v56, %v9225_v2 }
0x2a2a   : > { %v9226_v22 = vmul.f32 %v9842_v50, %v9218_v16  ;;  %v9235_v57 = vsel %vm6595_vm8, %v9233_v15, 0.0 }
0x2a2c   : > { %v9234_v0 = vadd.f32 %v9843_v56, %v9226_v22 }
0x2a2e   : > { %v9236_v25 = vsel %vm6599_vm9, %v9234_v0, 0.0 }
0x2a2f   : > { %v9237_v49 = vadd.f32 %v9236_v25, %v9235_v57 }
0x2a31   : > { %v9238_v11 = vrot.slane %v9237_v49, 4 }
0x2a33   : > { %v9239_v61 = vadd.f32 %v9238_v11, %v9237_v49 }
0x2a35   : > { %v9240_v62 = vrot.slane %v9239_v61, 2 }
0x2a37   : > { %v9241_v35 = vadd.f32 %v9240_v62, %v9239_v61 }
0x2a39   : > { %v9242_v18 = vrot.slane %v9241_v35, 1 }
0x2a3b   : > { %v9243_v55 = vadd.f32 %v9242_v18, %v9241_v35 }
0x2a3d   : > { %v9245_v9 = vmul.f32 0.11111111, %v9243_v55 }
0x2a3f   : > { %10974 = vmatmul.mubr.msk.f32.vlgmr.msra.gmra.mxu0 %vm6595_vm8, %v9245_v9 }
0x2aff   : > { %v9324_v33 = vpop.f32.mrf.mxu0 }
0x2b00   : > { %v9325_v40 = vadd.f32 %v9324_v33, %v9254_v41 }
0x2b01   : > { %v10975_v26 = vpop.f32.mrf.mxu0 }
0x2b02   : > { %9329 = vst.msk [vmem:[%s837_s12] sm:$0x1] %vm9328_vm15, %v9325_v40 }
0x2b03   : > { %11562 = shalt.err (!%p11559_p3)
}
0x2b04   : > { %s11563_s6 = scalar_lea.hbm %s15981_s13, 16  ;;  %s11567_s0 = scalar_lea.hbm %s16044_s28, 32 }
0x2b05   : > { %p11564_p4 = scmp.ne.s32.totalorder %s15981_s13, %s11563_s6  ;;  %p11568_p9 = scmp.lt.s32.totalorder %s15981_s13, %s16044_s28 }
0x2b06   : > { %p11569_p10 = scmp.lt.s32.totalorder %s11567_s0, %s11563_s6 }
0x2b07   : > { %p11565_p7 = pnand %p11564_p4, %p11803_p5 }
0x2b08   : > { %p11570_p11 = por %p11569_p10, %p11568_p9 }
0x2b09   : > { %p11566_p8 = pneg %p11565_p7 }
0x2b0b   : > { %p11571_p12 = pnand %p11570_p11, %p11566_p8 }
0x2b0d   : > { %11574 = shalt.err (!%p11571_p12)
}
0x2b0e   : > { %10977 = dma.vmem_to_hbm [thread:$0]  (%p11803_p5), %s9344_s4, 16, %s15981_s13, %s9331_s11  }
0x2b0f PF: > { %p10983_p13 = scmp.ge.s32.totalorder %s11609_s30, 2  ;;  %s9355_s14 = sand.u32 1, %s11597_s8  }
0x2b10   : > { %s9356_s10 = scalar_lea.sflag [#allocation6], %s9355_s14 }
0x2b11   : > { %p10980_p0 = pnand %p10983_p13, %p11807_p6 }
0x2b13   : > { %p10981_p1 = pneg %p10980_p0 }
0x2b15   : > { %11592 = dma.done.wait (%p10981_p1), %s9356_s10, 16  }
0x2b16   : > { %11594 = vsyncadd (%p10981_p1), %s9356_s10, 4294967280  ;;  %s16729_s30 = sld [smem:[#allocation9_spill]]  ;;  %s16732_s8 = smov %s11601_s5 }
0x2b17   : > { %s16730_s1 = sld [smem:[#allocation8_spill]] }
0x2b18   : > { %s16731_s9 = sld [smem:[#allocation10_spill]] }
0x2b1c   : > { %p38_p2 = scmp.ge.s32.totalorder %s16729_s30, 4  }
0x2b1d   : > { %s16733_s5 = smov %s16730_s1 }
0x2b1e   :  { %40 = sbr.rel (!%p38_p2) target bundleno = 19 (0x13), region = 361 }
0x2b23   :  { %9360 = vsyncpa [#allocation6], 1 }
0x2b24   :  { %9362 = vsyncpa [#allocation6 + $0x1], 1 }

</bundles_post_ra>
